<compile_context>
chip_gen: v7x
topology: tpu7x:2x2x1
jax: 0.10.0
libtpu: 0.0.40
codegen_flags: <defaults>
</compile_context>

<pallas_src>
import functools

import jax
import jax.numpy as jnp
from jax.experimental import pallas as pl
from jax.experimental.pallas import tpu as pltpu

LN_EPS = 1e-5                      # PyTorch nn.LayerNorm default
_GELU_C = 0.7978845608028654       # sqrt(2/pi)


# ---------------------------------------------------------------- math helpers
def _layernorm(x, w, b):
    """x: (M, E) f32, w/b: (1, E) f32."""
    mu = jnp.mean(x, axis=-1, keepdims=True)
    xc = x - mu
    var = jnp.mean(xc * xc, axis=-1, keepdims=True)
    return xc * jax.lax.rsqrt(var + LN_EPS) * w + b


def _gelu(x):
    # tanh-approx GELU: transcendental goes to the EUP slot instead of ~10 VALU ops.
    # TODO(synk): PyTorch nn.GELU() default is exact erf; approx error ~1e-3 relative.
    return 0.5 * x * (1.0 + jnp.tanh(_GELU_C * (x + 0.044715 * x * x * x)))


def _softmax(s):
    # Row softmax; divide moved to the EUP via approx reciprocal.
    m = jnp.max(s, axis=-1, keepdims=True)
    e = jnp.exp(s - m)
    denom = jnp.sum(e, axis=-1, keepdims=True)
    return e * pl.reciprocal(denom, approx=True)


def _mha(q, k, v, proj_w, proj_b, bt, n, num_heads, mm_dtype):
    """Multi-head attention core on batch-folded activations.

    q, k, v: (M, E) f32 with M = bt*n.  proj_w: (E, E) in mm_dtype, proj_b: (1, E) f32.
    Scores/PV are batched over the folded batch dim; head outputs are assembled
    lane-contiguously and projected with a single full-K (M,E)x(E,E) matmul.
    """
    m, e = q.shape
    hd = e // num_heads
    scale = hd ** -0.5
    q3 = (q * scale).reshape(bt, n, e)
    k3 = k.reshape(bt, n, e)
    v3 = v.reshape(bt, n, e)

    head_outs = []
    for h in range(num_heads):                       # static unroll over heads
        lo, hi = h * hd, (h + 1) * hd
        qh = q3[:, :, lo:hi].astype(mm_dtype)
        kh = k3[:, :, lo:hi].astype(mm_dtype)
        vh = v3[:, :, lo:hi].astype(mm_dtype)
        s = jnp.einsum('bqd,bkd->bqk', qh, kh,
                       preferred_element_type=jnp.float32)        # (bt, n, n)
        p = _softmax(s)
        head_outs.append(jnp.einsum('bqk,bkd->bqd', p.astype(mm_dtype), vh,
                                    preferred_element_type=jnp.float32))

    o = jnp.concatenate(head_outs, axis=-1).reshape(m, e)         # lane-contiguous (M, E)
    return jnp.dot(o.astype(mm_dtype), proj_w,
                   preferred_element_type=jnp.float32) + proj_b   # single full-K proj


# ---------------------------------------------------------------------- kernel
def encoder_kernel(rgb_ref, dep_ref,
                   ln_w_ref, ln_b_ref,
                   ma_q_ref, ma_kv_ref, ma_pw_ref, ma_pb_ref,
                   sa_qkv_ref, sa_pw_ref, sa_pb_ref,
                   fc1_w_ref, fc1_b_ref, fc2_w_ref, fc2_b_ref,
                   fn_w_ref, fn_b_ref,
                   rgb_out_ref, dep_out_ref,
                   rgb_acc, dep_acc,
                   *, num_heads, mm_dtype, bt, n):
    """Grid = (B // bt, depth).  One batch chunk per program on axis 0; the whole block
    stack is iterated on axis 1 while the (bt*n, E) activations stay in VMEM scratch."""
    d = pl.program_id(1)
    last = pl.num_programs(1) - 1
    e = rgb_acc.shape[-1]
    m = bt * n

    @pl.when(d == 0)
    def _load_inputs():
        rgb_acc[...] = rgb_ref[...].reshape(m, e).astype(jnp.float32)
        dep_acc[...] = dep_ref[...].reshape(m, e).astype(jnp.float32)

    rgb = rgb_acc[...]
    dep = dep_acc[...]

    def ln(x, s, i):
        w = ln_w_ref[0, s]                 # (3, E) f32 — LN idx: 0=mutual 1=self 2=mlp
        b = ln_b_ref[0, s]
        return _layernorm(x, w[i:i + 1, :], b[i:i + 1, :])

    # ---- mutual (cross-modal) attention: q from own stream, k/v from the other ----
    rgb_n = ln(rgb, 0, 0)
    dep_n = ln(dep, 1, 0)

    def cross_attn(s, q_in, kv_in):
        q = jnp.dot(q_in.astype(mm_dtype), ma_q_ref[0, s],
                    preferred_element_type=jnp.float32)                 # (M, E)
        kv = jnp.dot(kv_in.astype(mm_dtype), ma_kv_ref[0, s],
                     preferred_element_type=jnp.float32)                # (M, 2E)
        return _mha(q, kv[:, :e], kv[:, e:],
                    ma_pw_ref[0, s], ma_pb_ref[0, s], bt, n, num_heads, mm_dtype)

    rgb = rgb + cross_attn(0, rgb_n, dep_n)
    dep = dep + cross_attn(1, dep_n, rgb_n)

    # ---- self attention (per stream, fused qkv, qkv_bias=False) ----
    def self_attn(s, x):
        xn = ln(x, s, 1)
        qkv = jnp.dot(xn.astype(mm_dtype), sa_qkv_ref[0, s],
                      preferred_element_type=jnp.float32)               # (M, 3E)
        return _mha(qkv[:, :e], qkv[:, e:2 * e], qkv[:, 2 * e:],
                    sa_pw_ref[0, s], sa_pb_ref[0, s], bt, n, num_heads, mm_dtype)

    rgb = rgb + self_attn(0, rgb)
    dep = dep + self_attn(1, dep)

    # ---- MLP (Linear -> GELU -> Linear) ----
    def mlp(s, x):
        xn = ln(x, s, 2)
        h = jnp.dot(xn.astype(mm_dtype), fc1_w_ref[0, s],
                    preferred_element_type=jnp.float32) + fc1_b_ref[0, s]
        h = _gelu(h)
        return jnp.dot(h.astype(mm_dtype), fc2_w_ref[0, s],
                       preferred_element_type=jnp.float32) + fc2_b_ref[0, s]

    rgb = rgb + mlp(0, rgb)
    dep = dep + mlp(1, dep)

    rgb_acc[...] = rgb
    dep_acc[...] = dep

    # ---- final rgb_norm / depth_norm + single HBM writeback per batch chunk ----
    @pl.when(d == last)
    def _finalize():
        rgb_out_ref[...] = _layernorm(rgb, fn_w_ref[0], fn_b_ref[0]) \
            .reshape(bt, n, e).astype(rgb_out_ref.dtype)
        dep_out_ref[...] = _layernorm(dep, fn_w_ref[1], fn_b_ref[1]) \
            .reshape(bt, n, e).astype(dep_out_ref.dtype)


# -------------------------------------------------------------------- wrapper
_STACKED_NAMES = ("ln_w", "ln_b",
                  "ma_q_w", "ma_kv_w", "ma_proj_w", "ma_proj_b",
                  "sa_qkv_w", "sa_proj_w", "sa_proj_b",
                  "fc1_w", "fc1_b", "fc2_w", "fc2_b")


def transformer_forward(rgb_fea, depth_fea, params, *, num_heads, batch_tile=None):
    """Forward of Transformer(embed_dim, depth, num_heads, mlp_ratio).

    rgb_fea, depth_fea: (B, N, E).  Matmul weights are used in whatever dtype they are
    stored in (convert ONCE at init — no per-call cast).  batch_tile controls how many
    batch elements are folded into one compute block (default: all of them); pass a
    divisor of B >= 2 chunks on v7x to keep both TensorCores busy.
    """
    B, N, E = rgb_fea.shape
    depth = params["ln_w"].shape[0]
    mm_dtype = params["sa_qkv_w"].dtype

    if batch_tile is None:
        batch_tile = B                     # fold the whole batch: fattest MXU tiles,
    assert B % batch_tile == 0             # weight stack streamed once per chunk
    bg = B // batch_tile

    act_spec = pl.BlockSpec((batch_tile, N, E), lambda b, d: (b, 0, 0))
    fn_spec = pl.BlockSpec((2, 1, E), lambda b, d: (0, 0, 0))
    stacked_arrays = [params[name] for name in _STACKED_NAMES]
    stacked_specs = [pl.BlockSpec((1,) + params[name].shape[1:],
                                  lambda b, d: (d, 0, 0, 0))
                     for name in _STACKED_NAMES]

    grid_spec = pltpu.PrefetchScalarGridSpec(
        num_scalar_prefetch=0,
        grid=(bg, depth),
        in_specs=[act_spec, act_spec] + stacked_specs + [fn_spec, fn_spec],
        out_specs=(act_spec, act_spec),
        scratch_shapes=[pltpu.VMEM((batch_tile * N, E), jnp.float32),   # rgb (resident)
                        pltpu.VMEM((batch_tile * N, E), jnp.float32)],  # depth (resident)
    )

    kern = functools.partial(encoder_kernel, num_heads=num_heads, mm_dtype=mm_dtype,
                             bt=batch_tile, n=N)

    rgb_out, dep_out = pl.pallas_call(
        kern,
        out_shape=(jax.ShapeDtypeStruct((B, N, E), rgb_fea.dtype),
                   jax.ShapeDtypeStruct((B, N, E), depth_fea.dtype)),
        grid_spec=grid_spec,
        compiler_params=pltpu.CompilerParams(
            dimension_semantics=("parallel", "arbitrary"),
            vmem_limit_bytes=64 * 1024 * 1024),
    )(rgb_fea, depth_fea, *stacked_arrays,
      params["final_norm_w"], params["final_norm_b"])
    return rgb_out, dep_out


# --------------------------------------------------------------- param setup
def init_params(key, *, embed_dim, depth, mlp_ratio, matmul_dtype=jnp.bfloat16):
    """trunc_normal_(std=0.02) surrogate for Linear weights, zero biases,
    LayerNorm weight=1 / bias=0 — matching TransformerEncoder._init_weights.
    Matmul weights are stored in `matmul_dtype` ONCE here (no per-call cast).
    Weights are stored (in, out) (i.e. PyTorch W^T) and stacked:
    leading axis = block index, second axis = stream (0=rgb, 1=depth)."""
    E = embed_dim
    H = int(E * mlp_ratio)
    keys = iter(jax.random.split(key, 7 * 2 * depth))

    def w(shape):
        return (jax.random.normal(next(keys), shape, jnp.float32) * 0.02) \
            .astype(matmul_dtype)

    def stack(shape):
        return jnp.stack([jnp.stack([w(shape) for _ in range(2)], axis=0)
                          for _ in range(depth)], axis=0)

    return {
        # LayerNorms: index 0 = mutual-attn norm, 1 = self-attn norm, 2 = MLP norm
        "ln_w": jnp.ones((depth, 2, 3, E), jnp.float32),
        "ln_b": jnp.zeros((depth, 2, 3, E), jnp.float32),
        # Mutual attention (q from own stream; packed [k|v] applied to the other stream)
        "ma_q_w": stack((E, E)),
        "ma_kv_w": stack((E, 2 * E)),
        "ma_proj_w": stack((E, E)),
        "ma_proj_b": jnp.zeros((depth, 2, 1, E), jnp.float32),
        # Self attention (fused qkv, qkv_bias=False)
        "sa_qkv_w": stack((E, 3 * E)),
        "sa_proj_w": stack((E, E)),
        "sa_proj_b": jnp.zeros((depth, 2, 1, E), jnp.float32),
        # MLP
        "fc1_w": stack((E, H)),
        "fc1_b": jnp.zeros((depth, 2, 1, H), jnp.float32),
        "fc2_w": stack((H, E)),
        "fc2_b": jnp.zeros((depth, 2, 1, E), jnp.float32),
        # final rgb_norm / depth_norm
        "final_norm_w": jnp.ones((2, 1, E), jnp.float32),
        "final_norm_b": jnp.zeros((2, 1, E), jnp.float32),
    }


# ----------------------------------------------------------------------- main
if __name__ == "__main__":
    # Small shapes consistent with Transformer(embed_dim, depth, num_heads, mlp_ratio).
    # embed_dim=128 keeps the channel (lane) axis 128-dense for MXU/store efficiency.
    B, N = 2, 16
    EMBED_DIM, DEPTH, NUM_HEADS, MLP_RATIO = 128, 2, 4, 3.0

    key = jax.random.PRNGKey(0)
    k_rgb, k_dep, k_par = jax.random.split(key, 3)
    rgb_fea = jax.random.normal(k_rgb, (B, N, EMBED_DIM), jnp.float32)
    depth_fea = jax.random.normal(k_dep, (B, N, EMBED_DIM), jnp.float32)

    params = init_params(k_par, embed_dim=EMBED_DIM, depth=DEPTH,
                         mlp_ratio=MLP_RATIO, matmul_dtype=jnp.bfloat16)

    rgb_mem, depth_mem = transformer_forward(rgb_fea, depth_fea, params,
                                             num_heads=NUM_HEADS)
    jax.block_until_ready((rgb_mem, depth_mem))
    assert rgb_mem.shape == (B, N, EMBED_DIM), rgb_mem.shape
    assert depth_mem.shape == (B, N, EMBED_DIM), depth_mem.shape
    assert bool(jnp.all(jnp.isfinite(rgb_mem))) and bool(jnp.all(jnp.isfinite(depth_mem)))
    print("KERNEL_OK")
</pallas_src>

<mosaic_0001>
module attributes {stable_mosaic.version = 11 : i64} {
  func.func @encoder_kernel(%arg0: i32, %arg1: i32, %arg2: memref<2x16x128xf32, #tpu.memory_space<vmem>>, %arg3: memref<2x16x128xf32, #tpu.memory_space<vmem>>, %arg4: memref<1x2x3x128xf32, #tpu.memory_space<vmem>>, %arg5: memref<1x2x3x128xf32, #tpu.memory_space<vmem>>, %arg6: memref<1x2x128x128xbf16, #tpu.memory_space<vmem>>, %arg7: memref<1x2x128x256xbf16, #tpu.memory_space<vmem>>, %arg8: memref<1x2x128x128xbf16, #tpu.memory_space<vmem>>, %arg9: memref<1x2x1x128xf32, #tpu.memory_space<vmem>>, %arg10: memref<1x2x128x384xbf16, #tpu.memory_space<vmem>>, %arg11: memref<1x2x128x128xbf16, #tpu.memory_space<vmem>>, %arg12: memref<1x2x1x128xf32, #tpu.memory_space<vmem>>, %arg13: memref<1x2x128x384xbf16, #tpu.memory_space<vmem>>, %arg14: memref<1x2x1x384xf32, #tpu.memory_space<vmem>>, %arg15: memref<1x2x384x128xbf16, #tpu.memory_space<vmem>>, %arg16: memref<1x2x1x128xf32, #tpu.memory_space<vmem>>, %arg17: memref<2x1x128xf32, #tpu.memory_space<vmem>>, %arg18: memref<2x1x128xf32, #tpu.memory_space<vmem>>, %arg19: memref<2x16x128xf32, #tpu.memory_space<vmem>>, %arg20: memref<2x16x128xf32, #tpu.memory_space<vmem>>, %arg21: memref<32x128xf32, #tpu.memory_space<vmem>>, %arg22: memref<32x128xf32, #tpu.memory_space<vmem>>) attributes {dimension_semantics = [#tpu.dimension_semantics<parallel>, #tpu.dimension_semantics<arbitrary>], iteration_bounds = array<i64: 1, 2>, scalar_prefetch = 0 : i64, scratch_operands = 2 : i64, tpu.core_type = #tpu.core_type<tc>, window_params = [{transform_indices = @transform_0, window_bounds = array<i64: 2, 16, 128>}, {transform_indices = @transform_1, window_bounds = array<i64: 2, 16, 128>}, {transform_indices = @transform_2, window_bounds = array<i64: 1, 2, 3, 128>}, {transform_indices = @transform_3, window_bounds = array<i64: 1, 2, 3, 128>}, {transform_indices = @transform_4, window_bounds = array<i64: 1, 2, 128, 128>}, {transform_indices = @transform_5, window_bounds = array<i64: 1, 2, 128, 256>}, {transform_indices = @transform_6, window_bounds = array<i64: 1, 2, 128, 128>}, {transform_indices = @transform_7, window_bounds = array<i64: 1, 2, 1, 128>}, {transform_indices = @transform_8, window_bounds = array<i64: 1, 2, 128, 384>}, {transform_indices = @transform_9, window_bounds = array<i64: 1, 2, 128, 128>}, {transform_indices = @transform_10, window_bounds = array<i64: 1, 2, 1, 128>}, {transform_indices = @transform_11, window_bounds = array<i64: 1, 2, 128, 384>}, {transform_indices = @transform_12, window_bounds = array<i64: 1, 2, 1, 384>}, {transform_indices = @transform_13, window_bounds = array<i64: 1, 2, 384, 128>}, {transform_indices = @transform_14, window_bounds = array<i64: 1, 2, 1, 128>}, {pipeline_mode = #tpu.pipeline_mode<synchronous>, transform_indices = @transform_15, window_bounds = array<i64: 2, 1, 128>}, {pipeline_mode = #tpu.pipeline_mode<synchronous>, transform_indices = @transform_16, window_bounds = array<i64: 2, 1, 128>}, {transform_indices = @transform_17, window_bounds = array<i64: 2, 16, 128>}, {transform_indices = @transform_18, window_bounds = array<i64: 2, 16, 128>}]} {
    %c0_i32 = arith.constant 0 : i32
    %0 = arith.cmpi eq, %arg1, %c0_i32 : i32
    %1 = arith.extui %0 : i1 to i32
    %c0_i32_0 = arith.constant 0 : i32
    %2 = arith.cmpi ne, %1, %c0_i32_0 : i32
    scf.if %2 {
      %c0_263 = arith.constant 0 : index
      %c0_264 = arith.constant 0 : index
      %c0_265 = arith.constant 0 : index
      %628 = vector.load %arg2[%c0_263, %c0_264, %c0_265] : memref<2x16x128xf32, #tpu.memory_space<vmem>>, vector<2x16x128xf32>
      %629 = vector.shape_cast %628 : vector<2x16x128xf32> to vector<32x128xf32>
      %c0_266 = arith.constant 0 : index
      %c0_267 = arith.constant 0 : index
      %630 = vector.load %arg21[%c0_266, %c0_267] : memref<32x128xf32, #tpu.memory_space<vmem>>, vector<32x128xf32>
      tpu.vector_store %arg21[%c0_266, %c0_267], %629 {strides = array<i32>} : memref<32x128xf32, #tpu.memory_space<vmem>>, vector<32x128xf32>,
      %c0_268 = arith.constant 0 : index
      %c0_269 = arith.constant 0 : index
      %c0_270 = arith.constant 0 : index
      %631 = vector.load %arg3[%c0_268, %c0_269, %c0_270] : memref<2x16x128xf32, #tpu.memory_space<vmem>>, vector<2x16x128xf32>
      %632 = vector.shape_cast %631 : vector<2x16x128xf32> to vector<32x128xf32>
      %c0_271 = arith.constant 0 : index
      %c0_272 = arith.constant 0 : index
      %633 = vector.load %arg22[%c0_271, %c0_272] : memref<32x128xf32, #tpu.memory_space<vmem>>, vector<32x128xf32>
      tpu.vector_store %arg22[%c0_271, %c0_272], %632 {strides = array<i32>} : memref<32x128xf32, #tpu.memory_space<vmem>>, vector<32x128xf32>,
    } else {
    }
    %c0 = arith.constant 0 : index
    %c0_1 = arith.constant 0 : index
    %3 = vector.load %arg21[%c0, %c0_1] : memref<32x128xf32, #tpu.memory_space<vmem>>, vector<32x128xf32>
    %c0_2 = arith.constant 0 : index
    %c0_3 = arith.constant 0 : index
    %4 = vector.load %arg22[%c0_2, %c0_3] : memref<32x128xf32, #tpu.memory_space<vmem>>, vector<32x128xf32>
    %c0_4 = arith.constant 0 : index
    %c0_5 = arith.constant 0 : index
    %c0_6 = arith.constant 0 : index
    %c0_7 = arith.constant 0 : index
    %5 = vector.load %arg4[%c0_4, %c0_5, %c0_6, %c0_7] : memref<1x2x3x128xf32, #tpu.memory_space<vmem>>, vector<1x1x3x128xf32>
    %6 = vector.shape_cast %5 : vector<1x1x3x128xf32> to vector<3x128xf32>
    %c0_8 = arith.constant 0 : index
    %c0_9 = arith.constant 0 : index
    %c0_10 = arith.constant 0 : index
    %c0_11 = arith.constant 0 : index
    %7 = vector.load %arg5[%c0_8, %c0_9, %c0_10, %c0_11] : memref<1x2x3x128xf32, #tpu.memory_space<vmem>>, vector<1x1x3x128xf32>
    %8 = vector.shape_cast %7 : vector<1x1x3x128xf32> to vector<3x128xf32>
    %9 = vector.extract_strided_slice %6 {offsets = [0, 0], sizes = [1, 128], strides = [1, 1]} : vector<3x128xf32> to vector<1x128xf32>
    %10 = vector.extract_strided_slice %8 {offsets = [0, 0], sizes = [1, 128], strides = [1, 1]} : vector<3x128xf32> to vector<1x128xf32>
    %cst = arith.constant dense<0.000000e+00> : vector<32xf32>
    %11 = vector.multi_reduction <add>, %3, %cst [1] : vector<32x128xf32> to vector<32xf32>
    %12 = vector.shape_cast %11 : vector<32xf32> to vector<32x1xf32>
    %cst_12 = arith.constant 1.280000e+02 : f32
    %13 = vector.broadcast %cst_12 : f32 to vector<32x1xf32>
    %14 = arith.divf %12, %13 : vector<32x1xf32>
    %15 = vector.broadcast %14 : vector<32x1xf32> to vector<32x128xf32>
    %16 = arith.subf %3, %15 : vector<32x128xf32>
    %17 = arith.mulf %16, %16 : vector<32x128xf32>
    %cst_13 = arith.constant dense<0.000000e+00> : vector<32xf32>
    %18 = vector.multi_reduction <add>, %17, %cst_13 [1] : vector<32x128xf32> to vector<32xf32>
    %19 = vector.shape_cast %18 : vector<32xf32> to vector<32x1xf32>
    %cst_14 = arith.constant 1.280000e+02 : f32
    %20 = vector.broadcast %cst_14 : f32 to vector<32x1xf32>
    %21 = arith.divf %19, %20 : vector<32x1xf32>
    %cst_15 = arith.constant 9.99999974E-6 : f32
    %22 = vector.broadcast %cst_15 : f32 to vector<32x1xf32>
    %23 = arith.addf %21, %22 : vector<32x1xf32>
    %24 = math.rsqrt %23 : vector<32x1xf32>
    %25 = vector.broadcast %24 : vector<32x1xf32> to vector<32x128xf32>
    %26 = arith.mulf %16, %25 : vector<32x128xf32>
    %27 = vector.broadcast %9 : vector<1x128xf32> to vector<32x128xf32>
    %28 = arith.mulf %26, %27 : vector<32x128xf32>
    %29 = vector.broadcast %10 : vector<1x128xf32> to vector<32x128xf32>
    %30 = arith.addf %28, %29 : vector<32x128xf32>
    %c0_16 = arith.constant 0 : index
    %c1 = arith.constant 1 : index
    %c0_17 = arith.constant 0 : index
    %c0_18 = arith.constant 0 : index
    %31 = vector.load %arg4[%c0_16, %c1, %c0_17, %c0_18] : memref<1x2x3x128xf32, #tpu.memory_space<vmem>>, vector<1x1x3x128xf32>
    %32 = vector.shape_cast %31 : vector<1x1x3x128xf32> to vector<3x128xf32>
    %c0_19 = arith.constant 0 : index
    %c1_20 = arith.constant 1 : index
    %c0_21 = arith.constant 0 : index
    %c0_22 = arith.constant 0 : index
    %33 = vector.load %arg5[%c0_19, %c1_20, %c0_21, %c0_22] : memref<1x2x3x128xf32, #tpu.memory_space<vmem>>, vector<1x1x3x128xf32>
    %34 = vector.shape_cast %33 : vector<1x1x3x128xf32> to vector<3x128xf32>
    %35 = vector.extract_strided_slice %32 {offsets = [0, 0], sizes = [1, 128], strides = [1, 1]} : vector<3x128xf32> to vector<1x128xf32>
    %36 = vector.extract_strided_slice %34 {offsets = [0, 0], sizes = [1, 128], strides = [1, 1]} : vector<3x128xf32> to vector<1x128xf32>
    %cst_23 = arith.constant dense<0.000000e+00> : vector<32xf32>
    %37 = vector.multi_reduction <add>, %4, %cst_23 [1] : vector<32x128xf32> to vector<32xf32>
    %38 = vector.shape_cast %37 : vector<32xf32> to vector<32x1xf32>
    %cst_24 = arith.constant 1.280000e+02 : f32
    %39 = vector.broadcast %cst_24 : f32 to vector<32x1xf32>
    %40 = arith.divf %38, %39 : vector<32x1xf32>
    %41 = vector.broadcast %40 : vector<32x1xf32> to vector<32x128xf32>
    %42 = arith.subf %4, %41 : vector<32x128xf32>
    %43 = arith.mulf %42, %42 : vector<32x128xf32>
    %cst_25 = arith.constant dense<0.000000e+00> : vector<32xf32>
    %44 = vector.multi_reduction <add>, %43, %cst_25 [1] : vector<32x128xf32> to vector<32xf32>
    %45 = vector.shape_cast %44 : vector<32xf32> to vector<32x1xf32>
    %cst_26 = arith.constant 1.280000e+02 : f32
    %46 = vector.broadcast %cst_26 : f32 to vector<32x1xf32>
    %47 = arith.divf %45, %46 : vector<32x1xf32>
    %cst_27 = arith.constant 9.99999974E-6 : f32
    %48 = vector.broadcast %cst_27 : f32 to vector<32x1xf32>
    %49 = arith.addf %47, %48 : vector<32x1xf32>
    %50 = math.rsqrt %49 : vector<32x1xf32>
    %51 = vector.broadcast %50 : vector<32x1xf32> to vector<32x128xf32>
    %52 = arith.mulf %42, %51 : vector<32x128xf32>
    %53 = vector.broadcast %35 : vector<1x128xf32> to vector<32x128xf32>
    %54 = arith.mulf %52, %53 : vector<32x128xf32>
    %55 = vector.broadcast %36 : vector<1x128xf32> to vector<32x128xf32>
    %56 = arith.addf %54, %55 : vector<32x128xf32>
    %57 = arith.truncf %30 : vector<32x128xf32> to vector<32x128xbf16>
    %c0_28 = arith.constant 0 : index
    %c0_29 = arith.constant 0 : index
    %c0_30 = arith.constant 0 : index
    %c0_31 = arith.constant 0 : index
    %58 = vector.load %arg6[%c0_28, %c0_29, %c0_30, %c0_31] : memref<1x2x128x128xbf16, #tpu.memory_space<vmem>>, vector<1x1x128x128xbf16>
    %59 = vector.shape_cast %58 : vector<1x1x128x128xbf16> to vector<128x128xbf16>
    %cst_32 = arith.constant dense<0.000000e+00> : vector<32x128xf32>
    %60 = tpu.matmul %57, %59, %cst_32 {dimension_numbers = #tpu.dot_dimension_numbers<[1], [0], [0], [1], [0, 0, 1, 1], [], []>} : vector<32x128xbf16>, vector<128x128xbf16>, vector<32x128xf32> -> vector<32x128xf32>
    %61 = arith.truncf %56 : vector<32x128xf32> to vector<32x128xbf16>
    %c0_33 = arith.constant 0 : index
    %c0_34 = arith.constant 0 : index
    %c0_35 = arith.constant 0 : index
    %c0_36 = arith.constant 0 : index
    %62 = vector.load %arg7[%c0_33, %c0_34, %c0_35, %c0_36] : memref<1x2x128x256xbf16, #tpu.memory_space<vmem>>, vector<1x1x128x256xbf16>
    %63 = vector.shape_cast %62 : vector<1x1x128x256xbf16> to vector<128x256xbf16>
    %cst_37 = arith.constant dense<0.000000e+00> : vector<32x256xf32>
    %64 = tpu.matmul %61, %63, %cst_37 {dimension_numbers = #tpu.dot_dimension_numbers<[1], [0], [0], [1], [0, 0, 1, 1], [], []>} : vector<32x128xbf16>, vector<128x256xbf16>, vector<32x256xf32> -> vector<32x256xf32>
    %65 = vector.extract_strided_slice %64 {offsets = [0, 0], sizes = [32, 128], strides = [1, 1]} : vector<32x256xf32> to vector<32x128xf32>
    %66 = vector.extract_strided_slice %64 {offsets = [0, 128], sizes = [32, 128], strides = [1, 1]} : vector<32x256xf32> to vector<32x128xf32>
    %c0_38 = arith.constant 0 : index
    %c0_39 = arith.constant 0 : index
    %c0_40 = arith.constant 0 : index
    %c0_41 = arith.constant 0 : index
    %67 = vector.load %arg8[%c0_38, %c0_39, %c0_40, %c0_41] : memref<1x2x128x128xbf16, #tpu.memory_space<vmem>>, vector<1x1x128x128xbf16>
    %68 = vector.shape_cast %67 : vector<1x1x128x128xbf16> to vector<128x128xbf16>
    %c0_42 = arith.constant 0 : index
    %c0_43 = arith.constant 0 : index
    %c0_44 = arith.constant 0 : index
    %c0_45 = arith.constant 0 : index
    %69 = vector.load %arg9[%c0_42, %c0_43, %c0_44, %c0_45] : memref<1x2x1x128xf32, #tpu.memory_space<vmem>>, vector<1x1x1x128xf32>
    %70 = vector.shape_cast %69 : vector<1x1x1x128xf32> to vector<1x128xf32>
    %cst_46 = arith.constant 0.176776692 : f32
    %71 = vector.broadcast %cst_46 : f32 to vector<32x128xf32>
    %72 = arith.mulf %60, %71 : vector<32x128xf32>
    %73 = vector.shape_cast %72 : vector<32x128xf32> to vector<2x16x128xf32>
    %74 = vector.shape_cast %65 : vector<32x128xf32> to vector<2x16x128xf32>
    %75 = vector.shape_cast %66 : vector<32x128xf32> to vector<2x16x128xf32>
    %76 = vector.extract_strided_slice %73 {offsets = [0, 0, 0], sizes = [2, 16, 32], strides = [1, 1, 1]} : vector<2x16x128xf32> to vector<2x16x32xf32>
    %77 = arith.truncf %76 : vector<2x16x32xf32> to vector<2x16x32xbf16>
    %78 = vector.extract_strided_slice %74 {offsets = [0, 0, 0], sizes = [2, 16, 32], strides = [1, 1, 1]} : vector<2x16x128xf32> to vector<2x16x32xf32>
    %79 = arith.truncf %78 : vector<2x16x32xf32> to vector<2x16x32xbf16>
    %80 = vector.extract_strided_slice %75 {offsets = [0, 0, 0], sizes = [2, 16, 32], strides = [1, 1, 1]} : vector<2x16x128xf32> to vector<2x16x32xf32>
    %81 = arith.truncf %80 : vector<2x16x32xf32> to vector<2x16x32xbf16>
    "tpu.trace_start"() <{level = 10 : i32, message = "bqd,bkd->bqk"}> : () -> ()
    %cst_47 = arith.constant dense<0.000000e+00> : vector<2x16x16xf32>
    %82 = tpu.matmul %77, %79, %cst_47 {dimension_numbers = #tpu.dot_dimension_numbers<[2], [2], [1], [1], [0, 0, 0, 1, 1, 1], [0], [0]>} : vector<2x16x32xbf16>, vector<2x16x32xbf16>, vector<2x16x16xf32> -> vector<2x16x16xf32>
    "tpu.trace_stop"() : () -> ()
    %cst_48 = arith.constant dense<0xFF800000> : vector<2x16xf32>
    %83 = vector.multi_reduction <maximumf>, %82, %cst_48 [2] : vector<2x16x16xf32> to vector<2x16xf32>
    %84 = vector.shape_cast %83 : vector<2x16xf32> to vector<2x16x1xf32>
    %85 = vector.broadcast %84 : vector<2x16x1xf32> to vector<2x16x16xf32>
    %86 = arith.subf %82, %85 : vector<2x16x16xf32>
    %87 = math.exp %86 : vector<2x16x16xf32>
    %cst_49 = arith.constant dense<0.000000e+00> : vector<2x16xf32>
    %88 = vector.multi_reduction <add>, %87, %cst_49 [2] : vector<2x16x16xf32> to vector<2x16xf32>
    %89 = vector.shape_cast %88 : vector<2x16xf32> to vector<2x16x1xf32>
    %90 = tpu.reciprocal %89 {approx = true} : vector<2x16x1xf32> -> vector<2x16x1xf32>
    %91 = vector.broadcast %90 : vector<2x16x1xf32> to vector<2x16x16xf32>
    %92 = arith.mulf %87, %91 : vector<2x16x16xf32>
    %93 = arith.truncf %92 : vector<2x16x16xf32> to vector<2x16x16xbf16>
    "tpu.trace_start"() <{level = 10 : i32, message = "bqk,bkd->bqd"}> : () -> ()
    %cst_50 = arith.constant dense<0.000000e+00> : vector<2x16x32xf32>
    %94 = tpu.matmul %93, %81, %cst_50 {dimension_numbers = #tpu.dot_dimension_numbers<[2], [1], [1], [2], [0, 0, 0, 1, 1, 2], [0], [0]>} : vector<2x16x16xbf16>, vector<2x16x32xbf16>, vector<2x16x32xf32> -> vector<2x16x32xf32>
    "tpu.trace_stop"() : () -> ()
    %95 = vector.extract_strided_slice %73 {offsets = [0, 0, 32], sizes = [2, 16, 32], strides = [1, 1, 1]} : vector<2x16x128xf32> to vector<2x16x32xf32>
    %96 = arith.truncf %95 : vector<2x16x32xf32> to vector<2x16x32xbf16>
    %97 = vector.extract_strided_slice %74 {offsets = [0, 0, 32], sizes = [2, 16, 32], strides = [1, 1, 1]} : vector<2x16x128xf32> to vector<2x16x32xf32>
    %98 = arith.truncf %97 : vector<2x16x32xf32> to vector<2x16x32xbf16>
    %99 = vector.extract_strided_slice %75 {offsets = [0, 0, 32], sizes = [2, 16, 32], strides = [1, 1, 1]} : vector<2x16x128xf32> to vector<2x16x32xf32>
    %100 = arith.truncf %99 : vector<2x16x32xf32> to vector<2x16x32xbf16>
    "tpu.trace_start"() <{level = 10 : i32, message = "bqd,bkd->bqk"}> : () -> ()
    %cst_51 = arith.constant dense<0.000000e+00> : vector<2x16x16xf32>
    %101 = tpu.matmul %96, %98, %cst_51 {dimension_numbers = #tpu.dot_dimension_numbers<[2], [2], [1], [1], [0, 0, 0, 1, 1, 1], [0], [0]>} : vector<2x16x32xbf16>, vector<2x16x32xbf16>, vector<2x16x16xf32> -> vector<2x16x16xf32>
    "tpu.trace_stop"() : () -> ()
    %cst_52 = arith.constant dense<0xFF800000> : vector<2x16xf32>
    %102 = vector.multi_reduction <maximumf>, %101, %cst_52 [2] : vector<2x16x16xf32> to vector<2x16xf32>
    %103 = vector.shape_cast %102 : vector<2x16xf32> to vector<2x16x1xf32>
    %104 = vector.broadcast %103 : vector<2x16x1xf32> to vector<2x16x16xf32>
    %105 = arith.subf %101, %104 : vector<2x16x16xf32>
    %106 = math.exp %105 : vector<2x16x16xf32>
    %cst_53 = arith.constant dense<0.000000e+00> : vector<2x16xf32>
    %107 = vector.multi_reduction <add>, %106, %cst_53 [2] : vector<2x16x16xf32> to vector<2x16xf32>
    %108 = vector.shape_cast %107 : vector<2x16xf32> to vector<2x16x1xf32>
    %109 = tpu.reciprocal %108 {approx = true} : vector<2x16x1xf32> -> vector<2x16x1xf32>
    %110 = vector.broadcast %109 : vector<2x16x1xf32> to vector<2x16x16xf32>
    %111 = arith.mulf %106, %110 : vector<2x16x16xf32>
    %112 = arith.truncf %111 : vector<2x16x16xf32> to vector<2x16x16xbf16>
    "tpu.trace_start"() <{level = 10 : i32, message = "bqk,bkd->bqd"}> : () -> ()
    %cst_54 = arith.constant dense<0.000000e+00> : vector<2x16x32xf32>
    %113 = tpu.matmul %112, %100, %cst_54 {dimension_numbers = #tpu.dot_dimension_numbers<[2], [1], [1], [2], [0, 0, 0, 1, 1, 2], [0], [0]>} : vector<2x16x16xbf16>, vector<2x16x32xbf16>, vector<2x16x32xf32> -> vector<2x16x32xf32>
    "tpu.trace_stop"() : () -> ()
    %114 = vector.extract_strided_slice %73 {offsets = [0, 0, 64], sizes = [2, 16, 32], strides = [1, 1, 1]} : vector<2x16x128xf32> to vector<2x16x32xf32>
    %115 = arith.truncf %114 : vector<2x16x32xf32> to vector<2x16x32xbf16>
    %116 = vector.extract_strided_slice %74 {offsets = [0, 0, 64], sizes = [2, 16, 32], strides = [1, 1, 1]} : vector<2x16x128xf32> to vector<2x16x32xf32>
    %117 = arith.truncf %116 : vector<2x16x32xf32> to vector<2x16x32xbf16>
    %118 = vector.extract_strided_slice %75 {offsets = [0, 0, 64], sizes = [2, 16, 32], strides = [1, 1, 1]} : vector<2x16x128xf32> to vector<2x16x32xf32>
    %119 = arith.truncf %118 : vector<2x16x32xf32> to vector<2x16x32xbf16>
    "tpu.trace_start"() <{level = 10 : i32, message = "bqd,bkd->bqk"}> : () -> ()
    %cst_55 = arith.constant dense<0.000000e+00> : vector<2x16x16xf32>
    %120 = tpu.matmul %115, %117, %cst_55 {dimension_numbers = #tpu.dot_dimension_numbers<[2], [2], [1], [1], [0, 0, 0, 1, 1, 1], [0], [0]>} : vector<2x16x32xbf16>, vector<2x16x32xbf16>, vector<2x16x16xf32> -> vector<2x16x16xf32>
    "tpu.trace_stop"() : () -> ()
    %cst_56 = arith.constant dense<0xFF800000> : vector<2x16xf32>
    %121 = vector.multi_reduction <maximumf>, %120, %cst_56 [2] : vector<2x16x16xf32> to vector<2x16xf32>
    %122 = vector.shape_cast %121 : vector<2x16xf32> to vector<2x16x1xf32>
    %123 = vector.broadcast %122 : vector<2x16x1xf32> to vector<2x16x16xf32>
    %124 = arith.subf %120, %123 : vector<2x16x16xf32>
    %125 = math.exp %124 : vector<2x16x16xf32>
    %cst_57 = arith.constant dense<0.000000e+00> : vector<2x16xf32>
    %126 = vector.multi_reduction <add>, %125, %cst_57 [2] : vector<2x16x16xf32> to vector<2x16xf32>
    %127 = vector.shape_cast %126 : vector<2x16xf32> to vector<2x16x1xf32>
    %128 = tpu.reciprocal %127 {approx = true} : vector<2x16x1xf32> -> vector<2x16x1xf32>
    %129 = vector.broadcast %128 : vector<2x16x1xf32> to vector<2x16x16xf32>
    %130 = arith.mulf %125, %129 : vector<2x16x16xf32>
    %131 = arith.truncf %130 : vector<2x16x16xf32> to vector<2x16x16xbf16>
    "tpu.trace_start"() <{level = 10 : i32, message = "bqk,bkd->bqd"}> : () -> ()
    %cst_58 = arith.constant dense<0.000000e+00> : vector<2x16x32xf32>
    %132 = tpu.matmul %131, %119, %cst_58 {dimension_numbers = #tpu.dot_dimension_numbers<[2], [1], [1], [2], [0, 0, 0, 1, 1, 2], [0], [0]>} : vector<2x16x16xbf16>, vector<2x16x32xbf16>, vector<2x16x32xf32> -> vector<2x16x32xf32>
    "tpu.trace_stop"() : () -> ()
    %133 = vector.extract_strided_slice %73 {offsets = [0, 0, 96], sizes = [2, 16, 32], strides = [1, 1, 1]} : vector<2x16x128xf32> to vector<2x16x32xf32>
    %134 = arith.truncf %133 : vector<2x16x32xf32> to vector<2x16x32xbf16>
    %135 = vector.extract_strided_slice %74 {offsets = [0, 0, 96], sizes = [2, 16, 32], strides = [1, 1, 1]} : vector<2x16x128xf32> to vector<2x16x32xf32>
    %136 = arith.truncf %135 : vector<2x16x32xf32> to vector<2x16x32xbf16>
    %137 = vector.extract_strided_slice %75 {offsets = [0, 0, 96], sizes = [2, 16, 32], strides = [1, 1, 1]} : vector<2x16x128xf32> to vector<2x16x32xf32>
    %138 = arith.truncf %137 : vector<2x16x32xf32> to vector<2x16x32xbf16>
    "tpu.trace_start"() <{level = 10 : i32, message = "bqd,bkd->bqk"}> : () -> ()
    %cst_59 = arith.constant dense<0.000000e+00> : vector<2x16x16xf32>
    %139 = tpu.matmul %134, %136, %cst_59 {dimension_numbers = #tpu.dot_dimension_numbers<[2], [2], [1], [1], [0, 0, 0, 1, 1, 1], [0], [0]>} : vector<2x16x32xbf16>, vector<2x16x32xbf16>, vector<2x16x16xf32> -> vector<2x16x16xf32>
    "tpu.trace_stop"() : () -> ()
    %cst_60 = arith.constant dense<0xFF800000> : vector<2x16xf32>
    %140 = vector.multi_reduction <maximumf>, %139, %cst_60 [2] : vector<2x16x16xf32> to vector<2x16xf32>
    %141 = vector.shape_cast %140 : vector<2x16xf32> to vector<2x16x1xf32>
    %142 = vector.broadcast %141 : vector<2x16x1xf32> to vector<2x16x16xf32>
    %143 = arith.subf %139, %142 : vector<2x16x16xf32>
    %144 = math.exp %143 : vector<2x16x16xf32>
    %cst_61 = arith.constant dense<0.000000e+00> : vector<2x16xf32>
    %145 = vector.multi_reduction <add>, %144, %cst_61 [2] : vector<2x16x16xf32> to vector<2x16xf32>
    %146 = vector.shape_cast %145 : vector<2x16xf32> to vector<2x16x1xf32>
    %147 = tpu.reciprocal %146 {approx = true} : vector<2x16x1xf32> -> vector<2x16x1xf32>
    %148 = vector.broadcast %147 : vector<2x16x1xf32> to vector<2x16x16xf32>
    %149 = arith.mulf %144, %148 : vector<2x16x16xf32>
    %150 = arith.truncf %149 : vector<2x16x16xf32> to vector<2x16x16xbf16>
    "tpu.trace_start"() <{level = 10 : i32, message = "bqk,bkd->bqd"}> : () -> ()
    %cst_62 = arith.constant dense<0.000000e+00> : vector<2x16x32xf32>
    %151 = tpu.matmul %150, %138, %cst_62 {dimension_numbers = #tpu.dot_dimension_numbers<[2], [1], [1], [2], [0, 0, 0, 1, 1, 2], [0], [0]>} : vector<2x16x16xbf16>, vector<2x16x32xbf16>, vector<2x16x32xf32> -> vector<2x16x32xf32>
    "tpu.trace_stop"() : () -> ()
    %152 = tpu.concatenate %94, %113, %132, %151 in 2 : vector<2x16x32xf32>, vector<2x16x32xf32>, vector<2x16x32xf32>, vector<2x16x32xf32> -> vector<2x16x128xf32>
    %153 = vector.shape_cast %152 : vector<2x16x128xf32> to vector<32x128xf32>
    %154 = arith.truncf %153 : vector<32x128xf32> to vector<32x128xbf16>
    %cst_63 = arith.constant dense<0.000000e+00> : vector<32x128xf32>
    %155 = tpu.matmul %154, %68, %cst_63 {dimension_numbers = #tpu.dot_dimension_numbers<[1], [0], [0], [1], [0, 0, 1, 1], [], []>} : vector<32x128xbf16>, vector<128x128xbf16>, vector<32x128xf32> -> vector<32x128xf32>
    %156 = vector.broadcast %70 : vector<1x128xf32> to vector<32x128xf32>
    %157 = arith.addf %155, %156 : vector<32x128xf32>
    %158 = arith.addf %3, %157 : vector<32x128xf32>
    %159 = arith.truncf %56 : vector<32x128xf32> to vector<32x128xbf16>
    %c0_64 = arith.constant 0 : index
    %c1_65 = arith.constant 1 : index
    %c0_66 = arith.constant 0 : index
    %c0_67 = arith.constant 0 : index
    %160 = vector.load %arg6[%c0_64, %c1_65, %c0_66, %c0_67] : memref<1x2x128x128xbf16, #tpu.memory_space<vmem>>, vector<1x1x128x128xbf16>
    %161 = vector.shape_cast %160 : vector<1x1x128x128xbf16> to vector<128x128xbf16>
    %cst_68 = arith.constant dense<0.000000e+00> : vector<32x128xf32>
    %162 = tpu.matmul %159, %161, %cst_68 {dimension_numbers = #tpu.dot_dimension_numbers<[1], [0], [0], [1], [0, 0, 1, 1], [], []>} : vector<32x128xbf16>, vector<128x128xbf16>, vector<32x128xf32> -> vector<32x128xf32>
    %163 = arith.truncf %30 : vector<32x128xf32> to vector<32x128xbf16>
    %c0_69 = arith.constant 0 : index
    %c1_70 = arith.constant 1 : index
    %c0_71 = arith.constant 0 : index
    %c0_72 = arith.constant 0 : index
    %164 = vector.load %arg7[%c0_69, %c1_70, %c0_71, %c0_72] : memref<1x2x128x256xbf16, #tpu.memory_space<vmem>>, vector<1x1x128x256xbf16>
    %165 = vector.shape_cast %164 : vector<1x1x128x256xbf16> to vector<128x256xbf16>
    %cst_73 = arith.constant dense<0.000000e+00> : vector<32x256xf32>
    %166 = tpu.matmul %163, %165, %cst_73 {dimension_numbers = #tpu.dot_dimension_numbers<[1], [0], [0], [1], [0, 0, 1, 1], [], []>} : vector<32x128xbf16>, vector<128x256xbf16>, vector<32x256xf32> -> vector<32x256xf32>
    %167 = vector.extract_strided_slice %166 {offsets = [0, 0], sizes = [32, 128], strides = [1, 1]} : vector<32x256xf32> to vector<32x128xf32>
    %168 = vector.extract_strided_slice %166 {offsets = [0, 128], sizes = [32, 128], strides = [1, 1]} : vector<32x256xf32> to vector<32x128xf32>
    %c0_74 = arith.constant 0 : index
    %c1_75 = arith.constant 1 : index
    %c0_76 = arith.constant 0 : index
    %c0_77 = arith.constant 0 : index
    %169 = vector.load %arg8[%c0_74, %c1_75, %c0_76, %c0_77] : memref<1x2x128x128xbf16, #tpu.memory_space<vmem>>, vector<1x1x128x128xbf16>
    %170 = vector.shape_cast %169 : vector<1x1x128x128xbf16> to vector<128x128xbf16>
    %c0_78 = arith.constant 0 : index
    %c1_79 = arith.constant 1 : index
    %c0_80 = arith.constant 0 : index
    %c0_81 = arith.constant 0 : index
    %171 = vector.load %arg9[%c0_78, %c1_79, %c0_80, %c0_81] : memref<1x2x1x128xf32, #tpu.memory_space<vmem>>, vector<1x1x1x128xf32>
    %172 = vector.shape_cast %171 : vector<1x1x1x128xf32> to vector<1x128xf32>
    %cst_82 = arith.constant 0.176776692 : f32
    %173 = vector.broadcast %cst_82 : f32 to vector<32x128xf32>
    %174 = arith.mulf %162, %173 : vector<32x128xf32>
    %175 = vector.shape_cast %174 : vector<32x128xf32> to vector<2x16x128xf32>
    %176 = vector.shape_cast %167 : vector<32x128xf32> to vector<2x16x128xf32>
    %177 = vector.shape_cast %168 : vector<32x128xf32> to vector<2x16x128xf32>
    %178 = vector.extract_strided_slice %175 {offsets = [0, 0, 0], sizes = [2, 16, 32], strides = [1, 1, 1]} : vector<2x16x128xf32> to vector<2x16x32xf32>
    %179 = arith.truncf %178 : vector<2x16x32xf32> to vector<2x16x32xbf16>
    %180 = vector.extract_strided_slice %176 {offsets = [0, 0, 0], sizes = [2, 16, 32], strides = [1, 1, 1]} : vector<2x16x128xf32> to vector<2x16x32xf32>
    %181 = arith.truncf %180 : vector<2x16x32xf32> to vector<2x16x32xbf16>
    %182 = vector.extract_strided_slice %177 {offsets = [0, 0, 0], sizes = [2, 16, 32], strides = [1, 1, 1]} : vector<2x16x128xf32> to vector<2x16x32xf32>
    %183 = arith.truncf %182 : vector<2x16x32xf32> to vector<2x16x32xbf16>
    "tpu.trace_start"() <{level = 10 : i32, message = "bqd,bkd->bqk"}> : () -> ()
    %cst_83 = arith.constant dense<0.000000e+00> : vector<2x16x16xf32>
    %184 = tpu.matmul %179, %181, %cst_83 {dimension_numbers = #tpu.dot_dimension_numbers<[2], [2], [1], [1], [0, 0, 0, 1, 1, 1], [0], [0]>} : vector<2x16x32xbf16>, vector<2x16x32xbf16>, vector<2x16x16xf32> -> vector<2x16x16xf32>
    "tpu.trace_stop"() : () -> ()
    %cst_84 = arith.constant dense<0xFF800000> : vector<2x16xf32>
    %185 = vector.multi_reduction <maximumf>, %184, %cst_84 [2] : vector<2x16x16xf32> to vector<2x16xf32>
    %186 = vector.shape_cast %185 : vector<2x16xf32> to vector<2x16x1xf32>
    %187 = vector.broadcast %186 : vector<2x16x1xf32> to vector<2x16x16xf32>
    %188 = arith.subf %184, %187 : vector<2x16x16xf32>
    %189 = math.exp %188 : vector<2x16x16xf32>
    %cst_85 = arith.constant dense<0.000000e+00> : vector<2x16xf32>
    %190 = vector.multi_reduction <add>, %189, %cst_85 [2] : vector<2x16x16xf32> to vector<2x16xf32>
    %191 = vector.shape_cast %190 : vector<2x16xf32> to vector<2x16x1xf32>
    %192 = tpu.reciprocal %191 {approx = true} : vector<2x16x1xf32> -> vector<2x16x1xf32>
    %193 = vector.broadcast %192 : vector<2x16x1xf32> to vector<2x16x16xf32>
    %194 = arith.mulf %189, %193 : vector<2x16x16xf32>
    %195 = arith.truncf %194 : vector<2x16x16xf32> to vector<2x16x16xbf16>
    "tpu.trace_start"() <{level = 10 : i32, message = "bqk,bkd->bqd"}> : () -> ()
    %cst_86 = arith.constant dense<0.000000e+00> : vector<2x16x32xf32>
    %196 = tpu.matmul %195, %183, %cst_86 {dimension_numbers = #tpu.dot_dimension_numbers<[2], [1], [1], [2], [0, 0, 0, 1, 1, 2], [0], [0]>} : vector<2x16x16xbf16>, vector<2x16x32xbf16>, vector<2x16x32xf32> -> vector<2x16x32xf32>
    "tpu.trace_stop"() : () -> ()
    %197 = vector.extract_strided_slice %175 {offsets = [0, 0, 32], sizes = [2, 16, 32], strides = [1, 1, 1]} : vector<2x16x128xf32> to vector<2x16x32xf32>
    %198 = arith.truncf %197 : vector<2x16x32xf32> to vector<2x16x32xbf16>
    %199 = vector.extract_strided_slice %176 {offsets = [0, 0, 32], sizes = [2, 16, 32], strides = [1, 1, 1]} : vector<2x16x128xf32> to vector<2x16x32xf32>
    %200 = arith.truncf %199 : vector<2x16x32xf32> to vector<2x16x32xbf16>
    %201 = vector.extract_strided_slice %177 {offsets = [0, 0, 32], sizes = [2, 16, 32], strides = [1, 1, 1]} : vector<2x16x128xf32> to vector<2x16x32xf32>
    %202 = arith.truncf %201 : vector<2x16x32xf32> to vector<2x16x32xbf16>
    "tpu.trace_start"() <{level = 10 : i32, message = "bqd,bkd->bqk"}> : () -> ()
    %cst_87 = arith.constant dense<0.000000e+00> : vector<2x16x16xf32>
    %203 = tpu.matmul %198, %200, %cst_87 {dimension_numbers = #tpu.dot_dimension_numbers<[2], [2], [1], [1], [0, 0, 0, 1, 1, 1], [0], [0]>} : vector<2x16x32xbf16>, vector<2x16x32xbf16>, vector<2x16x16xf32> -> vector<2x16x16xf32>
    "tpu.trace_stop"() : () -> ()
    %cst_88 = arith.constant dense<0xFF800000> : vector<2x16xf32>
    %204 = vector.multi_reduction <maximumf>, %203, %cst_88 [2] : vector<2x16x16xf32> to vector<2x16xf32>
    %205 = vector.shape_cast %204 : vector<2x16xf32> to vector<2x16x1xf32>
    %206 = vector.broadcast %205 : vector<2x16x1xf32> to vector<2x16x16xf32>
    %207 = arith.subf %203, %206 : vector<2x16x16xf32>
    %208 = math.exp %207 : vector<2x16x16xf32>
    %cst_89 = arith.constant dense<0.000000e+00> : vector<2x16xf32>
    %209 = vector.multi_reduction <add>, %208, %cst_89 [2] : vector<2x16x16xf32> to vector<2x16xf32>
    %210 = vector.shape_cast %209 : vector<2x16xf32> to vector<2x16x1xf32>
    %211 = tpu.reciprocal %210 {approx = true} : vector<2x16x1xf32> -> vector<2x16x1xf32>
    %212 = vector.broadcast %211 : vector<2x16x1xf32> to vector<2x16x16xf32>
    %213 = arith.mulf %208, %212 : vector<2x16x16xf32>
    %214 = arith.truncf %213 : vector<2x16x16xf32> to vector<2x16x16xbf16>
    "tpu.trace_start"() <{level = 10 : i32, message = "bqk,bkd->bqd"}> : () -> ()
    %cst_90 = arith.constant dense<0.000000e+00> : vector<2x16x32xf32>
    %215 = tpu.matmul %214, %202, %cst_90 {dimension_numbers = #tpu.dot_dimension_numbers<[2], [1], [1], [2], [0, 0, 0, 1, 1, 2], [0], [0]>} : vector<2x16x16xbf16>, vector<2x16x32xbf16>, vector<2x16x32xf32> -> vector<2x16x32xf32>
    "tpu.trace_stop"() : () -> ()
    %216 = vector.extract_strided_slice %175 {offsets = [0, 0, 64], sizes = [2, 16, 32], strides = [1, 1, 1]} : vector<2x16x128xf32> to vector<2x16x32xf32>
    %217 = arith.truncf %216 : vector<2x16x32xf32> to vector<2x16x32xbf16>
    %218 = vector.extract_strided_slice %176 {offsets = [0, 0, 64], sizes = [2, 16, 32], strides = [1, 1, 1]} : vector<2x16x128xf32> to vector<2x16x32xf32>
    %219 = arith.truncf %218 : vector<2x16x32xf32> to vector<2x16x32xbf16>
    %220 = vector.extract_strided_slice %177 {offsets = [0, 0, 64], sizes = [2, 16, 32], strides = [1, 1, 1]} : vector<2x16x128xf32> to vector<2x16x32xf32>
    %221 = arith.truncf %220 : vector<2x16x32xf32> to vector<2x16x32xbf16>
    "tpu.trace_start"() <{level = 10 : i32, message = "bqd,bkd->bqk"}> : () -> ()
    %cst_91 = arith.constant dense<0.000000e+00> : vector<2x16x16xf32>
    %222 = tpu.matmul %217, %219, %cst_91 {dimension_numbers = #tpu.dot_dimension_numbers<[2], [2], [1], [1], [0, 0, 0, 1, 1, 1], [0], [0]>} : vector<2x16x32xbf16>, vector<2x16x32xbf16>, vector<2x16x16xf32> -> vector<2x16x16xf32>
    "tpu.trace_stop"() : () -> ()
    %cst_92 = arith.constant dense<0xFF800000> : vector<2x16xf32>
    %223 = vector.multi_reduction <maximumf>, %222, %cst_92 [2] : vector<2x16x16xf32> to vector<2x16xf32>
    %224 = vector.shape_cast %223 : vector<2x16xf32> to vector<2x16x1xf32>
    %225 = vector.broadcast %224 : vector<2x16x1xf32> to vector<2x16x16xf32>
    %226 = arith.subf %222, %225 : vector<2x16x16xf32>
    %227 = math.exp %226 : vector<2x16x16xf32>
    %cst_93 = arith.constant dense<0.000000e+00> : vector<2x16xf32>
    %228 = vector.multi_reduction <add>, %227, %cst_93 [2] : vector<2x16x16xf32> to vector<2x16xf32>
    %229 = vector.shape_cast %228 : vector<2x16xf32> to vector<2x16x1xf32>
    %230 = tpu.reciprocal %229 {approx = true} : vector<2x16x1xf32> -> vector<2x16x1xf32>
    %231 = vector.broadcast %230 : vector<2x16x1xf32> to vector<2x16x16xf32>
    %232 = arith.mulf %227, %231 : vector<2x16x16xf32>
    %233 = arith.truncf %232 : vector<2x16x16xf32> to vector<2x16x16xbf16>
    "tpu.trace_start"() <{level = 10 : i32, message = "bqk,bkd->bqd"}> : () -> ()
    %cst_94 = arith.constant dense<0.000000e+00> : vector<2x16x32xf32>
    %234 = tpu.matmul %233, %221, %cst_94 {dimension_numbers = #tpu.dot_dimension_numbers<[2], [1], [1], [2], [0, 0, 0, 1, 1, 2], [0], [0]>} : vector<2x16x16xbf16>, vector<2x16x32xbf16>, vector<2x16x32xf32> -> vector<2x16x32xf32>
    "tpu.trace_stop"() : () -> ()
    %235 = vector.extract_strided_slice %175 {offsets = [0, 0, 96], sizes = [2, 16, 32], strides = [1, 1, 1]} : vector<2x16x128xf32> to vector<2x16x32xf32>
    %236 = arith.truncf %235 : vector<2x16x32xf32> to vector<2x16x32xbf16>
    %237 = vector.extract_strided_slice %176 {offsets = [0, 0, 96], sizes = [2, 16, 32], strides = [1, 1, 1]} : vector<2x16x128xf32> to vector<2x16x32xf32>
    %238 = arith.truncf %237 : vector<2x16x32xf32> to vector<2x16x32xbf16>
    %239 = vector.extract_strided_slice %177 {offsets = [0, 0, 96], sizes = [2, 16, 32], strides = [1, 1, 1]} : vector<2x16x128xf32> to vector<2x16x32xf32>
    %240 = arith.truncf %239 : vector<2x16x32xf32> to vector<2x16x32xbf16>
    "tpu.trace_start"() <{level = 10 : i32, message = "bqd,bkd->bqk"}> : () -> ()
    %cst_95 = arith.constant dense<0.000000e+00> : vector<2x16x16xf32>
    %241 = tpu.matmul %236, %238, %cst_95 {dimension_numbers = #tpu.dot_dimension_numbers<[2], [2], [1], [1], [0, 0, 0, 1, 1, 1], [0], [0]>} : vector<2x16x32xbf16>, vector<2x16x32xbf16>, vector<2x16x16xf32> -> vector<2x16x16xf32>
    "tpu.trace_stop"() : () -> ()
    %cst_96 = arith.constant dense<0xFF800000> : vector<2x16xf32>
    %242 = vector.multi_reduction <maximumf>, %241, %cst_96 [2] : vector<2x16x16xf32> to vector<2x16xf32>
    %243 = vector.shape_cast %242 : vector<2x16xf32> to vector<2x16x1xf32>
    %244 = vector.broadcast %243 : vector<2x16x1xf32> to vector<2x16x16xf32>
    %245 = arith.subf %241, %244 : vector<2x16x16xf32>
    %246 = math.exp %245 : vector<2x16x16xf32>
    %cst_97 = arith.constant dense<0.000000e+00> : vector<2x16xf32>
    %247 = vector.multi_reduction <add>, %246, %cst_97 [2] : vector<2x16x16xf32> to vector<2x16xf32>
    %248 = vector.shape_cast %247 : vector<2x16xf32> to vector<2x16x1xf32>
    %249 = tpu.reciprocal %248 {approx = true} : vector<2x16x1xf32> -> vector<2x16x1xf32>
    %250 = vector.broadcast %249 : vector<2x16x1xf32> to vector<2x16x16xf32>
    %251 = arith.mulf %246, %250 : vector<2x16x16xf32>
    %252 = arith.truncf %251 : vector<2x16x16xf32> to vector<2x16x16xbf16>
    "tpu.trace_start"() <{level = 10 : i32, message = "bqk,bkd->bqd"}> : () -> ()
    %cst_98 = arith.constant dense<0.000000e+00> : vector<2x16x32xf32>
    %253 = tpu.matmul %252, %240, %cst_98 {dimension_numbers = #tpu.dot_dimension_numbers<[2], [1], [1], [2], [0, 0, 0, 1, 1, 2], [0], [0]>} : vector<2x16x16xbf16>, vector<2x16x32xbf16>, vector<2x16x32xf32> -> vector<2x16x32xf32>
    "tpu.trace_stop"() : () -> ()
    %254 = tpu.concatenate %196, %215, %234, %253 in 2 : vector<2x16x32xf32>, vector<2x16x32xf32>, vector<2x16x32xf32>, vector<2x16x32xf32> -> vector<2x16x128xf32>
    %255 = vector.shape_cast %254 : vector<2x16x128xf32> to vector<32x128xf32>
    %256 = arith.truncf %255 : vector<32x128xf32> to vector<32x128xbf16>
    %cst_99 = arith.constant dense<0.000000e+00> : vector<32x128xf32>
    %257 = tpu.matmul %256, %170, %cst_99 {dimension_numbers = #tpu.dot_dimension_numbers<[1], [0], [0], [1], [0, 0, 1, 1], [], []>} : vector<32x128xbf16>, vector<128x128xbf16>, vector<32x128xf32> -> vector<32x128xf32>
    %258 = vector.broadcast %172 : vector<1x128xf32> to vector<32x128xf32>
    %259 = arith.addf %257, %258 : vector<32x128xf32>
    %260 = arith.addf %4, %259 : vector<32x128xf32>
    %c0_100 = arith.constant 0 : index
    %c0_101 = arith.constant 0 : index
    %c0_102 = arith.constant 0 : index
    %c0_103 = arith.constant 0 : index
    %261 = vector.load %arg4[%c0_100, %c0_101, %c0_102, %c0_103] : memref<1x2x3x128xf32, #tpu.memory_space<vmem>>, vector<1x1x3x128xf32>
    %262 = vector.shape_cast %261 : vector<1x1x3x128xf32> to vector<3x128xf32>
    %c0_104 = arith.constant 0 : index
    %c0_105 = arith.constant 0 : index
    %c0_106 = arith.constant 0 : index
    %c0_107 = arith.constant 0 : index
    %263 = vector.load %arg5[%c0_104, %c0_105, %c0_106, %c0_107] : memref<1x2x3x128xf32, #tpu.memory_space<vmem>>, vector<1x1x3x128xf32>
    %264 = vector.shape_cast %263 : vector<1x1x3x128xf32> to vector<3x128xf32>
    %265 = vector.extract_strided_slice %262 {offsets = [1, 0], sizes = [1, 128], strides = [1, 1]} : vector<3x128xf32> to vector<1x128xf32>
    %266 = vector.extract_strided_slice %264 {offsets = [1, 0], sizes = [1, 128], strides = [1, 1]} : vector<3x128xf32> to vector<1x128xf32>
    %cst_108 = arith.constant dense<0.000000e+00> : vector<32xf32>
    %267 = vector.multi_reduction <add>, %158, %cst_108 [1] : vector<32x128xf32> to vector<32xf32>
    %268 = vector.shape_cast %267 : vector<32xf32> to vector<32x1xf32>
    %cst_109 = arith.constant 1.280000e+02 : f32
    %269 = vector.broadcast %cst_109 : f32 to vector<32x1xf32>
    %270 = arith.divf %268, %269 : vector<32x1xf32>
    %271 = vector.broadcast %270 : vector<32x1xf32> to vector<32x128xf32>
    %272 = arith.subf %158, %271 : vector<32x128xf32>
    %273 = arith.mulf %272, %272 : vector<32x128xf32>
    %cst_110 = arith.constant dense<0.000000e+00> : vector<32xf32>
    %274 = vector.multi_reduction <add>, %273, %cst_110 [1] : vector<32x128xf32> to vector<32xf32>
    %275 = vector.shape_cast %274 : vector<32xf32> to vector<32x1xf32>
    %cst_111 = arith.constant 1.280000e+02 : f32
    %276 = vector.broadcast %cst_111 : f32 to vector<32x1xf32>
    %277 = arith.divf %275, %276 : vector<32x1xf32>
    %cst_112 = arith.constant 9.99999974E-6 : f32
    %278 = vector.broadcast %cst_112 : f32 to vector<32x1xf32>
    %279 = arith.addf %277, %278 : vector<32x1xf32>
    %280 = math.rsqrt %279 : vector<32x1xf32>
    %281 = vector.broadcast %280 : vector<32x1xf32> to vector<32x128xf32>
    %282 = arith.mulf %272, %281 : vector<32x128xf32>
    %283 = vector.broadcast %265 : vector<1x128xf32> to vector<32x128xf32>
    %284 = arith.mulf %282, %283 : vector<32x128xf32>
    %285 = vector.broadcast %266 : vector<1x128xf32> to vector<32x128xf32>
    %286 = arith.addf %284, %285 : vector<32x128xf32>
    %287 = arith.truncf %286 : vector<32x128xf32> to vector<32x128xbf16>
    %c0_113 = arith.constant 0 : index
    %c0_114 = arith.constant 0 : index
    %c0_115 = arith.constant 0 : index
    %c0_116 = arith.constant 0 : index
    %288 = vector.load %arg10[%c0_113, %c0_114, %c0_115, %c0_116] : memref<1x2x128x384xbf16, #tpu.memory_space<vmem>>, vector<1x1x128x384xbf16>
    %289 = vector.shape_cast %288 : vector<1x1x128x384xbf16> to vector<128x384xbf16>
    %cst_117 = arith.constant dense<0.000000e+00> : vector<32x384xf32>
    %290 = tpu.matmul %287, %289, %cst_117 {dimension_numbers = #tpu.dot_dimension_numbers<[1], [0], [0], [1], [0, 0, 1, 1], [], []>} : vector<32x128xbf16>, vector<128x384xbf16>, vector<32x384xf32> -> vector<32x384xf32>
    %291 = vector.extract_strided_slice %290 {offsets = [0, 0], sizes = [32, 128], strides = [1, 1]} : vector<32x384xf32> to vector<32x128xf32>
    %292 = vector.extract_strided_slice %290 {offsets = [0, 128], sizes = [32, 128], strides = [1, 1]} : vector<32x384xf32> to vector<32x128xf32>
    %293 = vector.extract_strided_slice %290 {offsets = [0, 256], sizes = [32, 128], strides = [1, 1]} : vector<32x384xf32> to vector<32x128xf32>
    %c0_118 = arith.constant 0 : index
    %c0_119 = arith.constant 0 : index
    %c0_120 = arith.constant 0 : index
    %c0_121 = arith.constant 0 : index
    %294 = vector.load %arg11[%c0_118, %c0_119, %c0_120, %c0_121] : memref<1x2x128x128xbf16, #tpu.memory_space<vmem>>, vector<1x1x128x128xbf16>
    %295 = vector.shape_cast %294 : vector<1x1x128x128xbf16> to vector<128x128xbf16>
    %c0_122 = arith.constant 0 : index
    %c0_123 = arith.constant 0 : index
    %c0_124 = arith.constant 0 : index
    %c0_125 = arith.constant 0 : index
    %296 = vector.load %arg12[%c0_122, %c0_123, %c0_124, %c0_125] : memref<1x2x1x128xf32, #tpu.memory_space<vmem>>, vector<1x1x1x128xf32>
    %297 = vector.shape_cast %296 : vector<1x1x1x128xf32> to vector<1x128xf32>
    %cst_126 = arith.constant 0.176776692 : f32
    %298 = vector.broadcast %cst_126 : f32 to vector<32x128xf32>
    %299 = arith.mulf %291, %298 : vector<32x128xf32>
    %300 = vector.shape_cast %299 : vector<32x128xf32> to vector<2x16x128xf32>
    %301 = vector.shape_cast %292 : vector<32x128xf32> to vector<2x16x128xf32>
    %302 = vector.shape_cast %293 : vector<32x128xf32> to vector<2x16x128xf32>
    %303 = vector.extract_strided_slice %300 {offsets = [0, 0, 0], sizes = [2, 16, 32], strides = [1, 1, 1]} : vector<2x16x128xf32> to vector<2x16x32xf32>
    %304 = arith.truncf %303 : vector<2x16x32xf32> to vector<2x16x32xbf16>
    %305 = vector.extract_strided_slice %301 {offsets = [0, 0, 0], sizes = [2, 16, 32], strides = [1, 1, 1]} : vector<2x16x128xf32> to vector<2x16x32xf32>
    %306 = arith.truncf %305 : vector<2x16x32xf32> to vector<2x16x32xbf16>
    %307 = vector.extract_strided_slice %302 {offsets = [0, 0, 0], sizes = [2, 16, 32], strides = [1, 1, 1]} : vector<2x16x128xf32> to vector<2x16x32xf32>
    %308 = arith.truncf %307 : vector<2x16x32xf32> to vector<2x16x32xbf16>
    "tpu.trace_start"() <{level = 10 : i32, message = "bqd,bkd->bqk"}> : () -> ()
    %cst_127 = arith.constant dense<0.000000e+00> : vector<2x16x16xf32>
    %309 = tpu.matmul %304, %306, %cst_127 {dimension_numbers = #tpu.dot_dimension_numbers<[2], [2], [1], [1], [0, 0, 0, 1, 1, 1], [0], [0]>} : vector<2x16x32xbf16>, vector<2x16x32xbf16>, vector<2x16x16xf32> -> vector<2x16x16xf32>
    "tpu.trace_stop"() : () -> ()
    %cst_128 = arith.constant dense<0xFF800000> : vector<2x16xf32>
    %310 = vector.multi_reduction <maximumf>, %309, %cst_128 [2] : vector<2x16x16xf32> to vector<2x16xf32>
    %311 = vector.shape_cast %310 : vector<2x16xf32> to vector<2x16x1xf32>
    %312 = vector.broadcast %311 : vector<2x16x1xf32> to vector<2x16x16xf32>
    %313 = arith.subf %309, %312 : vector<2x16x16xf32>
    %314 = math.exp %313 : vector<2x16x16xf32>
    %cst_129 = arith.constant dense<0.000000e+00> : vector<2x16xf32>
    %315 = vector.multi_reduction <add>, %314, %cst_129 [2] : vector<2x16x16xf32> to vector<2x16xf32>
    %316 = vector.shape_cast %315 : vector<2x16xf32> to vector<2x16x1xf32>
    %317 = tpu.reciprocal %316 {approx = true} : vector<2x16x1xf32> -> vector<2x16x1xf32>
    %318 = vector.broadcast %317 : vector<2x16x1xf32> to vector<2x16x16xf32>
    %319 = arith.mulf %314, %318 : vector<2x16x16xf32>
    %320 = arith.truncf %319 : vector<2x16x16xf32> to vector<2x16x16xbf16>
    "tpu.trace_start"() <{level = 10 : i32, message = "bqk,bkd->bqd"}> : () -> ()
    %cst_130 = arith.constant dense<0.000000e+00> : vector<2x16x32xf32>
    %321 = tpu.matmul %320, %308, %cst_130 {dimension_numbers = #tpu.dot_dimension_numbers<[2], [1], [1], [2], [0, 0, 0, 1, 1, 2], [0], [0]>} : vector<2x16x16xbf16>, vector<2x16x32xbf16>, vector<2x16x32xf32> -> vector<2x16x32xf32>
    "tpu.trace_stop"() : () -> ()
    %322 = vector.extract_strided_slice %300 {offsets = [0, 0, 32], sizes = [2, 16, 32], strides = [1, 1, 1]} : vector<2x16x128xf32> to vector<2x16x32xf32>
    %323 = arith.truncf %322 : vector<2x16x32xf32> to vector<2x16x32xbf16>
    %324 = vector.extract_strided_slice %301 {offsets = [0, 0, 32], sizes = [2, 16, 32], strides = [1, 1, 1]} : vector<2x16x128xf32> to vector<2x16x32xf32>
    %325 = arith.truncf %324 : vector<2x16x32xf32> to vector<2x16x32xbf16>
    %326 = vector.extract_strided_slice %302 {offsets = [0, 0, 32], sizes = [2, 16, 32], strides = [1, 1, 1]} : vector<2x16x128xf32> to vector<2x16x32xf32>
    %327 = arith.truncf %326 : vector<2x16x32xf32> to vector<2x16x32xbf16>
    "tpu.trace_start"() <{level = 10 : i32, message = "bqd,bkd->bqk"}> : () -> ()
    %cst_131 = arith.constant dense<0.000000e+00> : vector<2x16x16xf32>
    %328 = tpu.matmul %323, %325, %cst_131 {dimension_numbers = #tpu.dot_dimension_numbers<[2], [2], [1], [1], [0, 0, 0, 1, 1, 1], [0], [0]>} : vector<2x16x32xbf16>, vector<2x16x32xbf16>, vector<2x16x16xf32> -> vector<2x16x16xf32>
    "tpu.trace_stop"() : () -> ()
    %cst_132 = arith.constant dense<0xFF800000> : vector<2x16xf32>
    %329 = vector.multi_reduction <maximumf>, %328, %cst_132 [2] : vector<2x16x16xf32> to vector<2x16xf32>
    %330 = vector.shape_cast %329 : vector<2x16xf32> to vector<2x16x1xf32>
    %331 = vector.broadcast %330 : vector<2x16x1xf32> to vector<2x16x16xf32>
    %332 = arith.subf %328, %331 : vector<2x16x16xf32>
    %333 = math.exp %332 : vector<2x16x16xf32>
    %cst_133 = arith.constant dense<0.000000e+00> : vector<2x16xf32>
    %334 = vector.multi_reduction <add>, %333, %cst_133 [2] : vector<2x16x16xf32> to vector<2x16xf32>
    %335 = vector.shape_cast %334 : vector<2x16xf32> to vector<2x16x1xf32>
    %336 = tpu.reciprocal %335 {approx = true} : vector<2x16x1xf32> -> vector<2x16x1xf32>
    %337 = vector.broadcast %336 : vector<2x16x1xf32> to vector<2x16x16xf32>
    %338 = arith.mulf %333, %337 : vector<2x16x16xf32>
    %339 = arith.truncf %338 : vector<2x16x16xf32> to vector<2x16x16xbf16>
    "tpu.trace_start"() <{level = 10 : i32, message = "bqk,bkd->bqd"}> : () -> ()
    %cst_134 = arith.constant dense<0.000000e+00> : vector<2x16x32xf32>
    %340 = tpu.matmul %339, %327, %cst_134 {dimension_numbers = #tpu.dot_dimension_numbers<[2], [1], [1], [2], [0, 0, 0, 1, 1, 2], [0], [0]>} : vector<2x16x16xbf16>, vector<2x16x32xbf16>, vector<2x16x32xf32> -> vector<2x16x32xf32>
    "tpu.trace_stop"() : () -> ()
    %341 = vector.extract_strided_slice %300 {offsets = [0, 0, 64], sizes = [2, 16, 32], strides = [1, 1, 1]} : vector<2x16x128xf32> to vector<2x16x32xf32>
    %342 = arith.truncf %341 : vector<2x16x32xf32> to vector<2x16x32xbf16>
    %343 = vector.extract_strided_slice %301 {offsets = [0, 0, 64], sizes = [2, 16, 32], strides = [1, 1, 1]} : vector<2x16x128xf32> to vector<2x16x32xf32>
    %344 = arith.truncf %343 : vector<2x16x32xf32> to vector<2x16x32xbf16>
    %345 = vector.extract_strided_slice %302 {offsets = [0, 0, 64], sizes = [2, 16, 32], strides = [1, 1, 1]} : vector<2x16x128xf32> to vector<2x16x32xf32>
    %346 = arith.truncf %345 : vector<2x16x32xf32> to vector<2x16x32xbf16>
    "tpu.trace_start"() <{level = 10 : i32, message = "bqd,bkd->bqk"}> : () -> ()
    %cst_135 = arith.constant dense<0.000000e+00> : vector<2x16x16xf32>
    %347 = tpu.matmul %342, %344, %cst_135 {dimension_numbers = #tpu.dot_dimension_numbers<[2], [2], [1], [1], [0, 0, 0, 1, 1, 1], [0], [0]>} : vector<2x16x32xbf16>, vector<2x16x32xbf16>, vector<2x16x16xf32> -> vector<2x16x16xf32>
    "tpu.trace_stop"() : () -> ()
    %cst_136 = arith.constant dense<0xFF800000> : vector<2x16xf32>
    %348 = vector.multi_reduction <maximumf>, %347, %cst_136 [2] : vector<2x16x16xf32> to vector<2x16xf32>
    %349 = vector.shape_cast %348 : vector<2x16xf32> to vector<2x16x1xf32>
    %350 = vector.broadcast %349 : vector<2x16x1xf32> to vector<2x16x16xf32>
    %351 = arith.subf %347, %350 : vector<2x16x16xf32>
    %352 = math.exp %351 : vector<2x16x16xf32>
    %cst_137 = arith.constant dense<0.000000e+00> : vector<2x16xf32>
    %353 = vector.multi_reduction <add>, %352, %cst_137 [2] : vector<2x16x16xf32> to vector<2x16xf32>
    %354 = vector.shape_cast %353 : vector<2x16xf32> to vector<2x16x1xf32>
    %355 = tpu.reciprocal %354 {approx = true} : vector<2x16x1xf32> -> vector<2x16x1xf32>
    %356 = vector.broadcast %355 : vector<2x16x1xf32> to vector<2x16x16xf32>
    %357 = arith.mulf %352, %356 : vector<2x16x16xf32>
    %358 = arith.truncf %357 : vector<2x16x16xf32> to vector<2x16x16xbf16>
    "tpu.trace_start"() <{level = 10 : i32, message = "bqk,bkd->bqd"}> : () -> ()
    %cst_138 = arith.constant dense<0.000000e+00> : vector<2x16x32xf32>
    %359 = tpu.matmul %358, %346, %cst_138 {dimension_numbers = #tpu.dot_dimension_numbers<[2], [1], [1], [2], [0, 0, 0, 1, 1, 2], [0], [0]>} : vector<2x16x16xbf16>, vector<2x16x32xbf16>, vector<2x16x32xf32> -> vector<2x16x32xf32>
    "tpu.trace_stop"() : () -> ()
    %360 = vector.extract_strided_slice %300 {offsets = [0, 0, 96], sizes = [2, 16, 32], strides = [1, 1, 1]} : vector<2x16x128xf32> to vector<2x16x32xf32>
    %361 = arith.truncf %360 : vector<2x16x32xf32> to vector<2x16x32xbf16>
    %362 = vector.extract_strided_slice %301 {offsets = [0, 0, 96], sizes = [2, 16, 32], strides = [1, 1, 1]} : vector<2x16x128xf32> to vector<2x16x32xf32>
    %363 = arith.truncf %362 : vector<2x16x32xf32> to vector<2x16x32xbf16>
    %364 = vector.extract_strided_slice %302 {offsets = [0, 0, 96], sizes = [2, 16, 32], strides = [1, 1, 1]} : vector<2x16x128xf32> to vector<2x16x32xf32>
    %365 = arith.truncf %364 : vector<2x16x32xf32> to vector<2x16x32xbf16>
    "tpu.trace_start"() <{level = 10 : i32, message = "bqd,bkd->bqk"}> : () -> ()
    %cst_139 = arith.constant dense<0.000000e+00> : vector<2x16x16xf32>
    %366 = tpu.matmul %361, %363, %cst_139 {dimension_numbers = #tpu.dot_dimension_numbers<[2], [2], [1], [1], [0, 0, 0, 1, 1, 1], [0], [0]>} : vector<2x16x32xbf16>, vector<2x16x32xbf16>, vector<2x16x16xf32> -> vector<2x16x16xf32>
    "tpu.trace_stop"() : () -> ()
    %cst_140 = arith.constant dense<0xFF800000> : vector<2x16xf32>
    %367 = vector.multi_reduction <maximumf>, %366, %cst_140 [2] : vector<2x16x16xf32> to vector<2x16xf32>
    %368 = vector.shape_cast %367 : vector<2x16xf32> to vector<2x16x1xf32>
    %369 = vector.broadcast %368 : vector<2x16x1xf32> to vector<2x16x16xf32>
    %370 = arith.subf %366, %369 : vector<2x16x16xf32>
    %371 = math.exp %370 : vector<2x16x16xf32>
    %cst_141 = arith.constant dense<0.000000e+00> : vector<2x16xf32>
    %372 = vector.multi_reduction <add>, %371, %cst_141 [2] : vector<2x16x16xf32> to vector<2x16xf32>
    %373 = vector.shape_cast %372 : vector<2x16xf32> to vector<2x16x1xf32>
    %374 = tpu.reciprocal %373 {approx = true} : vector<2x16x1xf32> -> vector<2x16x1xf32>
    %375 = vector.broadcast %374 : vector<2x16x1xf32> to vector<2x16x16xf32>
    %376 = arith.mulf %371, %375 : vector<2x16x16xf32>
    %377 = arith.truncf %376 : vector<2x16x16xf32> to vector<2x16x16xbf16>
    "tpu.trace_start"() <{level = 10 : i32, message = "bqk,bkd->bqd"}> : () -> ()
    %cst_142 = arith.constant dense<0.000000e+00> : vector<2x16x32xf32>
    %378 = tpu.matmul %377, %365, %cst_142 {dimension_numbers = #tpu.dot_dimension_numbers<[2], [1], [1], [2], [0, 0, 0, 1, 1, 2], [0], [0]>} : vector<2x16x16xbf16>, vector<2x16x32xbf16>, vector<2x16x32xf32> -> vector<2x16x32xf32>
    "tpu.trace_stop"() : () -> ()
    %379 = tpu.concatenate %321, %340, %359, %378 in 2 : vector<2x16x32xf32>, vector<2x16x32xf32>, vector<2x16x32xf32>, vector<2x16x32xf32> -> vector<2x16x128xf32>
    %380 = vector.shape_cast %379 : vector<2x16x128xf32> to vector<32x128xf32>
    %381 = arith.truncf %380 : vector<32x128xf32> to vector<32x128xbf16>
    %cst_143 = arith.constant dense<0.000000e+00> : vector<32x128xf32>
    %382 = tpu.matmul %381, %295, %cst_143 {dimension_numbers = #tpu.dot_dimension_numbers<[1], [0], [0], [1], [0, 0, 1, 1], [], []>} : vector<32x128xbf16>, vector<128x128xbf16>, vector<32x128xf32> -> vector<32x128xf32>
    %383 = vector.broadcast %297 : vector<1x128xf32> to vector<32x128xf32>
    %384 = arith.addf %382, %383 : vector<32x128xf32>
    %385 = arith.addf %158, %384 : vector<32x128xf32>
    %c0_144 = arith.constant 0 : index
    %c1_145 = arith.constant 1 : index
    %c0_146 = arith.constant 0 : index
    %c0_147 = arith.constant 0 : index
    %386 = vector.load %arg4[%c0_144, %c1_145, %c0_146, %c0_147] : memref<1x2x3x128xf32, #tpu.memory_space<vmem>>, vector<1x1x3x128xf32>
    %387 = vector.shape_cast %386 : vector<1x1x3x128xf32> to vector<3x128xf32>
    %c0_148 = arith.constant 0 : index
    %c1_149 = arith.constant 1 : index
    %c0_150 = arith.constant 0 : index
    %c0_151 = arith.constant 0 : index
    %388 = vector.load %arg5[%c0_148, %c1_149, %c0_150, %c0_151] : memref<1x2x3x128xf32, #tpu.memory_space<vmem>>, vector<1x1x3x128xf32>
    %389 = vector.shape_cast %388 : vector<1x1x3x128xf32> to vector<3x128xf32>
    %390 = vector.extract_strided_slice %387 {offsets = [1, 0], sizes = [1, 128], strides = [1, 1]} : vector<3x128xf32> to vector<1x128xf32>
    %391 = vector.extract_strided_slice %389 {offsets = [1, 0], sizes = [1, 128], strides = [1, 1]} : vector<3x128xf32> to vector<1x128xf32>
    %cst_152 = arith.constant dense<0.000000e+00> : vector<32xf32>
    %392 = vector.multi_reduction <add>, %260, %cst_152 [1] : vector<32x128xf32> to vector<32xf32>
    %393 = vector.shape_cast %392 : vector<32xf32> to vector<32x1xf32>
    %cst_153 = arith.constant 1.280000e+02 : f32
    %394 = vector.broadcast %cst_153 : f32 to vector<32x1xf32>
    %395 = arith.divf %393, %394 : vector<32x1xf32>
    %396 = vector.broadcast %395 : vector<32x1xf32> to vector<32x128xf32>
    %397 = arith.subf %260, %396 : vector<32x128xf32>
    %398 = arith.mulf %397, %397 : vector<32x128xf32>
    %cst_154 = arith.constant dense<0.000000e+00> : vector<32xf32>
    %399 = vector.multi_reduction <add>, %398, %cst_154 [1] : vector<32x128xf32> to vector<32xf32>
    %400 = vector.shape_cast %399 : vector<32xf32> to vector<32x1xf32>
    %cst_155 = arith.constant 1.280000e+02 : f32
    %401 = vector.broadcast %cst_155 : f32 to vector<32x1xf32>
    %402 = arith.divf %400, %401 : vector<32x1xf32>
    %cst_156 = arith.constant 9.99999974E-6 : f32
    %403 = vector.broadcast %cst_156 : f32 to vector<32x1xf32>
    %404 = arith.addf %402, %403 : vector<32x1xf32>
    %405 = math.rsqrt %404 : vector<32x1xf32>
    %406 = vector.broadcast %405 : vector<32x1xf32> to vector<32x128xf32>
    %407 = arith.mulf %397, %406 : vector<32x128xf32>
    %408 = vector.broadcast %390 : vector<1x128xf32> to vector<32x128xf32>
    %409 = arith.mulf %407, %408 : vector<32x128xf32>
    %410 = vector.broadcast %391 : vector<1x128xf32> to vector<32x128xf32>
    %411 = arith.addf %409, %410 : vector<32x128xf32>
    %412 = arith.truncf %411 : vector<32x128xf32> to vector<32x128xbf16>
    %c0_157 = arith.constant 0 : index
    %c1_158 = arith.constant 1 : index
    %c0_159 = arith.constant 0 : index
    %c0_160 = arith.constant 0 : index
    %413 = vector.load %arg10[%c0_157, %c1_158, %c0_159, %c0_160] : memref<1x2x128x384xbf16, #tpu.memory_space<vmem>>, vector<1x1x128x384xbf16>
    %414 = vector.shape_cast %413 : vector<1x1x128x384xbf16> to vector<128x384xbf16>
    %cst_161 = arith.constant dense<0.000000e+00> : vector<32x384xf32>
    %415 = tpu.matmul %412, %414, %cst_161 {dimension_numbers = #tpu.dot_dimension_numbers<[1], [0], [0], [1], [0, 0, 1, 1], [], []>} : vector<32x128xbf16>, vector<128x384xbf16>, vector<32x384xf32> -> vector<32x384xf32>
    %416 = vector.extract_strided_slice %415 {offsets = [0, 0], sizes = [32, 128], strides = [1, 1]} : vector<32x384xf32> to vector<32x128xf32>
    %417 = vector.extract_strided_slice %415 {offsets = [0, 128], sizes = [32, 128], strides = [1, 1]} : vector<32x384xf32> to vector<32x128xf32>
    %418 = vector.extract_strided_slice %415 {offsets = [0, 256], sizes = [32, 128], strides = [1, 1]} : vector<32x384xf32> to vector<32x128xf32>
    %c0_162 = arith.constant 0 : index
    %c1_163 = arith.constant 1 : index
    %c0_164 = arith.constant 0 : index
    %c0_165 = arith.constant 0 : index
    %419 = vector.load %arg11[%c0_162, %c1_163, %c0_164, %c0_165] : memref<1x2x128x128xbf16, #tpu.memory_space<vmem>>, vector<1x1x128x128xbf16>
    %420 = vector.shape_cast %419 : vector<1x1x128x128xbf16> to vector<128x128xbf16>
    %c0_166 = arith.constant 0 : index
    %c1_167 = arith.constant 1 : index
    %c0_168 = arith.constant 0 : index
    %c0_169 = arith.constant 0 : index
    %421 = vector.load %arg12[%c0_166, %c1_167, %c0_168, %c0_169] : memref<1x2x1x128xf32, #tpu.memory_space<vmem>>, vector<1x1x1x128xf32>
    %422 = vector.shape_cast %421 : vector<1x1x1x128xf32> to vector<1x128xf32>
    %cst_170 = arith.constant 0.176776692 : f32
    %423 = vector.broadcast %cst_170 : f32 to vector<32x128xf32>
    %424 = arith.mulf %416, %423 : vector<32x128xf32>
    %425 = vector.shape_cast %424 : vector<32x128xf32> to vector<2x16x128xf32>
    %426 = vector.shape_cast %417 : vector<32x128xf32> to vector<2x16x128xf32>
    %427 = vector.shape_cast %418 : vector<32x128xf32> to vector<2x16x128xf32>
    %428 = vector.extract_strided_slice %425 {offsets = [0, 0, 0], sizes = [2, 16, 32], strides = [1, 1, 1]} : vector<2x16x128xf32> to vector<2x16x32xf32>
    %429 = arith.truncf %428 : vector<2x16x32xf32> to vector<2x16x32xbf16>
    %430 = vector.extract_strided_slice %426 {offsets = [0, 0, 0], sizes = [2, 16, 32], strides = [1, 1, 1]} : vector<2x16x128xf32> to vector<2x16x32xf32>
    %431 = arith.truncf %430 : vector<2x16x32xf32> to vector<2x16x32xbf16>
    %432 = vector.extract_strided_slice %427 {offsets = [0, 0, 0], sizes = [2, 16, 32], strides = [1, 1, 1]} : vector<2x16x128xf32> to vector<2x16x32xf32>
    %433 = arith.truncf %432 : vector<2x16x32xf32> to vector<2x16x32xbf16>
    "tpu.trace_start"() <{level = 10 : i32, message = "bqd,bkd->bqk"}> : () -> ()
    %cst_171 = arith.constant dense<0.000000e+00> : vector<2x16x16xf32>
    %434 = tpu.matmul %429, %431, %cst_171 {dimension_numbers = #tpu.dot_dimension_numbers<[2], [2], [1], [1], [0, 0, 0, 1, 1, 1], [0], [0]>} : vector<2x16x32xbf16>, vector<2x16x32xbf16>, vector<2x16x16xf32> -> vector<2x16x16xf32>
    "tpu.trace_stop"() : () -> ()
    %cst_172 = arith.constant dense<0xFF800000> : vector<2x16xf32>
    %435 = vector.multi_reduction <maximumf>, %434, %cst_172 [2] : vector<2x16x16xf32> to vector<2x16xf32>
    %436 = vector.shape_cast %435 : vector<2x16xf32> to vector<2x16x1xf32>
    %437 = vector.broadcast %436 : vector<2x16x1xf32> to vector<2x16x16xf32>
    %438 = arith.subf %434, %437 : vector<2x16x16xf32>
    %439 = math.exp %438 : vector<2x16x16xf32>
    %cst_173 = arith.constant dense<0.000000e+00> : vector<2x16xf32>
    %440 = vector.multi_reduction <add>, %439, %cst_173 [2] : vector<2x16x16xf32> to vector<2x16xf32>
    %441 = vector.shape_cast %440 : vector<2x16xf32> to vector<2x16x1xf32>
    %442 = tpu.reciprocal %441 {approx = true} : vector<2x16x1xf32> -> vector<2x16x1xf32>
    %443 = vector.broadcast %442 : vector<2x16x1xf32> to vector<2x16x16xf32>
    %444 = arith.mulf %439, %443 : vector<2x16x16xf32>
    %445 = arith.truncf %444 : vector<2x16x16xf32> to vector<2x16x16xbf16>
    "tpu.trace_start"() <{level = 10 : i32, message = "bqk,bkd->bqd"}> : () -> ()
    %cst_174 = arith.constant dense<0.000000e+00> : vector<2x16x32xf32>
    %446 = tpu.matmul %445, %433, %cst_174 {dimension_numbers = #tpu.dot_dimension_numbers<[2], [1], [1], [2], [0, 0, 0, 1, 1, 2], [0], [0]>} : vector<2x16x16xbf16>, vector<2x16x32xbf16>, vector<2x16x32xf32> -> vector<2x16x32xf32>
    "tpu.trace_stop"() : () -> ()
    %447 = vector.extract_strided_slice %425 {offsets = [0, 0, 32], sizes = [2, 16, 32], strides = [1, 1, 1]} : vector<2x16x128xf32> to vector<2x16x32xf32>
    %448 = arith.truncf %447 : vector<2x16x32xf32> to vector<2x16x32xbf16>
    %449 = vector.extract_strided_slice %426 {offsets = [0, 0, 32], sizes = [2, 16, 32], strides = [1, 1, 1]} : vector<2x16x128xf32> to vector<2x16x32xf32>
    %450 = arith.truncf %449 : vector<2x16x32xf32> to vector<2x16x32xbf16>
    %451 = vector.extract_strided_slice %427 {offsets = [0, 0, 32], sizes = [2, 16, 32], strides = [1, 1, 1]} : vector<2x16x128xf32> to vector<2x16x32xf32>
    %452 = arith.truncf %451 : vector<2x16x32xf32> to vector<2x16x32xbf16>
    "tpu.trace_start"() <{level = 10 : i32, message = "bqd,bkd->bqk"}> : () -> ()
    %cst_175 = arith.constant dense<0.000000e+00> : vector<2x16x16xf32>
    %453 = tpu.matmul %448, %450, %cst_175 {dimension_numbers = #tpu.dot_dimension_numbers<[2], [2], [1], [1], [0, 0, 0, 1, 1, 1], [0], [0]>} : vector<2x16x32xbf16>, vector<2x16x32xbf16>, vector<2x16x16xf32> -> vector<2x16x16xf32>
    "tpu.trace_stop"() : () -> ()
    %cst_176 = arith.constant dense<0xFF800000> : vector<2x16xf32>
    %454 = vector.multi_reduction <maximumf>, %453, %cst_176 [2] : vector<2x16x16xf32> to vector<2x16xf32>
    %455 = vector.shape_cast %454 : vector<2x16xf32> to vector<2x16x1xf32>
    %456 = vector.broadcast %455 : vector<2x16x1xf32> to vector<2x16x16xf32>
    %457 = arith.subf %453, %456 : vector<2x16x16xf32>
    %458 = math.exp %457 : vector<2x16x16xf32>
    %cst_177 = arith.constant dense<0.000000e+00> : vector<2x16xf32>
    %459 = vector.multi_reduction <add>, %458, %cst_177 [2] : vector<2x16x16xf32> to vector<2x16xf32>
    %460 = vector.shape_cast %459 : vector<2x16xf32> to vector<2x16x1xf32>
    %461 = tpu.reciprocal %460 {approx = true} : vector<2x16x1xf32> -> vector<2x16x1xf32>
    %462 = vector.broadcast %461 : vector<2x16x1xf32> to vector<2x16x16xf32>
    %463 = arith.mulf %458, %462 : vector<2x16x16xf32>
    %464 = arith.truncf %463 : vector<2x16x16xf32> to vector<2x16x16xbf16>
    "tpu.trace_start"() <{level = 10 : i32, message = "bqk,bkd->bqd"}> : () -> ()
    %cst_178 = arith.constant dense<0.000000e+00> : vector<2x16x32xf32>
    %465 = tpu.matmul %464, %452, %cst_178 {dimension_numbers = #tpu.dot_dimension_numbers<[2], [1], [1], [2], [0, 0, 0, 1, 1, 2], [0], [0]>} : vector<2x16x16xbf16>, vector<2x16x32xbf16>, vector<2x16x32xf32> -> vector<2x16x32xf32>
    "tpu.trace_stop"() : () -> ()
    %466 = vector.extract_strided_slice %425 {offsets = [0, 0, 64], sizes = [2, 16, 32], strides = [1, 1, 1]} : vector<2x16x128xf32> to vector<2x16x32xf32>
    %467 = arith.truncf %466 : vector<2x16x32xf32> to vector<2x16x32xbf16>
    %468 = vector.extract_strided_slice %426 {offsets = [0, 0, 64], sizes = [2, 16, 32], strides = [1, 1, 1]} : vector<2x16x128xf32> to vector<2x16x32xf32>
    %469 = arith.truncf %468 : vector<2x16x32xf32> to vector<2x16x32xbf16>
    %470 = vector.extract_strided_slice %427 {offsets = [0, 0, 64], sizes = [2, 16, 32], strides = [1, 1, 1]} : vector<2x16x128xf32> to vector<2x16x32xf32>
    %471 = arith.truncf %470 : vector<2x16x32xf32> to vector<2x16x32xbf16>
    "tpu.trace_start"() <{level = 10 : i32, message = "bqd,bkd->bqk"}> : () -> ()
    %cst_179 = arith.constant dense<0.000000e+00> : vector<2x16x16xf32>
    %472 = tpu.matmul %467, %469, %cst_179 {dimension_numbers = #tpu.dot_dimension_numbers<[2], [2], [1], [1], [0, 0, 0, 1, 1, 1], [0], [0]>} : vector<2x16x32xbf16>, vector<2x16x32xbf16>, vector<2x16x16xf32> -> vector<2x16x16xf32>
    "tpu.trace_stop"() : () -> ()
    %cst_180 = arith.constant dense<0xFF800000> : vector<2x16xf32>
    %473 = vector.multi_reduction <maximumf>, %472, %cst_180 [2] : vector<2x16x16xf32> to vector<2x16xf32>
    %474 = vector.shape_cast %473 : vector<2x16xf32> to vector<2x16x1xf32>
    %475 = vector.broadcast %474 : vector<2x16x1xf32> to vector<2x16x16xf32>
    %476 = arith.subf %472, %475 : vector<2x16x16xf32>
    %477 = math.exp %476 : vector<2x16x16xf32>
    %cst_181 = arith.constant dense<0.000000e+00> : vector<2x16xf32>
    %478 = vector.multi_reduction <add>, %477, %cst_181 [2] : vector<2x16x16xf32> to vector<2x16xf32>
    %479 = vector.shape_cast %478 : vector<2x16xf32> to vector<2x16x1xf32>
    %480 = tpu.reciprocal %479 {approx = true} : vector<2x16x1xf32> -> vector<2x16x1xf32>
    %481 = vector.broadcast %480 : vector<2x16x1xf32> to vector<2x16x16xf32>
    %482 = arith.mulf %477, %481 : vector<2x16x16xf32>
    %483 = arith.truncf %482 : vector<2x16x16xf32> to vector<2x16x16xbf16>
    "tpu.trace_start"() <{level = 10 : i32, message = "bqk,bkd->bqd"}> : () -> ()
    %cst_182 = arith.constant dense<0.000000e+00> : vector<2x16x32xf32>
    %484 = tpu.matmul %483, %471, %cst_182 {dimension_numbers = #tpu.dot_dimension_numbers<[2], [1], [1], [2], [0, 0, 0, 1, 1, 2], [0], [0]>} : vector<2x16x16xbf16>, vector<2x16x32xbf16>, vector<2x16x32xf32> -> vector<2x16x32xf32>
    "tpu.trace_stop"() : () -> ()
    %485 = vector.extract_strided_slice %425 {offsets = [0, 0, 96], sizes = [2, 16, 32], strides = [1, 1, 1]} : vector<2x16x128xf32> to vector<2x16x32xf32>
    %486 = arith.truncf %485 : vector<2x16x32xf32> to vector<2x16x32xbf16>
    %487 = vector.extract_strided_slice %426 {offsets = [0, 0, 96], sizes = [2, 16, 32], strides = [1, 1, 1]} : vector<2x16x128xf32> to vector<2x16x32xf32>
    %488 = arith.truncf %487 : vector<2x16x32xf32> to vector<2x16x32xbf16>
    %489 = vector.extract_strided_slice %427 {offsets = [0, 0, 96], sizes = [2, 16, 32], strides = [1, 1, 1]} : vector<2x16x128xf32> to vector<2x16x32xf32>
    %490 = arith.truncf %489 : vector<2x16x32xf32> to vector<2x16x32xbf16>
    "tpu.trace_start"() <{level = 10 : i32, message = "bqd,bkd->bqk"}> : () -> ()
    %cst_183 = arith.constant dense<0.000000e+00> : vector<2x16x16xf32>
    %491 = tpu.matmul %486, %488, %cst_183 {dimension_numbers = #tpu.dot_dimension_numbers<[2], [2], [1], [1], [0, 0, 0, 1, 1, 1], [0], [0]>} : vector<2x16x32xbf16>, vector<2x16x32xbf16>, vector<2x16x16xf32> -> vector<2x16x16xf32>
    "tpu.trace_stop"() : () -> ()
    %cst_184 = arith.constant dense<0xFF800000> : vector<2x16xf32>
    %492 = vector.multi_reduction <maximumf>, %491, %cst_184 [2] : vector<2x16x16xf32> to vector<2x16xf32>
    %493 = vector.shape_cast %492 : vector<2x16xf32> to vector<2x16x1xf32>
    %494 = vector.broadcast %493 : vector<2x16x1xf32> to vector<2x16x16xf32>
    %495 = arith.subf %491, %494 : vector<2x16x16xf32>
    %496 = math.exp %495 : vector<2x16x16xf32>
    %cst_185 = arith.constant dense<0.000000e+00> : vector<2x16xf32>
    %497 = vector.multi_reduction <add>, %496, %cst_185 [2] : vector<2x16x16xf32> to vector<2x16xf32>
    %498 = vector.shape_cast %497 : vector<2x16xf32> to vector<2x16x1xf32>
    %499 = tpu.reciprocal %498 {approx = true} : vector<2x16x1xf32> -> vector<2x16x1xf32>
    %500 = vector.broadcast %499 : vector<2x16x1xf32> to vector<2x16x16xf32>
    %501 = arith.mulf %496, %500 : vector<2x16x16xf32>
    %502 = arith.truncf %501 : vector<2x16x16xf32> to vector<2x16x16xbf16>
    "tpu.trace_start"() <{level = 10 : i32, message = "bqk,bkd->bqd"}> : () -> ()
    %cst_186 = arith.constant dense<0.000000e+00> : vector<2x16x32xf32>
    %503 = tpu.matmul %502, %490, %cst_186 {dimension_numbers = #tpu.dot_dimension_numbers<[2], [1], [1], [2], [0, 0, 0, 1, 1, 2], [0], [0]>} : vector<2x16x16xbf16>, vector<2x16x32xbf16>, vector<2x16x32xf32> -> vector<2x16x32xf32>
    "tpu.trace_stop"() : () -> ()
    %504 = tpu.concatenate %446, %465, %484, %503 in 2 : vector<2x16x32xf32>, vector<2x16x32xf32>, vector<2x16x32xf32>, vector<2x16x32xf32> -> vector<2x16x128xf32>
    %505 = vector.shape_cast %504 : vector<2x16x128xf32> to vector<32x128xf32>
    %506 = arith.truncf %505 : vector<32x128xf32> to vector<32x128xbf16>
    %cst_187 = arith.constant dense<0.000000e+00> : vector<32x128xf32>
    %507 = tpu.matmul %506, %420, %cst_187 {dimension_numbers = #tpu.dot_dimension_numbers<[1], [0], [0], [1], [0, 0, 1, 1], [], []>} : vector<32x128xbf16>, vector<128x128xbf16>, vector<32x128xf32> -> vector<32x128xf32>
    %508 = vector.broadcast %422 : vector<1x128xf32> to vector<32x128xf32>
    %509 = arith.addf %507, %508 : vector<32x128xf32>
    %510 = arith.addf %260, %509 : vector<32x128xf32>
    %c0_188 = arith.constant 0 : index
    %c0_189 = arith.constant 0 : index
    %c0_190 = arith.constant 0 : index
    %c0_191 = arith.constant 0 : index
    %511 = vector.load %arg4[%c0_188, %c0_189, %c0_190, %c0_191] : memref<1x2x3x128xf32, #tpu.memory_space<vmem>>, vector<1x1x3x128xf32>
    %512 = vector.shape_cast %511 : vector<1x1x3x128xf32> to vector<3x128xf32>
    %c0_192 = arith.constant 0 : index
    %c0_193 = arith.constant 0 : index
    %c0_194 = arith.constant 0 : index
    %c0_195 = arith.constant 0 : index
    %513 = vector.load %arg5[%c0_192, %c0_193, %c0_194, %c0_195] : memref<1x2x3x128xf32, #tpu.memory_space<vmem>>, vector<1x1x3x128xf32>
    %514 = vector.shape_cast %513 : vector<1x1x3x128xf32> to vector<3x128xf32>
    %515 = vector.extract_strided_slice %512 {offsets = [2, 0], sizes = [1, 128], strides = [1, 1]} : vector<3x128xf32> to vector<1x128xf32>
    %516 = vector.extract_strided_slice %514 {offsets = [2, 0], sizes = [1, 128], strides = [1, 1]} : vector<3x128xf32> to vector<1x128xf32>
    %cst_196 = arith.constant dense<0.000000e+00> : vector<32xf32>
    %517 = vector.multi_reduction <add>, %385, %cst_196 [1] : vector<32x128xf32> to vector<32xf32>
    %518 = vector.shape_cast %517 : vector<32xf32> to vector<32x1xf32>
    %cst_197 = arith.constant 1.280000e+02 : f32
    %519 = vector.broadcast %cst_197 : f32 to vector<32x1xf32>
    %520 = arith.divf %518, %519 : vector<32x1xf32>
    %521 = vector.broadcast %520 : vector<32x1xf32> to vector<32x128xf32>
    %522 = arith.subf %385, %521 : vector<32x128xf32>
    %523 = arith.mulf %522, %522 : vector<32x128xf32>
    %cst_198 = arith.constant dense<0.000000e+00> : vector<32xf32>
    %524 = vector.multi_reduction <add>, %523, %cst_198 [1] : vector<32x128xf32> to vector<32xf32>
    %525 = vector.shape_cast %524 : vector<32xf32> to vector<32x1xf32>
    %cst_199 = arith.constant 1.280000e+02 : f32
    %526 = vector.broadcast %cst_199 : f32 to vector<32x1xf32>
    %527 = arith.divf %525, %526 : vector<32x1xf32>
    %cst_200 = arith.constant 9.99999974E-6 : f32
    %528 = vector.broadcast %cst_200 : f32 to vector<32x1xf32>
    %529 = arith.addf %527, %528 : vector<32x1xf32>
    %530 = math.rsqrt %529 : vector<32x1xf32>
    %531 = vector.broadcast %530 : vector<32x1xf32> to vector<32x128xf32>
    %532 = arith.mulf %522, %531 : vector<32x128xf32>
    %533 = vector.broadcast %515 : vector<1x128xf32> to vector<32x128xf32>
    %534 = arith.mulf %532, %533 : vector<32x128xf32>
    %535 = vector.broadcast %516 : vector<1x128xf32> to vector<32x128xf32>
    %536 = arith.addf %534, %535 : vector<32x128xf32>
    %537 = arith.truncf %536 : vector<32x128xf32> to vector<32x128xbf16>
    %c0_201 = arith.constant 0 : index
    %c0_202 = arith.constant 0 : index
    %c0_203 = arith.constant 0 : index
    %c0_204 = arith.constant 0 : index
    %538 = vector.load %arg13[%c0_201, %c0_202, %c0_203, %c0_204] : memref<1x2x128x384xbf16, #tpu.memory_space<vmem>>, vector<1x1x128x384xbf16>
    %539 = vector.shape_cast %538 : vector<1x1x128x384xbf16> to vector<128x384xbf16>
    %cst_205 = arith.constant dense<0.000000e+00> : vector<32x384xf32>
    %540 = tpu.matmul %537, %539, %cst_205 {dimension_numbers = #tpu.dot_dimension_numbers<[1], [0], [0], [1], [0, 0, 1, 1], [], []>} : vector<32x128xbf16>, vector<128x384xbf16>, vector<32x384xf32> -> vector<32x384xf32>
    %c0_206 = arith.constant 0 : index
    %c0_207 = arith.constant 0 : index
    %c0_208 = arith.constant 0 : index
    %c0_209 = arith.constant 0 : index
    %541 = vector.load %arg14[%c0_206, %c0_207, %c0_208, %c0_209] : memref<1x2x1x384xf32, #tpu.memory_space<vmem>>, vector<1x1x1x384xf32>
    %542 = vector.shape_cast %541 : vector<1x1x1x384xf32> to vector<1x384xf32>
    %543 = vector.broadcast %542 : vector<1x384xf32> to vector<32x384xf32>
    %544 = arith.addf %540, %543 : vector<32x384xf32>
    %cst_210 = arith.constant 5.000000e-01 : f32
    %545 = vector.broadcast %cst_210 : f32 to vector<32x384xf32>
    %546 = arith.mulf %545, %544 : vector<32x384xf32>
    %cst_211 = arith.constant 4.471500e-02 : f32
    %547 = vector.broadcast %cst_211 : f32 to vector<32x384xf32>
    %548 = arith.mulf %547, %544 : vector<32x384xf32>
    %549 = arith.mulf %548, %544 : vector<32x384xf32>
    %550 = arith.mulf %549, %544 : vector<32x384xf32>
    %551 = arith.addf %544, %550 : vector<32x384xf32>
    %cst_212 = arith.constant 0.797884583 : f32
    %552 = vector.broadcast %cst_212 : f32 to vector<32x384xf32>
    %553 = arith.mulf %552, %551 : vector<32x384xf32>
    %554 = math.tanh %553 : vector<32x384xf32>
    %cst_213 = arith.constant 1.000000e+00 : f32
    %555 = vector.broadcast %cst_213 : f32 to vector<32x384xf32>
    %556 = arith.addf %555, %554 : vector<32x384xf32>
    %557 = arith.mulf %546, %556 : vector<32x384xf32>
    %558 = arith.truncf %557 : vector<32x384xf32> to vector<32x384xbf16>
    %c0_214 = arith.constant 0 : index
    %c0_215 = arith.constant 0 : index
    %c0_216 = arith.constant 0 : index
    %c0_217 = arith.constant 0 : index
    %559 = vector.load %arg15[%c0_214, %c0_215, %c0_216, %c0_217] : memref<1x2x384x128xbf16, #tpu.memory_space<vmem>>, vector<1x1x384x128xbf16>
    %560 = vector.shape_cast %559 : vector<1x1x384x128xbf16> to vector<384x128xbf16>
    %cst_218 = arith.constant dense<0.000000e+00> : vector<32x128xf32>
    %561 = tpu.matmul %558, %560, %cst_218 {dimension_numbers = #tpu.dot_dimension_numbers<[1], [0], [0], [1], [0, 0, 1, 1], [], []>} : vector<32x384xbf16>, vector<384x128xbf16>, vector<32x128xf32> -> vector<32x128xf32>
    %c0_219 = arith.constant 0 : index
    %c0_220 = arith.constant 0 : index
    %c0_221 = arith.constant 0 : index
    %c0_222 = arith.constant 0 : index
    %562 = vector.load %arg16[%c0_219, %c0_220, %c0_221, %c0_222] : memref<1x2x1x128xf32, #tpu.memory_space<vmem>>, vector<1x1x1x128xf32>
    %563 = vector.shape_cast %562 : vector<1x1x1x128xf32> to vector<1x128xf32>
    %564 = vector.broadcast %563 : vector<1x128xf32> to vector<32x128xf32>
    %565 = arith.addf %561, %564 : vector<32x128xf32>
    %566 = arith.addf %385, %565 : vector<32x128xf32>
    %c0_223 = arith.constant 0 : index
    %c1_224 = arith.constant 1 : index
    %c0_225 = arith.constant 0 : index
    %c0_226 = arith.constant 0 : index
    %567 = vector.load %arg4[%c0_223, %c1_224, %c0_225, %c0_226] : memref<1x2x3x128xf32, #tpu.memory_space<vmem>>, vector<1x1x3x128xf32>
    %568 = vector.shape_cast %567 : vector<1x1x3x128xf32> to vector<3x128xf32>
    %c0_227 = arith.constant 0 : index
    %c1_228 = arith.constant 1 : index
    %c0_229 = arith.constant 0 : index
    %c0_230 = arith.constant 0 : index
    %569 = vector.load %arg5[%c0_227, %c1_228, %c0_229, %c0_230] : memref<1x2x3x128xf32, #tpu.memory_space<vmem>>, vector<1x1x3x128xf32>
    %570 = vector.shape_cast %569 : vector<1x1x3x128xf32> to vector<3x128xf32>
    %571 = vector.extract_strided_slice %568 {offsets = [2, 0], sizes = [1, 128], strides = [1, 1]} : vector<3x128xf32> to vector<1x128xf32>
    %572 = vector.extract_strided_slice %570 {offsets = [2, 0], sizes = [1, 128], strides = [1, 1]} : vector<3x128xf32> to vector<1x128xf32>
    %cst_231 = arith.constant dense<0.000000e+00> : vector<32xf32>
    %573 = vector.multi_reduction <add>, %510, %cst_231 [1] : vector<32x128xf32> to vector<32xf32>
    %574 = vector.shape_cast %573 : vector<32xf32> to vector<32x1xf32>
    %cst_232 = arith.constant 1.280000e+02 : f32
    %575 = vector.broadcast %cst_232 : f32 to vector<32x1xf32>
    %576 = arith.divf %574, %575 : vector<32x1xf32>
    %577 = vector.broadcast %576 : vector<32x1xf32> to vector<32x128xf32>
    %578 = arith.subf %510, %577 : vector<32x128xf32>
    %579 = arith.mulf %578, %578 : vector<32x128xf32>
    %cst_233 = arith.constant dense<0.000000e+00> : vector<32xf32>
    %580 = vector.multi_reduction <add>, %579, %cst_233 [1] : vector<32x128xf32> to vector<32xf32>
    %581 = vector.shape_cast %580 : vector<32xf32> to vector<32x1xf32>
    %cst_234 = arith.constant 1.280000e+02 : f32
    %582 = vector.broadcast %cst_234 : f32 to vector<32x1xf32>
    %583 = arith.divf %581, %582 : vector<32x1xf32>
    %cst_235 = arith.constant 9.99999974E-6 : f32
    %584 = vector.broadcast %cst_235 : f32 to vector<32x1xf32>
    %585 = arith.addf %583, %584 : vector<32x1xf32>
    %586 = math.rsqrt %585 : vector<32x1xf32>
    %587 = vector.broadcast %586 : vector<32x1xf32> to vector<32x128xf32>
    %588 = arith.mulf %578, %587 : vector<32x128xf32>
    %589 = vector.broadcast %571 : vector<1x128xf32> to vector<32x128xf32>
    %590 = arith.mulf %588, %589 : vector<32x128xf32>
    %591 = vector.broadcast %572 : vector<1x128xf32> to vector<32x128xf32>
    %592 = arith.addf %590, %591 : vector<32x128xf32>
    %593 = arith.truncf %592 : vector<32x128xf32> to vector<32x128xbf16>
    %c0_236 = arith.constant 0 : index
    %c1_237 = arith.constant 1 : index
    %c0_238 = arith.constant 0 : index
    %c0_239 = arith.constant 0 : index
    %594 = vector.load %arg13[%c0_236, %c1_237, %c0_238, %c0_239] : memref<1x2x128x384xbf16, #tpu.memory_space<vmem>>, vector<1x1x128x384xbf16>
    %595 = vector.shape_cast %594 : vector<1x1x128x384xbf16> to vector<128x384xbf16>
    %cst_240 = arith.constant dense<0.000000e+00> : vector<32x384xf32>
    %596 = tpu.matmul %593, %595, %cst_240 {dimension_numbers = #tpu.dot_dimension_numbers<[1], [0], [0], [1], [0, 0, 1, 1], [], []>} : vector<32x128xbf16>, vector<128x384xbf16>, vector<32x384xf32> -> vector<32x384xf32>
    %c0_241 = arith.constant 0 : index
    %c1_242 = arith.constant 1 : index
    %c0_243 = arith.constant 0 : index
    %c0_244 = arith.constant 0 : index
    %597 = vector.load %arg14[%c0_241, %c1_242, %c0_243, %c0_244] : memref<1x2x1x384xf32, #tpu.memory_space<vmem>>, vector<1x1x1x384xf32>
    %598 = vector.shape_cast %597 : vector<1x1x1x384xf32> to vector<1x384xf32>
    %599 = vector.broadcast %598 : vector<1x384xf32> to vector<32x384xf32>
    %600 = arith.addf %596, %599 : vector<32x384xf32>
    %cst_245 = arith.constant 5.000000e-01 : f32
    %601 = vector.broadcast %cst_245 : f32 to vector<32x384xf32>
    %602 = arith.mulf %601, %600 : vector<32x384xf32>
    %cst_246 = arith.constant 4.471500e-02 : f32
    %603 = vector.broadcast %cst_246 : f32 to vector<32x384xf32>
    %604 = arith.mulf %603, %600 : vector<32x384xf32>
    %605 = arith.mulf %604, %600 : vector<32x384xf32>
    %606 = arith.mulf %605, %600 : vector<32x384xf32>
    %607 = arith.addf %600, %606 : vector<32x384xf32>
    %cst_247 = arith.constant 0.797884583 : f32
    %608 = vector.broadcast %cst_247 : f32 to vector<32x384xf32>
    %609 = arith.mulf %608, %607 : vector<32x384xf32>
    %610 = math.tanh %609 : vector<32x384xf32>
    %cst_248 = arith.constant 1.000000e+00 : f32
    %611 = vector.broadcast %cst_248 : f32 to vector<32x384xf32>
    %612 = arith.addf %611, %610 : vector<32x384xf32>
    %613 = arith.mulf %602, %612 : vector<32x384xf32>
    %614 = arith.truncf %613 : vector<32x384xf32> to vector<32x384xbf16>
    %c0_249 = arith.constant 0 : index
    %c1_250 = arith.constant 1 : index
    %c0_251 = arith.constant 0 : index
    %c0_252 = arith.constant 0 : index
    %615 = vector.load %arg15[%c0_249, %c1_250, %c0_251, %c0_252] : memref<1x2x384x128xbf16, #tpu.memory_space<vmem>>, vector<1x1x384x128xbf16>
    %616 = vector.shape_cast %615 : vector<1x1x384x128xbf16> to vector<384x128xbf16>
    %cst_253 = arith.constant dense<0.000000e+00> : vector<32x128xf32>
    %617 = tpu.matmul %614, %616, %cst_253 {dimension_numbers = #tpu.dot_dimension_numbers<[1], [0], [0], [1], [0, 0, 1, 1], [], []>} : vector<32x384xbf16>, vector<384x128xbf16>, vector<32x128xf32> -> vector<32x128xf32>
    %c0_254 = arith.constant 0 : index
    %c1_255 = arith.constant 1 : index
    %c0_256 = arith.constant 0 : index
    %c0_257 = arith.constant 0 : index
    %618 = vector.load %arg16[%c0_254, %c1_255, %c0_256, %c0_257] : memref<1x2x1x128xf32, #tpu.memory_space<vmem>>, vector<1x1x1x128xf32>
    %619 = vector.shape_cast %618 : vector<1x1x1x128xf32> to vector<1x128xf32>
    %620 = vector.broadcast %619 : vector<1x128xf32> to vector<32x128xf32>
    %621 = arith.addf %617, %620 : vector<32x128xf32>
    %622 = arith.addf %510, %621 : vector<32x128xf32>
    %c0_258 = arith.constant 0 : index
    %c0_259 = arith.constant 0 : index
    %623 = vector.load %arg21[%c0_258, %c0_259] : memref<32x128xf32, #tpu.memory_space<vmem>>, vector<32x128xf32>
    tpu.vector_store %arg21[%c0_258, %c0_259], %566 {strides = array<i32>} : memref<32x128xf32, #tpu.memory_space<vmem>>, vector<32x128xf32>,
    %c0_260 = arith.constant 0 : index
    %c0_261 = arith.constant 0 : index
    %624 = vector.load %arg22[%c0_260, %c0_261] : memref<32x128xf32, #tpu.memory_space<vmem>>, vector<32x128xf32>
    tpu.vector_store %arg22[%c0_260, %c0_261], %622 {strides = array<i32>} : memref<32x128xf32, #tpu.memory_space<vmem>>, vector<32x128xf32>,
    %c1_i32 = arith.constant 1 : i32
    %625 = arith.cmpi eq, %arg1, %c1_i32 : i32
    %626 = arith.extui %625 : i1 to i32
    %c0_i32_262 = arith.constant 0 : i32
    %627 = arith.cmpi ne, %626, %c0_i32_262 : i32
    scf.if %627 {
      %c0_263 = arith.constant 0 : index
      %c0_264 = arith.constant 0 : index
      %c0_265 = arith.constant 0 : index
      %628 = vector.load %arg17[%c0_263, %c0_264, %c0_265] : memref<2x1x128xf32, #tpu.memory_space<vmem>>, vector<1x1x128xf32>
      %629 = vector.shape_cast %628 : vector<1x1x128xf32> to vector<1x128xf32>
      %c0_266 = arith.constant 0 : index
      %c0_267 = arith.constant 0 : index
      %c0_268 = arith.constant 0 : index
      %630 = vector.load %arg18[%c0_266, %c0_267, %c0_268] : memref<2x1x128xf32, #tpu.memory_space<vmem>>, vector<1x1x128xf32>
      %631 = vector.shape_cast %630 : vector<1x1x128xf32> to vector<1x128xf32>
      %cst_269 = arith.constant dense<0.000000e+00> : vector<32xf32>
      %632 = vector.multi_reduction <add>, %566, %cst_269 [1] : vector<32x128xf32> to vector<32xf32>
      %633 = vector.shape_cast %632 : vector<32xf32> to vector<32x1xf32>
      %cst_270 = arith.constant 1.280000e+02 : f32
      %634 = vector.broadcast %cst_270 : f32 to vector<32x1xf32>
      %635 = arith.divf %633, %634 : vector<32x1xf32>
      %636 = vector.broadcast %635 : vector<32x1xf32> to vector<32x128xf32>
      %637 = arith.subf %566, %636 : vector<32x128xf32>
      %638 = arith.mulf %637, %637 : vector<32x128xf32>
      %cst_271 = arith.constant dense<0.000000e+00> : vector<32xf32>
      %639 = vector.multi_reduction <add>, %638, %cst_271 [1] : vector<32x128xf32> to vector<32xf32>
      %640 = vector.shape_cast %639 : vector<32xf32> to vector<32x1xf32>
      %cst_272 = arith.constant 1.280000e+02 : f32
      %641 = vector.broadcast %cst_272 : f32 to vector<32x1xf32>
      %642 = arith.divf %640, %641 : vector<32x1xf32>
      %cst_273 = arith.constant 9.99999974E-6 : f32
      %643 = vector.broadcast %cst_273 : f32 to vector<32x1xf32>
      %644 = arith.addf %642, %643 : vector<32x1xf32>
      %645 = math.rsqrt %644 : vector<32x1xf32>
      %646 = vector.broadcast %645 : vector<32x1xf32> to vector<32x128xf32>
      %647 = arith.mulf %637, %646 : vector<32x128xf32>
      %648 = vector.broadcast %629 : vector<1x128xf32> to vector<32x128xf32>
      %649 = arith.mulf %647, %648 : vector<32x128xf32>
      %650 = vector.broadcast %631 : vector<1x128xf32> to vector<32x128xf32>
      %651 = arith.addf %649, %650 : vector<32x128xf32>
      %652 = vector.shape_cast %651 : vector<32x128xf32> to vector<2x16x128xf32>
      %c0_274 = arith.constant 0 : index
      %c0_275 = arith.constant 0 : index
      %c0_276 = arith.constant 0 : index
      %653 = vector.load %arg19[%c0_274, %c0_275, %c0_276] : memref<2x16x128xf32, #tpu.memory_space<vmem>>, vector<2x16x128xf32>
      tpu.vector_store %arg19[%c0_274, %c0_275, %c0_276], %652 {strides = array<i32>} : memref<2x16x128xf32, #tpu.memory_space<vmem>>, vector<2x16x128xf32>,
      %c1_277 = arith.constant 1 : index
      %c0_278 = arith.constant 0 : index
      %c0_279 = arith.constant 0 : index
      %654 = vector.load %arg17[%c1_277, %c0_278, %c0_279] : memref<2x1x128xf32, #tpu.memory_space<vmem>>, vector<1x1x128xf32>
      %655 = vector.shape_cast %654 : vector<1x1x128xf32> to vector<1x128xf32>
      %c1_280 = arith.constant 1 : index
      %c0_281 = arith.constant 0 : index
      %c0_282 = arith.constant 0 : index
      %656 = vector.load %arg18[%c1_280, %c0_281, %c0_282] : memref<2x1x128xf32, #tpu.memory_space<vmem>>, vector<1x1x128xf32>
      %657 = vector.shape_cast %656 : vector<1x1x128xf32> to vector<1x128xf32>
      %cst_283 = arith.constant dense<0.000000e+00> : vector<32xf32>
      %658 = vector.multi_reduction <add>, %622, %cst_283 [1] : vector<32x128xf32> to vector<32xf32>
      %659 = vector.shape_cast %658 : vector<32xf32> to vector<32x1xf32>
      %cst_284 = arith.constant 1.280000e+02 : f32
      %660 = vector.broadcast %cst_284 : f32 to vector<32x1xf32>
      %661 = arith.divf %659, %660 : vector<32x1xf32>
      %662 = vector.broadcast %661 : vector<32x1xf32> to vector<32x128xf32>
      %663 = arith.subf %622, %662 : vector<32x128xf32>
      %664 = arith.mulf %663, %663 : vector<32x128xf32>
      %cst_285 = arith.constant dense<0.000000e+00> : vector<32xf32>
      %665 = vector.multi_reduction <add>, %664, %cst_285 [1] : vector<32x128xf32> to vector<32xf32>
      %666 = vector.shape_cast %665 : vector<32xf32> to vector<32x1xf32>
      %cst_286 = arith.constant 1.280000e+02 : f32
      %667 = vector.broadcast %cst_286 : f32 to vector<32x1xf32>
      %668 = arith.divf %666, %667 : vector<32x1xf32>
      %cst_287 = arith.constant 9.99999974E-6 : f32
      %669 = vector.broadcast %cst_287 : f32 to vector<32x1xf32>
      %670 = arith.addf %668, %669 : vector<32x1xf32>
      %671 = math.rsqrt %670 : vector<32x1xf32>
      %672 = vector.broadcast %671 : vector<32x1xf32> to vector<32x128xf32>
      %673 = arith.mulf %663, %672 : vector<32x128xf32>
      %674 = vector.broadcast %655 : vector<1x128xf32> to vector<32x128xf32>
      %675 = arith.mulf %673, %674 : vector<32x128xf32>
      %676 = vector.broadcast %657 : vector<1x128xf32> to vector<32x128xf32>
      %677 = arith.addf %675, %676 : vector<32x128xf32>
      %678 = vector.shape_cast %677 : vector<32x128xf32> to vector<2x16x128xf32>
      %c0_288 = arith.constant 0 : index
      %c0_289 = arith.constant 0 : index
      %c0_290 = arith.constant 0 : index
      %679 = vector.load %arg20[%c0_288, %c0_289, %c0_290] : memref<2x16x128xf32, #tpu.memory_space<vmem>>, vector<2x16x128xf32>
      tpu.vector_store %arg20[%c0_288, %c0_289, %c0_290], %678 {strides = array<i32>} : memref<2x16x128xf32, #tpu.memory_space<vmem>>, vector<2x16x128xf32>,
    } else {
    }
    return
  }
  func.func @transform_0(%arg0: i32, %arg1: i32) -> (i32, i32, i32) {
    %c0_i32 = arith.constant 0 : i32
    %c0_i32_0 = arith.constant 0 : i32
    %c0_i32_1 = arith.constant 0 : i32
    return %arg0, %c0_i32, %c0_i32_0 : i32, i32, i32
  }
  func.func @transform_1(%arg0: i32, %arg1: i32) -> (i32, i32, i32) {
    %c0_i32 = arith.constant 0 : i32
    %c0_i32_0 = arith.constant 0 : i32
    %c0_i32_1 = arith.constant 0 : i32
    return %arg0, %c0_i32, %c0_i32_0 : i32, i32, i32
  }
  func.func @transform_2(%arg0: i32, %arg1: i32) -> (i32, i32, i32, i32) {
    %c0_i32 = arith.constant 0 : i32
    %c0_i32_0 = arith.constant 0 : i32
    %c0_i32_1 = arith.constant 0 : i32
    %c0_i32_2 = arith.constant 0 : i32
    return %arg1, %c0_i32, %c0_i32_0, %c0_i32_1 : i32, i32, i32, i32
  }
  func.func @transform_3(%arg0: i32, %arg1: i32) -> (i32, i32, i32, i32) {
    %c0_i32 = arith.constant 0 : i32
    %c0_i32_0 = arith.constant 0 : i32
    %c0_i32_1 = arith.constant 0 : i32
    %c0_i32_2 = arith.constant 0 : i32
    return %arg1, %c0_i32, %c0_i32_0, %c0_i32_1 : i32, i32, i32, i32
  }
  func.func @transform_4(%arg0: i32, %arg1: i32) -> (i32, i32, i32, i32) {
    %c0_i32 = arith.constant 0 : i32
    %c0_i32_0 = arith.constant 0 : i32
    %c0_i32_1 = arith.constant 0 : i32
    %c0_i32_2 = arith.constant 0 : i32
    return %arg1, %c0_i32, %c0_i32_0, %c0_i32_1 : i32, i32, i32, i32
  }
  func.func @transform_5(%arg0: i32, %arg1: i32) -> (i32, i32, i32, i32) {
    %c0_i32 = arith.constant 0 : i32
    %c0_i32_0 = arith.constant 0 : i32
    %c0_i32_1 = arith.constant 0 : i32
    %c0_i32_2 = arith.constant 0 : i32
    return %arg1, %c0_i32, %c0_i32_0, %c0_i32_1 : i32, i32, i32, i32
  }
  func.func @transform_6(%arg0: i32, %arg1: i32) -> (i32, i32, i32, i32) {
    %c0_i32 = arith.constant 0 : i32
    %c0_i32_0 = arith.constant 0 : i32
    %c0_i32_1 = arith.constant 0 : i32
    %c0_i32_2 = arith.constant 0 : i32
    return %arg1, %c0_i32, %c0_i32_0, %c0_i32_1 : i32, i32, i32, i32
  }
  func.func @transform_7(%arg0: i32, %arg1: i32) -> (i32, i32, i32, i32) {
    %c0_i32 = arith.constant 0 : i32
    %c0_i32_0 = arith.constant 0 : i32
    %c0_i32_1 = arith.constant 0 : i32
    %c0_i32_2 = arith.constant 0 : i32
    return %arg1, %c0_i32, %c0_i32_0, %c0_i32_1 : i32, i32, i32, i32
  }
  func.func @transform_8(%arg0: i32, %arg1: i32) -> (i32, i32, i32, i32) {
    %c0_i32 = arith.constant 0 : i32
    %c0_i32_0 = arith.constant 0 : i32
    %c0_i32_1 = arith.constant 0 : i32
    %c0_i32_2 = arith.constant 0 : i32
    return %arg1, %c0_i32, %c0_i32_0, %c0_i32_1 : i32, i32, i32, i32
  }
  func.func @transform_9(%arg0: i32, %arg1: i32) -> (i32, i32, i32, i32) {
    %c0_i32 = arith.constant 0 : i32
    %c0_i32_0 = arith.constant 0 : i32
    %c0_i32_1 = arith.constant 0 : i32
    %c0_i32_2 = arith.constant 0 : i32
    return %arg1, %c0_i32, %c0_i32_0, %c0_i32_1 : i32, i32, i32, i32
  }
  func.func @transform_10(%arg0: i32, %arg1: i32) -> (i32, i32, i32, i32) {
    %c0_i32 = arith.constant 0 : i32
    %c0_i32_0 = arith.constant 0 : i32
    %c0_i32_1 = arith.constant 0 : i32
    %c0_i32_2 = arith.constant 0 : i32
    return %arg1, %c0_i32, %c0_i32_0, %c0_i32_1 : i32, i32, i32, i32
  }
  func.func @transform_11(%arg0: i32, %arg1: i32) -> (i32, i32, i32, i32) {
    %c0_i32 = arith.constant 0 : i32
    %c0_i32_0 = arith.constant 0 : i32
    %c0_i32_1 = arith.constant 0 : i32
    %c0_i32_2 = arith.constant 0 : i32
    return %arg1, %c0_i32, %c0_i32_0, %c0_i32_1 : i32, i32, i32, i32
  }
  func.func @transform_12(%arg0: i32, %arg1: i32) -> (i32, i32, i32, i32) {
    %c0_i32 = arith.constant 0 : i32
    %c0_i32_0 = arith.constant 0 : i32
    %c0_i32_1 = arith.constant 0 : i32
    %c0_i32_2 = arith.constant 0 : i32
    return %arg1, %c0_i32, %c0_i32_0, %c0_i32_1 : i32, i32, i32, i32
  }
  func.func @transform_13(%arg0: i32, %arg1: i32) -> (i32, i32, i32, i32) {
    %c0_i32 = arith.constant 0 : i32
    %c0_i32_0 = arith.constant 0 : i32
    %c0_i32_1 = arith.constant 0 : i32
    %c0_i32_2 = arith.constant 0 : i32
    return %arg1, %c0_i32, %c0_i32_0, %c0_i32_1 : i32, i32, i32, i32
  }
  func.func @transform_14(%arg0: i32, %arg1: i32) -> (i32, i32, i32, i32) {
    %c0_i32 = arith.constant 0 : i32
    %c0_i32_0 = arith.constant 0 : i32
    %c0_i32_1 = arith.constant 0 : i32
    %c0_i32_2 = arith.constant 0 : i32
    return %arg1, %c0_i32, %c0_i32_0, %c0_i32_1 : i32, i32, i32, i32
  }
  func.func @transform_15(%arg0: i32, %arg1: i32) -> (i32, i32, i32) {
    %c0_i32 = arith.constant 0 : i32
    %c0_i32_0 = arith.constant 0 : i32
    %c0_i32_1 = arith.constant 0 : i32
    %c0_i32_2 = arith.constant 0 : i32
    return %c0_i32, %c0_i32_0, %c0_i32_1 : i32, i32, i32
  }
  func.func @transform_16(%arg0: i32, %arg1: i32) -> (i32, i32, i32) {
    %c0_i32 = arith.constant 0 : i32
    %c0_i32_0 = arith.constant 0 : i32
    %c0_i32_1 = arith.constant 0 : i32
    %c0_i32_2 = arith.constant 0 : i32
    return %c0_i32, %c0_i32_0, %c0_i32_1 : i32, i32, i32
  }
  func.func @transform_17(%arg0: i32, %arg1: i32) -> (i32, i32, i32) {
    %c0_i32 = arith.constant 0 : i32
    %c0_i32_0 = arith.constant 0 : i32
    %c0_i32_1 = arith.constant 0 : i32
    return %arg0, %c0_i32, %c0_i32_0 : i32, i32, i32
  }
  func.func @transform_18(%arg0: i32, %arg1: i32) -> (i32, i32, i32) {
    %c0_i32 = arith.constant 0 : i32
    %c0_i32_0 = arith.constant 0 : i32
    %c0_i32_1 = arith.constant 0 : i32
    return %arg0, %c0_i32, %c0_i32_0 : i32, i32, i32
  }
}

</mosaic_0001>

<bundles_post_ra>
// kernel: tpu_custom_call.1
= control target key start
LH: loop header
LB: loop body
LE: loop exit
PB: predicated region body
PF: predicated region fallthrough
CT: control target
= control target key end

     0   :  { %s14723_s0 = inlined_call_operand.hbm [shape: f32[2,16,128], index: 0, kind: input, shape index: {}]   ;;  %s14724_s1 = inlined_call_operand.hbm [shape: f32[2,16,128], index: 1, kind: input, shape index: {}]   ;;  %s14725_s2 = inlined_call_operand.hbm [shape: f32[2,2,3,128], index: 2, kind: input, shape index: {}]   ;;  %s14726_s3 = inlined_call_operand.hbm [shape: f32[2,2,3,128], index: 3, kind: input, shape index: {}]   ;;  %s14727_s4 = inlined_call_operand.hbm [shape: bf16[2,2,128,128], index: 4, kind: input, shape index: {}]   ;;  %s14728_s5 = inlined_call_operand.hbm [shape: bf16[2,2,128,256], index: 5, kind: input, shape index: {}]   ;;  %s14729_s6 = inlined_call_operand.hbm [shape: bf16[2,2,128,128], index: 6, kind: input, shape index: {}]   ;;  %s14730_s7 = inlined_call_operand.hbm [shape: f32[2,2,1,128], index: 7, kind: input, shape index: {}]   ;;  %s14731_s8 = inlined_call_operand.hbm [shape: bf16[2,2,128,384], index: 8, kind: input, shape index: {}]   ;;  %s14732_s9 = inlined_call_operand.hbm [shape: bf16[2,2,128,128], index: 9, kind: input, shape index: {}]   ;;  %s14733_s10 = inlined_call_operand.hbm [shape: f32[2,2,1,128], index: 10, kind: input, shape index: {}]   ;;  %s14734_s11 = inlined_call_operand.hbm [shape: bf16[2,2,128,384], index: 11, kind: input, shape index: {}]   ;;  %s14735_s12 = inlined_call_operand.hbm [shape: f32[2,2,1,384], index: 12, kind: input, shape index: {}]   ;;  %s14736_s13 = inlined_call_operand.hbm [shape: bf16[2,2,384,128], index: 13, kind: input, shape index: {}]   ;;  %s14737_s14 = inlined_call_operand.hbm [shape: f32[2,2,1,128], index: 14, kind: input, shape index: {}]   ;;  %s14738_s15 = inlined_call_operand.hbm [shape: f32[2,1,128], index: 15, kind: input, shape index: {}]   ;;  %s14739_s16 = inlined_call_operand.hbm [shape: f32[2,1,128], index: 16, kind: input, shape index: {}]   ;;  %s14740_s17 = inlined_call_operand.hbm [shape: f32[2,16,128], index: 17, kind: output, shape index: {0}]   ;;  %s14741_s18 = inlined_call_operand.hbm [shape: f32[2,16,128], index: 18, kind: output, shape index: {1}]  }
   0x1   :  { %14775 = sst [smem:[#allocation42_spill]] %s14723_s0 }
   0x2   :  { %14776 = sst [smem:[#allocation43_spill]] %s14724_s1 }
   0x3   :  { %14777 = sst [smem:[#allocation44_spill]] %s14725_s2 }
   0x4   :  { %14778 = sst [smem:[#allocation45_spill]] %s14726_s3 }
   0x5   :  { %14779 = sst [smem:[#allocation46_spill]] %s14727_s4 }
   0x6   :  { %14780 = sst [smem:[#allocation47_spill]] %s14728_s5 }
   0x7   :  { %14781 = sst [smem:[#allocation48_spill]] %s14729_s6 }
   0x8   :  { %14782 = sst [smem:[#allocation49_spill]] %s14730_s7 }
   0x9   :  { %14783 = sst [smem:[#allocation50_spill]] %s14731_s8 }
   0xa   :  { %14784 = sst [smem:[#allocation51_spill]] %s14732_s9 }
   0xb   :  { %14785 = sst [smem:[#allocation52_spill]] %s14733_s10 }
   0xc   :  { %14786 = sst [smem:[#allocation53_spill]] %s14734_s11 }
   0xd   :  { %14787 = sst [smem:[#allocation54_spill]] %s14735_s12 }
   0xe   :  { %14788 = sst [smem:[#allocation55_spill]] %s14736_s13 }
   0xf   :  { %14789 = sst [smem:[#allocation56_spill]] %s14737_s14 }
  0x10   :  { %14790 = sst [smem:[#allocation57_spill]] %s14740_s17 }
  0x11   :  { %14791 = sst [smem:[#allocation58_spill]] %s14741_s18 }
  0x12   :  { %24 = vsyncpa [#allocation5], 0 }
  0x13   :  { %25 = vsyncpa [#allocation8], 0 }
  0x14   :  { %26 = vsyncpa [#allocation24], 0 }
  0x15   :  { %27 = vsyncpa [#allocation6], 0 }
  0x16   :  { %28 = vsyncpa [#allocation27], 0  ;;  %s12306_s27 = smov 0   ;;  %s12308_s28 = smov 0  }
  0x17   :  { %s12310_s29 = smov 0   ;;  %s12312_s30 = smov 0  }
  0x18   :  { %s12314_s0 = smov 0   ;;  %s12316_s19 = smov 0  }
  0x19 LB: > { %14792 = sst [smem:[#allocation35_spill]] %s12152_s28  ;;  %s12335_s1 = sadd.s32 4294967295, %s12168_s19   ;;  %s12168_s19 = sphi %s12316_s19, %s34_s19   ;;  %s12164_s0 = sphi %s12314_s0, %s14852_s0   ;;  %s12160_s30 = sphi %s12312_s30, %s14851_s30   ;;  %s12156_s29 = sphi %s12310_s29, %s14850_s29   ;;  %s12152_s28 = sphi %s12308_s28, %s14849_s28   ;;  %s12148_s27 = sphi %s12306_s27, %s14846_s27  }
  0x1a   : > { %14793 = sst [smem:[#allocation36_spill]] %s12160_s30  ;;  %s43_s20 = sadd.s32 1, %s12164_s0 }
  0x1b   : > { %14794 = sst [smem:[#allocation37_spill]] %s12335_s1  ;;  %p44_p0 = scmp.ge.s32.totalorder %s43_s20, 2 }
  0x1c   : > { %s105_s21 = sadd.s32 1, %s12156_s29  ;;  %p112_p1 = scmp.ne.s32.totalorder %s12156_s29, %s12152_s28 }
  0x1d   : > { %p113_p2 = scmp.eq.s32.totalorder %s12168_s19, 0  ;;  %s14854_s20 = smov (%p44_p0, %s43_s20), 0 }
  0x1e   : > { %14795 = sst [smem:[#allocation38_spill]] %s14854_s20  ;;  %p118_p4 = scmp.ne.s32.totalorder %s12152_s28, %s12148_s27 }
  0x1f   : > { %p12344_p3 = por %p113_p2, %p112_p1  ;;  %s102_s2 = ssub.s32 %s12164_s0, %s14854_s20 }
  0x20   : > { %p14755_p5 = scmp.eq.s32.totalorder %s12335_s1, 0  ;;  %p103_p6 = scmp.eq.s32.totalorder %s102_s2, 0 }
  0x21   : > { %s14796_s22 = scalar_select %p12344_p3, 1, 0 }
  0x22   : > { %p9157_p7 = scmp.ge.s32.totalorder %s12168_s19, 1  ;;  %p12355_p8 = por %p14755_p5, %p118_p4 }
  0x23   : > { %p535_p9 = scmp.lt.s32.totalorder %s12168_s19, 3  ;;  %s12170_s26 = smov [#allocation7]  }
  0x24   : > { %s14797_s23 = scalar_select %p12355_p8, 1, 0 }
  0x25   : > { %s12361_s24 = scalar_select %p103_p6, %s12156_s29, %s105_s21  }
  0x26   : > { %14798 = sst [smem:[#allocation39_spill]] %s14797_s23  ;;  %p12363_p10 = pnand %p9157_p7, %p535_p9 }
  0x27   : > { %14799 = sst [smem:[#allocation40_spill]] %s12361_s24  ;;  %s568_s27 = sshll.u32 %s12170_s26, 4  ;;  %s569_s27 = int_to_ptr.vmem [resolvable:$true] %s568_s27 }
  0x28   : > { %s14800_s25 = scalar_select %p12363_p10, 1, 0 }
  0x29   : > { %p10697_p11 = pneg %p12363_p10  ;;  %s12171_s20 = smov [#allocation4]  }
  0x2a   : > { %14801 = sst [smem:[#allocation41_spill]] %s14800_s25  ;;  %s551_s18 = sshll.u32 %s12171_s20, 4  ;;  %s552_s18 = int_to_ptr.vmem [resolvable:$true] %s551_s18 }
  0x2b   : > { %p12371_p12 = pnand %p10697_p11, %p14755_p5  ;;  %s14803_s17 = sld [smem:[#allocation43_spill]] }
  0x2d   : > { %p12383_p0 = pneg %p12371_p12 }
  0x31   : > { %s11566_s30 = scalar_lea.hbm %s14803_s17, 512 }
  0x32   : > { %p11567_p13 = scmp.ne.s32.totalorder %s14803_s17, %s11566_s30  ;;  %p11573_p4 = scmp.lt.u32.totalorder %s11566_s30, %s14803_s17 }
  0x34   : > { %p11569_p1 = pnand %p12383_p0, %p11567_p13 }
  0x36   : > { %p11570_p2 = pneg %p11569_p1 }
  0x38   : > { %p11575_p6 = pnand %p11573_p4, %p11570_p2 }
  0x3a   : > { %11578 = shalt.err (!%p11575_p6)
}
  0x3b   : > { %s11579_s20 = scalar_lea.vmem %s569_s27, 512  ;;  %p11587_p5 = scmp.lt.s32.totalorder %s569_s27, %s569_s27 }
  0x3c   : > { %p11580_p7 = scmp.ne.s32.totalorder %s569_s27, %s11579_s20  ;;  %p11588_p8 = scmp.lt.s32.totalorder %s11579_s20, %s11579_s20 }
  0x3e   : > { %p11582_p9 = pnand %p11580_p7, %p12383_p0  ;;  %p11589_p10 = por %p11588_p8, %p11587_p5 }
  0x40   : > { %p11583_p11 = pneg %p11582_p9 }
  0x42   : > { %p11590_p3 = pnand %p11589_p10, %p11583_p11 }
  0x44   : > { %11593 = shalt.err (!%p11590_p3)
}
  0x45   : > { %s12172_s28 = smov 128   ;;  %s12173_s23 = smov 8  }
  0x46   : > { %10703 = dma.hbm_to_vmem [thread:$0]  (!%p12371_p12), %s14803_s17, 512, %s569_s27, [#allocation8], %s12172_s28, %s12172_s28, %s12173_s23  }
  0x47   : > { %s14805_s21 = sld [smem:[#allocation42_spill]] }
  0x4d   : > { %s11594_s14 = scalar_lea.hbm %s14805_s21, 512 }
  0x4e   : > { %p11595_p5 = scmp.ne.s32.totalorder %s14805_s21, %s11594_s14  ;;  %p11601_p10 = scmp.lt.u32.totalorder %s11594_s14, %s14805_s21 }
  0x50   : > { %p11597_p3 = pnand %p11595_p5, %p12383_p0 }
  0x52   : > { %p11598_p8 = pneg %p11597_p3 }
  0x54   : > { %p11603_p13 = pnand %p11601_p10, %p11598_p8 }
  0x56   : > { %11606 = shalt.err (!%p11603_p13)
}
  0x57   : > { %s11607_s1 = scalar_lea.vmem %s552_s18, 512  ;;  %p11615_p6 = scmp.lt.s32.totalorder %s552_s18, %s552_s18 }
  0x58   : > { %p11608_p1 = scmp.ne.s32.totalorder %s552_s18, %s11607_s1  ;;  %p11616_p7 = scmp.lt.s32.totalorder %s11607_s1, %s11607_s1 }
  0x5a   : > { %p11610_p2 = pnand %p11608_p1, %p12383_p0  ;;  %p11617_p9 = por %p11616_p7, %p11615_p6 }
  0x5c   : > { %p11611_p4 = pneg %p11610_p2 }
  0x5e   : > { %p11618_p11 = pnand %p11617_p9, %p11611_p4 }
  0x60   : > { %11621 = shalt.err (!%p11618_p11)
}
  0x61   : > { %10700 = dma.hbm_to_vmem [thread:$0]  (!%p12371_p12), %s14805_s21, 512, %s552_s18, [#allocation5], %s12172_s28, %s12172_s28, %s12173_s23  }
  0x62   : > { %s12174_s11 = smov [#allocation22]   ;;  %s11622_s24 = scalar_lea.hbm %s14738_s15, 32 }
  0x63   : > { %s581_s14 = sshll.u32 %s12174_s11, 4  ;;  %p11623_p5 = scmp.ne.s32.totalorder %s14738_s15, %s11622_s24  ;;  %s582_s14 = int_to_ptr.vmem [resolvable:$true] %s581_s14 }
  0x64   : > { %p11629_p10 = scmp.lt.u32.totalorder %s11622_s24, %s14738_s15 }
  0x65   : > { %p11625_p3 = pnand %p11623_p5, %p12383_p0 }
  0x67   : > { %p11626_p8 = pneg %p11625_p3 }
  0x69   : > { %p11631_p13 = pnand %p11629_p10, %p11626_p8 }
  0x6b   : > { %11634 = shalt.err (!%p11631_p13)
}
  0x6c   : > { %s11635_s18 = scalar_lea.vmem %s582_s14, 32  ;;  %p11643_p6 = scmp.lt.s32.totalorder %s582_s14, %s582_s14 }
  0x6d   : > { %p11636_p1 = scmp.ne.s32.totalorder %s582_s14, %s11635_s18  ;;  %p11644_p7 = scmp.lt.s32.totalorder %s11635_s18, %s11635_s18 }
  0x6f   : > { %p11638_p2 = pnand %p11636_p1, %p12383_p0  ;;  %p11645_p9 = por %p11644_p7, %p11643_p6 }
  0x71   : > { %p11639_p4 = pneg %p11638_p2 }
  0x73   : > { %p11646_p11 = pnand %p11645_p9, %p11639_p4 }
  0x75   : > { %11649 = shalt.err (!%p11646_p11)
}
  0x76   : > { %s12175_s28 = smov 16   ;;  %s12176_s23 = smov 1  }
  0x77   : > { %10706 = dma.hbm_to_vmem [thread:$0]  (!%p12371_p12), %s14738_s15, 32, %s582_s14, [#allocation8], %s12175_s28, %s12175_s28, %s12176_s23  }
  0x78   : > { %s12177_s13 = smov [#allocation23]   ;;  %s11650_s24 = scalar_lea.hbm %s14739_s16, 32 }
  0x79   : > { %s594_s11 = sshll.u32 %s12177_s13, 4  ;;  %p11651_p5 = scmp.ne.s32.totalorder %s14739_s16, %s11650_s24  ;;  %s595_s11 = int_to_ptr.vmem [resolvable:$true] %s594_s11 }
  0x7a   : > { %p11657_p10 = scmp.lt.u32.totalorder %s11650_s24, %s14739_s16 }
  0x7b   : > { %p11653_p3 = pnand %p11651_p5, %p12383_p0 }
  0x7d   : > { %p11654_p8 = pneg %p11653_p3 }
  0x7f   : > { %p11659_p13 = pnand %p11657_p10, %p11654_p8 }
  0x81   : > { %11662 = shalt.err (!%p11659_p13)
}
  0x82   : > { %s11663_s14 = scalar_lea.vmem %s595_s11, 32  ;;  %p11671_p6 = scmp.lt.s32.totalorder %s595_s11, %s595_s11 }
  0x83   : > { %p11664_p1 = scmp.ne.s32.totalorder %s595_s11, %s11663_s14  ;;  %p11672_p7 = scmp.lt.s32.totalorder %s11663_s14, %s11663_s14 }
  0x85   : > { %p11666_p2 = pnand %p11664_p1, %p12383_p0  ;;  %p11673_p9 = por %p11672_p7, %p11671_p6 }
  0x87   : > { %p11667_p4 = pneg %p11666_p2 }
  0x89   : > { %p11674_p11 = pnand %p11673_p9, %p11667_p4 }
  0x8b   : > { %11677 = shalt.err (!%p11674_p11)
}
  0x8c   : > { %10709 = dma.hbm_to_vmem [thread:$0]  (!%p12371_p12), %s14739_s16, 32, %s595_s11, [#allocation24], %s12175_s28, %s12175_s28, %s12176_s23  }
  0x8d   : > { %p9162_p5 = scmp.ge.s32.totalorder %s12168_s19, 2 }
  0x8e   : > { %s608_s26 = sand.u32 (!%p9162_p5), 1, %s12168_s19   ;;  %s12456_s13 = sand.u32 (!%p9162_p5), 1, %s12156_s29  }
  0x8f   : > { %604 = sbr.rel (%p9162_p5) target bundleno = 520 (0x208), region = 32  ;;  %s9163_s27 = sshll.u32 (!%p9162_p5), %s12456_s13, 3 }
  0x90   : > { %s9700_s30 = sshll.u32 (!%p9162_p5), %s12164_s0, 7  ;;  %s14806_s25 = sld [smem:[#allocation44_spill]] (!%p9162_p5) }
  0x91   : > { %s612_s23 = scalar_lea.vmem (!%p9162_p5), [#allocation9], %s9163_s27  ;;  %s12471_s20 = scalar_lea.sflag (!%p9162_p5), [#allocation5], %s608_s26 }
  0x92   : > { %s619_s11 = sshll.u32 (!%p9162_p5), %s612_s23, 4  ;;  %p14807_p0 = scmp.ne.s32.totalorder (!%p9162_p5), %s14796_s22, 0  ;;  %s12469_s11 = int_to_ptr.vmem [resolvable:$true] %s619_s11 }
  0x96   : > { %s12465_s28 = scalar_lea.hbm %s14806_s25, %s9700_s30  ;;  %s11682_s17 = scalar_lea.hbm %s14806_s25, 256 }
  0x97   : > { %s11678_s1 = scalar_lea.hbm %s12465_s28, 128  ;;  %p11683_p10 = scmp.lt.u32.totalorder %s12465_s28, %s14806_s25 }
  0x98   : > { %p11679_p12 = scmp.ne.s32.totalorder %s12465_s28, %s11678_s1  ;;  %p11684_p13 = scmp.lt.u32.totalorder %s11682_s17, %s11678_s1 }
  0x99   : > { %p11686_p2 = scmp.lt.u32.totalorder %s11678_s1, %s12465_s28 }
  0x9a   : > { %p11680_p3 = pnand %p11679_p12, %p14807_p0  ;;  %p11685_p1 = por %p11684_p13, %p11683_p10 }
  0x9c   : > { %p11681_p8 = pneg %p11680_p3  ;;  %p11687_p4 = por %p11686_p2, %p11685_p1 }
  0x9e   : > { %p11688_p6 = pnand %p11687_p4, %p11681_p8 }
  0xa0   : > { %11691 = shalt.err (!%p11688_p6)
}
  0xa1   : > { %s11692_s26 = scalar_lea.vmem %s12469_s11, 128  ;;  %s12178_s24 = smov [#allocation9]  }
  0xa2   : > { %p11693_p7 = scmp.ne.s32.totalorder %s12469_s11, %s11692_s26  ;;  %s11696_s23 = sshll.u32 %s12178_s24, 4  ;;  %s11697_s23 = int_to_ptr.vmem [resolvable:$false] %s11696_s23 }
  0xa3   : > { %s11698_s18 = scalar_lea.vmem %s11697_s23, 256  ;;  %p11699_p5 = scmp.lt.s32.totalorder %s12469_s11, %s11697_s23 }
  0xa4   : > { %p11694_p9 = pnand %p11693_p7, %p14807_p0  ;;  %p11700_p12 = scmp.lt.s32.totalorder %s11698_s18, %s11692_s26 }
  0xa6   : > { %p11695_p11 = pneg %p11694_p9  ;;  %p11701_p3 = por %p11700_p12, %p11699_p5 }
  0xa8   : > { %p11702_p10 = pnand %p11701_p3, %p11695_p11 }
  0xaa   : > { %11705 = shalt.err (!%p11702_p10)
}
  0xab   : > { %s14764_s1 = smov 64   ;;  %s14766_s14 = smov 4  }
  0xac   : > { %10655 = dma.hbm_to_vmem [thread:$0]  (%p14807_p0), %s12465_s28, 128, %s12469_s11, %s12471_s20, %s14764_s1, %s14764_s1, %s14766_s14  }
  0xad   : > { %s14808_s3 = sld [smem:[#allocation45_spill]]  ;;  %s633_s26 = scalar_lea.vmem [#allocation10], %s9163_s27 }
  0xae   : > { %s640_s24 = sshll.u32 %s633_s26, 4  ;;  %s12510_s23 = sshll.u32 %s12456_s13, 7  ;;  %s12507_s24 = int_to_ptr.vmem [resolvable:$true] %s640_s24 }
  0xb3   : > { %s12503_s2 = scalar_lea.hbm %s14808_s3, %s9700_s30  ;;  %s11710_s30 = scalar_lea.hbm %s14808_s3, 256 }
  0xb4   : > { %s11706_s18 = scalar_lea.hbm %s12503_s2, 128  ;;  %p11711_p2 = scmp.lt.u32.totalorder %s12503_s2, %s14808_s3 }
  0xb5   : > { %p11707_p8 = scmp.ne.s32.totalorder %s12503_s2, %s11706_s18  ;;  %p11712_p4 = scmp.lt.u32.totalorder %s11710_s30, %s11706_s18 }
  0xb6   : > { %p11714_p7 = scmp.lt.u32.totalorder %s11706_s18, %s12503_s2 }
  0xb7   : > { %p11708_p13 = pnand %p11707_p8, %p14807_p0  ;;  %p11713_p6 = por %p11712_p4, %p11711_p2 }
  0xb9   : > { %p11709_p1 = pneg %p11708_p13  ;;  %p11715_p9 = por %p11714_p7, %p11713_p6 }
  0xbb   : > { %p11716_p11 = pnand %p11715_p9, %p11709_p1 }
  0xbd   : > { %11719 = shalt.err (!%p11716_p11)
}
  0xbe   : > { %s11720_s27 = scalar_lea.vmem %s12507_s24, 128  ;;  %s12181_s26 = smov [#allocation10]  }
  0xbf   : > { %p11721_p5 = scmp.ne.s32.totalorder %s12507_s24, %s11720_s27  ;;  %s11724_s28 = sshll.u32 %s12181_s26, 4  ;;  %s11725_s28 = int_to_ptr.vmem [resolvable:$false] %s11724_s28 }
  0xc0   : > { %s11726_s11 = scalar_lea.vmem %s11725_s28, 256  ;;  %p11727_p10 = scmp.lt.s32.totalorder %s12507_s24, %s11725_s28 }
  0xc1   : > { %p11722_p12 = pnand %p11721_p5, %p14807_p0  ;;  %p11728_p8 = scmp.lt.s32.totalorder %s11726_s11, %s11720_s27 }
  0xc3   : > { %p11723_p3 = pneg %p11722_p12  ;;  %p11729_p13 = por %p11728_p8, %p11727_p10 }
  0xc5   : > { %p11730_p2 = pnand %p11729_p13, %p11723_p3 }
  0xc7   : > { %11733 = shalt.err (!%p11730_p2)
}
  0xc8   : > { %10656 = dma.hbm_to_vmem [thread:$0]  (%p14807_p0), %s12503_s2, 128, %s12507_s24, %s12471_s20, %s14764_s1, %s14764_s1, %s14766_s14  }
  0xc9   : > { %s12538_s18 = sshll.u32 %s12164_s0, 11  ;;  %s14809_s4 = sld [smem:[#allocation46_spill]] }
  0xca   : > { %s654_s27 = scalar_lea.vmem [#allocation11], %s12510_s23  ;;  %s9172_s28 = sshll.u32 %s12456_s13, 8 }
  0xcb   : > { %s661_s26 = sshll.u32 %s654_s27, 4  ;;  %s12547_s26 = int_to_ptr.vmem [resolvable:$true] %s661_s26 }
  0xcf   : > { %s12544_s12 = scalar_lea.hbm %s14809_s4, %s12538_s18  ;;  %s11738_s30 = scalar_lea.hbm %s14809_s4, 4096 }
  0xd0   : > { %s11734_s11 = scalar_lea.hbm %s12544_s12, 2048  ;;  %p11739_p7 = scmp.lt.u32.totalorder %s12544_s12, %s14809_s4 }
  0xd1   : > { %p11735_p1 = scmp.ne.s32.totalorder %s12544_s12, %s11734_s11  ;;  %p11740_p9 = scmp.lt.u32.totalorder %s11738_s30, %s11734_s11 }
  0xd2   : > { %p11742_p5 = scmp.lt.u32.totalorder %s11734_s11, %s12544_s12 }
  0xd3   : > { %p11736_p4 = pnand %p11735_p1, %p14807_p0  ;;  %p11741_p11 = por %p11740_p9, %p11739_p7 }
  0xd5   : > { %p11737_p6 = pneg %p11736_p4  ;;  %p11743_p12 = por %p11742_p5, %p11741_p11 }
  0xd7   : > { %p11744_p3 = pnand %p11743_p12, %p11737_p6 }
  0xd9   : > { %11747 = shalt.err (!%p11744_p3)
}
  0xda   : > { %s11748_s27 = scalar_lea.vmem %s12547_s26, 2048  ;;  %s12182_s2 = smov [#allocation11]  }
  0xdb   : > { %p11749_p10 = scmp.ne.s32.totalorder %s12547_s26, %s11748_s27  ;;  %s11752_s24 = sshll.u32 %s12182_s2, 4  ;;  %s11753_s24 = int_to_ptr.vmem [resolvable:$false] %s11752_s24 }
  0xdc   : > { %s11754_s1 = scalar_lea.vmem %s11753_s24, 4096  ;;  %p11755_p2 = scmp.lt.s32.totalorder %s12547_s26, %s11753_s24 }
  0xdd   : > { %p11750_p8 = pnand %p11749_p10, %p14807_p0  ;;  %p11756_p1 = scmp.lt.s32.totalorder %s11754_s1, %s11748_s27 }
  0xdf   : > { %p11751_p13 = pneg %p11750_p8  ;;  %p11757_p4 = por %p11756_p1, %p11755_p2 }
  0xe1   : > { %p11758_p7 = pnand %p11757_p4, %p11751_p13 }
  0xe3   : > { %11761 = shalt.err (!%p11758_p7)
}
  0xe4   : > { %s14810_s11 = smov 64   ;;  %s9703_s30 = sshll.u32 %s12164_s0, 12 }
  0xe5   : > { %10657 = dma.hbm_to_vmem [thread:$0]  (%p14807_p0), %s12544_s12, 2048, %s12547_s26, %s12471_s20, %s14810_s11, %s14810_s11, %s14766_s14  }
  0xe6   : > { %s14811_s5 = sld [smem:[#allocation47_spill]]  ;;  %s675_s24 = scalar_lea.vmem [#allocation12], %s9172_s28 }
  0xe7   : > { %s682_s1 = sshll.u32 %s675_s24, 4  ;;  %s12583_s1 = int_to_ptr.vmem [resolvable:$true] %s682_s1 }
  0xec   : > { %s12579_s27 = scalar_lea.hbm %s14811_s5, %s9703_s30  ;;  %s11766_s17 = scalar_lea.hbm %s14811_s5, 8192 }
  0xed   : > { %s11762_s3 = scalar_lea.hbm %s12579_s27, 4096  ;;  %p11767_p5 = scmp.lt.u32.totalorder %s12579_s27, %s14811_s5 }
  0xee   : > { %p11763_p6 = scmp.ne.s32.totalorder %s12579_s27, %s11762_s3  ;;  %p11768_p12 = scmp.lt.u32.totalorder %s11766_s17, %s11762_s3 }
  0xef   : > { %p11770_p10 = scmp.lt.u32.totalorder %s11762_s3, %s12579_s27 }
  0xf0   : > { %p11764_p9 = pnand %p11763_p6, %p14807_p0  ;;  %p11769_p3 = por %p11768_p12, %p11767_p5 }
  0xf2   : > { %p11765_p11 = pneg %p11764_p9  ;;  %p11771_p8 = por %p11770_p10, %p11769_p3 }
  0xf4   : > { %p11772_p13 = pnand %p11771_p8, %p11765_p11 }
  0xf6   : > { %11775 = shalt.err (!%p11772_p13)
}
  0xf7   : > { %s11776_s28 = scalar_lea.vmem %s12583_s1, 4096  ;;  %s12183_s24 = smov [#allocation12]  }
  0xf8   : > { %p11777_p2 = scmp.ne.s32.totalorder %s12583_s1, %s11776_s28  ;;  %s11780_s12 = sshll.u32 %s12183_s24, 4  ;;  %s11781_s12 = int_to_ptr.vmem [resolvable:$false] %s11780_s12 }
  0xf9   : > { %s11782_s26 = scalar_lea.vmem %s11781_s12, 8192  ;;  %p11783_p7 = scmp.lt.s32.totalorder %s12583_s1, %s11781_s12 }
  0xfa   : > { %p11778_p1 = pnand %p11777_p2, %p14807_p0  ;;  %p11784_p6 = scmp.lt.s32.totalorder %s11782_s26, %s11776_s28 }
  0xfc   : > { %p11779_p4 = pneg %p11778_p1  ;;  %p11785_p9 = por %p11784_p6, %p11783_p7 }
  0xfe   : > { %p11786_p5 = pnand %p11785_p9, %p11779_p4 }
 0x100   : > { %11789 = shalt.err (!%p11786_p5)
}
 0x101   : > { %s12184_s3 = smov 128   ;;  %s12185_s17 = smov 8  }
 0x102   : > { %10658 = dma.hbm_to_vmem [thread:$0]  (%p14807_p0), %s12579_s27, 4096, %s12583_s1, %s12471_s20, %s12184_s3, %s12184_s3, %s12185_s17  }
 0x103   : > { %s14812_s6 = sld [smem:[#allocation48_spill]]  ;;  %s696_s28 = scalar_lea.vmem [#allocation13], %s12510_s23 }
 0x104   : > { %s703_s12 = sshll.u32 %s696_s28, 4  ;;  %s12617_s26 = sshll.u32 %s12456_s13, 1  ;;  %s12614_s12 = int_to_ptr.vmem [resolvable:$true] %s703_s12 }
 0x109   : > { %s12611_s24 = scalar_lea.hbm %s14812_s6, %s12538_s18  ;;  %s11794_s3 = scalar_lea.hbm %s14812_s6, 4096 }
 0x10a   : > { %s11790_s14 = scalar_lea.hbm %s12611_s24, 2048  ;;  %p11795_p10 = scmp.lt.u32.totalorder %s12611_s24, %s14812_s6 }
 0x10b   : > { %p11791_p11 = scmp.ne.s32.totalorder %s12611_s24, %s11790_s14  ;;  %p11796_p8 = scmp.lt.u32.totalorder %s11794_s3, %s11790_s14 }
 0x10c   : > { %p11798_p2 = scmp.lt.u32.totalorder %s11790_s14, %s12611_s24 }
 0x10d   : > { %p11792_p12 = pnand %p11791_p11, %p14807_p0  ;;  %p11797_p13 = por %p11796_p8, %p11795_p10 }
 0x10f   : > { %p11793_p3 = pneg %p11792_p12  ;;  %p11799_p1 = por %p11798_p2, %p11797_p13 }
 0x111   : > { %p11800_p4 = pnand %p11799_p1, %p11793_p3 }
 0x113   : > { %11803 = shalt.err (!%p11800_p4)
}
 0x114   : > { %s11804_s2 = scalar_lea.vmem %s12614_s12, 2048  ;;  %s12186_s28 = smov [#allocation13]  }
 0x115   : > { %p11805_p7 = scmp.ne.s32.totalorder %s12614_s12, %s11804_s2  ;;  %s11808_s27 = sshll.u32 %s12186_s28, 4  ;;  %s11809_s27 = int_to_ptr.vmem [resolvable:$false] %s11808_s27 }
 0x116   : > { %s11810_s1 = scalar_lea.vmem %s11809_s27, 4096  ;;  %p11811_p5 = scmp.lt.s32.totalorder %s12614_s12, %s11809_s27 }
 0x117   : > { %p11806_p6 = pnand %p11805_p7, %p14807_p0  ;;  %p11812_p11 = scmp.lt.s32.totalorder %s11810_s1, %s11804_s2 }
 0x119   : > { %p11807_p9 = pneg %p11806_p6  ;;  %p11813_p12 = por %p11812_p11, %p11811_p5 }
 0x11b   : > { %p11814_p10 = pnand %p11813_p12, %p11807_p9 }
 0x11d   : > { %11817 = shalt.err (!%p11814_p10)
}
 0x11e   : > { %s14813_s14 = smov 4   ;;  %s12645_s3 = sshll.u32 %s12164_s0, 5 }
 0x11f   : > { %10659 = dma.hbm_to_vmem [thread:$0]  (%p14807_p0), %s12611_s24, 2048, %s12614_s12, %s12471_s20, %s14810_s11, %s14810_s11, %s14813_s14  }
 0x120   : > { %s14814_s7 = sld [smem:[#allocation49_spill]]  ;;  %s717_s28 = scalar_lea.vmem [#allocation14], %s12617_s26 }
 0x121   : > { %s724_s27 = sshll.u32 %s717_s28, 4  ;;  %s12657_s1 = smul.u32 384, %s12456_s13  ;;  %s12654_s27 = int_to_ptr.vmem [resolvable:$true] %s724_s27 }
 0x126   : > { %s12651_s2 = scalar_lea.hbm %s14814_s7, %s12645_s3  ;;  %s11822_s17 = scalar_lea.hbm %s14814_s7, 64 }
 0x127   : > { %s11818_s4 = scalar_lea.hbm %s12651_s2, 32  ;;  %p11823_p2 = scmp.lt.u32.totalorder %s12651_s2, %s14814_s7 }
 0x128   : > { %p11819_p3 = scmp.ne.s32.totalorder %s12651_s2, %s11818_s4  ;;  %p11824_p1 = scmp.lt.u32.totalorder %s11822_s17, %s11818_s4 }
 0x129   : > { %p11826_p7 = scmp.lt.u32.totalorder %s11818_s4, %s12651_s2 }
 0x12a   : > { %p11820_p8 = pnand %p11819_p3, %p14807_p0  ;;  %p11825_p4 = por %p11824_p1, %p11823_p2 }
 0x12c   : > { %p11821_p13 = pneg %p11820_p8  ;;  %p11827_p6 = por %p11826_p7, %p11825_p4 }
 0x12e   : > { %p11828_p9 = pnand %p11827_p6, %p11821_p13 }
 0x130   : > { %11831 = shalt.err (!%p11828_p9)
}
 0x131   : > { %s11832_s28 = scalar_lea.vmem %s12654_s27, 32  ;;  %s12187_s24 = smov [#allocation14]  }
 0x132   : > { %p11833_p5 = scmp.ne.s32.totalorder %s12654_s27, %s11832_s28  ;;  %s11836_s12 = sshll.u32 %s12187_s24, 4  ;;  %s11837_s12 = int_to_ptr.vmem [resolvable:$false] %s11836_s12 }
 0x133   : > { %s11838_s5 = scalar_lea.vmem %s11837_s12, 64  ;;  %p11839_p10 = scmp.lt.s32.totalorder %s12654_s27, %s11837_s12 }
 0x134   : > { %p11834_p11 = pnand %p11833_p5, %p14807_p0  ;;  %p11840_p3 = scmp.lt.s32.totalorder %s11838_s5, %s11832_s28 }
 0x136   : > { %p11835_p12 = pneg %p11834_p11  ;;  %p11841_p8 = por %p11840_p3, %p11839_p10 }
 0x138   : > { %p11842_p2 = pnand %p11841_p8, %p11835_p12 }
 0x13a   : > { %11845 = shalt.err (!%p11842_p2)
}
 0x13b   : > { %s14768_s4 = smov 16   ;;  %s14770_s17 = smov 1  }
 0x13c   : > { %10660 = dma.hbm_to_vmem [thread:$0]  (%p14807_p0), %s12651_s2, 32, %s12654_s27, %s12471_s20, %s14768_s4, %s14768_s4, %s14770_s17  }
 0x13d   : > { %s12685_s30 = smul.u32 6144, %s12164_s0  ;;  %s738_s28 = scalar_lea.vmem [#allocation15], %s12657_s1 }
 0x13e   : > { %s745_s24 = sshll.u32 %s738_s28, 4  ;;  %s14815_s8 = sld [smem:[#allocation50_spill]]  ;;  %s12694_s24 = int_to_ptr.vmem [resolvable:$true] %s745_s24 }
 0x144   : > { %s12692_s6 = scalar_lea.hbm %s14815_s8, %s12685_s30  ;;  %s11850_s28 = scalar_lea.hbm %s14815_s8, 12288 }
 0x145   : > { %s11846_s7 = scalar_lea.hbm %s12692_s6, 6144  ;;  %p11851_p7 = scmp.lt.u32.totalorder %s12692_s6, %s14815_s8 }
 0x146   : > { %p11847_p13 = scmp.ne.s32.totalorder %s12692_s6, %s11846_s7  ;;  %p11852_p6 = scmp.lt.u32.totalorder %s11850_s28, %s11846_s7 }
 0x147   : > { %p11854_p5 = scmp.lt.u32.totalorder %s11846_s7, %s12692_s6 }
 0x148   : > { %p11848_p1 = pnand %p11847_p13, %p14807_p0  ;;  %p11853_p9 = por %p11852_p6, %p11851_p7 }
 0x14a   : > { %p11849_p4 = pneg %p11848_p1  ;;  %p11855_p11 = por %p11854_p5, %p11853_p9 }
 0x14c   : > { %p11856_p12 = pnand %p11855_p11, %p11849_p4 }
 0x14e   : > { %11859 = shalt.err (!%p11856_p12)
}
 0x14f   : > { %s11860_s12 = scalar_lea.vmem %s12694_s24, 6144  ;;  %s12190_s5 = smov [#allocation15]  }
 0x150   : > { %p11861_p10 = scmp.ne.s32.totalorder %s12694_s24, %s11860_s12  ;;  %s11864_s2 = sshll.u32 %s12190_s5, 4  ;;  %s11865_s2 = int_to_ptr.vmem [resolvable:$false] %s11864_s2 }
 0x151   : > { %s11866_s4 = scalar_lea.vmem %s11865_s2, 12288  ;;  %p11867_p2 = scmp.lt.s32.totalorder %s12694_s24, %s11865_s2 }
 0x152   : > { %p11862_p3 = pnand %p11861_p10, %p14807_p0  ;;  %p11868_p13 = scmp.lt.s32.totalorder %s11866_s4, %s11860_s12 }
 0x154   : > { %p11863_p8 = pneg %p11862_p3  ;;  %p11869_p1 = por %p11868_p13, %p11867_p2 }
 0x156   : > { %p11870_p7 = pnand %p11869_p1, %p11863_p8 }
 0x158   : > { %11873 = shalt.err (!%p11870_p7)
}
 0x159   : > { %s14772_s7 = smov 192   ;;  %s14773_s17 = smov 12  }
 0x15a   : > { %10661 = dma.hbm_to_vmem [thread:$0]  (%p14807_p0), %s12692_s6, 6144, %s12694_s24, %s12471_s20, %s14772_s7, %s14772_s7, %s14773_s17  }
 0x15b   : > { %s14816_s9 = sld [smem:[#allocation51_spill]]  ;;  %s759_s5 = scalar_lea.vmem [#allocation16], %s12510_s23 }
 0x15c   : > { %s766_s2 = sshll.u32 %s759_s5, 4  ;;  %s12728_s2 = int_to_ptr.vmem [resolvable:$true] %s766_s2 }
 0x161   : > { %s12725_s12 = scalar_lea.hbm %s14816_s9, %s12538_s18  ;;  %s11878_s24 = scalar_lea.hbm %s14816_s9, 4096 }
 0x162   : > { %s11874_s4 = scalar_lea.hbm %s12725_s12, 2048  ;;  %p11879_p5 = scmp.lt.u32.totalorder %s12725_s12, %s14816_s9 }
 0x163   : > { %p11875_p4 = scmp.ne.s32.totalorder %s12725_s12, %s11874_s4  ;;  %p11880_p11 = scmp.lt.u32.totalorder %s11878_s24, %s11874_s4 }
 0x164   : > { %p11882_p10 = scmp.lt.u32.totalorder %s11874_s4, %s12725_s12 }
 0x165   : > { %p11876_p6 = pnand %p11875_p4, %p14807_p0  ;;  %p11881_p12 = por %p11880_p11, %p11879_p5 }
 0x167   : > { %p11877_p9 = pneg %p11876_p6  ;;  %p11883_p3 = por %p11882_p10, %p11881_p12 }
 0x169   : > { %p11884_p8 = pnand %p11883_p3, %p11877_p9 }
 0x16b   : > { %11887 = shalt.err (!%p11884_p8)
}
 0x16c   : > { %s11888_s23 = scalar_lea.vmem %s12728_s2, 2048  ;;  %s12193_s8 = smov [#allocation16]  }
 0x16d   : > { %p11889_p2 = scmp.ne.s32.totalorder %s12728_s2, %s11888_s23  ;;  %s11892_s28 = sshll.u32 %s12193_s8, 4  ;;  %s11893_s28 = int_to_ptr.vmem [resolvable:$false] %s11892_s28 }
 0x16e   : > { %s11894_s5 = scalar_lea.vmem %s11893_s28, 4096  ;;  %p11895_p7 = scmp.lt.s32.totalorder %s12728_s2, %s11893_s28 }
 0x16f   : > { %p11890_p13 = pnand %p11889_p2, %p14807_p0  ;;  %p11896_p4 = scmp.lt.s32.totalorder %s11894_s5, %s11888_s23 }
 0x171   : > { %p11891_p1 = pneg %p11890_p13  ;;  %p11897_p6 = por %p11896_p4, %p11895_p7 }
 0x173   : > { %p11898_p5 = pnand %p11897_p6, %p11891_p1 }
 0x175   : > { %11901 = shalt.err (!%p11898_p5)
}
 0x176   : > { %10662 = dma.hbm_to_vmem [thread:$0]  (%p14807_p0), %s12725_s12, 2048, %s12728_s2, %s12471_s20, %s14810_s11, %s14810_s11, %s14813_s14  }
 0x177   : > { %s14817_s10 = sld [smem:[#allocation52_spill]]  ;;  %s780_s27 = scalar_lea.vmem [#allocation17], %s12617_s26 }
 0x178   : > { %s787_s18 = sshll.u32 %s780_s27, 4  ;;  %s12762_s18 = int_to_ptr.vmem [resolvable:$true] %s787_s18 }
 0x17d   : > { %s12759_s24 = scalar_lea.hbm %s14817_s10, %s12645_s3  ;;  %s11906_s2 = scalar_lea.hbm %s14817_s10, 64 }
 0x17e   : > { %s11902_s23 = scalar_lea.hbm %s12759_s24, 32  ;;  %p11907_p10 = scmp.lt.u32.totalorder %s12759_s24, %s14817_s10 }
 0x17f   : > { %p11903_p9 = scmp.ne.s32.totalorder %s12759_s24, %s11902_s23  ;;  %p11908_p3 = scmp.lt.u32.totalorder %s11906_s2, %s11902_s23 }
 0x180   : > { %p11910_p2 = scmp.lt.u32.totalorder %s11902_s23, %s12759_s24 }
 0x181   : > { %p11904_p11 = pnand %p11903_p9, %p14807_p0  ;;  %p11909_p8 = por %p11908_p3, %p11907_p10 }
 0x183   : > { %p11905_p12 = pneg %p11904_p11  ;;  %p11911_p13 = por %p11910_p2, %p11909_p8 }
 0x185   : > { %p11912_p1 = pnand %p11911_p13, %p11905_p12 }
 0x187   : > { %11915 = shalt.err (!%p11912_p1)
}
 0x188   : > { %s11916_s4 = scalar_lea.vmem %s12762_s18, 32  ;;  %s12194_s6 = smov [#allocation17]  }
 0x189   : > { %p11917_p7 = scmp.ne.s32.totalorder %s12762_s18, %s11916_s4  ;;  %s11920_s27 = sshll.u32 %s12194_s6, 4  ;;  %s11921_s27 = int_to_ptr.vmem [resolvable:$false] %s11920_s27 }
 0x18a   : > { %s11922_s8 = scalar_lea.vmem %s11921_s27, 64  ;;  %p11923_p5 = scmp.lt.s32.totalorder %s12762_s18, %s11921_s27 }
 0x18b   : > { %p11918_p4 = pnand %p11917_p7, %p14807_p0  ;;  %p11924_p9 = scmp.lt.s32.totalorder %s11922_s8, %s11916_s4 }
 0x18d   : > { %p11919_p6 = pneg %p11918_p4  ;;  %p11925_p11 = por %p11924_p9, %p11923_p5 }
 0x18f   : > { %p11926_p10 = pnand %p11925_p11, %p11919_p6 }
 0x191   : > { %11929 = shalt.err (!%p11926_p10)
}
 0x192   : > { %s14818_s23 = smov 1   ;;  %s14819_s12 = smov 16  }
 0x193   : > { %10663 = dma.hbm_to_vmem [thread:$0]  (%p14807_p0), %s12759_s24, 32, %s12762_s18, %s12471_s20, %s14819_s12, %s14819_s12, %s14818_s23  }
 0x194   : > { %s14820_s5 = sld [smem:[#allocation53_spill]]  ;;  %s801_s6 = scalar_lea.vmem [#allocation18], %s12657_s1 }
 0x195   : > { %s808_s27 = sshll.u32 %s801_s6, 4  ;;  %s10641_s8 = smul.u32 6, %s12456_s13  ;;  %s12796_s27 = int_to_ptr.vmem [resolvable:$true] %s808_s27 }
 0x19a   : > { %s12793_s4 = scalar_lea.hbm %s14820_s5, %s12685_s30  ;;  %s11934_s2 = scalar_lea.hbm %s14820_s5, 12288 }
 0x19b   : > { %s11930_s7 = scalar_lea.hbm %s12793_s4, 6144  ;;  %p11935_p2 = scmp.lt.u32.totalorder %s12793_s4, %s14820_s5 }
 0x19c   : > { %p11931_p12 = scmp.ne.s32.totalorder %s12793_s4, %s11930_s7  ;;  %p11936_p13 = scmp.lt.u32.totalorder %s11934_s2, %s11930_s7 }
 0x19d   : > { %p11938_p7 = scmp.lt.u32.totalorder %s11930_s7, %s12793_s4 }
 0x19e   : > { %p11932_p3 = pnand %p11931_p12, %p14807_p0  ;;  %p11937_p1 = por %p11936_p13, %p11935_p2 }
 0x1a0   : > { %p11933_p8 = pneg %p11932_p3  ;;  %p11939_p4 = por %p11938_p7, %p11937_p1 }
 0x1a2   : > { %p11940_p6 = pnand %p11939_p4, %p11933_p8 }
 0x1a4   : > { %11943 = shalt.err (!%p11940_p6)
}
 0x1a5   : > { %s11944_s6 = scalar_lea.vmem %s12796_s27, 6144  ;;  %s12195_s24 = smov [#allocation18]  }
 0x1a6   : > { %p11945_p5 = scmp.ne.s32.totalorder %s12796_s27, %s11944_s6  ;;  %s11948_s18 = sshll.u32 %s12195_s24, 4  ;;  %s11949_s18 = int_to_ptr.vmem [resolvable:$false] %s11948_s18 }
 0x1a7   : > { %s11950_s17 = scalar_lea.vmem %s11949_s18, 12288  ;;  %p11951_p10 = scmp.lt.s32.totalorder %s12796_s27, %s11949_s18 }
 0x1a8   : > { %p11946_p9 = pnand %p11945_p5, %p14807_p0  ;;  %p11952_p12 = scmp.lt.s32.totalorder %s11950_s17, %s11944_s6 }
 0x1aa   : > { %p11947_p11 = pneg %p11946_p9  ;;  %p11953_p3 = por %p11952_p12, %p11951_p10 }
 0x1ac   : > { %p11954_p2 = pnand %p11953_p3, %p11947_p11 }
 0x1ae   : > { %11957 = shalt.err (!%p11954_p2)
}
 0x1af   : > { %s14821_s7 = smov 12   ;;  %s14822_s2 = smov 192  }
 0x1b0   : > { %10664 = dma.hbm_to_vmem [thread:$0]  (%p14807_p0), %s12793_s4, 6144, %s12796_s27, %s12471_s20, %s14822_s2, %s14822_s2, %s14821_s7  }
 0x1b1   : > { %s10642_s28 = smul.u32 96, %s12164_s0  ;;  %s822_s24 = scalar_lea.vmem [#allocation19], %s10641_s8 }
 0x1b2   : > { %s829_s18 = sshll.u32 %s822_s24, 4  ;;  %s14823_s5 = sld [smem:[#allocation54_spill]]  ;;  %s12832_s18 = int_to_ptr.vmem [resolvable:$true] %s829_s18 }
 0x1b8   : > { %s12830_s9 = scalar_lea.hbm %s14823_s5, %s10642_s28  ;;  %s11962_s27 = scalar_lea.hbm %s14823_s5, 192 }
 0x1b9   : > { %s11958_s10 = scalar_lea.hbm %s12830_s9, 96  ;;  %p11963_p7 = scmp.lt.u32.totalorder %s12830_s9, %s14823_s5 }
 0x1ba   : > { %p11959_p8 = scmp.ne.s32.totalorder %s12830_s9, %s11958_s10  ;;  %p11964_p4 = scmp.lt.u32.totalorder %s11962_s27, %s11958_s10 }
 0x1bb   : > { %p11966_p5 = scmp.lt.u32.totalorder %s11958_s10, %s12830_s9 }
 0x1bc   : > { %p11960_p13 = pnand %p11959_p8, %p14807_p0  ;;  %p11965_p6 = por %p11964_p4, %p11963_p7 }
 0x1be   : > { %p11961_p1 = pneg %p11960_p13  ;;  %p11967_p9 = por %p11966_p5, %p11965_p6 }
 0x1c0   : > { %p11968_p11 = pnand %p11967_p9, %p11961_p1 }
 0x1c2   : > { %11971 = shalt.err (!%p11968_p11)
}
 0x1c3   : > { %s11972_s2 = scalar_lea.vmem %s12832_s18, 96  ;;  %s12196_s28 = smov [#allocation19]  }
 0x1c4   : > { %p11973_p10 = scmp.ne.s32.totalorder %s12832_s18, %s11972_s2  ;;  %s11976_s24 = sshll.u32 %s12196_s28, 4  ;;  %s11977_s24 = int_to_ptr.vmem [resolvable:$false] %s11976_s24 }
 0x1c5   : > { %s11978_s6 = scalar_lea.vmem %s11977_s24, 192  ;;  %p11979_p2 = scmp.lt.s32.totalorder %s12832_s18, %s11977_s24 }
 0x1c6   : > { %p11974_p12 = pnand %p11973_p10, %p14807_p0  ;;  %p11980_p8 = scmp.lt.s32.totalorder %s11978_s6, %s11972_s2 }
 0x1c8   : > { %p11975_p3 = pneg %p11974_p12  ;;  %p11981_p13 = por %p11980_p8, %p11979_p2 }
 0x1ca   : > { %p11982_p7 = pnand %p11981_p13, %p11975_p3 }
 0x1cc   : > { %11985 = shalt.err (!%p11982_p7)
}
 0x1cd   : > { %s12197_s10 = smov 48   ;;  %s12198_s17 = smov 3  }
 0x1ce   : > { %10665 = dma.hbm_to_vmem [thread:$0]  (%p14807_p0), %s12830_s9, 96, %s12832_s18, %s12471_s20, %s12197_s10, %s12197_s10, %s12198_s17  }
 0x1cf   : > { %s14824_s27 = sld [smem:[#allocation55_spill]]  ;;  %s843_s2 = scalar_lea.vmem [#allocation20], %s12657_s1 }
 0x1d0   : > { %s850_s28 = sshll.u32 %s843_s2, 4  ;;  %s12863_s28 = int_to_ptr.vmem [resolvable:$true] %s850_s28 }
 0x1d5   : > { %s14825_s8 = smov %s14824_s27  ;;  %s12860_s7 = scalar_lea.hbm %s14824_s27, %s12685_s30 }
 0x1d6   : > { %s11986_s24 = scalar_lea.hbm %s12860_s7, 6144  ;;  %s11990_s18 = scalar_lea.hbm %s14825_s8, 12288 }
 0x1d7   : > { %p11987_p1 = scmp.ne.s32.totalorder %s12860_s7, %s11986_s24  ;;  %p11991_p5 = scmp.lt.u32.totalorder %s12860_s7, %s14825_s8 }
 0x1d8   : > { %p11992_p9 = scmp.lt.u32.totalorder %s11990_s18, %s11986_s24  ;;  %p11994_p10 = scmp.lt.u32.totalorder %s11986_s24, %s12860_s7 }
 0x1d9   : > { %p11988_p4 = pnand %p11987_p1, %p14807_p0 }
 0x1da   : > { %p11993_p11 = por %p11992_p9, %p11991_p5 }
 0x1db   : > { %p11989_p6 = pneg %p11988_p4 }
 0x1dc   : > { %p11995_p12 = por %p11994_p10, %p11993_p11 }
 0x1de   : > { %p11996_p3 = pnand %p11995_p12, %p11989_p6 }
 0x1e0   : > { %11999 = shalt.err (!%p11996_p3)
}
 0x1e1   : > { %s12000_s1 = scalar_lea.vmem %s12863_s28, 6144  ;;  %s12199_s17 = smov [#allocation20]  }
 0x1e2   : > { %p12001_p2 = scmp.ne.s32.totalorder %s12863_s28, %s12000_s1  ;;  %s12004_s4 = sshll.u32 %s12199_s17, 4  ;;  %s12005_s4 = int_to_ptr.vmem [resolvable:$false] %s12004_s4 }
 0x1e3   : > { %s12006_s13 = scalar_lea.vmem %s12005_s4, 12288  ;;  %p12007_p7 = scmp.lt.s32.totalorder %s12863_s28, %s12005_s4 }
 0x1e4   : > { %p12002_p8 = pnand %p12001_p2, %p14807_p0  ;;  %p12008_p1 = scmp.lt.s32.totalorder %s12006_s13, %s12000_s1 }
 0x1e6   : > { %p12003_p13 = pneg %p12002_p8  ;;  %p12009_p4 = por %p12008_p1, %p12007_p7 }
 0x1e8   : > { %p12010_p5 = pnand %p12009_p4, %p12003_p13 }
 0x1ea   : > { %12013 = shalt.err (!%p12010_p5)
}
 0x1eb   : > { %10666 = dma.hbm_to_vmem [thread:$0]  (%p14807_p0), %s12860_s7, 6144, %s12863_s28, %s12471_s20, %s14810_s11, %s14810_s11, %s14813_s14  }
 0x1ec   : > { %s14826_s24 = sld [smem:[#allocation56_spill]]  ;;  %s864_s9 = scalar_lea.vmem [#allocation21], %s12617_s26 }
 0x1ed   : > { %s871_s18 = sshll.u32 %s864_s9, 4  ;;  %s12897_s18 = int_to_ptr.vmem [resolvable:$true] %s871_s18 }
 0x1f2   : > { %s12894_s6 = scalar_lea.hbm %s14826_s24, %s12645_s3  ;;  %s12018_s14 = scalar_lea.hbm %s14826_s24, 64 }
 0x1f3   : > { %s12014_s10 = scalar_lea.hbm %s12894_s6, 32  ;;  %p12019_p10 = scmp.lt.u32.totalorder %s12894_s6, %s14826_s24 }
 0x1f4   : > { %p12015_p6 = scmp.ne.s32.totalorder %s12894_s6, %s12014_s10  ;;  %p12020_p12 = scmp.lt.u32.totalorder %s12018_s14, %s12014_s10 }
 0x1f5   : > { %p12022_p2 = scmp.lt.u32.totalorder %s12014_s10, %s12894_s6 }
 0x1f6   : > { %p12016_p9 = pnand %p12015_p6, %p14807_p0  ;;  %p12021_p3 = por %p12020_p12, %p12019_p10 }
 0x1f8   : > { %p12017_p11 = pneg %p12016_p9  ;;  %p12023_p8 = por %p12022_p2, %p12021_p3 }
 0x1fa   : > { %p12024_p13 = pnand %p12023_p8, %p12017_p11 }
 0x1fc   : > { %12027 = shalt.err (!%p12024_p13)
}
 0x1fd   : > { %s12028_s26 = scalar_lea.vmem %s12897_s18, 32  ;;  %s12200_s28 = smov [#allocation21]  }
 0x1fe   : > { %p12029_p7 = scmp.ne.s32.totalorder %s12897_s18, %s12028_s26  ;;  %s12032_s1 = sshll.u32 %s12200_s28, 4  ;;  %s12033_s1 = int_to_ptr.vmem [resolvable:$false] %s12032_s1 }
 0x1ff   : > { %s12034_s17 = scalar_lea.vmem %s12033_s1, 64  ;;  %p12035_p5 = scmp.lt.s32.totalorder %s12897_s18, %s12033_s1 }
 0x200   : > { %p12030_p1 = pnand %p12029_p7, %p14807_p0  ;;  %p12036_p6 = scmp.lt.s32.totalorder %s12034_s17, %s12028_s26 }
 0x202   : > { %p12031_p4 = pneg %p12030_p1  ;;  %p12037_p9 = por %p12036_p6, %p12035_p5 }
 0x204   : > { %p12038_p10 = pnand %p12037_p9, %p12031_p4 }
 0x206   : > { %12041 = shalt.err (!%p12038_p10)
}
 0x207   : > { %10667 = dma.hbm_to_vmem [thread:$0]  (%p14807_p0), %s12894_s6, 32, %s12897_s18, %s12471_s20, %s14819_s12, %s14819_s12, %s14818_s23  }
 0x208 PF: > { %s14827_s4 = sld [smem:[#allocation41_spill]] }
 0x20e   : > { %p14828_p11 = scmp.ne.s32.totalorder %s14827_s4, 0 }
 0x20f   : > { %s14829_s13 = sld [smem:[#allocation37_spill]] (!%p14828_p11) }
 0x210   : > { %883 = sbr.rel (%p14828_p11) target bundleno = 12740 (0x31c4), region = 88 }
 0x215   : > { %p14830_p12 = scmp.eq.s32.totalorder (!%p14828_p11), %s14829_s13, 0 }
 0x217   : > { %12119 = dma.done.wait (%p14830_p12), [#allocation5], 512   ;;  %p14831_p3 = pmov %p14830_p12 }
 0x219   : > { %12121 = vsyncadd (%p14831_p3), [#allocation5], 4294966784  ;;  %p14832_p2 = pmov %p14831_p3 }
 0x21b   : > { %12123 = dma.done.wait (%p14832_p2), [#allocation8], 512   ;;  %p14833_p8 = pmov %p14832_p2 }
 0x21c   : > { %s14834_s22 = sld [smem:[#allocation35_spill]]  ;;  %s14835_s27 = sld [smem:[#allocation39_spill]] }
 0x21d   : > { %12125 = vsyncadd (%p14833_p8), [#allocation8], 4294966784  ;;  %s893_s20 = sand.u32 1, %s14829_s13  }
 0x21e   : > { %s894_s2 = scalar_lea.sflag [#allocation5], %s893_s20 }
 0x222   : > { %s895_s23 = sand.u32 1, %s14834_s22   ;;  %p14836_p0 = scmp.ne.s32.totalorder %s14835_s27, 0 }
 0x223   : > { %s9197_s12 = sshll.u32 %s895_s23, 3 }
 0x224   : > { %s12936_s6 = scalar_lea.vmem [#allocation9], %s9197_s12 }
 0x225   : > { %12127 = dma.done.wait (%p14836_p0), %s894_s2, 29120  }
 0x226   : > { %12129 = vsyncadd (%p14836_p0), %s894_s2, 4294938176  ;;  %s9199_s9 = sshll.u32 %s895_s23, 7  ;;  %s9200_s18 = sshll.u32 %s895_s23, 8 }
 0x227   : > { %s12942_s10 = sshll.u32 %s895_s23, 1  ;;  %s10645_s30 = smul.u32 384, %s895_s23 }
 0x228   : > { %s10646_s11 = smul.u32 6, %s895_s23  ;;  %s12944_s14 = scalar_lea.vmem [#allocation10], %s9197_s12 }
 0x229   : > { %s12946_s7 = scalar_lea.vmem [#allocation11], %s9199_s9  ;;  %s12948_s3 = scalar_lea.vmem [#allocation12], %s9200_s18 }
 0x22a   : > { %s12950_s26 = scalar_lea.vmem [#allocation13], %s9199_s9  ;;  %s942_s28 = scalar_lea.vmem [#allocation14], %s12942_s10 }
 0x22b   : > { %s12953_s1 = scalar_lea.vmem [#allocation15], %s10645_s30  ;;  %s12955_s17 = scalar_lea.vmem [#allocation16], %s9199_s9 }
 0x22c   : > { %s969_s4 = scalar_lea.vmem [#allocation17], %s12942_s10  ;;  %s12958_s22 = scalar_lea.vmem [#allocation18], %s10645_s30 }
 0x22d   : > { %s12960_s27 = scalar_lea.vmem [#allocation19], %s10646_s11  ;;  %s12962_s20 = scalar_lea.vmem [#allocation20], %s10645_s30 }
 0x22e   : > { %s1005_s23 = scalar_lea.vmem [#allocation21], %s12942_s10  ;;  %p14837_p13 = pmov %p14832_p2 }
 0x22f   : > { %p14838_p7 = pmov %p14832_p2 }
 0x230   : > { %12131 = dma.done.wait (%p14837_p13), [#allocation8], 32  }
 0x231   : > { %12133 = vsyncadd (%p14838_p7), [#allocation8], 4294967264  ;;  %p14839_p1 = pmov %p14832_p2 }
 0x233   : > { %12135 = dma.done.wait (%p14839_p1), [#allocation24], 32   ;;  %p14840_p4 = pmov %p14839_p1 }
 0x234   : > { %s14841_s12 = sld [smem:[#allocation36_spill]] }
 0x235   : > { %12137 = vsyncadd (%p14840_p4), [#allocation24], 4294967264 }
 0x23a   : > { %p9208_p5 = scmp.ne.s32.totalorder %s14841_s12, 0 }
 0x23b   : > { %v1130_v0 = vld [vmem:[#allocation4] sm:$0xff] (!%p9208_p5)  ;;  %v1131_v1 = vld [vmem:[#allocation4 + $0x8] sm:$0xff] (!%p9208_p5)  ;;  %v1132_v2 = vld [vmem:[#allocation4 + $0x10] sm:$0xff] (!%p9208_p5) }
 0x23c   : > { %1129 = sbr.rel (%p9208_p5) target bundleno = 579 (0x243), region = 160  ;;  %1134 = vst [vmem:[#allocation2] sm:$0xff] (!%p9208_p5), %v1130_v0  ;;  %1135 = vst [vmem:[#allocation2 + $0x8] sm:$0xff] (!%p9208_p5), %v1131_v1  ;;  %v1133_v3 = vld [vmem:[#allocation4 + $0x18] sm:$0xff] (!%p9208_p5)  ;;  %v1138_v4 = vld [vmem:[#allocation7] sm:$0xff] (!%p9208_p5) }
 0x23d   : > { %1136 = vst [vmem:[#allocation2 + $0x10] sm:$0xff] (!%p9208_p5), %v1132_v2  ;;  %v1139_v5 = vld [vmem:[#allocation7 + $0x8] sm:$0xff] (!%p9208_p5)  ;;  %1137 = vst [vmem:[#allocation2 + $0x18] sm:$0xff] (!%p9208_p5), %v1133_v3  ;;  %v1140_v6 = vld [vmem:[#allocation7 + $0x10] sm:$0xff] (!%p9208_p5) }
 0x23e   : > { %1142 = vst [vmem:[#allocation3] sm:$0xff] (!%p9208_p5), %v1138_v4  ;;  %1143 = vst [vmem:[#allocation3 + $0x8] sm:$0xff] (!%p9208_p5), %v1139_v5  ;;  %v1141_v7 = vld [vmem:[#allocation7 + $0x18] sm:$0xff] (!%p9208_p5) }
 0x23f   : > { %1144 = vst [vmem:[#allocation3 + $0x10] sm:$0xff] (!%p9208_p5), %v1140_v6  ;;  %1145 = vst [vmem:[#allocation3 + $0x18] sm:$0xff] (!%p9208_p5), %v1141_v7 }
 0x243 PF: > { %v1146_v12 = vld [vmem:[#allocation2] sm:$0xff]  ;;  %v1147_v13 = vld [vmem:[#allocation2 + $0x8] sm:$0xff]  ;;  %v10921_v18 = vld [vmem:[%s12948_s3 + $0x14] ss:$8 sps:$4 sm:$0xff]   ;;  %v12201_v6 = vmov 0   ;;  %vm12203_vm0 = vmmov 0  }
 0x244   : > { %v1148_v14 = vld [vmem:[#allocation2 + $0x10] sm:$0xff]  ;;  %v1149_v15 = vld [vmem:[#allocation2 + $0x18] sm:$0xff]  ;;  %v10918_v16 = vld [vmem:[%s12948_s3 + $0x4] ss:$8 sps:$4 sm:$0xff]   ;;  %1526 = vmatprep.mubr.bf16.mxu1 %v12201_v6  ;;  %vm1574_vm1 = vcmask 261120   ;;  %vm1669_vm2 = vcmask 130048  }
 0x245   : > { %v1150_v8 = vld [vmem:[#allocation3] sm:$0xff]  ;;  %v1151_v10 = vld [vmem:[#allocation3 + $0x8] sm:$0xff]  ;;  %1494 = vmatprep.subr.bf16.mxu1 %v10918_v16  ;;  %v10923_v51 = vld [vmem:[%s12948_s3 + $0x10] ss:$8 sps:$4 sm:$0xff]   ;;  %s12204_s13 = smov 96   ;;  %s12205_s2 = smov 64  }
 0x246   : > { %v1152_v9 = vld [vmem:[#allocation3 + $0x10] sm:$0xff]  ;;  %1221 = vadd.xlane.f32.xlu0 %v1150_v8  ;;  %v1153_v11 = vld [vmem:[#allocation3 + $0x18] sm:$0xff]  ;;  %v10920_v17 = vld [vmem:[%s12948_s3] ss:$8 sps:$4 sm:$0xff]   ;;  %s12206_s9 = smov 32   ;;  %vm2588_vm3 = vcmask 523264  }
 0x247   : > { %1225 = vadd.xlane.f32.xlu1 %v1152_v9  ;;  %1495 = vmatpush1.bf16.msra.mxu1 %v10920_v17  ;;  %v10924_v52 = vld [vmem:[%s12948_s3 + $0x24] ss:$8 sps:$4 sm:$0xff]   ;;  %v10926_v53 = vld [vmem:[%s12948_s3 + $0x20] ss:$8 sps:$4 sm:$0xff]   ;;  %v10928_v55 = vld [vmem:[%s12948_s3 + $0x34] ss:$8 sps:$4 sm:$0xff]  }
 0x248   : > { %1496 = vmatprep.subr.bf16.mxu1 %v10921_v18  ;;  %v10927_v54 = vld [vmem:[%s12946_s7] sm:$0xff]   ;;  %v10930_v56 = vld [vmem:[%s12948_s3 + $0x30] ss:$8 sps:$4 sm:$0xff]   ;;  %v10931_v57 = vld [vmem:[%s12946_s7 + $0x8] sm:$0xff]   ;;  %vm2593_vm4 = vcmask 785408  }
 0x249   : > { %10013 = vmatprep.subr.bf16.mxu0 %v10927_v54  ;;  %v10932_v58 = vld [vmem:[%s12948_s3 + $0x44] ss:$8 sps:$4 sm:$0xff]   ;;  %v10934_v59 = vld [vmem:[%s12948_s3 + $0x40] ss:$8 sps:$4 sm:$0xff]   ;;  %v10935_v60 = vld [vmem:[%s12946_s7 + $0x10] sm:$0xff]  }
 0x24a   : > { %1223 = vadd.xlane.f32.xlu0 %v1151_v10  ;;  %10014 = vmatpush3.bf16.msra.mxu0 %v10927_v54  ;;  %v10936_v61 = vld [vmem:[%s12948_s3 + $0x54] ss:$8 sps:$4 sm:$0xff]   ;;  %v10938_v62 = vld [vmem:[%s12948_s3 + $0x50] ss:$8 sps:$4 sm:$0xff]   ;;  %v10940_v0 = vld [vmem:[%s12948_s3 + $0x64] ss:$8 sps:$4 sm:$0xff]  }
 0x24b   : > { %1227 = vadd.xlane.f32.xlu1 %v1153_v11  ;;  %1497 = vmatpush1.bf16.msra.mxu1 %v10923_v51  ;;  %v10939_v63 = vld [vmem:[%s12946_s7 + $0x18] sm:$0xff]   ;;  %v10942_v1 = vld [vmem:[%s12948_s3 + $0x60] ss:$8 sps:$4 sm:$0xff]   ;;  %v10948_v7 = vld [vmem:[%s12946_s7 + $0x30] sm:$0xff]  }
 0x24c   : > { %1498 = vmatprep.subr.bf16.mxu1 %v10924_v52  ;;  %10015 = vmatprep.subr.bf16.mxu0 %v10931_v57  ;;  %v10943_v2 = vld [vmem:[%s12946_s7 + $0x20] sm:$0xff]   ;;  %v10944_v3 = vld [vmem:[%s12948_s3 + $0x74] ss:$8 sps:$4 sm:$0xff]   ;;  %v10946_v4 = vld [vmem:[%s12948_s3 + $0x70] ss:$8 sps:$4 sm:$0xff]  }
 0x24d   : > { %v10947_v5 = vld [vmem:[%s12946_s7 + $0x28] sm:$0xff]  }
 0x24e   : > { %1156 = vadd.xlane.f32.xlu0 %v1146_v12  ;;  %10016 = vmatpush3.bf16.msra.mxu0 %v10931_v57  ;;  %v1154_v54 = vld [vmem:[%s12936_s6] sm:$0x7] }
 0x24f   : > { %1158 = vadd.xlane.f32.xlu1 %v1147_v13  ;;  %1499 = vmatpush1.bf16.msra.mxu1 %v10926_v53 }
 0x250   : > { %1500 = vmatprep.subr.bf16.mxu1 %v10928_v55  ;;  %10017 = vmatprep.subr.bf16.mxu0 %v10935_v60 }
 0x252   : > { %1160 = vadd.xlane.f32.xlu0 %v1148_v14  ;;  %10018 = vmatpush3.bf16.msra.mxu0 %v10935_v60 }
 0x253   : > { %1162 = vadd.xlane.f32.xlu1 %v1149_v15  ;;  %1501 = vmatpush1.bf16.msra.mxu1 %v10930_v56 }
 0x254   : > { %1502 = vmatprep.subr.bf16.mxu1 %v10932_v58  ;;  %10019 = vmatprep.subr.bf16.mxu0 %v10939_v63 }
 0x256   : > { %10020 = vmatpush3.bf16.msra.mxu0 %v10939_v63 }
 0x257   : > { %1503 = vmatpush1.bf16.msra.mxu1 %v10934_v59  ;;  %10021 = vmatprep.subr.bf16.mxu0 %v10943_v2 }
 0x258   : > { %1504 = vmatprep.subr.bf16.mxu1 %v10936_v61 }
 0x25a   : > { %10022 = vmatpush3.bf16.msra.mxu0 %v10943_v2 }
 0x25b   : > { %1505 = vmatpush1.bf16.msra.mxu1 %v10938_v62  ;;  %10023 = vmatprep.subr.bf16.mxu0 %v10947_v5  ;;  %v1155_v62 = vld [vmem:[%s12944_s14] sm:$0x7] }
 0x25c   : > { %1506 = vmatprep.subr.bf16.mxu1 %v10940_v0 }
 0x25e   : > { %10024 = vmatpush3.bf16.msra.mxu0 %v10947_v5 }
 0x25f   : > { %1507 = vmatpush1.bf16.msra.mxu1 %v10942_v1  ;;  %10025 = vmatprep.subr.bf16.mxu0 %v10948_v7 }
 0x260   : > { %1508 = vmatprep.subr.bf16.mxu1 %v10944_v3 }
 0x262   : > { %10026 = vmatpush3.bf16.msra.mxu0 %v10948_v7 }
 0x263   : > { %1509 = vmatpush1.bf16.msra.mxu1 %v10946_v4 }
 0x2d3   : > { %v1222_v19 = vpop.xlane.xlu0 %1221 }
 0x2d4   : > { %v1226_v20 = vpop.xlane.xlu1 %1225  ;;  %v1229_v21 = vmul.f32 0.0078125, %v1222_v19 }
 0x2d5   : > { %v1231_v22 = vmul.f32 0.0078125, %v1226_v20 }
 0x2d6   : > { %v12977_v23 = vsub.f32 %v1150_v8, %v1229_v21  ;;  %v10949_v8 = vld [vmem:[%s12946_s7 + $0x38] sm:$0xff]  }
 0x2d7   : > { %v12979_v24 = vsub.f32 %v1152_v9, %v1231_v22  ;;  %v1224_v25 = vpop.xlane.xlu0 %1223  ;;  %10027 = vmatprep.subr.bf16.mxu0 %v10949_v8 }
 0x2d8   : > { %v1228_v26 = vpop.xlane.xlu1 %1227  ;;  %v1230_v27 = vmul.f32 0.0078125, %v1224_v25  ;;  %v1237_v28 = vmul.f32 %v12977_v23, %v12977_v23  ;;  %10028 = vmatpush3.bf16.msra.mxu0 %v10949_v8 }
 0x2d9   : > { %v1232_v29 = vmul.f32 0.0078125, %v1228_v26  ;;  %v1239_v31 = vmul.f32 %v12979_v24, %v12979_v24 }
 0x2da   : > { %1241 = vadd.xlane.f32.xlu0 %v1237_v28  ;;  %v12983_v30 = vsub.f32 %v1151_v10, %v1230_v27 }
 0x2db   : > { %v12987_v32 = vsub.f32 %v1153_v11, %v1232_v29  ;;  %v1157_v33 = vpop.xlane.xlu0 %1156 }
 0x2dc   : > { %v1159_v34 = vpop.xlane.xlu1 %1158  ;;  %v1165_v35 = vmul.f32 0.0078125, %v1157_v33  ;;  %v1238_v36 = vmul.f32 %v12983_v30, %v12983_v30 }
 0x2dd   : > { %v1166_v37 = vmul.f32 0.0078125, %v1159_v34  ;;  %v1240_v38 = vmul.f32 %v12987_v32, %v12987_v32 }
 0x2de   : > { %1243 = vadd.xlane.f32.xlu1 %v1238_v36  ;;  %1245 = vadd.xlane.f32.xlu0 %v1239_v31  ;;  %v12993_v39 = vsub.f32 %v1146_v12, %v1165_v35  ;;  %v9209_v35 = vld [vmem:[%s12936_s6 + $0x4] sm:$0x7] }
 0x2df   : > { %v12995_v40 = vsub.f32 %v1147_v13, %v1166_v37  ;;  %v1161_v41 = vpop.xlane.xlu0 %1160 }
 0x2e0   : > { %v1163_v42 = vpop.xlane.xlu1 %1162  ;;  %v1167_v43 = vmul.f32 0.0078125, %v1161_v41  ;;  %v1173_v44 = vmul.f32 %v12993_v39, %v12993_v39 }
 0x2e1   : > { %v1168_v45 = vmul.f32 0.0078125, %v1163_v42  ;;  %v1174_v46 = vmul.f32 %v12995_v40, %v12995_v40 }
 0x2e2   : > { %1247 = vadd.xlane.f32.xlu1 %v1240_v38  ;;  %1177 = vadd.xlane.f32.xlu0 %v1173_v44  ;;  %v13001_v47 = vsub.f32 %v1148_v14, %v1167_v43  ;;  %v1201_v14 = vlaneseq }
 0x2e3   : > { %v13003_v48 = vsub.f32 %v1149_v15, %v1168_v45  ;;  %v9210_v45 = vld [vmem:[%s12944_s14 + $0x4] sm:$0x7] }
 0x2e4   : > { %v1175_v49 = vmul.f32 %v13001_v47, %v13001_v47  ;;  %v13031_v21 = vshrl.u32 %v1201_v14, 7 }
 0x2e5   : > { %v1176_v50 = vmul.f32 %v13003_v48, %v13003_v48 }
 0x2e6   : > { %1179 = vadd.xlane.f32.xlu1 %v1174_v46  ;;  %1181 = vadd.xlane.f32.xlu0 %v1175_v49  ;;  %v13034_v31 = vsub.s32 0, %v13031_v21 }
 0x2e8   : > { %v1268_v43 = vrot.slane %v9209_v35, %v13034_v31  ;;  %v1276_v53 = vrot.slane %v9210_v45, %v13034_v31  ;;  %v1204_v60 = vrot.slane %v1154_v54, %v13034_v31  ;;  %v1212_v5 = vrot.slane %v1155_v62, %v13034_v31 }
 0x2ea   : > { %1183 = vadd.xlane.f32.xlu1 %v1176_v50 }
 0x367   : > { %v1242_v9 = vpop.xlane.xlu0 %1241 }
 0x368   : > { %v1249_v10 = vmul.f32 0.0078125, %v1242_v9 }
 0x36a   : > { %v1253_v11 = vadd.f32 1e-05, %v1249_v10 }
 0x36b   : > { %v1244_v12 = vpop.xlane.xlu1 %1243  ;;  %v1246_v13 = vpop.xlane.xlu0 %1245 }
 0x36c   : > { %11190 = vrsqrt.f32 %v1253_v11  ;;  %v1250_v15 = vmul.f32 0.0078125, %v1244_v12  ;;  %v1251_v16 = vmul.f32 0.0078125, %v1246_v13 }
 0x36e   : > { %v1254_v17 = vadd.f32 1e-05, %v1250_v15  ;;  %v1255_v18 = vadd.f32 1e-05, %v1251_v16 }
 0x36f   : > { %v1248_v19 = vpop.xlane.xlu1 %1247  ;;  %v1178_v20 = vpop.xlane.xlu0 %1177 }
 0x370   : > { %11192 = vrsqrt.f32 %v1254_v17  ;;  %v1252_v22 = vmul.f32 0.0078125, %v1248_v19  ;;  %v1185_v25 = vmul.f32 0.0078125, %v1178_v20 }
 0x371   : > { %11194 = vrsqrt.f32 %v1255_v18  ;;  %v12202_v18 = vmov 0.0  }
 0x372   : > { %v1256_v26 = vadd.f32 1e-05, %v1252_v22  ;;  %v1189_v27 = vadd.f32 1e-05, %v1185_v25  ;;  %10033 = vmatprep.subr.bf16.mxu1 %v12202_v18  ;;  %10039 = vmatprep.subr.bf16.mxu0 %v12202_v18 }
 0x373   : > { %v1180_v28 = vpop.xlane.xlu1 %1179  ;;  %v1182_v29 = vpop.xlane.xlu0 %1181 }
 0x374   : > { %11196 = vrsqrt.f32 %v1256_v26  ;;  %v1186_v33 = vmul.f32 0.0078125, %v1180_v28  ;;  %v1187_v34 = vmul.f32 0.0078125, %v1182_v29 }
 0x375   : > { %11198 = vrsqrt.f32 %v1189_v27 }
 0x376   : > { %v11191_v36 = vpop.eup %11190  ;;  %v1190_v37 = vadd.f32 1e-05, %v1186_v33  ;;  %v1191_v38 = vadd.f32 1e-05, %v1187_v34 }
 0x377   : > { %v1184_v41 = vpop.xlane.xlu1 %1183  ;;  %v1261_v42 = vmul.f32 %v11191_v36, %v12977_v23 }
 0x378   : > { %11200 = vrsqrt.f32 %v1190_v37  ;;  %v1188_v44 = vmul.f32 0.0078125, %v1184_v41 }
 0x379   : > { %11202 = vrsqrt.f32 %v1191_v38  ;;  %v1269_v52 = vmul.f32 %v1268_v43, %v1261_v42 }
 0x37a   : > { %v11193_v46 = vpop.eup %11192  ;;  %v1192_v49 = vadd.f32 1e-05, %v1188_v44 }
 0x37b   : > { %v11195_v50 = vpop.eup %11194  ;;  %v1262_v51 = vmul.f32 %v11193_v46, %v12983_v30  ;;  %v1277_v58 = vadd.f32 %v1276_v53, %v1269_v52 }
 0x37c   : > { %11204 = vrsqrt.f32 %v1192_v49  ;;  %v1263_v23 = vmul.f32 %v11195_v50, %v12979_v24 }
 0x37d   : > { %v1270_v55 = vmul.f32 %v1268_v43, %v1262_v51 }
 0x37e   : > { %v11197_v56 = vpop.eup %11196  ;;  %v1271_v2 = vmul.f32 %v1268_v43, %v1263_v23 }
 0x37f   : > { %v11199_v57 = vpop.eup %11198  ;;  %v1278_v59 = vadd.f32 %v1276_v53, %v1270_v55  ;;  %v1264_v61 = vmul.f32 %v11197_v56, %v12987_v32 }
 0x380   : > { %v1197_v63 = vmul.f32 %v11199_v57, %v12993_v39  ;;  %v1279_v9 = vadd.f32 %v1276_v53, %v1271_v2 }
 0x381   : > { %v13048_v30 = vpack.c.bf16 %v1278_v59, %v1277_v58  ;;  %v1272_v0 = vmul.f32 %v1268_v43, %v1264_v61 }
 0x382   : > { %v11201_v1 = vpop.eup %11200  ;;  %v1205_v4 = vmul.f32 %v1204_v60, %v1197_v63 }
 0x383   : > { %v11203_v3 = vpop.eup %11202  ;;  %1527 = vmatmul.mubr.bf16.vlgmr.msra.gmra.mrb[0].mxu1 %v13048_v30  ;;  %v1198_v24 = vmul.f32 %v11201_v1, %v12995_v40  ;;  %v1280_v8 = vadd.f32 %v1276_v53, %v1272_v0 }
 0x384   : > { %1536 = vmatprep.mubr.bf16.mxu1 %v12201_v6  ;;  %v1199_v32 = vmul.f32 %v11203_v3, %v13001_v47  ;;  %v1213_v10 = vadd.f32 %v1212_v5, %v1205_v4 }
 0x385   : > { %v1206_v7 = vmul.f32 %v1204_v60, %v1198_v24  ;;  %v13058_v15 = vpack.c.bf16 %v1280_v8, %v1279_v9 }
 0x386   : > { %v11205_v39 = vpop.eup %11204  ;;  %v1207_v13 = vmul.f32 %v1204_v60, %v1199_v32 }
 0x387   : > { %v1214_v11 = vadd.f32 %v1212_v5, %v1206_v7  ;;  %v1200_v12 = vmul.f32 %v11205_v39, %v13003_v48 }
 0x388   : > { %v1215_v16 = vadd.f32 %v1212_v5, %v1207_v13 }
 0x389   : > { %v13056_v14 = vpack.c.bf16 %v1214_v11, %v1213_v10  ;;  %v1208_v40 = vmul.f32 %v1204_v60, %v1200_v12 }
 0x38b   : > { %10029 = vmatprep.mubr.bf16.mxu0 %v13056_v14  ;;  %1537 = vmatmul.mubr.bf16.gmra.mrb[4].mxu1 %v13058_v15  ;;  %v1216_v47 = vadd.f32 %v1212_v5, %v1208_v40 }
 0x38c   : > { %10035 = vmatprep.mubr.msk.bf16.mxu1 %vm12203_vm0, %v12202_v18 }
 0x38d   : > { %v13062_v17 = vpack.c.bf16 %v1216_v47, %v1215_v16 }
 0x38f   : > { %10030 = vmatmul.mubr.bf16.vlgmr.msra.gmra.mrb[0].mxu0 %v13062_v17 }
 0x390   : > { %10041 = vmatprep.mubr.msk.bf16.mxu0 %vm12203_vm0, %v12202_v18 }
 0x456   : > { %v1528_v48 = vpop.f32.mrb[0].mxu1 }
 0x457   : > { %v1530_v19 = vpop.f32.mrb[1].mxu1 }
 0x458   : > { %v1532_v20 = vpop.f32.mrb[2].mxu1 }
 0x459   : > { %v13071_v22 = vpack.c.bf16 %v1532_v20, %v1528_v48  ;;  %v1534_v25 = vpop.f32.mrb[3].mxu1 }
 0x45a   : > { %v13073_v26 = vpack.c.bf16 %v1534_v25, %v1530_v19 }
 0x45b   : > { %v1579_v27 = vsel %vm1574_vm1, %v13071_v22, 0 }
 0x45c   : > { %10034 = vmatpush3.bf16.xpose.msra.mxu1 %v1579_v27 }
 0x45d   : > { %10045 = vmatprep.subr.bf16.mxu1 %v12202_v18 }
 0x45e   : > { %v1538_v28 = vpop.f32.mrb[4].mxu1 }
 0x45f   : > { %v1540_v29 = vpop.f32.mrb[5].mxu1 }
 0x460   : > { %v1542_v33 = vpop.f32.mrb[6].mxu1 }
 0x461   : > { %v13078_v34 = vpack.c.bf16 %v1542_v33, %v1538_v28  ;;  %v1544_v35 = vpop.f32.mrb[7].mxu1 }
 0x462   : > { %v13080_v36 = vpack.c.bf16 %v1544_v35, %v1540_v29  ;;  %v10031_v37 = vpop.f32.mrb[0].mxu0 }
 0x463   : > { %v1381_v38 = vpop.f32.mrb[1].mxu0  ;;  %v1626_v41 = vsel %vm1574_vm1, %v13078_v34, 0  ;;  %v1566_v43 = vmul.f32 0.17677669, %v10031_v37 }
 0x464   : > { %v10032_v42 = vpop.f32.mrb[2].mxu0  ;;  %10040 = vmatpush3.bf16.xpose.msra.mxu0 %v1626_v41  ;;  %v1564_v46 = vmul.f32 0.17677669, %v1381_v38 }
 0x465   : > { %v1567_v44 = vmul.f32 0.17677669, %v10032_v42  ;;  %v1384_v45 = vpop.f32.mrb[3].mxu0  ;;  %10051 = vmatprep.subr.bf16.mxu0 %v12202_v18 }
 0x466   : > { %v1565_v49 = vmul.f32 0.17677669, %v1384_v45 }
 0x467   : > { %v13085_v50 = vpack.c.bf16 %v1567_v44, %v1566_v43 }
 0x468   : > { %v13087_v51 = vpack.c.bf16 %v1565_v49, %v1564_v46 }
 0x46a   : > { %10036 = vmatmul.mubr.msk.bf16.vlgmr.msra.gmra.mrb[8].mxu1 %vm1574_vm1, %v13087_v51 }
 0x46b   : > { %10046 = vmatpush3.bf16.msra.mxu1 %v13073_v26  ;;  %10042 = vmatmul.mubr.msk.bf16.vlgmr.msra.gmra.mrb[4].mxu0 %vm1574_vm1, %v13085_v50 }
 0x46c   : > { %10052 = vmatpush3.bf16.msra.mxu0 %v13080_v36  ;;  %10047 = vmatprep.mubr.msk.bf16.mxu1 %vm12203_vm0, %v12202_v18 }
 0x46d   : > { %10057 = vmatprep.subr.bf16.mxu1 %v12202_v18  ;;  %10053 = vmatprep.mubr.msk.bf16.mxu0 %vm12203_vm0, %v12202_v18 }
 0x46e   : > { %10063 = vmatprep.subr.bf16.mxu0 %v12202_v18 }
 0x53d   : > { %v1615_v52 = vpop.f32.mrb[8].mxu1 }
 0x53e   : > { %v10037_v53 = vpop.f32.mrb[9].mxu1  ;;  %v1662_v54 = vpop.f32.mrb[4].mxu0  ;;  %v1670_v55 = vsel %vm1669_vm2, %v1615_v52, -inf }
 0x53f   : > { %v10043_v56 = vpop.f32.mrb[5].mxu0  ;;  %1671 = vmax.xlane.f32.xlu0 %v1670_v55  ;;  %v1618_v23 = vpop.f32.mrb[10].mxu1  ;;  %v1676_v61 = vsel %vm1669_vm2, %v1662_v54, -inf }
 0x540   : > { %v10038_v57 = vpop.f32.mrb[11].mxu1  ;;  %v1665_v58 = vpop.f32.mrb[6].mxu0  ;;  %v1673_v59 = vsel %vm1669_vm2, %v1618_v23, -inf }
 0x541   : > { %v10044_v60 = vpop.f32.mrb[7].mxu0  ;;  %1674 = vmax.xlane.f32.xlu1 %v1673_v59  ;;  %v1679_v62 = vsel %vm1669_vm2, %v1665_v58, -inf }
 0x543   : > { %1677 = vmax.xlane.f32.xlu0 %v1676_v61 }
 0x545   : > { %1680 = vmax.xlane.f32.xlu1 %v1679_v62 }
 0x5cc   : > { %v1672_v63 = vpop.xlane.xlu0 %1671 }
 0x5cd   : > { %v1682_v0 = vsub.f32 %v1615_v52, %v1672_v63 }
 0x5ce   : > { %v1675_v1 = vpop.xlane.xlu1 %1674 }
 0x5cf   : > { %v1686_v2 = vmul.f32 1.442695, %v1682_v0  ;;  %v1683_v3 = vsub.f32 %v1618_v23, %v1675_v1 }
 0x5d0   : > { %v1678_v24 = vpop.xlane.xlu0 %1677 }
 0x5d1   : > { %11206 = vpow2.f32 %v1686_v2  ;;  %v1688_v4 = vmul.f32 1.442695, %v1683_v3  ;;  %v1684_v5 = vsub.f32 %v1662_v54, %v1678_v24 }
 0x5d2   : > { %v1681_v12 = vpop.xlane.xlu1 %1680 }
 0x5d3   : > { %11208 = vpow2.f32 %v1688_v4  ;;  %v1690_v32 = vmul.f32 1.442695, %v1684_v5  ;;  %v1685_v13 = vsub.f32 %v1665_v58, %v1681_v12 }
 0x5d5   : > { %11210 = vpow2.f32 %v1690_v32  ;;  %v1692_v40 = vmul.f32 1.442695, %v1685_v13 }
 0x5d7   : > { %11212 = vpow2.f32 %v1692_v40 }
 0x5db   : > { %v11207_v7 = vpop.eup %11206 }
 0x5dc   : > { %v1694_v8 = vsel %vm1669_vm2, %v11207_v7, 0.0 }
 0x5dd   : > { %v11209_v39 = vpop.eup %11208  ;;  %1695 = vadd.xlane.f32.xlu0 %v1694_v8 }
 0x5de   : > { %v1697_v9 = vsel %vm1669_vm2, %v11209_v39, 0.0 }
 0x5df   : > { %v11211_v10 = vpop.eup %11210  ;;  %1698 = vadd.xlane.f32.xlu1 %v1697_v9 }
 0x5e0   : > { %v1700_v11 = vsel %vm1669_vm2, %v11211_v10, 0.0 }
 0x5e1   : > { %1701 = vadd.xlane.f32.xlu0 %v1700_v11  ;;  %v11213_v16 = vpop.eup %11212 }
 0x5e2   : > { %v1703_v47 = vsel %vm1669_vm2, %v11213_v16, 0.0 }
 0x5f0   : > { %1861 = vrot.lane.b32.xlu1 %v13078_v34, %s12204_s13 }
 0x5f7   : > { %1808 = vrot.lane.b32.xlu0 %v13071_v22, %s12204_s13 }
 0x614   : > { %1704 = vadd.xlane.f32.xlu1 %v1703_v47 }
 0x625   : > { %1805 = vrot.lane.b32.xlu1 %v13087_v51, %s12204_s13 }
 0x629   : > { %1858 = vrot.lane.b32.xlu1 %v13085_v50, %s12204_s13 }
 0x66a   : > { %v1696_v48 = vpop.xlane.xlu0 %1695 }
 0x66b   : > { %11214 = vrcp.f32 %v1696_v48 }
 0x66c   : > { %v1699_v19 = vpop.xlane.xlu1 %1698 }
 0x66d   : > { %11216 = vrcp.f32 %v1699_v19 }
 0x66e   : > { %v1702_v20 = vpop.xlane.xlu0 %1701 }
 0x66f   : > { %11218 = vrcp.f32 %v1702_v20 }
 0x670   : > { %v1862_v38 = vpop.permute.xlu1 %1861 }
 0x671   : > { %v1867_v52 = vsel %vm1574_vm1, %v1862_v38, 0 }
 0x672   : > { %v1809_v33 = vpop.permute.xlu0 %1808 }
 0x673   : > { %v1814_v37 = vsel %vm1574_vm1, %v1809_v33, 0 }
 0x675   : > { %v11215_v25 = vpop.eup %11214 }
 0x676   : > { %v1710_v28 = vmul.f32 %v11215_v25, %v11207_v7 }
 0x677   : > { %v11217_v27 = vpop.eup %11216 }
 0x678   : > { %v1711_v29 = vmul.f32 %v11217_v27, %v11209_v39 }
 0x679   : > { %v11219_v43 = vpop.eup %11218 }
 0x67a   : > { %v1714_v35 = vpack.c.bf16 %v1711_v29, %v1710_v28  ;;  %v1712_v45 = vmul.f32 %v11219_v43, %v11211_v10 }
 0x67c   : > { %10048 = vmatmul.mubr.msk.bf16.vlgmr.msra.gmra.mrb[12].mxu1 %vm1669_vm2, %v1714_v35 }
 0x67d   : > { %10058 = vmatpush3.bf16.xpose.msra.mxu1 %v1814_v37  ;;  %10059 = vmatprep.mubr.msk.bf16.mxu1 %vm12203_vm0, %v12202_v18 }
 0x67e   : > { %10069 = vmatprep.subr.bf16.mxu1 %v12202_v18 }
 0x6a1   : > { %v1705_v41 = vpop.xlane.xlu1 %1704 }
 0x6a2   : > { %11220 = vrcp.f32 %v1705_v41 }
 0x6a5   : > { %v1806_v42 = vpop.permute.xlu1 %1805 }
 0x6a6   : > { %10060 = vmatmul.mubr.msk.bf16.vlgmr.msra.gmra.mrb[16].mxu1 %vm1574_vm1, %v1806_v42 }
 0x6a7   : > { %10071 = vmatprep.mubr.msk.bf16.mxu1 %vm12203_vm0, %v12202_v18 }
 0x6a9   : > { %v1859_v53 = vpop.permute.xlu1 %1858 }
 0x6ac   : > { %v11221_v44 = vpop.eup %11220 }
 0x6ad   : > { %v1713_v46 = vmul.f32 %v11221_v44, %v11213_v16 }
 0x6af   : > { %v1715_v49 = vpack.c.bf16 %v1713_v46, %v1712_v45 }
 0x6b1   : > { %10054 = vmatmul.mubr.msk.bf16.vlgmr.msra.gmra.mrb[8].mxu0 %vm1669_vm2, %v1715_v49 }
 0x6b2   : > { %10064 = vmatpush3.bf16.xpose.msra.mxu0 %v1867_v52  ;;  %10065 = vmatprep.mubr.msk.bf16.mxu0 %vm12203_vm0, %v12202_v18 }
 0x6b3   : > { %10075 = vmatprep.subr.bf16.mxu0 %v12202_v18 }
 0x6b9   : > { %10066 = vmatmul.mubr.msk.bf16.vlgmr.msra.gmra.mrb[12].mxu0 %vm1574_vm1, %v1859_v53 }
 0x6ba   : > { %10077 = vmatprep.mubr.msk.bf16.mxu0 %vm12203_vm0, %v12202_v18 }
 0x74f   : > { %v13133_v54 = vpop.f32.mrb[12].mxu1 }
 0x750   : > { %v10049_v55 = vpop.f32.mrb[13].mxu1 }
 0x751   : > { %v13135_v56 = vpop.f32.mrb[14].mxu1 }
 0x752   : > { %v10050_v23 = vpop.f32.mrb[15].mxu1 }
 0x779   : > { %v1850_v57 = vpop.f32.mrb[16].mxu1 }
 0x77a   : > { %v10061_v58 = vpop.f32.mrb[17].mxu1  ;;  %v1910_v59 = vsel %vm1669_vm2, %v1850_v57, -inf }
 0x77b   : > { %1911 = vmax.xlane.f32.xlu0 %v1910_v59  ;;  %v1853_v60 = vpop.f32.mrb[18].mxu1 }
 0x77c   : > { %v10062_v61 = vpop.f32.mrb[19].mxu1  ;;  %v1913_v62 = vsel %vm1669_vm2, %v1853_v60, -inf }
 0x77d   : > { %1914 = vmax.xlane.f32.xlu1 %v1913_v62 }
 0x784   : > { %v13139_v63 = vpop.f32.mrb[8].mxu0 }
 0x785   : > { %v10055_v0 = vpop.f32.mrb[9].mxu0 }
 0x786   : > { %v13141_v1 = vpop.f32.mrb[10].mxu0 }
 0x787   : > { %v10056_v2 = vpop.f32.mrb[11].mxu0 }
 0x78c   : > { %v1903_v3 = vpop.f32.mrb[12].mxu0 }
 0x78d   : > { %v10067_v24 = vpop.f32.mrb[13].mxu0  ;;  %v1916_v4 = vsel %vm1669_vm2, %v1903_v3, -inf }
 0x78e   : > { %v1906_v5 = vpop.f32.mrb[14].mxu0  ;;  %1917 = vmax.xlane.f32.xlu0 %v1916_v4 }
 0x78f   : > { %v10068_v32 = vpop.f32.mrb[15].mxu0  ;;  %v1919_v7 = vsel %vm1669_vm2, %v1906_v5, -inf }
 0x792   : > { %1920 = vmax.xlane.f32.xlu0 %v1919_v7 }
 0x808   : > { %v1912_v8 = vpop.xlane.xlu0 %1911 }
 0x809   : > { %v1922_v39 = vsub.f32 %v1850_v57, %v1912_v8 }
 0x80a   : > { %v1915_v9 = vpop.xlane.xlu1 %1914 }
 0x80b   : > { %v1926_v10 = vmul.f32 1.442695, %v1922_v39  ;;  %v1923_v11 = vsub.f32 %v1853_v60, %v1915_v9 }
 0x80d   : > { %11222 = vpow2.f32 %v1926_v10  ;;  %v1928_v12 = vmul.f32 1.442695, %v1923_v11 }
 0x80f   : > { %11224 = vpow2.f32 %v1928_v12 }
 0x817   : > { %v11223_v13 = vpop.eup %11222 }
 0x818   : > { %v1934_v40 = vsel %vm1669_vm2, %v11223_v13, 0.0 }
 0x819   : > { %v11225_v16 = vpop.eup %11224  ;;  %1935 = vadd.xlane.f32.xlu0 %v1934_v40 }
 0x81a   : > { %v1937_v47 = vsel %vm1669_vm2, %v11225_v16, 0.0 }
 0x81b   : > { %v1918_v48 = vpop.xlane.xlu0 %1917  ;;  %1938 = vadd.xlane.f32.xlu1 %v1937_v47 }
 0x81c   : > { %v1924_v19 = vsub.f32 %v1903_v3, %v1918_v48 }
 0x81e   : > { %v1930_v20 = vmul.f32 1.442695, %v1924_v19 }
 0x81f   : > { %v1921_v28 = vpop.xlane.xlu0 %1920 }
 0x820   : > { %11226 = vpow2.f32 %v1930_v20  ;;  %v1925_v29 = vsub.f32 %v1906_v5, %v1921_v28 }
 0x822   : > { %v1932_v33 = vmul.f32 1.442695, %v1925_v29 }
 0x824   : > { %11228 = vpow2.f32 %v1932_v33 }
 0x82a   : > { %v11227_v25 = vpop.eup %11226 }
 0x82b   : > { %v1940_v27 = vsel %vm1669_vm2, %v11227_v25, 0.0 }
 0x82c   : > { %1941 = vadd.xlane.f32.xlu0 %v1940_v27  ;;  %2005 = vrot.lane.b32.xlu1 %v13080_v36, %s12204_s13 }
 0x82e   : > { %v11229_v35 = vpop.eup %11228 }
 0x82f   : > { %v1943_v37 = vsel %vm1669_vm2, %v11229_v35, 0.0 }
 0x830   : > { %2054 = vrot.lane.b32.xlu1 %v13071_v22, %s12205_s2 }
 0x842   : > { %1957 = vrot.lane.b32.xlu0 %v13073_v26, %s12204_s13 }
 0x846   : > { %2052 = vrot.lane.b32.xlu0 %v13087_v51, %s12205_s2 }
 0x854   : > { %1944 = vadd.xlane.f32.xlu1 %v1943_v37 }
 0x865   : > { %2105 = vrot.lane.b32.xlu1 %v13078_v34, %s12205_s2 }
 0x869   : > { %2103 = vrot.lane.b32.xlu1 %v13085_v50, %s12205_s2 }
 0x8a6   : > { %v1936_v42 = vpop.xlane.xlu0 %1935 }
 0x8a8   : > { %v1939_v38 = vpop.xlane.xlu1 %1938 }
 0x8a9   : > { %11230 = vrcp.f32 %v1939_v38 }
 0x8aa   : > { %11232 = vrcp.f32 %v1936_v42 }
 0x8ac   : > { %v2006_v41 = vpop.permute.xlu1 %2005 }
 0x8ad   : > { %10076 = vmatpush3.bf16.msra.mxu0 %v2006_v41 }
 0x8ae   : > { %10087 = vmatprep.subr.bf16.mxu0 %v12202_v18 }
 0x8b0   : > { %v2055_v55 = vpop.permute.xlu1 %2054 }
 0x8b1   : > { %v2060_v23 = vsel %vm1574_vm1, %v2055_v55, 0 }
 0x8b3   : > { %v11231_v43 = vpop.eup %11230 }
 0x8b4   : > { %v11233_v45 = vpop.eup %11232  ;;  %v1951_v46 = vmul.f32 %v11231_v43, %v11225_v16 }
 0x8b5   : > { %v1950_v49 = vmul.f32 %v11233_v45, %v11223_v13 }
 0x8b7   : > { %v1954_v53 = vpack.c.bf16 %v1951_v46, %v1950_v49 }
 0x8b9   : > { %v1942_v44 = vpop.xlane.xlu0 %1941 }
 0x8ba   : > { %11234 = vrcp.f32 %v1942_v44 }
 0x8bd   : > { %v1958_v52 = vpop.permute.xlu0 %1957 }
 0x8be   : > { %10070 = vmatpush3.bf16.msra.mxu1 %v1958_v52 }
 0x8bf   : > { %10081 = vmatprep.subr.bf16.mxu1 %v12202_v18 }
 0x8c1   : > { %10072 = vmatmul.mubr.msk.bf16.vlgmr.msra.gmra.mrb[20].mxu1 %vm1669_vm2, %v1954_v53  ;;  %v2053_v57 = vpop.permute.xlu0 %2052 }
 0x8c2   : > { %10083 = vmatprep.mubr.msk.bf16.mxu1 %vm12203_vm0, %v12202_v18 }
 0x8c4   : > { %v11235_v59 = vpop.eup %11234 }
 0x8c5   : > { %v1952_v61 = vmul.f32 %v11235_v59, %v11227_v25 }
 0x8c7   : > { %10082 = vmatpush3.bf16.xpose.msra.mxu1 %v2060_v23 }
 0x8c8   : > { %10093 = vmatprep.subr.bf16.mxu1 %v12202_v18 }
 0x8ce   : > { %10084 = vmatmul.mubr.msk.bf16.vlgmr.msra.gmra.mrb[24].mxu1 %vm1574_vm1, %v2053_v57 }
 0x8cf   : > { %10095 = vmatprep.mubr.msk.bf16.mxu1 %vm12203_vm0, %v12202_v18 }
 0x8e1   : > { %v1945_v58 = vpop.xlane.xlu1 %1944 }
 0x8e2   : > { %11236 = vrcp.f32 %v1945_v58 }
 0x8e5   : > { %v2106_v0 = vpop.permute.xlu1 %2105 }
 0x8e6   : > { %v2111_v3 = vsel %vm1574_vm1, %v2106_v0, 0 }
 0x8e9   : > { %v2104_v24 = vpop.permute.xlu1 %2103 }
 0x8ec   : > { %v11237_v60 = vpop.eup %11236 }
 0x8ed   : > { %v1953_v62 = vmul.f32 %v11237_v60, %v11229_v35 }
 0x8ef   : > { %v1955_v2 = vpack.c.bf16 %v1953_v62, %v1952_v61 }
 0x8f1   : > { %10078 = vmatmul.mubr.msk.bf16.vlgmr.msra.gmra.mrb[16].mxu0 %vm1669_vm2, %v1955_v2 }
 0x8f2   : > { %10088 = vmatpush3.bf16.xpose.msra.mxu0 %v2111_v3  ;;  %10089 = vmatprep.mubr.msk.bf16.mxu0 %vm12203_vm0, %v12202_v18 }
 0x8f3   : > { %10099 = vmatprep.subr.bf16.mxu0 %v12202_v18 }
 0x8f9   : > { %10090 = vmatmul.mubr.msk.bf16.vlgmr.msra.gmra.mrb[20].mxu0 %vm1574_vm1, %v2104_v24 }
 0x8fa   : > { %10101 = vmatprep.mubr.msk.bf16.mxu0 %vm12203_vm0, %v12202_v18 }
 0x994   : > { %v13179_v4 = vpop.f32.mrb[20].mxu1 }
 0x995   : > { %v10073_v5 = vpop.f32.mrb[21].mxu1 }
 0x996   : > { %v13181_v32 = vpop.f32.mrb[22].mxu1 }
 0x997   : > { %v10798_v7 = vpack.i.bf16 %v13181_v32, %v13179_v4  ;;  %v10074_v8 = vpop.f32.mrb[23].mxu1 }
 0x9a1   : > { %v2096_v39 = vpop.f32.mrb[24].mxu1 }
 0x9a2   : > { %v10085_v9 = vpop.f32.mrb[25].mxu1  ;;  %v2154_v10 = vsel %vm1669_vm2, %v2096_v39, -inf }
 0x9a3   : > { %2155 = vmax.xlane.f32.xlu0 %v2154_v10  ;;  %v2099_v11 = vpop.f32.mrb[26].mxu1 }
 0x9a4   : > { %v10086_v12 = vpop.f32.mrb[27].mxu1  ;;  %v2157_v13 = vsel %vm1669_vm2, %v2099_v11, -inf }
 0x9a5   : > { %2158 = vmax.xlane.f32.xlu1 %v2157_v13 }
 0x9c4   : > { %v13187_v40 = vpop.f32.mrb[16].mxu0 }
 0x9c5   : > { %v10079_v16 = vpop.f32.mrb[17].mxu0 }
 0x9c6   : > { %v13189_v47 = vpop.f32.mrb[18].mxu0 }
 0x9c7   : > { %v10803_v48 = vpack.i.bf16 %v13189_v47, %v13187_v40  ;;  %v10080_v19 = vpop.f32.mrb[19].mxu0  ;;  %v10950_v47 = vld [vmem:[%s12946_s7 + $0x40] sm:$0xff]  }
 0x9cc   : > { %v2147_v20 = vpop.f32.mrb[20].mxu0 }
 0x9cd   : > { %v10091_v25 = vpop.f32.mrb[21].mxu0  ;;  %v2160_v27 = vsel %vm1669_vm2, %v2147_v20, -inf }
 0x9ce   : > { %v2150_v28 = vpop.f32.mrb[22].mxu0  ;;  %2161 = vmax.xlane.f32.xlu0 %v2160_v27 }
 0x9cf   : > { %v10092_v29 = vpop.f32.mrb[23].mxu0  ;;  %v2163_v33 = vsel %vm1669_vm2, %v2150_v28, -inf }
 0x9d2   : > { %2164 = vmax.xlane.f32.xlu0 %v2163_v33 }
 0xa30   : > { %v2156_v35 = vpop.xlane.xlu0 %2155 }
 0xa31   : > { %v2166_v37 = vsub.f32 %v2096_v39, %v2156_v35 }
 0xa32   : > { %v2159_v38 = vpop.xlane.xlu1 %2158 }
 0xa33   : > { %v2170_v41 = vmul.f32 1.442695, %v2166_v37  ;;  %v2167_v42 = vsub.f32 %v2099_v11, %v2159_v38 }
 0xa35   : > { %11238 = vpow2.f32 %v2170_v41  ;;  %v2172_v43 = vmul.f32 1.442695, %v2167_v42 }
 0xa37   : > { %11240 = vpow2.f32 %v2172_v43 }
 0xa3f   : > { %v11239_v44 = vpop.eup %11238 }
 0xa40   : > { %v2178_v45 = vsel %vm1669_vm2, %v11239_v44, 0.0 }
 0xa41   : > { %v11241_v46 = vpop.eup %11240  ;;  %2179 = vadd.xlane.f32.xlu0 %v2178_v45 }
 0xa42   : > { %v2181_v49 = vsel %vm1669_vm2, %v11241_v46, 0.0 }
 0xa43   : > { %2182 = vadd.xlane.f32.xlu1 %v2181_v49 }
 0xa54   : > { %2247 = vrot.lane.b32.xlu1 %v13080_v36, %s12205_s2 }
 0xa58   : > { %2296 = vrot.lane.b32.xlu1 %v13071_v22, %s12206_s9 }
 0xa5b   : > { %v2162_v52 = vpop.xlane.xlu0 %2161 }
 0xa5c   : > { %v2168_v53 = vsub.f32 %v2147_v20, %v2162_v52 }
 0xa5e   : > { %v2174_v55 = vmul.f32 1.442695, %v2168_v53 }
 0xa5f   : > { %v2165_v23 = vpop.xlane.xlu0 %2164 }
 0xa60   : > { %11242 = vpow2.f32 %v2174_v55  ;;  %v2169_v57 = vsub.f32 %v2150_v28, %v2165_v23 }
 0xa62   : > { %v2176_v59 = vmul.f32 1.442695, %v2169_v57 }
 0xa64   : > { %11244 = vpow2.f32 %v2176_v59 }
 0xa6a   : > { %v11243_v58 = vpop.eup %11242 }
 0xa6b   : > { %v2184_v60 = vsel %vm1669_vm2, %v11243_v58, 0.0 }
 0xa6c   : > { %2185 = vadd.xlane.f32.xlu0 %v2184_v60 }
 0xa6e   : > { %v11245_v61 = vpop.eup %11244 }
 0xa6f   : > { %v2187_v62 = vsel %vm1669_vm2, %v11245_v61, 0.0 }
 0xa7c   : > { %2188 = vadd.xlane.f32.xlu1 %v2187_v62 }
 0xa82   : > { %2200 = vrot.lane.b32.xlu0 %v13073_v26, %s12205_s2 }
 0xa86   : > { %2294 = vrot.lane.b32.xlu0 %v13087_v51, %s12206_s9 }
 0xa8d   : > { %2347 = vrot.lane.b32.xlu1 %v13078_v34, %s12206_s9 }
 0xa91   : > { %2345 = vrot.lane.b32.xlu1 %v13085_v50, %s12206_s9 }
 0xace   : > { %v2180_v2 = vpop.xlane.xlu0 %2179 }
 0xad0   : > { %v2183_v22 = vpop.xlane.xlu1 %2182 }
 0xad1   : > { %11246 = vrcp.f32 %v2183_v22 }
 0xad2   : > { %11248 = vrcp.f32 %v2180_v2 }
 0xad4   : > { %v2248_v0 = vpop.permute.xlu1 %2247 }
 0xad5   : > { %10100 = vmatpush3.bf16.msra.mxu0 %v2248_v0 }
 0xad6   : > { %10111 = vmatprep.subr.bf16.mxu0 %v12202_v18 }
 0xad8   : > { %v2297_v34 = vpop.permute.xlu1 %2296 }
 0xad9   : > { %v2302_v50 = vsel %vm1574_vm1, %v2297_v34, 0 }
 0xadb   : > { %v11247_v3 = vpop.eup %11246 }
 0xadc   : > { %v11249_v5 = vpop.eup %11248  ;;  %v2195_v8 = vmul.f32 %v11247_v3, %v11241_v46 }
 0xadd   : > { %v2194_v39 = vmul.f32 %v11249_v5, %v11239_v44 }
 0xadf   : > { %v2198_v9 = vpack.c.bf16 %v2195_v8, %v2194_v39 }
 0xaf9   : > { %v2186_v24 = vpop.xlane.xlu0 %2185 }
 0xafa   : > { %11250 = vrcp.f32 %v2186_v24 }
 0xafd   : > { %v2201_v51 = vpop.permute.xlu0 %2200 }
 0xafe   : > { %10094 = vmatpush3.bf16.msra.mxu1 %v2201_v51 }
 0xaff   : > { %10105 = vmatprep.subr.bf16.mxu1 %v12202_v18 }
 0xb01   : > { %10096 = vmatmul.mubr.msk.bf16.vlgmr.msra.gmra.mrb[28].mxu1 %vm1669_vm2, %v2198_v9  ;;  %v2295_v11 = vpop.permute.xlu0 %2294 }
 0xb02   : > { %10107 = vmatprep.mubr.msk.bf16.mxu1 %vm12203_vm0, %v12202_v18 }
 0xb04   : > { %v11251_v12 = vpop.eup %11250 }
 0xb05   : > { %v2196_v16 = vmul.f32 %v11251_v12, %v11243_v58 }
 0xb07   : > { %10106 = vmatpush3.bf16.xpose.msra.mxu1 %v2302_v50 }
 0xb08   : > { %10117 = vmatprep.subr.bf16.mxu1 %v12202_v18 }
 0xb09   : > { %v2189_v10 = vpop.xlane.xlu1 %2188 }
 0xb0a   : > { %11252 = vrcp.f32 %v2189_v10 }
 0xb0d   : > { %v2348_v20 = vpop.permute.xlu1 %2347 }
 0xb0e   : > { %10108 = vmatmul.mubr.msk.bf16.vlgmr.msra.gmra.mrb[32].mxu1 %vm1574_vm1, %v2295_v11  ;;  %v2353_v27 = vsel %vm1574_vm1, %v2348_v20, 0 }
 0xb0f   : > { %10119 = vmatprep.mubr.msk.bf16.mxu1 %vm12203_vm0, %v12202_v18 }
 0xb11   : > { %v2346_v28 = vpop.permute.xlu1 %2345 }
 0xb14   : > { %v11253_v13 = vpop.eup %11252 }
 0xb15   : > { %v2197_v19 = vmul.f32 %v11253_v13, %v11245_v61 }
 0xb17   : > { %v2199_v25 = vpack.c.bf16 %v2197_v19, %v2196_v16 }
 0xb19   : > { %10102 = vmatmul.mubr.msk.bf16.vlgmr.msra.gmra.mrb[24].mxu0 %vm1669_vm2, %v2199_v25 }
 0xb1a   : > { %10112 = vmatpush3.bf16.xpose.msra.mxu0 %v2353_v27  ;;  %10113 = vmatprep.mubr.msk.bf16.mxu0 %vm12203_vm0, %v12202_v18 }
 0xb1b   : > { %10123 = vmatprep.subr.bf16.mxu0 %v12202_v18 }
 0xb21   : > { %10114 = vmatmul.mubr.msk.bf16.vlgmr.msra.gmra.mrb[28].mxu0 %vm1574_vm1, %v2346_v28 }
 0xb22   : > { %10125 = vmatprep.mubr.msk.bf16.mxu0 %vm12203_vm0, %v12202_v18 }
 0xbd4   : > { %v2240_v29 = vpop.f32.mrb[28].mxu1 }
 0xbd5   : > { %v10097_v33 = vpop.f32.mrb[29].mxu1 }
 0xbd6   : > { %v2243_v35 = vpop.f32.mrb[30].mxu1 }
 0xbd7   : > { %v10808_v37 = vpack.i.bf16 %v2243_v35, %v2240_v29  ;;  %v10098_v38 = vpop.f32.mrb[31].mxu1 }
 0xbe1   : > { %v2338_v41 = vpop.f32.mrb[32].mxu1 }
 0xbe2   : > { %v10109_v42 = vpop.f32.mrb[33].mxu1  ;;  %v2396_v43 = vsel %vm1669_vm2, %v2338_v41, -inf }
 0xbe3   : > { %2397 = vmax.xlane.f32.xlu0 %v2396_v43  ;;  %v2341_v44 = vpop.f32.mrb[34].mxu1  ;;  %v10951_v43 = vld [vmem:[%s12946_s7 + $0x48] sm:$0xff]  }
 0xbe4   : > { %v10110_v45 = vpop.f32.mrb[35].mxu1  ;;  %v2399_v46 = vsel %vm1669_vm2, %v2341_v44, -inf }
 0xbe5   : > { %2400 = vmax.xlane.f32.xlu1 %v2399_v46  ;;  %v10953_v45 = vld [vmem:[%s12946_s7 + $0x58] sm:$0xff]   ;;  %v10954_v46 = vld [vmem:[%s12946_s7 + $0x60] sm:$0xff]  }
 0xbec   : > { %v2287_v49 = vpop.f32.mrb[24].mxu0 }
 0xbed   : > { %v10103_v52 = vpop.f32.mrb[25].mxu0 }
 0xbee   : > { %v2290_v53 = vpop.f32.mrb[26].mxu0  ;;  %v10956_v52 = vld [vmem:[%s12946_s7 + $0x70] sm:$0xff]  }
 0xbef   : > { %v10813_v55 = vpack.i.bf16 %v2290_v53, %v2287_v49  ;;  %v10104_v23 = vpop.f32.mrb[27].mxu0  ;;  %v10955_v49 = vld [vmem:[%s12946_s7 + $0x68] sm:$0xff]   ;;  %v10958_v53 = vld [vmem:[%s12950_s26] sm:$0xff]  }
 0xbf0   : > { %v10960_v23 = vld [vmem:[%s12950_s26 + $0x10] sm:$0xff]  }
 0xbf4   : > { %v2389_v57 = vpop.f32.mrb[28].mxu0 }
 0xbf5   : > { %v10115_v58 = vpop.f32.mrb[29].mxu0  ;;  %v2402_v59 = vsel %vm1669_vm2, %v2389_v57, -inf }
 0xbf6   : > { %v2392_v60 = vpop.f32.mrb[30].mxu0  ;;  %2403 = vmax.xlane.f32.xlu0 %v2402_v59  ;;  %v10962_v58 = vld [vmem:[%s12950_s26 + $0x20] sm:$0xff]   ;;  %v10963_v59 = vld [vmem:[%s12950_s26 + $0x28] sm:$0xff]  }
 0xbf7   : > { %v10116_v61 = vpop.f32.mrb[31].mxu0  ;;  %v2405_v62 = vsel %vm1669_vm2, %v2392_v60, -inf }
 0xbfa   : > { %2406 = vmax.xlane.f32.xlu0 %v2405_v62 }
 0xc70   : > { %v2398_v22 = vpop.xlane.xlu0 %2397 }
 0xc71   : > { %v2408_v0 = vsub.f32 %v2338_v41, %v2398_v22 }
 0xc72   : > { %v2401_v2 = vpop.xlane.xlu1 %2400 }
 0xc73   : > { %v2412_v3 = vmul.f32 1.442695, %v2408_v0  ;;  %v2409_v24 = vsub.f32 %v2341_v44, %v2401_v2  ;;  %v10952_v44 = vld [vmem:[%s12946_s7 + $0x50] sm:$0xff]   ;;  %v10965_v2 = vld [vmem:[%s12950_s26 + $0x38] sm:$0xff]  }
 0xc75   : > { %11254 = vpow2.f32 %v2412_v3  ;;  %v2414_v5 = vmul.f32 1.442695, %v2409_v24  ;;  %v10968_v3 = vld [vmem:[%s12948_s3 + $0x84] ss:$8 sps:$4 sm:$0xff]  }
 0xc77   : > { %11256 = vpow2.f32 %v2414_v5 }
 0xc7f   : > { %v11255_v8 = vpop.eup %11254 }
 0xc80   : > { %v2420_v39 = vsel %vm1669_vm2, %v11255_v8, 0.0 }
 0xc81   : > { %v11257_v51 = vpop.eup %11256  ;;  %2421 = vadd.xlane.f32.xlu0 %v2420_v39 }
 0xc82   : > { %v2423_v9 = vsel %vm1669_vm2, %v11257_v51, 0.0 }
 0xc83   : > { %v2404_v34 = vpop.xlane.xlu0 %2403  ;;  %2424 = vadd.xlane.f32.xlu1 %v2423_v9 }
 0xc84   : > { %v2410_v50 = vsub.f32 %v2389_v57, %v2404_v34  ;;  %v10961_v57 = vld [vmem:[%s12950_s26 + $0x18] sm:$0xff]  }
 0xc86   : > { %v2416_v10 = vmul.f32 1.442695, %v2410_v50 }
 0xc87   : > { %v2407_v11 = vpop.xlane.xlu0 %2406 }
 0xc88   : > { %11258 = vpow2.f32 %v2416_v10  ;;  %v2411_v12 = vsub.f32 %v2392_v60, %v2407_v11 }
 0xc8a   : > { %v2418_v13 = vmul.f32 1.442695, %v2411_v12 }
 0xc8c   : > { %11260 = vpow2.f32 %v2418_v13 }
 0xc92   : > { %v11259_v16 = vpop.eup %11258 }
 0xc93   : > { %v2426_v19 = vsel %vm1669_vm2, %v11259_v16, 0.0 }
 0xc94   : > { %2427 = vadd.xlane.f32.xlu0 %v2426_v19 }
 0xc96   : > { %v11261_v20 = vpop.eup %11260 }
 0xc97   : > { %v2429_v25 = vsel %vm1669_vm2, %v11261_v20, 0.0 }
 0xc98   : > { %2430 = vadd.xlane.f32.xlu1 %v2429_v25 }
 0xca9   : > { %2489 = vrot.lane.b32.xlu1 %v13080_v36, %s12206_s9 }
 0xcaa   : > { %2442 = vrot.lane.b32.xlu0 %v13073_v26, %s12206_s9 }
 0xcad   : > { %10799 = vrot.lane.b32.xlu1 %v10798_v7, %s12206_s9 }
 0xcae   : > { %10809 = vrot.lane.b32.xlu0 %v10808_v37, %s12205_s2 }
 0xcb1   : > { %10804 = vrot.lane.b32.xlu1 %v10803_v48, %s12206_s9 }
 0xcb5   : > { %10814 = vrot.lane.b32.xlu1 %v10813_v55, %s12205_s2  ;;  %v10959_v55 = vld [vmem:[%s12950_s26 + $0x8] sm:$0xff]  }
 0xd0e   : > { %v2422_v36 = vpop.xlane.xlu0 %2421 }
 0xd10   : > { %v2425_v27 = vpop.xlane.xlu1 %2424 }
 0xd11   : > { %11262 = vrcp.f32 %v2425_v27 }
 0xd12   : > { %11264 = vrcp.f32 %v2422_v36 }
 0xd1b   : > { %v11263_v26 = vpop.eup %11262 }
 0xd1c   : > { %v11265_v29 = vpop.eup %11264  ;;  %v2437_v33 = vmul.f32 %v11263_v26, %v11257_v51 }
 0xd1d   : > { %v2436_v4 = vmul.f32 %v11265_v29, %v11255_v8 }
 0xd1f   : > { %v2440_v40 = vpack.c.bf16 %v2437_v33, %v2436_v4 }
 0xd21   : > { %v2428_v28 = vpop.xlane.xlu0 %2427 }
 0xd22   : > { %11266 = vrcp.f32 %v2428_v28 }
 0xd25   : > { %v2443_v32 = vpop.permute.xlu0 %2442  ;;  %v2431_v7 = vpop.xlane.xlu1 %2430 }
 0xd26   : > { %11268 = vrcp.f32 %v2431_v7  ;;  %10118 = vmatpush3.bf16.msra.mxu1 %v2443_v32 }
 0xd27   : > { %10129 = vmatprep.subr.bf16.mxu1 %v10958_v53 }
 0xd29   : > { %10120 = vmatmul.mubr.msk.bf16.vlgmr.msra.gmra.mrb[36].mxu1 %vm1669_vm2, %v2440_v40  ;;  %v2490_v48 = vpop.permute.xlu1 %2489  ;;  %v10810_v26 = vpop.permute.xlu0 %10809 }
 0xd2a   : > { %10124 = vmatpush3.bf16.msra.mxu0 %v2490_v48  ;;  %10130 = vmatpush3.bf16.msra.mxu1 %v10958_v53  ;;  %v10812_v33 = vunpack.i.h.bf16 %v10810_v26  ;;  %v10811_v4 = vunpack.i.l.bf16 %v10810_v26 }
 0xd2b   : > { %10149 = vmatprep.subr.bf16.mxu0 %v10950_v47  ;;  %10131 = vmatprep.subr.bf16.mxu1 %v10959_v55 }
 0xd2c   : > { %v11267_v35 = vpop.eup %11266 }
 0xd2d   : > { %v2438_v38 = vmul.f32 %v11267_v35, %v11259_v16  ;;  %v10800_v25 = vpop.permute.xlu1 %10799 }
 0xd2e   : > { %10132 = vmatpush3.bf16.msra.mxu1 %v10959_v55  ;;  %v10802_v27 = vunpack.i.h.bf16 %v10800_v25  ;;  %v10801_v36 = vunpack.i.l.bf16 %v10800_v25 }
 0xd2f   : > { %10133 = vmatprep.subr.bf16.mxu1 %v10960_v23 }
 0xd30   : > { %v11269_v37 = vpop.eup %11268  ;;  %v2585_v28 = vsel %vm1574_vm1, %v13135_v56, %v10802_v27  ;;  %v2584_v29 = vsel %vm1574_vm1, %v13133_v54, %v10801_v36 }
 0xd31   : > { %v2439_v41 = vmul.f32 %v11269_v37, %v11261_v20  ;;  %v10805_v7 = vpop.permute.xlu1 %10804  ;;  %v2589_v48 = vsel %vm2588_vm3, %v2584_v29, %v10811_v4  ;;  %v2590_v35 = vsel %vm2588_vm3, %v2585_v28, %v10812_v33 }
 0xd32   : > { %10134 = vmatpush3.bf16.msra.mxu1 %v10960_v23 }
 0xd33   : > { %v2441_v42 = vpack.c.bf16 %v2439_v41, %v2438_v38  ;;  %10135 = vmatprep.subr.bf16.mxu1 %v10961_v57  ;;  %v10807_v41 = vunpack.i.h.bf16 %v10805_v7 }
 0xd35   : > { %10126 = vmatmul.mubr.msk.bf16.vlgmr.msra.gmra.mrb[32].mxu0 %vm1669_vm2, %v2441_v42  ;;  %v10815_v54 = vpop.permute.xlu1 %10814  ;;  %v10806_v42 = vunpack.i.l.bf16 %v10805_v7 }
 0xd36   : > { %10150 = vmatpush3.bf16.msra.mxu0 %v10950_v47  ;;  %10165 = vmatprep.mubr.bf16.mxu0 %v13048_v30  ;;  %v10957_v30 = vld [vmem:[%s12946_s7 + $0x78] sm:$0xff]  }
 0xd37   : > { %10151 = vmatprep.subr.bf16.mxu0 %v10951_v43  ;;  %10136 = vmatpush3.bf16.msra.mxu1 %v10961_v57 }
 0xd38   : > { %10137 = vmatprep.subr.bf16.mxu1 %v10962_v58 }
 0xd3a   : > { %10152 = vmatpush3.bf16.msra.mxu0 %v10951_v43  ;;  %v10817_v43 = vunpack.i.h.bf16 %v10815_v54 }
 0xd3b   : > { %10153 = vmatprep.subr.bf16.mxu0 %v10952_v44  ;;  %10138 = vmatpush3.bf16.msra.mxu1 %v10962_v58  ;;  %v10966_v58 = vld [vmem:[%s12948_s3 + $0x80] ss:$8 sps:$4 sm:$0xff]  }
 0xd3c   : > { %10139 = vmatprep.subr.bf16.mxu1 %v10963_v59 }
 0xd3e   : > { %10154 = vmatpush3.bf16.msra.mxu0 %v10952_v44  ;;  %v10816_v44 = vunpack.i.l.bf16 %v10815_v54 }
 0xd3f   : > { %10155 = vmatprep.subr.bf16.mxu0 %v10953_v45  ;;  %10140 = vmatpush3.bf16.msra.mxu1 %v10963_v59  ;;  %v10971_v59 = vld [vmem:[%s12948_s3 + $0x94] ss:$8 sps:$4 sm:$0xff]  }
 0xd42   : > { %10156 = vmatpush3.bf16.msra.mxu0 %v10953_v45 }
 0xd43   : > { %10157 = vmatprep.subr.bf16.mxu0 %v10954_v46 }
 0xd46   : > { %10158 = vmatpush3.bf16.msra.mxu0 %v10954_v46  ;;  %v2587_v46 = vsel %vm1574_vm1, %v13141_v1, %v10807_v41 }
 0xd47   : > { %10159 = vmatprep.subr.bf16.mxu0 %v10955_v49  ;;  %v2592_v55 = vsel %vm2588_vm3, %v2587_v46, %v10817_v43 }
 0xd4a   : > { %10160 = vmatpush3.bf16.msra.mxu0 %v10955_v49  ;;  %v2586_v49 = vsel %vm1574_vm1, %v13139_v63, %v10806_v42  ;;  %v10969_v63 = vld [vmem:[%s12948_s3 + $0x90] ss:$8 sps:$4 sm:$0xff]  }
 0xd4b   : > { %10161 = vmatprep.subr.bf16.mxu0 %v10956_v52  ;;  %v2591_v53 = vsel %vm2588_vm3, %v2586_v49, %v10816_v44 }
 0xd4e   : > { %10162 = vmatpush3.bf16.msra.mxu0 %v10956_v52 }
 0xd4f   : > { %10163 = vmatprep.subr.bf16.mxu0 %v10957_v30 }
 0xd52   : > { %10164 = vmatpush3.bf16.msra.mxu0 %v10957_v30 }
 0xd53   : > { %10169 = vmatprep.subr.bf16.mxu0 %v12202_v18 }
 0xd55   : > { %10166 = vmatmul.mubr.bf16.vlgmr.msra.gmra.mrb[36].mxu0 %v13058_v15  ;;  %v10964_v15 = vld [vmem:[%s12950_s26 + $0x30] sm:$0xff]  }
 0xd56   : > { %10171 = vmatprep.mubr.msk.bf16.mxu0 %vm12203_vm0, %v12202_v18  ;;  %10141 = vmatprep.subr.bf16.mxu1 %v10964_v15 }
 0xd57   : > { %10142 = vmatpush3.bf16.msra.mxu1 %v10964_v15  ;;  %v10974_v15 = vld [vmem:[%s12948_s3 + $0xa4] ss:$8 sps:$4 sm:$0xff]  }
 0xd58   : > { %10143 = vmatprep.subr.bf16.mxu1 %v10965_v2 }
 0xd5b   : > { %10144 = vmatpush3.bf16.msra.mxu1 %v10965_v2  ;;  %v10983_v2 = vld [vmem:[%s12948_s3 + $0xd4] ss:$8 sps:$4 sm:$0xff]  }
 0xd5c   : > { %2918 = vmatprep.subr.bf16.mxu1 %v10968_v3  ;;  %v10981_v3 = vld [vmem:[%s12948_s3 + $0xd0] ss:$8 sps:$4 sm:$0xff]  }
 0xdfc   : > { %v2482_v60 = vpop.f32.mrb[36].mxu1 }
 0xdfd   : > { %v10121_v61 = vpop.f32.mrb[37].mxu1 }
 0xdfe   : > { %v2485_v62 = vpop.f32.mrb[38].mxu1  ;;  %v10977_v61 = vld [vmem:[%s12948_s3 + $0xb4] ss:$8 sps:$4 sm:$0xff]  }
 0xdff   : > { %v10818_v22 = vpack.i.bf16 %v2485_v62, %v2482_v60  ;;  %v10122_v0 = vpop.f32.mrb[39].mxu1  ;;  %v10972_v60 = vld [vmem:[%s12948_s3 + $0xa0] ss:$8 sps:$4 sm:$0xff]   ;;  %v10975_v62 = vld [vmem:[%s12948_s3 + $0xb0] ss:$8 sps:$4 sm:$0xff]  }
 0xe00   : > { %v10978_v0 = vld [vmem:[%s12948_s3 + $0xc0] ss:$8 sps:$4 sm:$0xff]  }
 0xe01   : > { %10819 = vrot.lane.b32.xlu0 %v10818_v22, %s12204_s13  ;;  %v10980_v22 = vld [vmem:[%s12948_s3 + $0xc4] ss:$8 sps:$4 sm:$0xff]  }
 0xe08   : > { %v2529_v24 = vpop.f32.mrb[32].mxu0 }
 0xe09   : > { %v10127_v5 = vpop.f32.mrb[33].mxu0 }
 0xe0a   : > { %v2532_v8 = vpop.f32.mrb[34].mxu0  ;;  %v10984_v5 = vld [vmem:[%s12948_s3 + $0xe0] ss:$8 sps:$4 sm:$0xff]  }
 0xe0b   : > { %v10823_v39 = vpack.i.bf16 %v2532_v8, %v2529_v24  ;;  %v10128_v51 = vpop.f32.mrb[35].mxu0  ;;  %v10986_v24 = vld [vmem:[%s12948_s3 + $0xe4] ss:$8 sps:$4 sm:$0xff]   ;;  %v10989_v8 = vld [vmem:[%s12948_s3 + $0xf4] ss:$8 sps:$4 sm:$0xff]  }
 0xe0d   : > { %10824 = vrot.lane.b32.xlu1 %v10823_v39, %s12204_s13  ;;  %v10987_v39 = vld [vmem:[%s12948_s3 + $0xf0] ss:$8 sps:$4 sm:$0xff]  }
 0xe28   : > { %v10167_v9 = vpop.f32.mrb[36].mxu0 }
 0xe29   : > { %v2806_v34 = vpop.f32.mrb[37].mxu0  ;;  %v2992_v10 = vmul.f32 0.17677669, %v10167_v9 }
 0xe2a   : > { %v10168_v50 = vpop.f32.mrb[38].mxu0  ;;  %v2990_v13 = vmul.f32 0.17677669, %v2806_v34 }
 0xe2b   : > { %v2993_v11 = vmul.f32 0.17677669, %v10168_v50  ;;  %v2809_v12 = vpop.f32.mrb[39].mxu0 }
 0xe2c   : > { %v2991_v16 = vmul.f32 0.17677669, %v2809_v12 }
 0xe2d   : > { %v13277_v19 = vpack.c.bf16 %v2993_v11, %v2992_v10 }
 0xe2e   : > { %v13279_v20 = vpack.c.bf16 %v2991_v16, %v2990_v13 }
 0xe73   : > { %v10820_v32 = vpop.permute.xlu0 %10819 }
 0xe74   : > { %v10822_v40 = vunpack.i.h.bf16 %v10820_v32  ;;  %v10821_v47 = vunpack.i.l.bf16 %v10820_v32 }
 0xe76   : > { %v2594_v37 = vsel %vm2593_vm4, %v2589_v48, %v10821_v47  ;;  %v2595_v38 = vsel %vm2593_vm4, %v2590_v35, %v10822_v40 }
 0xe77   : > { %v2598_v56 = vpack.c.bf16 %v2595_v38, %v2594_v37 }
 0xe79   : > { %10145 = vmatprep.mubr.bf16.mxu1 %v2598_v56 }
 0xe7f   : > { %v10825_v45 = vpop.permute.xlu1 %10824 }
 0xe80   : > { %v10827_v52 = vunpack.i.h.bf16 %v10825_v45  ;;  %v10826_v30 = vunpack.i.l.bf16 %v10825_v45 }
 0xe82   : > { %v2596_v23 = vsel %vm2593_vm4, %v2591_v53, %v10826_v30  ;;  %v2597_v57 = vsel %vm2593_vm4, %v2592_v55, %v10827_v52 }
 0xe83   : > { %v2599_v1 = vpack.c.bf16 %v2597_v57, %v2596_v23 }
 0xe85   : > { %10146 = vmatmul.mubr.bf16.vlgmr.msra.gmra.mrb[40].mxu1 %v2599_v1 }
 0xe86   : > { %2919 = vmatpush1.bf16.msra.mxu1 %v10966_v58  ;;  %2950 = vmatprep.mubr.bf16.mxu1 %v12201_v6 }
 0xe87   : > { %2920 = vmatprep.subr.bf16.mxu1 %v10971_v59 }
 0xe8a   : > { %2921 = vmatpush1.bf16.msra.mxu1 %v10969_v63 }
 0xe8b   : > { %2922 = vmatprep.subr.bf16.mxu1 %v10974_v15 }
 0xe8e   : > { %2923 = vmatpush1.bf16.msra.mxu1 %v10972_v60 }
 0xe8f   : > { %2924 = vmatprep.subr.bf16.mxu1 %v10977_v61 }
 0xe92   : > { %2925 = vmatpush1.bf16.msra.mxu1 %v10975_v62 }
 0xe93   : > { %2926 = vmatprep.subr.bf16.mxu1 %v10980_v22 }
 0xe96   : > { %2927 = vmatpush1.bf16.msra.mxu1 %v10978_v0 }
 0xe97   : > { %2928 = vmatprep.subr.bf16.mxu1 %v10983_v2 }
 0xe9a   : > { %2929 = vmatpush1.bf16.msra.mxu1 %v10981_v3 }
 0xe9b   : > { %2930 = vmatprep.subr.bf16.mxu1 %v10986_v24 }
 0xe9e   : > { %2931 = vmatpush1.bf16.msra.mxu1 %v10984_v5 }
 0xe9f   : > { %2932 = vmatprep.subr.bf16.mxu1 %v10989_v8 }
 0xea2   : > { %2933 = vmatpush1.bf16.msra.mxu1 %v10987_v39 }
 0xea3   : > { %10199 = vmatprep.subr.bf16.mxu1 %v12202_v18 }
 0xea5   : > { %2951 = vmatmul.mubr.bf16.vlgmr.msra.gmra.mrb[44].mxu1 %v13056_v14 }
 0xea6   : > { %2960 = vmatprep.mubr.bf16.mxu1 %v12201_v6 }
 0xead   : > { %2961 = vmatmul.mubr.bf16.gmra.mrb[48].mxu1 %v13062_v17 }
 0xeae   : > { %10201 = vmatprep.mubr.msk.bf16.mxu1 %vm12203_vm0, %v12202_v18 }
 0xf58   : > { %v13319_v51 = vpop.f32.mrb[40].mxu1 }
 0xf59   : > { %v13321_v9 = vpop.f32.mrb[41].mxu1 }
 0xf5a   : > { %v13323_v34 = vpop.f32.mrb[42].mxu1 }
 0xf5b   : > { %v13325_v50 = vpop.f32.mrb[43].mxu1 }
 0xf78   : > { %v2952_v10 = vpop.f32.mrb[44].mxu1 }
 0xf79   : > { %v2954_v11 = vpop.f32.mrb[45].mxu1 }
 0xf7a   : > { %v2956_v12 = vpop.f32.mrb[46].mxu1 }
 0xf7b   : > { %v13327_v13 = vpack.c.bf16 %v2956_v12, %v2952_v10  ;;  %v2958_v14 = vpop.f32.mrb[47].mxu1 }
 0xf7c   : > { %v13329_v16 = vpack.c.bf16 %v2958_v14, %v2954_v11 }
 0xf7d   : > { %v3004_v17 = vsel %vm1574_vm1, %v13327_v13, 0 }
 0xf7e   : > { %10170 = vmatpush3.bf16.xpose.msra.mxu0 %v3004_v17 }
 0xf7f   : > { %10175 = vmatprep.subr.bf16.mxu0 %v12202_v18 }
 0xf80   : > { %v2962_v25 = vpop.f32.mrb[48].mxu1 }
 0xf81   : > { %v2964_v27 = vpop.f32.mrb[49].mxu1 }
 0xf82   : > { %v2966_v36 = vpop.f32.mrb[50].mxu1 }
 0xf83   : > { %v13334_v26 = vpack.c.bf16 %v2966_v36, %v2962_v25  ;;  %v2968_v28 = vpop.f32.mrb[51].mxu1 }
 0xf84   : > { %v13336_v29 = vpack.c.bf16 %v2968_v28, %v2964_v27 }
 0xf85   : > { %10172 = vmatmul.mubr.msk.bf16.vlgmr.msra.gmra.mrb[40].mxu0 %vm1574_vm1, %v13279_v20  ;;  %v3051_v33 = vsel %vm1574_vm1, %v13334_v26, 0 }
 0xf86   : > { %10176 = vmatpush3.bf16.xpose.msra.mxu0 %v3051_v33  ;;  %10177 = vmatprep.mubr.msk.bf16.mxu0 %vm12203_vm0, %v12202_v18 }
 0xf87   : > { %10181 = vmatprep.subr.bf16.mxu0 %v12202_v18 }
 0xf8d   : > { %10178 = vmatmul.mubr.msk.bf16.vlgmr.msra.gmra.mrb[44].mxu0 %vm1574_vm1, %v13277_v19 }
 0xf8e   : > { %10182 = vmatpush3.bf16.msra.mxu0 %v13329_v16  ;;  %10183 = vmatprep.mubr.msk.bf16.mxu0 %vm12203_vm0, %v12202_v18 }
 0xf8f   : > { %10187 = vmatprep.subr.bf16.mxu0 %v12202_v18 }
0x1058   : > { %v3040_v4 = vpop.f32.mrb[40].mxu0 }
0x1059   : > { %v10173_v32 = vpop.f32.mrb[41].mxu0  ;;  %v3094_v7 = vsel %vm1669_vm2, %v3040_v4, -inf }
0x105a   : > { %3095 = vmax.xlane.f32.xlu0 %v3094_v7  ;;  %v3043_v40 = vpop.f32.mrb[42].mxu0 }
0x105b   : > { %v10174_v47 = vpop.f32.mrb[43].mxu0  ;;  %v3097_v48 = vsel %vm1669_vm2, %v3043_v40, -inf }
0x105c   : > { %3098 = vmax.xlane.f32.xlu1 %v3097_v48 }
0x1060   : > { %v3087_v35 = vpop.f32.mrb[44].mxu0 }
0x1061   : > { %v10179_v37 = vpop.f32.mrb[45].mxu0  ;;  %v3100_v38 = vsel %vm1669_vm2, %v3087_v35, -inf }
0x1062   : > { %3101 = vmax.xlane.f32.xlu1 %v3100_v38  ;;  %v3090_v56 = vpop.f32.mrb[46].mxu0 }
0x1063   : > { %v10180_v54 = vpop.f32.mrb[47].mxu0  ;;  %v3103_v41 = vsel %vm1669_vm2, %v3090_v56, -inf }
0x1066   : > { %3104 = vmax.xlane.f32.xlu1 %v3103_v41 }
0x1070   : > { %3285 = vrot.lane.b32.xlu0 %v13334_v26, %s12204_s13 }
0x1077   : > { %3282 = vrot.lane.b32.xlu1 %v13277_v19, %s12204_s13 }
0x10e7   : > { %v3096_v42 = vpop.xlane.xlu0 %3095 }
0x10e8   : > { %v3106_v43 = vsub.f32 %v3040_v4, %v3096_v42 }
0x10e9   : > { %v3099_v44 = vpop.xlane.xlu1 %3098 }
0x10ea   : > { %v3110_v45 = vmul.f32 1.442695, %v3106_v43  ;;  %v3107_v46 = vsub.f32 %v3043_v40, %v3099_v44 }
0x10eb   : > { %v3286_v49 = vpop.permute.xlu0 %3285 }
0x10ec   : > { %11270 = vpow2.f32 %v3110_v45  ;;  %v3112_v52 = vmul.f32 1.442695, %v3107_v46  ;;  %v3291_v30 = vsel %vm1574_vm1, %v3286_v49, 0 }
0x10ed   : > { %10200 = vmatpush3.bf16.xpose.msra.mxu1 %v3291_v30 }
0x10ee   : > { %11272 = vpow2.f32 %v3112_v52  ;;  %10211 = vmatprep.subr.bf16.mxu1 %v12202_v18 }
0x10ef   : > { %v3102_v53 = vpop.xlane.xlu1 %3101 }
0x10f0   : > { %v3108_v55 = vsub.f32 %v3087_v35, %v3102_v53 }
0x10f2   : > { %v3114_v23 = vmul.f32 1.442695, %v3108_v55 }
0x10f3   : > { %v3105_v57 = vpop.xlane.xlu1 %3104 }
0x10f4   : > { %11274 = vpow2.f32 %v3114_v23  ;;  %v3109_v58 = vsub.f32 %v3090_v56, %v3105_v57 }
0x10f6   : > { %v11271_v1 = vpop.eup %11270  ;;  %v3116_v59 = vmul.f32 1.442695, %v3109_v58 }
0x10f7   : > { %v3283_v63 = vpop.permute.xlu1 %3282  ;;  %v3118_v15 = vsel %vm1669_vm2, %v11271_v1, 0.0 }
0x10f8   : > { %v11273_v60 = vpop.eup %11272  ;;  %11276 = vpow2.f32 %v3116_v59  ;;  %3119 = vadd.xlane.f32.xlu0 %v3118_v15  ;;  %10202 = vmatmul.mubr.msk.bf16.vlgmr.msra.gmra.mrb[52].mxu1 %vm1574_vm1, %v3283_v63 }
0x10f9   : > { %v3121_v61 = vsel %vm1669_vm2, %v11273_v60, 0.0  ;;  %10213 = vmatprep.mubr.msk.bf16.mxu1 %vm12203_vm0, %v12202_v18 }
0x10fa   : > { %3122 = vadd.xlane.f32.xlu1 %v3121_v61 }
0x10fe   : > { %v11275_v62 = vpop.eup %11274 }
0x10ff   : > { %v3124_v22 = vsel %vm1669_vm2, %v11275_v62, 0.0 }
0x1100   : > { %3125 = vadd.xlane.f32.xlu0 %v3124_v22 }
0x1102   : > { %v11277_v0 = vpop.eup %11276 }
0x1103   : > { %v3127_v2 = vsel %vm1669_vm2, %v11277_v0, 0.0 }
0x1104   : > { %3128 = vadd.xlane.f32.xlu0 %v3127_v2 }
0x110b   : > { %3229 = vrot.lane.b32.xlu1 %v13279_v20, %s12204_s13 }
0x111a   : > { %3232 = vrot.lane.b32.xlu0 %v13327_v13, %s12204_s13 }
0x1185   : > { %v3120_v3 = vpop.xlane.xlu0 %3119 }
0x1186   : > { %11278 = vrcp.f32 %v3120_v3 }
0x1187   : > { %v3123_v24 = vpop.xlane.xlu1 %3122 }
0x1188   : > { %11280 = vrcp.f32 %v3123_v24 }
0x118b   : > { %v3230_v32 = vpop.permute.xlu1 %3229 }
0x118d   : > { %v3126_v5 = vpop.xlane.xlu0 %3125 }
0x118e   : > { %11282 = vrcp.f32 %v3126_v5 }
0x1190   : > { %v11279_v8 = vpop.eup %11278 }
0x1191   : > { %v3129_v39 = vpop.xlane.xlu0 %3128  ;;  %v3134_v11 = vmul.f32 %v11279_v8, %v11271_v1 }
0x1192   : > { %v11281_v10 = vpop.eup %11280  ;;  %11284 = vrcp.f32 %v3129_v39 }
0x1193   : > { %v3135_v12 = vmul.f32 %v11281_v10, %v11273_v60 }
0x1195   : > { %v3138_v14 = vpack.c.bf16 %v3135_v12, %v3134_v11  ;;  %v3233_v28 = vpop.permute.xlu0 %3232 }
0x1196   : > { %v3238_v4 = vsel %vm1574_vm1, %v3233_v28, 0 }
0x1197   : > { %10184 = vmatmul.mubr.msk.bf16.vlgmr.msra.gmra.mrb[48].mxu0 %vm1669_vm2, %v3138_v14 }
0x1198   : > { %10188 = vmatpush3.bf16.msra.mxu0 %v13336_v29  ;;  %10189 = vmatprep.mubr.msk.bf16.mxu0 %vm12203_vm0, %v12202_v18  ;;  %v11283_v17 = vpop.eup %11282 }
0x1199   : > { %10193 = vmatprep.subr.bf16.mxu0 %v12202_v18  ;;  %v3136_v27 = vmul.f32 %v11283_v17, %v11275_v62 }
0x119c   : > { %v11285_v25 = vpop.eup %11284 }
0x119d   : > { %v3137_v36 = vmul.f32 %v11285_v25, %v11277_v0 }
0x119f   : > { %v3139_v33 = vpack.c.bf16 %v3137_v36, %v3136_v27 }
0x11a1   : > { %10190 = vmatmul.mubr.msk.bf16.vlgmr.msra.gmra.mrb[52].mxu0 %vm1669_vm2, %v3139_v33 }
0x11a2   : > { %10194 = vmatpush3.bf16.xpose.msra.mxu0 %v3238_v4  ;;  %10195 = vmatprep.mubr.msk.bf16.mxu0 %vm12203_vm0, %v12202_v18 }
0x11a3   : > { %10205 = vmatprep.subr.bf16.mxu0 %v12202_v18 }
0x11a9   : > { %10196 = vmatmul.mubr.msk.bf16.vlgmr.msra.gmra.mrb[56].mxu0 %vm1574_vm1, %v3230_v32 }
0x11aa   : > { %10207 = vmatprep.mubr.msk.bf16.mxu0 %vm12203_vm0, %v12202_v18 }
0x11cb   : > { %v3327_v7 = vpop.f32.mrb[52].mxu1 }
0x11cc   : > { %v10203_v40 = vpop.f32.mrb[53].mxu1  ;;  %v3340_v47 = vsel %vm1669_vm2, %v3327_v7, -inf }
0x11cd   : > { %3341 = vmax.xlane.f32.xlu0 %v3340_v47  ;;  %v3330_v48 = vpop.f32.mrb[54].mxu1 }
0x11ce   : > { %v10204_v35 = vpop.f32.mrb[55].mxu1  ;;  %v3343_v37 = vsel %vm1669_vm2, %v3330_v48, -inf }
0x11cf   : > { %3344 = vmax.xlane.f32.xlu1 %v3343_v37 }
0x11e0   : > { %3529 = vrot.lane.b32.xlu1 %v13334_v26, %s12205_s2 }
0x125a   : > { %v3342_v38 = vpop.xlane.xlu0 %3341 }
0x125b   : > { %v3348_v56 = vsub.f32 %v3327_v7, %v3342_v38 }
0x125c   : > { %v3345_v54 = vpop.xlane.xlu1 %3344 }
0x125d   : > { %v3354_v41 = vmul.f32 1.442695, %v3348_v56  ;;  %v3349_v42 = vsub.f32 %v3330_v48, %v3345_v54 }
0x125f   : > { %11286 = vpow2.f32 %v3354_v41  ;;  %v3356_v43 = vmul.f32 1.442695, %v3349_v42 }
0x1260   : > { %v3530_v5 = vpop.permute.xlu1 %3529 }
0x1261   : > { %11288 = vpow2.f32 %v3356_v43  ;;  %v3535_v12 = vsel %vm1574_vm1, %v3530_v5, 0 }
0x1269   : > { %v11287_v44 = vpop.eup %11286 }
0x126a   : > { %v13389_v45 = vpop.f32.mrb[48].mxu0  ;;  %v3364_v46 = vsel %vm1669_vm2, %v11287_v44, 0.0 }
0x126b   : > { %v11289_v49 = vpop.eup %11288  ;;  %v10185_v52 = vpop.f32.mrb[49].mxu0  ;;  %3365 = vadd.xlane.f32.xlu0 %v3364_v46 }
0x126c   : > { %v13392_v30 = vpop.f32.mrb[50].mxu0  ;;  %v3367_v55 = vsel %vm1669_vm2, %v11289_v49, 0.0 }
0x126d   : > { %v10186_v53 = vpop.f32.mrb[51].mxu0 }
0x126f   : > { %3368 = vadd.xlane.f32.xlu0 %v3367_v55 }
0x1274   : > { %v13395_v23 = vpop.f32.mrb[52].mxu0 }
0x1275   : > { %v10191_v57 = vpop.f32.mrb[53].mxu0 }
0x1276   : > { %v13397_v58 = vpop.f32.mrb[54].mxu0 }
0x1277   : > { %v10192_v1 = vpop.f32.mrb[55].mxu0 }
0x127c   : > { %v3274_v59 = vpop.f32.mrb[56].mxu0 }
0x127d   : > { %v10197_v63 = vpop.f32.mrb[57].mxu0  ;;  %v3334_v15 = vsel %vm1669_vm2, %v3274_v59, -inf }
0x127e   : > { %3335 = vmax.xlane.f32.xlu1 %v3334_v15  ;;  %v3277_v60 = vpop.f32.mrb[58].mxu0 }
0x127f   : > { %v10198_v61 = vpop.f32.mrb[59].mxu0  ;;  %v3337_v62 = vsel %vm1669_vm2, %v3277_v60, -inf }
0x1285   : > { %3429 = vrot.lane.b32.xlu0 %v13336_v29, %s12204_s13 }
0x12a4   : > { %3338 = vmax.xlane.f32.xlu0 %v3337_v62 }
0x12ba   : > { %3527 = vrot.lane.b32.xlu0 %v13277_v19, %s12205_s2 }
0x12be   : > { %3478 = vrot.lane.b32.xlu0 %v13327_v13, %s12205_s2 }
0x12f8   : > { %v3366_v22 = vpop.xlane.xlu0 %3365 }
0x12f9   : > { %11290 = vrcp.f32 %v3366_v22 }
0x12fc   : > { %v3369_v0 = vpop.xlane.xlu0 %3368 }
0x12fd   : > { %11292 = vrcp.f32 %v3369_v0 }
0x1300   : > { %v3430_v2 = vpop.permute.xlu0 %3429 }
0x1301   : > { %10212 = vmatpush3.bf16.msra.mxu1 %v3430_v2 }
0x1302   : > { %10223 = vmatprep.subr.bf16.mxu1 %v12202_v18 }
0x1303   : > { %v11291_v3 = vpop.eup %11290 }
0x1304   : > { %v3376_v8 = vmul.f32 %v11291_v3, %v11287_v44 }
0x1307   : > { %v11293_v24 = vpop.eup %11292 }
0x1308   : > { %v3377_v39 = vmul.f32 %v11293_v24, %v11289_v49 }
0x130a   : > { %v3379_v10 = vpack.c.bf16 %v3377_v39, %v3376_v8 }
0x130b   : > { %v3336_v11 = vpop.xlane.xlu1 %3335 }
0x130c   : > { %v3346_v14 = vsub.f32 %v3274_v59, %v3336_v11  ;;  %10214 = vmatmul.mubr.msk.bf16.vlgmr.msra.gmra.mrb[56].mxu1 %vm1669_vm2, %v3379_v10 }
0x130d   : > { %10224 = vmatpush3.bf16.xpose.msra.mxu1 %v3535_v12  ;;  %10225 = vmatprep.mubr.msk.bf16.mxu1 %vm12203_vm0, %v12202_v18 }
0x130e   : > { %v3350_v17 = vmul.f32 1.442695, %v3346_v14  ;;  %10235 = vmatprep.subr.bf16.mxu1 %v12202_v18 }
0x1310   : > { %11294 = vpow2.f32 %v3350_v17 }
0x131a   : > { %v11295_v25 = vpop.eup %11294 }
0x131b   : > { %v3358_v27 = vsel %vm1669_vm2, %v11295_v25, 0.0 }
0x131c   : > { %3359 = vadd.xlane.f32.xlu1 %v3358_v27 }
0x1331   : > { %v3339_v36 = vpop.xlane.xlu0 %3338 }
0x1332   : > { %v3347_v28 = vsub.f32 %v3277_v60, %v3339_v36 }
0x1334   : > { %v3352_v33 = vmul.f32 1.442695, %v3347_v28 }
0x1335   : > { %v3528_v4 = vpop.permute.xlu0 %3527 }
0x1336   : > { %11296 = vpow2.f32 %v3352_v33  ;;  %10226 = vmatmul.mubr.msk.bf16.vlgmr.msra.gmra.mrb[60].mxu1 %vm1574_vm1, %v3528_v4 }
0x1337   : > { %10237 = vmatprep.mubr.msk.bf16.mxu1 %vm12203_vm0, %v12202_v18 }
0x1339   : > { %v3479_v54 = vpop.permute.xlu0 %3478 }
0x133a   : > { %v3484_v42 = vsel %vm1574_vm1, %v3479_v54, 0 }
0x1340   : > { %v11297_v32 = vpop.eup %11296 }
0x1341   : > { %v3361_v7 = vsel %vm1669_vm2, %v11297_v32, 0.0 }
0x1342   : > { %3362 = vadd.xlane.f32.xlu1 %v3361_v7 }
0x1353   : > { %3381 = vrot.lane.b32.xlu1 %v13329_v16, %s12204_s13 }
0x1357   : > { %3476 = vrot.lane.b32.xlu1 %v13279_v20, %s12205_s2 }
0x13a9   : > { %v3360_v40 = vpop.xlane.xlu1 %3359 }
0x13aa   : > { %11298 = vrcp.f32 %v3360_v40 }
0x13b4   : > { %v11299_v35 = vpop.eup %11298 }
0x13b5   : > { %v3374_v38 = vmul.f32 %v11299_v35, %v11295_v25 }
0x13cf   : > { %v3363_v47 = vpop.xlane.xlu1 %3362 }
0x13d0   : > { %11300 = vrcp.f32 %v3363_v47 }
0x13d3   : > { %v3382_v48 = vpop.permute.xlu1 %3381 }
0x13d4   : > { %10206 = vmatpush3.bf16.msra.mxu0 %v3382_v48 }
0x13d5   : > { %10217 = vmatprep.subr.bf16.mxu0 %v12202_v18 }
0x13d7   : > { %v3477_v53 = vpop.permute.xlu1 %3476 }
0x13da   : > { %v11301_v37 = vpop.eup %11300 }
0x13db   : > { %v3375_v56 = vmul.f32 %v11301_v37, %v11297_v32 }
0x13dd   : > { %v3378_v41 = vpack.c.bf16 %v3375_v56, %v3374_v38 }
0x13df   : > { %10208 = vmatmul.mubr.msk.bf16.vlgmr.msra.gmra.mrb[60].mxu0 %vm1669_vm2, %v3378_v41  ;;  %v13425_v43 = vpop.f32.mrb[56].mxu1 }
0x13e0   : > { %10218 = vmatpush3.bf16.xpose.msra.mxu0 %v3484_v42  ;;  %v10215_v44 = vpop.f32.mrb[57].mxu1  ;;  %10219 = vmatprep.mubr.msk.bf16.mxu0 %vm12203_vm0, %v12202_v18 }
0x13e1   : > { %v13429_v46 = vpop.f32.mrb[58].mxu1  ;;  %10229 = vmatprep.subr.bf16.mxu0 %v12202_v18 }
0x13e2   : > { %v10833_v49 = vpack.i.bf16 %v13429_v46, %v13425_v43  ;;  %v10216_v52 = vpop.f32.mrb[59].mxu1 }
0x13e7   : > { %10220 = vmatmul.mubr.msk.bf16.vlgmr.msra.gmra.mrb[64].mxu0 %vm1574_vm1, %v3477_v53 }
0x13e8   : > { %10231 = vmatprep.mubr.msk.bf16.mxu0 %vm12203_vm0, %v12202_v18 }
0x1409   : > { %v3571_v55 = vpop.f32.mrb[60].mxu1 }
0x140a   : > { %v10227_v57 = vpop.f32.mrb[61].mxu1  ;;  %v3584_v1 = vsel %vm1669_vm2, %v3571_v55, -inf }
0x140b   : > { %3585 = vmax.xlane.f32.xlu0 %v3584_v1  ;;  %v3574_v59 = vpop.f32.mrb[62].mxu1 }
0x140c   : > { %v10228_v63 = vpop.f32.mrb[63].mxu1  ;;  %v3587_v15 = vsel %vm1669_vm2, %v3574_v59, -inf }
0x140d   : > { %3588 = vmax.xlane.f32.xlu1 %v3587_v15 }
0x141e   : > { %3771 = vrot.lane.b32.xlu1 %v13334_v26, %s12206_s9 }
0x1498   : > { %v3586_v60 = vpop.xlane.xlu0 %3585 }
0x1499   : > { %v3592_v61 = vsub.f32 %v3571_v55, %v3586_v60 }
0x149a   : > { %v3589_v62 = vpop.xlane.xlu1 %3588 }
0x149b   : > { %v3598_v22 = vmul.f32 1.442695, %v3592_v61  ;;  %v3593_v0 = vsub.f32 %v3574_v59, %v3589_v62 }
0x149d   : > { %11302 = vpow2.f32 %v3598_v22  ;;  %v3600_v2 = vmul.f32 1.442695, %v3593_v0 }
0x149e   : > { %v3772_v47 = vpop.permute.xlu1 %3771 }
0x149f   : > { %11304 = vpow2.f32 %v3600_v2 }
0x14a7   : > { %v11303_v3 = vpop.eup %11302 }
0x14a8   : > { %v3608_v24 = vsel %vm1669_vm2, %v11303_v3, 0.0 }
0x14a9   : > { %v11305_v5 = vpop.eup %11304  ;;  %3609 = vadd.xlane.f32.xlu0 %v3608_v24 }
0x14aa   : > { %v3611_v8 = vsel %vm1669_vm2, %v11305_v5, 0.0 }
0x14ad   : > { %3612 = vadd.xlane.f32.xlu0 %v3611_v8 }
0x14b2   : > { %v13443_v39 = vpop.f32.mrb[60].mxu0 }
0x14b3   : > { %v10209_v10 = vpop.f32.mrb[61].mxu0 }
0x14b4   : > { %v13445_v26 = vpop.f32.mrb[62].mxu0 }
0x14b5   : > { %v10828_v11 = vpack.i.bf16 %v13445_v26, %v13443_v39  ;;  %v10210_v12 = vpop.f32.mrb[63].mxu0 }
0x14b6   : > { %v9251_v12 = vld [vmem:[%s942_s28] ss:$0 sm:$0xff] }
0x14ba   : > { %v3520_v14 = vpop.f32.mrb[64].mxu0 }
0x14bb   : > { %v10221_v17 = vpop.f32.mrb[65].mxu0  ;;  %v3578_v25 = vsel %vm1669_vm2, %v3520_v14, -inf }
0x14bc   : > { %3579 = vmax.xlane.f32.xlu1 %v3578_v25  ;;  %v3523_v27 = vpop.f32.mrb[66].mxu0 }
0x14bd   : > { %v10222_v36 = vpop.f32.mrb[67].mxu0  ;;  %v3581_v28 = vsel %vm1669_vm2, %v3523_v27, -inf }
0x14be   : > { %v2700_v36 = vadd.f32 %v13323_v34, %v9251_v12 }
0x14c3   : > { %3671 = vrot.lane.b32.xlu0 %v13336_v29, %s12205_s2 }
0x14e2   : > { %3582 = vmax.xlane.f32.xlu0 %v3581_v28 }
0x14f8   : > { %3769 = vrot.lane.b32.xlu0 %v13277_v19, %s12206_s9  ;;  %v3777_v19 = vsel %vm1574_vm1, %v3772_v47, 0  ;;  %v11543_v47 = vld [vmem:[#allocation2 + $0x18] sm:$0xff] }
0x14fc   : > { %3720 = vrot.lane.b32.xlu0 %v13327_v13, %s12206_s9 }
0x1536   : > { %v3610_v33 = vpop.xlane.xlu0 %3609 }
0x1537   : > { %11306 = vrcp.f32 %v3610_v33 }
0x153a   : > { %v3613_v4 = vpop.xlane.xlu0 %3612 }
0x153b   : > { %11308 = vrcp.f32 %v3613_v4 }
0x153e   : > { %v3672_v32 = vpop.permute.xlu0 %3671 }
0x153f   : > { %10236 = vmatpush3.bf16.msra.mxu1 %v3672_v32  ;;  %v11542_v32 = vld [vmem:[#allocation2] sm:$0xff] }
0x1540   : > { %10247 = vmatprep.subr.bf16.mxu1 %v12202_v18 }
0x1541   : > { %v11307_v7 = vpop.eup %11306 }
0x1542   : > { %v3620_v48 = vmul.f32 %v11307_v7, %v11303_v3 }
0x1545   : > { %v11309_v40 = vpop.eup %11308 }
0x1546   : > { %v3621_v35 = vmul.f32 %v11309_v40, %v11305_v5  ;;  %v2692_v40 = vadd.f32 %v9251_v12, %v13325_v50 }
0x1548   : > { %v3623_v37 = vpack.c.bf16 %v3621_v35, %v3620_v48  ;;  %v13496_v48 = vadd.f32 %v11543_v47, %v2700_v36  ;;  %v11544_v35 = vld [vmem:[#allocation2 + $0x8] sm:$0xff] }
0x1549   : > { %v3580_v38 = vpop.xlane.xlu1 %3579  ;;  %v13500_v34 = vadd.f32 %v11544_v35, %v2692_v40 }
0x154a   : > { %v3590_v56 = vsub.f32 %v3520_v14, %v3580_v38  ;;  %10238 = vmatmul.mubr.msk.bf16.vlgmr.msra.gmra.mrb[64].mxu1 %vm1669_vm2, %v3623_v37  ;;  %v2689_v14 = vadd.f32 %v9251_v12, %v13321_v9  ;;  %v2697_v9 = vadd.f32 %v13319_v51, %v9251_v12  ;;  %v11545_v37 = vld [vmem:[#allocation2 + $0x10] sm:$0xff] }
0x154b   : > { %10248 = vmatpush3.bf16.xpose.msra.mxu1 %v3777_v19  ;;  %10249 = vmatprep.mubr.msk.bf16.mxu1 %vm12203_vm0, %v12202_v18 }
0x154c   : > { %v3594_v13 = vmul.f32 1.442695, %v3590_v56  ;;  %10259 = vmatprep.subr.bf16.mxu1 %v12202_v18  ;;  %v13493_v7 = vadd.f32 %v11542_v32, %v2689_v14  ;;  %v13504_v38 = vadd.f32 %v11545_v37, %v2697_v9 }
0x154e   : > { %11310 = vpow2.f32 %v3594_v13 }
0x1558   : > { %v11311_v54 = vpop.eup %11310 }
0x1559   : > { %v3602_v41 = vsel %vm1669_vm2, %v11311_v54, 0.0 }
0x155a   : > { %3603 = vadd.xlane.f32.xlu1 %v3602_v41 }
0x156f   : > { %v3583_v42 = vpop.xlane.xlu0 %3582 }
0x1570   : > { %v3591_v44 = vsub.f32 %v3523_v27, %v3583_v42 }
0x1572   : > { %v3596_v52 = vmul.f32 1.442695, %v3591_v44 }
0x1573   : > { %v3770_v53 = vpop.permute.xlu0 %3769 }
0x1574   : > { %11312 = vpow2.f32 %v3596_v52  ;;  %10250 = vmatmul.mubr.msk.bf16.vlgmr.msra.gmra.mrb[68].mxu1 %vm1574_vm1, %v3770_v53 }
0x1575   : > { %10261 = vmatprep.mubr.msk.bf16.mxu1 %vm12203_vm0, %v12202_v18 }
0x1577   : > { %v3721_v22 = vpop.permute.xlu0 %3720 }
0x1578   : > { %v3726_v2 = vsel %vm1574_vm1, %v3721_v22, 0 }
0x157e   : > { %v11313_v55 = vpop.eup %11312 }
0x157f   : > { %v3605_v57 = vsel %vm1669_vm2, %v11313_v55, 0.0 }
0x1580   : > { %3606 = vadd.xlane.f32.xlu1 %v3605_v57 }
0x1591   : > { %3624 = vrot.lane.b32.xlu1 %v13329_v16, %s12205_s2 }
0x1595   : > { %3718 = vrot.lane.b32.xlu1 %v13279_v20, %s12206_s9 }
0x15e7   : > { %v3604_v1 = vpop.xlane.xlu1 %3603 }
0x15e8   : > { %11314 = vrcp.f32 %v3604_v1 }
0x15f2   : > { %v11315_v15 = vpop.eup %11314 }
0x15f3   : > { %v3618_v61 = vmul.f32 %v11315_v15, %v11311_v54 }
0x160d   : > { %v3607_v59 = vpop.xlane.xlu1 %3606 }
0x160e   : > { %11316 = vrcp.f32 %v3607_v59 }
0x1611   : > { %v3625_v63 = vpop.permute.xlu1 %3624 }
0x1612   : > { %10230 = vmatpush3.bf16.msra.mxu0 %v3625_v63 }
0x1613   : > { %10241 = vmatprep.subr.bf16.mxu0 %v12202_v18 }
0x1615   : > { %v3719_v10 = vpop.permute.xlu1 %3718 }
0x1618   : > { %v11317_v60 = vpop.eup %11316 }
0x1619   : > { %v3619_v62 = vmul.f32 %v11317_v60, %v11313_v55 }
0x161b   : > { %v3622_v0 = vpack.c.bf16 %v3619_v62, %v3618_v61 }
0x161d   : > { %10232 = vmatmul.mubr.msk.bf16.vlgmr.msra.gmra.mrb[68].mxu0 %vm1669_vm2, %v3622_v0  ;;  %v13475_v20 = vpop.f32.mrb[64].mxu1 }
0x161e   : > { %10242 = vmatpush3.bf16.xpose.msra.mxu0 %v3726_v2  ;;  %v10239_v3 = vpop.f32.mrb[65].mxu1  ;;  %10243 = vmatprep.mubr.msk.bf16.mxu0 %vm12203_vm0, %v12202_v18 }
0x161f   : > { %v13479_v24 = vpop.f32.mrb[66].mxu1  ;;  %10253 = vmatprep.subr.bf16.mxu0 %v12202_v18 }
0x1620   : > { %v10843_v5 = vpack.i.bf16 %v13479_v24, %v13475_v20  ;;  %v10240_v8 = vpop.f32.mrb[67].mxu1 }
0x1625   : > { %10244 = vmatmul.mubr.msk.bf16.vlgmr.msra.gmra.mrb[72].mxu0 %vm1574_vm1, %v3719_v10 }
0x1626   : > { %10255 = vmatprep.mubr.msk.bf16.mxu0 %vm12203_vm0, %v12202_v18 }
0x1647   : > { %v3813_v17 = vpop.f32.mrb[68].mxu1 }
0x1648   : > { %v10251_v25 = vpop.f32.mrb[69].mxu1  ;;  %v3826_v27 = vsel %vm1669_vm2, %v3813_v17, -inf }
0x1649   : > { %3827 = vmax.xlane.f32.xlu0 %v3826_v27  ;;  %v3816_v28 = vpop.f32.mrb[70].mxu1 }
0x164a   : > { %v10252_v33 = vpop.f32.mrb[71].mxu1  ;;  %v3829_v4 = vsel %vm1669_vm2, %v3816_v28, -inf }
0x164b   : > { %3830 = vmax.xlane.f32.xlu1 %v3829_v4 }
0x164d   : > { %4131 = vadd.xlane.f32.xlu0 %v13493_v7 }
0x164f   : > { %4137 = vadd.xlane.f32.xlu1 %v13496_v48 }
0x1651   : > { %4133 = vadd.xlane.f32.xlu0 %v13500_v34 }
0x1655   : > { %4135 = vadd.xlane.f32.xlu0 %v13504_v38 }
0x16d6   : > { %v3828_v50 = vpop.xlane.xlu0 %3827 }
0x16d7   : > { %v3834_v19 = vsub.f32 %v3813_v17, %v3828_v50 }
0x16d8   : > { %v3831_v56 = vpop.xlane.xlu1 %3830 }
0x16d9   : > { %v3840_v13 = vmul.f32 1.442695, %v3834_v19  ;;  %v3835_v54 = vsub.f32 %v3816_v28, %v3831_v56  ;;  %v10990_v56 = vld [vmem:[%s12953_s1] ss:$12 sps:$4 sm:$0xff]  }
0x16da   : > { %v4132_v41 = vpop.xlane.xlu0 %4131 }
0x16db   : > { %11318 = vpow2.f32 %v3840_v13  ;;  %v3842_v51 = vmul.f32 1.442695, %v3835_v54  ;;  %v4139_v44 = vmul.f32 0.0078125, %v4132_v41  ;;  %v10995_v54 = vld [vmem:[%s12953_s1 + $0x1c] ss:$12 sps:$4 sm:$0xff]  }
0x16dc   : > { %v4138_v60 = vpop.xlane.xlu1 %4137 }
0x16dd   : > { %11320 = vpow2.f32 %v3842_v51  ;;  %v13508_v57 = vsub.f32 %v13493_v7, %v4139_v44  ;;  %v4142_v22 = vmul.f32 0.0078125, %v4138_v60  ;;  %v10993_v44 = vld [vmem:[%s12953_s1 + $0x18] ss:$12 sps:$4 sm:$0xff]   ;;  %v10996_v60 = vld [vmem:[%s12953_s1 + $0x30] ss:$12 sps:$4 sm:$0xff]  }
0x16de   : > { %v4134_v42 = vpop.xlane.xlu0 %4133 }
0x16df   : > { %v4140_v52 = vmul.f32 0.0078125, %v4134_v42  ;;  %v4147_v62 = vmul.f32 %v13508_v57, %v13508_v57  ;;  %v13523_v3 = vsub.f32 %v13496_v48, %v4142_v22 }
0x16e1   : > { %v13512_v63 = vsub.f32 %v13500_v34, %v4140_v52  ;;  %v4150_v27 = vmul.f32 %v13523_v3, %v13523_v3 }
0x16e2   : > { %v4136_v53 = vpop.xlane.xlu0 %4135 }
0x16e3   : > { %v4141_v15 = vmul.f32 0.0078125, %v4136_v53  ;;  %v4148_v2 = vmul.f32 %v13512_v63, %v13512_v63  ;;  %v10998_v53 = vld [vmem:[%s12953_s1 + $0x34] ss:$12 sps:$4 sm:$0xff]  }
0x16e5   : > { %v11319_v55 = vpop.eup %11318  ;;  %v13518_v0 = vsub.f32 %v13504_v38, %v4141_v15 }
0x16e6   : > { %v3850_v1 = vsel %vm1669_vm2, %v11319_v55, 0.0 }
0x16e7   : > { %v11321_v59 = vpop.eup %11320  ;;  %3851 = vadd.xlane.f32.xlu0 %v3850_v1  ;;  %v4149_v8 = vmul.f32 %v13518_v0, %v13518_v0 }
0x16e8   : > { %v3853_v61 = vsel %vm1669_vm2, %v11321_v59, 0.0 }
0x16e9   : > { %3854 = vadd.xlane.f32.xlu1 %v3853_v61 }
0x16eb   : > { %4151 = vadd.xlane.f32.xlu0 %v4147_v62  ;;  %v11001_v62 = vld [vmem:[%s12953_s1 + $0x4c] ss:$12 sps:$4 sm:$0xff]  }
0x16ed   : > { %4153 = vadd.xlane.f32.xlu1 %v4148_v2 }
0x16f0   : > { %v3664_v10 = vpop.f32.mrb[68].mxu0 }
0x16f1   : > { %v10233_v12 = vpop.f32.mrb[69].mxu0  ;;  %4155 = vadd.xlane.f32.xlu1 %v4149_v8 }
0x16f2   : > { %v3667_v14 = vpop.f32.mrb[70].mxu0  ;;  %v11004_v12 = vld [vmem:[%s12953_s1 + $0x64] ss:$12 sps:$4 sm:$0xff]  }
0x16f3   : > { %v10838_v17 = vpack.i.bf16 %v3667_v14, %v3664_v10  ;;  %v10234_v25 = vpop.f32.mrb[71].mxu0  ;;  %v10999_v10 = vld [vmem:[%s12953_s1 + $0x48] ss:$12 sps:$4 sm:$0xff]  }
0x16f4   : > { %v11007_v25 = vld [vmem:[%s12953_s1 + $0x7c] ss:$12 sps:$4 sm:$0xff]  }
0x16f5   : > { %4157 = vadd.xlane.f32.xlu1 %v4150_v27 }
0x16f8   : > { %v3762_v36 = vpop.f32.mrb[72].mxu0 }
0x16f9   : > { %v10245_v28 = vpop.f32.mrb[73].mxu0  ;;  %v3820_v33 = vsel %vm1669_vm2, %v3762_v36, -inf }
0x16fa   : > { %v3765_v4 = vpop.f32.mrb[74].mxu0  ;;  %3821 = vmax.xlane.f32.xlu1 %v3820_v33  ;;  %v13558_v28 = vsub.s32 1, %v13031_v21 }
0x16fb   : > { %v10246_v32 = vpop.f32.mrb[75].mxu0  ;;  %v3823_v40 = vsel %vm1669_vm2, %v3765_v4, -inf }
0x16fc   : > { %v11005_v32 = vld [vmem:[%s12953_s1 + $0x78] ss:$12 sps:$4 sm:$0xff]  }
0x16fe   : > { %3824 = vmax.xlane.f32.xlu1 %v3823_v40  ;;  %v4129_v40 = vld [vmem:[%s12936_s6] sm:$0x7] }
0x1701   : > { %3913 = vrot.lane.b32.xlu0 %v13336_v29, %s12206_s9 }
0x1705   : > { %3866 = vrot.lane.b32.xlu0 %v13329_v16, %s12206_s9  ;;  %v10992_v16 = vld [vmem:[%s12953_s1 + $0x4] ss:$12 sps:$4 sm:$0xff]  }
0x1709   : > { %10834 = vrot.lane.b32.xlu0 %v10833_v49, %s12206_s9 }
0x170d   : > { %10839 = vrot.lane.b32.xlu0 %v10838_v17, %s12205_s2  ;;  %v11002_v17 = vld [vmem:[%s12953_s1 + $0x60] ss:$12 sps:$4 sm:$0xff]  }
0x1711   : > { %10844 = vrot.lane.b32.xlu0 %v10843_v5, %s12205_s2 }
0x1774   : > { %v3852_v47 = vpop.xlane.xlu0 %3851 }
0x1775   : > { %11322 = vrcp.f32 %v3852_v47  ;;  %v11010_v47 = vld [vmem:[%s12953_s1 + $0x94] ss:$12 sps:$4 sm:$0xff]  }
0x1776   : > { %v3855_v9 = vpop.xlane.xlu1 %3854 }
0x1777   : > { %11324 = vrcp.f32 %v3855_v9 }
0x1778   : > { %v4152_v29 = vpop.xlane.xlu0 %4151 }
0x1779   : > { %v4159_v41 = vmul.f32 0.0078125, %v4152_v29 }
0x177a   : > { %v4154_v35 = vpop.xlane.xlu1 %4153 }
0x177b   : > { %v4160_v19 = vmul.f32 0.0078125, %v4154_v35 }
0x177c   : > { %v3914_v37 = vpop.permute.xlu0 %3913 }
0x177d   : > { %10260 = vmatpush3.bf16.msra.mxu1 %v3914_v37  ;;  %v4164_v51 = vadd.f32 1e-05, %v4160_v19  ;;  %v11011_v19 = vld [vmem:[%s12953_s1 + $0xa8] ss:$12 sps:$4 sm:$0xff]  }
0x177e   : > { %v4156_v43 = vpop.xlane.xlu1 %4155  ;;  %4353 = vmatprep.subr.bf16.mxu1 %v10992_v16  ;;  %v4178_v16 = vrot.slane %v4129_v40, %v13558_v28 }
0x177f   : > { %v11323_v46 = vpop.eup %11322  ;;  %11326 = vrsqrt.f32 %v4164_v51  ;;  %v4161_v22 = vmul.f32 0.0078125, %v4156_v43  ;;  %v11008_v43 = vld [vmem:[%s12953_s1 + $0x90] ss:$12 sps:$4 sm:$0xff]  }
0x1780   : > { %v3867_v49 = vpop.permute.xlu0 %3866  ;;  %v3862_v20 = vmul.f32 %v11323_v46, %v11319_v55  ;;  %v4163_v55 = vadd.f32 1e-05, %v4159_v41  ;;  %v4130_v46 = vld [vmem:[%s12944_s14] sm:$0x7] }
0x1781   : > { %v11325_v50 = vpop.eup %11324  ;;  %10254 = vmatpush3.bf16.msra.mxu0 %v3867_v49  ;;  %v4165_v14 = vadd.f32 1e-05, %v4161_v22  ;;  %v11013_v49 = vld [vmem:[%s12953_s1 + $0xac] ss:$12 sps:$4 sm:$0xff]  }
0x1782   : > { %v3863_v24 = vmul.f32 %v11325_v50, %v11321_v59  ;;  %v4158_v5 = vpop.xlane.xlu1 %4157 }
0x1783   : > { %v4162_v59 = vmul.f32 0.0078125, %v4158_v5  ;;  %v4186_v5 = vrot.slane %v4130_v46, %v13558_v28 }
0x1784   : > { %v3865_v13 = vpack.c.bf16 %v3863_v24, %v3862_v20 }
0x1785   : > { %v4166_v8 = vadd.f32 1e-05, %v4162_v59 }
0x1786   : > { %10262 = vmatmul.mubr.msk.bf16.vlgmr.msra.gmra.mrb[72].mxu1 %vm1669_vm2, %v3865_v13 }
0x1787   : > { %4354 = vmatpush1.bf16.msra.mxu1 %v10990_v56  ;;  %v3822_v42 = vpop.xlane.xlu1 %3821  ;;  %4385 = vmatprep.mubr.bf16.mxu1 %v12201_v6 }
0x1788   : > { %v3832_v52 = vsub.f32 %v3762_v36, %v3822_v42  ;;  %4355 = vmatprep.subr.bf16.mxu1 %v10995_v54 }
0x1789   : > { %v11327_v27 = vpop.eup %11326 }
0x178a   : > { %v3836_v1 = vmul.f32 1.442695, %v3832_v52  ;;  %v4172_v9 = vmul.f32 %v11327_v27, %v13512_v63 }
0x178b   : > { %4356 = vmatpush1.bf16.msra.mxu1 %v10993_v44  ;;  %v3825_v15 = vpop.xlane.xlu1 %3824 }
0x178c   : > { %11328 = vpow2.f32 %v3836_v1  ;;  %v3833_v61 = vsub.f32 %v3765_v4, %v3825_v15  ;;  %4357 = vmatprep.subr.bf16.mxu1 %v10998_v53  ;;  %v4180_v50 = vmul.f32 %v4178_v16, %v4172_v9 }
0x178d   : > { %11330 = vrsqrt.f32 %v4163_v55 }
0x178e   : > { %v3838_v2 = vmul.f32 1.442695, %v3833_v61 }
0x178f   : > { %4358 = vmatpush1.bf16.msra.mxu1 %v10996_v60 }
0x1790   : > { %11332 = vpow2.f32 %v3838_v2  ;;  %4359 = vmatprep.subr.bf16.mxu1 %v11001_v62 }
0x1791   : > { %11334 = vrsqrt.f32 %v4166_v8 }
0x1792   : > { %11336 = vrsqrt.f32 %v4165_v14 }
0x1793   : > { %4360 = vmatpush1.bf16.msra.mxu1 %v10999_v10 }
0x1794   : > { %4361 = vmatprep.subr.bf16.mxu1 %v11004_v12 }
0x1796   : > { %v11329_v36 = vpop.eup %11328 }
0x1797   : > { %v11331_v33 = vpop.eup %11330  ;;  %4362 = vmatpush1.bf16.msra.mxu1 %v11002_v17  ;;  %v3844_v4 = vsel %vm1669_vm2, %v11329_v36, 0.0 }
0x1798   : > { %3845 = vadd.xlane.f32.xlu1 %v3844_v4  ;;  %4363 = vmatprep.subr.bf16.mxu1 %v11007_v25  ;;  %v4171_v35 = vmul.f32 %v11331_v33, %v13508_v57  ;;  %v4188_v57 = vadd.f32 %v4186_v5, %v4180_v50 }
0x179a   : > { %v11333_v29 = vpop.eup %11332  ;;  %v4179_v24 = vmul.f32 %v4178_v16, %v4171_v35 }
0x179b   : > { %4364 = vmatpush1.bf16.msra.mxu1 %v11005_v32  ;;  %v3847_v37 = vsel %vm1669_vm2, %v11333_v29, 0.0  ;;  %v11335_v20 = vpop.eup %11334 }
0x179c   : > { %3848 = vadd.xlane.f32.xlu1 %v3847_v37  ;;  %4365 = vmatprep.subr.bf16.mxu1 %v11010_v47  ;;  %v11337_v63 = vpop.eup %11336  ;;  %v4174_v56 = vmul.f32 %v11335_v20, %v13523_v3  ;;  %v4187_v13 = vadd.f32 %v4186_v5, %v4179_v24 }
0x179d   : > { %v4173_v54 = vmul.f32 %v11337_v63, %v13518_v0 }
0x179e   : > { %v13575_v41 = vpack.c.bf16 %v4188_v57, %v4187_v13  ;;  %v4182_v51 = vmul.f32 %v4178_v16, %v4174_v56 }
0x179f   : > { %4366 = vmatpush1.bf16.msra.mxu1 %v11008_v43  ;;  %v4181_v42 = vmul.f32 %v4178_v16, %v4173_v54  ;;  %v10835_v16 = vpop.permute.xlu0 %10834 }
0x17a0   : > { %4367 = vmatprep.subr.bf16.mxu1 %v11013_v49  ;;  %v4190_v44 = vadd.f32 %v4186_v5, %v4182_v51  ;;  %v10837_v49 = vunpack.i.h.bf16 %v10835_v16  ;;  %v10836_v50 = vunpack.i.l.bf16 %v10835_v16 }
0x17a1   : > { %v4189_v52 = vadd.f32 %v4186_v5, %v4181_v42 }
0x17a2   : > { %v4011_v63 = vsel %vm1574_vm1, %v13397_v58, %v10837_v49 }
0x17a3   : > { %4368 = vmatpush1.bf16.msra.mxu1 %v11011_v19  ;;  %v13580_v53 = vpack.c.bf16 %v4190_v44, %v4189_v52  ;;  %v13613_v37 = vpop.permute.xlu0 %10839  ;;  %v4010_v19 = vsel %vm1574_vm1, %v13395_v23, %v10836_v50  ;;  %v11014_v44 = vld [vmem:[%s12950_s26 + $0x40] sm:$0xff]   ;;  %v11015_v23 = vld [vmem:[%s12950_s26 + $0x48] sm:$0xff]   ;;  %v11016_v52 = vld [vmem:[%s12950_s26 + $0x50] sm:$0xff]  }
0x17a4   : > { %10305 = vmatprep.subr.bf16.mxu1 %v12202_v18  ;;  %10265 = vmatprep.subr.bf16.mxu0 %v11014_v44  ;;  %v10841_v49 = vunpack.i.l.bf16 %v13613_v37 }
0x17a6   : > { %4386 = vmatmul.mubr.bf16.vlgmr.msra.gmra.mrb[76].mxu1 %v13575_v41 }
0x17a7   : > { %4395 = vmatprep.mubr.bf16.mxu1 %v12201_v6  ;;  %v10845_v43 = vpop.permute.xlu0 %10844 }
0x17a8   : > { %v10847_v20 = vunpack.i.h.bf16 %v10845_v43  ;;  %v10846_v24 = vunpack.i.l.bf16 %v10845_v43  ;;  %v10842_v43 = vunpack.i.h.bf16 %v13613_v37  ;;  %v11024_v37 = vld [vmem:[%s12953_s1 + $0x38] ss:$12 sps:$4 sm:$0xff]  }
0x17aa   : > { %v4014_v13 = vsel %vm2588_vm3, %v4010_v19, %v10846_v24  ;;  %v4015_v54 = vsel %vm2588_vm3, %v4011_v63, %v10847_v20 }
0x17ad   : > { %10829 = vrot.lane.b32.xlu1 %v10828_v11, %s12206_s9 }
0x17ae   : > { %4396 = vmatmul.mubr.bf16.gmra.mrb[80].mxu1 %v13580_v53 }
0x17af   : > { %10307 = vmatprep.mubr.msk.bf16.mxu1 %vm12203_vm0, %v12202_v18 }
0x1825   : > { %v3846_v0 = vpop.xlane.xlu1 %3845 }
0x1826   : > { %11338 = vrcp.f32 %v3846_v0  ;;  %v11017_v0 = vld [vmem:[%s12950_s26 + $0x58] sm:$0xff]  }
0x1829   : > { %v3849_v3 = vpop.xlane.xlu1 %3848 }
0x182a   : > { %11340 = vrcp.f32 %v3849_v3  ;;  %v11018_v3 = vld [vmem:[%s12950_s26 + $0x60] sm:$0xff]  }
0x182d   : > { %v13615_v46 = vpop.permute.xlu1 %10829 }
0x1830   : > { %v11339_v55 = vpop.eup %11338 }
0x1831   : > { %v3860_v59 = vmul.f32 %v11339_v55, %v11329_v36  ;;  %v11019_v55 = vld [vmem:[%s12950_s26 + $0x68] sm:$0xff]  }
0x1834   : > { %v11341_v1 = vpop.eup %11340 }
0x1835   : > { %v3861_v15 = vmul.f32 %v11341_v1, %v11333_v29  ;;  %v11020_v1 = vld [vmem:[%s12950_s26 + $0x70] sm:$0xff]  }
0x1837   : > { %v3864_v60 = vpack.c.bf16 %v3861_v15, %v3860_v59  ;;  %v11021_v59 = vld [vmem:[%s12950_s26 + $0x78] sm:$0xff]  }
0x1838   : > { %v11022_v15 = vld [vmem:[%s12953_s1 + $0x8] ss:$12 sps:$4 sm:$0xff]  }
0x1839   : > { %10256 = vmatmul.mubr.msk.bf16.vlgmr.msra.gmra.mrb[76].mxu0 %vm1669_vm2, %v3864_v60 }
0x183a   : > { %10266 = vmatpush3.bf16.msra.mxu0 %v11014_v44 }
0x183b   : > { %10267 = vmatprep.subr.bf16.mxu0 %v11015_v23 }
0x183e   : > { %10268 = vmatpush3.bf16.msra.mxu0 %v11015_v23 }
0x183f   : > { %10269 = vmatprep.subr.bf16.mxu0 %v11016_v52 }
0x1842   : > { %10270 = vmatpush3.bf16.msra.mxu0 %v11016_v52 }
0x1843   : > { %10271 = vmatprep.subr.bf16.mxu0 %v11017_v0 }
0x1846   : > { %10272 = vmatpush3.bf16.msra.mxu0 %v11017_v0 }
0x1847   : > { %10273 = vmatprep.subr.bf16.mxu0 %v11018_v3 }
0x184a   : > { %10274 = vmatpush3.bf16.msra.mxu0 %v11018_v3 }
0x184b   : > { %10275 = vmatprep.subr.bf16.mxu0 %v11019_v55 }
0x184e   : > { %10276 = vmatpush3.bf16.msra.mxu0 %v11019_v55 }
0x184f   : > { %10277 = vmatprep.subr.bf16.mxu0 %v11020_v1 }
0x1852   : > { %10278 = vmatpush3.bf16.msra.mxu0 %v11020_v1 }
0x1853   : > { %10279 = vmatprep.subr.bf16.mxu0 %v11021_v59 }
0x1856   : > { %10280 = vmatpush3.bf16.msra.mxu0 %v11021_v59 }
0x1857   : > { %10285 = vmatprep.subr.bf16.mxu0 %v11022_v15 }
0x1859   : > { %v3953_v61 = vpop.f32.mrb[72].mxu1 }
0x185a   : > { %v10263_v62 = vpop.f32.mrb[73].mxu1 }
0x185b   : > { %v3956_v39 = vpop.f32.mrb[74].mxu1 }
0x185c   : > { %v10853_v26 = vpack.i.bf16 %v3956_v39, %v3953_v61  ;;  %v10264_v11 = vpop.f32.mrb[75].mxu1 }
0x185e   : > { %10854 = vrot.lane.b32.xlu1 %v10853_v26, %s12204_s13 }
0x1879   : > { %v4387_v22 = vpop.f32.mrb[76].mxu1 }
0x187a   : > { %v4389_v2 = vpop.f32.mrb[77].mxu1  ;;  %v4472_v10 = vmul.f32 0.17677669, %v4387_v22 }
0x187b   : > { %v4391_v8 = vpop.f32.mrb[78].mxu1 }
0x187c   : > { %v4473_v12 = vmul.f32 0.17677669, %v4391_v8  ;;  %v4393_v14 = vpop.f32.mrb[79].mxu1 }
0x187d   : > { %v13591_v17 = vpack.c.bf16 %v4393_v14, %v4389_v2 }
0x187e   : > { %v13593_v25 = vpack.c.bf16 %v4473_v12, %v4472_v10 }
0x187f   : > { %v4486_v27 = vsel %vm1574_vm1, %v13591_v17, 0 }
0x1880   : > { %10306 = vmatpush3.bf16.xpose.msra.mxu1 %v4486_v27 }
0x1881   : > { %v4397_v36 = vpop.f32.mrb[80].mxu1  ;;  %10311 = vmatprep.subr.bf16.mxu1 %v12202_v18 }
0x1882   : > { %v4399_v33 = vpop.f32.mrb[81].mxu1  ;;  %v4474_v32 = vmul.f32 0.17677669, %v4397_v36 }
0x1883   : > { %v4401_v4 = vpop.f32.mrb[82].mxu1 }
0x1884   : > { %v4475_v40 = vmul.f32 0.17677669, %v4401_v4  ;;  %v4403_v47 = vpop.f32.mrb[83].mxu1 }
0x1885   : > { %v13598_v9 = vpack.c.bf16 %v4403_v47, %v4399_v33  ;;  %v10831_v47 = vunpack.i.l.bf16 %v13615_v46 }
0x1886   : > { %v13600_v29 = vpack.c.bf16 %v4475_v40, %v4474_v32  ;;  %v10832_v40 = vunpack.i.h.bf16 %v13615_v46 }
0x1887   : > { %10308 = vmatmul.mubr.msk.bf16.vlgmr.msra.gmra.mrb[84].mxu1 %vm1574_vm1, %v13593_v25  ;;  %v4533_v35 = vsel %vm1574_vm1, %v13598_v9, 0  ;;  %v4008_v16 = vsel %vm1574_vm1, %v13389_v45, %v10831_v47  ;;  %v11023_v45 = vld [vmem:[%s12953_s1 + $0x20] ss:$12 sps:$4 sm:$0xff]  }
0x1888   : > { %10312 = vmatpush3.bf16.xpose.msra.mxu1 %v4533_v35  ;;  %10313 = vmatprep.mubr.msk.bf16.mxu1 %vm12203_vm0, %v12202_v18  ;;  %v4009_v35 = vsel %vm1574_vm1, %v13392_v30, %v10832_v40  ;;  %v4012_v46 = vsel %vm2588_vm3, %v4008_v16, %v10841_v49 }
0x1889   : > { %10317 = vmatprep.subr.bf16.mxu1 %v12202_v18 }
0x188f   : > { %10314 = vmatmul.mubr.msk.bf16.vlgmr.msra.gmra.mrb[88].mxu1 %vm1574_vm1, %v13600_v29 }
0x1890   : > { %10319 = vmatprep.mubr.msk.bf16.mxu1 %vm12203_vm0, %v12202_v18 }
0x18d0   : > { %v10855_v5 = vpop.permute.xlu1 %10854 }
0x18d1   : > { %v10857_v57 = vunpack.i.h.bf16 %v10855_v5  ;;  %v10856_v56 = vunpack.i.l.bf16 %v10855_v5  ;;  %v4013_v5 = vsel %vm2588_vm3, %v4009_v35, %v10842_v43 }
0x18d3   : > { %v13624_v51 = vsel %vm2593_vm4, %v4014_v13, %v10856_v56  ;;  %v13627_v42 = vsel %vm2593_vm4, %v4015_v54, %v10857_v57  ;;  %v11025_v57 = vld [vmem:[%s12953_s1 + $0x50] ss:$12 sps:$4 sm:$0xff]   ;;  %v11026_v56 = vld [vmem:[%s12953_s1 + $0x68] ss:$12 sps:$4 sm:$0xff]   ;;  %v11027_v13 = vld [vmem:[%s12953_s1 + $0x80] ss:$12 sps:$4 sm:$0xff]  }
0x18d4   : > { %v4021_v58 = vpack.c.bf16 %v13627_v42, %v13624_v51  ;;  %v11028_v54 = vld [vmem:[%s12953_s1 + $0x98] ss:$12 sps:$4 sm:$0xff]   ;;  %v11029_v51 = vld [vmem:[%s12953_s1 + $0xb0] ss:$12 sps:$4 sm:$0xff]  }
0x190c   : > { %v3906_v60 = vpop.f32.mrb[76].mxu0 }
0x190d   : > { %v10257_v61 = vpop.f32.mrb[77].mxu0 }
0x190e   : > { %v3909_v62 = vpop.f32.mrb[78].mxu0 }
0x190f   : > { %v10848_v39 = vpack.i.bf16 %v3909_v62, %v3906_v60  ;;  %v10258_v26 = vpop.f32.mrb[79].mxu0 }
0x1911   : > { %10849 = vrot.lane.b32.xlu0 %v10848_v39, %s12204_s13 }
0x195a   : > { %v13641_v11 = vpop.f32.mrb[84].mxu1 }
0x195b   : > { %v10309_v22 = vpop.f32.mrb[85].mxu1  ;;  %v4576_v4 = vsel %vm1669_vm2, %v13641_v11, -inf }
0x195c   : > { %v13643_v2 = vpop.f32.mrb[86].mxu1 }
0x195d   : > { %v10310_v8 = vpop.f32.mrb[87].mxu1  ;;  %v4579_v32 = vsel %vm1669_vm2, %v13643_v2, -inf }
0x1962   : > { %v4569_v10 = vpop.f32.mrb[88].mxu1 }
0x1963   : > { %v10315_v12 = vpop.f32.mrb[89].mxu1  ;;  %v4582_v14 = vsel %vm1669_vm2, %v4569_v10, -inf }
0x1964   : > { %v4572_v27 = vpop.f32.mrb[90].mxu1  ;;  %4583 = vmax.xlane.f32.xlu0 %v4582_v14 }
0x1965   : > { %v10316_v36 = vpop.f32.mrb[91].mxu1  ;;  %v4585_v33 = vsel %vm1669_vm2, %v4572_v27, -inf }
0x1966   : > { %4586 = vmax.xlane.f32.xlu1 %v4585_v33 }
0x196a   : > { %4577 = vmax.xlane.f32.xlu1 %v4576_v4 }
0x196e   : > { %4580 = vmax.xlane.f32.xlu1 %v4579_v32 }
0x197f   : > { %4764 = vrot.lane.b32.xlu1 %v13600_v29, %s12204_s13 }
0x1983   : > { %v10850_v50 = vpop.permute.xlu0 %10849 }
0x1984   : > { %v10852_v20 = vunpack.i.h.bf16 %v10850_v50  ;;  %v10851_v24 = vunpack.i.l.bf16 %v10850_v50 }
0x1986   : > { %v4016_v63 = vsel %vm2593_vm4, %v4012_v46, %v10851_v24  ;;  %v4017_v30 = vsel %vm2593_vm4, %v4013_v5, %v10852_v20 }
0x1987   : > { %v4020_v19 = vpack.c.bf16 %v4017_v30, %v4016_v63 }
0x1989   : > { %10281 = vmatprep.mubr.bf16.mxu0 %v4020_v19 }
0x198a   : > { %10282 = vmatmul.mubr.bf16.vlgmr.msra.gmra.mrb[80].mxu0 %v4021_v58 }
0x198b   : > { %10286 = vmatpush3.bf16.msra.mxu0 %v11022_v15  ;;  %10301 = vmatprep.mubr.bf16.mxu0 %v13575_v41 }
0x198c   : > { %10287 = vmatprep.subr.bf16.mxu0 %v11023_v45 }
0x198f   : > { %10288 = vmatpush3.bf16.msra.mxu0 %v11023_v45 }
0x1990   : > { %10289 = vmatprep.subr.bf16.mxu0 %v11024_v37 }
0x1993   : > { %10290 = vmatpush3.bf16.msra.mxu0 %v11024_v37 }
0x1994   : > { %10291 = vmatprep.subr.bf16.mxu0 %v11025_v57 }
0x1997   : > { %10292 = vmatpush3.bf16.msra.mxu0 %v11025_v57 }
0x1998   : > { %10293 = vmatprep.subr.bf16.mxu0 %v11026_v56 }
0x199b   : > { %10294 = vmatpush3.bf16.msra.mxu0 %v11026_v56 }
0x199c   : > { %10295 = vmatprep.subr.bf16.mxu0 %v11027_v13 }
0x199f   : > { %10296 = vmatpush3.bf16.msra.mxu0 %v11027_v13 }
0x19a0   : > { %10297 = vmatprep.subr.bf16.mxu0 %v11028_v54 }
0x19a3   : > { %10298 = vmatpush3.bf16.msra.mxu0 %v11028_v54 }
0x19a4   : > { %10299 = vmatprep.subr.bf16.mxu0 %v11029_v51 }
0x19a7   : > { %10300 = vmatpush3.bf16.msra.mxu0 %v11029_v51 }
0x19a8   : > { %10323 = vmatprep.subr.bf16.mxu0 %v12202_v18 }
0x19aa   : > { %10302 = vmatmul.mubr.bf16.vlgmr.msra.gmra.mrb[84].mxu0 %v13580_v53 }
0x19ab   : > { %10325 = vmatprep.mubr.msk.bf16.mxu0 %vm12203_vm0, %v12202_v18 }
0x19f1   : > { %v4584_v41 = vpop.xlane.xlu0 %4583 }
0x19f2   : > { %v4590_v42 = vsub.f32 %v4569_v10, %v4584_v41 }
0x19f3   : > { %v4587_v58 = vpop.xlane.xlu1 %4586 }
0x19f4   : > { %v4596_v44 = vmul.f32 1.442695, %v4590_v42  ;;  %v4591_v23 = vsub.f32 %v4572_v27, %v4587_v58 }
0x19f6   : > { %11342 = vpow2.f32 %v4596_v44  ;;  %v4598_v52 = vmul.f32 1.442695, %v4591_v23 }
0x19f7   : > { %v4578_v0 = vpop.xlane.xlu1 %4577 }
0x19f8   : > { %11344 = vpow2.f32 %v4598_v52  ;;  %v4588_v39 = vsub.f32 %v13641_v11, %v4578_v0 }
0x19fa   : > { %v4592_v26 = vmul.f32 1.442695, %v4588_v39 }
0x19fb   : > { %v4581_v3 = vpop.xlane.xlu1 %4580 }
0x19fc   : > { %v4589_v55 = vsub.f32 %v13643_v2, %v4581_v3 }
0x19fe   : > { %v4594_v1 = vmul.f32 1.442695, %v4589_v55 }
0x19ff   : > { %v4765_v46 = vpop.permute.xlu1 %4764 }
0x1a00   : > { %v11343_v59 = vpop.eup %11342  ;;  %11346 = vpow2.f32 %v4594_v1 }
0x1a01   : > { %v4606_v53 = vsel %vm1669_vm2, %v11343_v59, 0.0  ;;  %11348 = vpow2.f32 %v4592_v26 }
0x1a02   : > { %v11345_v15 = vpop.eup %11344  ;;  %4607 = vadd.xlane.f32.xlu0 %v4606_v53 }
0x1a03   : > { %v4609_v60 = vsel %vm1669_vm2, %v11345_v15, 0.0 }
0x1a06   : > { %4610 = vadd.xlane.f32.xlu0 %v4609_v60 }
0x1a0a   : > { %v11347_v61 = vpop.eup %11346 }
0x1a0b   : > { %v4603_v62 = vsel %vm1669_vm2, %v11347_v61, 0.0  ;;  %v11349_v22 = vpop.eup %11348 }
0x1a0c   : > { %4604 = vadd.xlane.f32.xlu1 %v4603_v62  ;;  %v4600_v2 = vsel %vm1669_vm2, %v11349_v22, 0.0 }
0x1a1c   : > { %4767 = vrot.lane.b32.xlu0 %v13598_v9, %s12204_s13 }
0x1a1d   : > { %4711 = vrot.lane.b32.xlu1 %v13593_v25, %s12204_s13 }
0x1a3b   : > { %4601 = vadd.xlane.f32.xlu0 %v4600_v2 }
0x1a51   : > { %4714 = vrot.lane.b32.xlu0 %v13591_v17, %s12204_s13 }
0x1a5d   : > { %v13692_v8 = vpop.f32.mrb[80].mxu0 }
0x1a5e   : > { %v13694_v10 = vpop.f32.mrb[81].mxu0 }
0x1a5f   : > { %v13696_v12 = vpop.f32.mrb[82].mxu0 }
0x1a60   : > { %v13698_v14 = vpop.f32.mrb[83].mxu0 }
0x1a7d   : > { %v10303_v27 = vpop.f32.mrb[84].mxu0 }
0x1a7e   : > { %v4440_v36 = vpop.f32.mrb[85].mxu0 }
0x1a7f   : > { %v10304_v11 = vpop.f32.mrb[86].mxu0 }
0x1a80   : > { %v13700_v33 = vpack.c.bf16 %v10304_v11, %v10303_v27  ;;  %v4443_v4 = vpop.f32.mrb[87].mxu0 }
0x1a81   : > { %v13702_v32 = vpack.c.bf16 %v4443_v4, %v4440_v36 }
0x1a82   : > { %10324 = vmatpush3.bf16.msra.mxu0 %v13700_v33 }
0x1a83   : > { %10318 = vmatpush3.bf16.msra.mxu1 %v13702_v32  ;;  %10335 = vmatprep.subr.bf16.mxu0 %v12202_v18 }
0x1a84   : > { %10329 = vmatprep.subr.bf16.mxu1 %v12202_v18 }
0x1a8f   : > { %v4608_v40 = vpop.xlane.xlu0 %4607 }
0x1a90   : > { %11350 = vrcp.f32 %v4608_v40 }
0x1a93   : > { %v4611_v47 = vpop.xlane.xlu0 %4610 }
0x1a94   : > { %11352 = vrcp.f32 %v4611_v47 }
0x1a97   : > { %v4768_v50 = vpop.permute.xlu0 %4767 }
0x1a98   : > { %v4773_v24 = vsel %vm1574_vm1, %v4768_v50, 0 }
0x1a99   : > { %v4605_v5 = vpop.xlane.xlu1 %4604 }
0x1a9a   : > { %v11351_v35 = vpop.eup %11350  ;;  %11354 = vrcp.f32 %v4605_v5 }
0x1a9b   : > { %v4618_v43 = vmul.f32 %v11351_v35, %v11343_v59 }
0x1a9d   : > { %v4712_v54 = vpop.permute.xlu1 %4711 }
0x1a9e   : > { %v11353_v16 = vpop.eup %11352 }
0x1a9f   : > { %v4619_v49 = vmul.f32 %v11353_v16, %v11345_v15 }
0x1aa1   : > { %v4621_v20 = vpack.c.bf16 %v4619_v49, %v4618_v43 }
0x1aa3   : > { %10326 = vmatmul.mubr.msk.bf16.vlgmr.msra.gmra.mrb[88].mxu0 %vm1669_vm2, %v4621_v20 }
0x1aa4   : > { %10336 = vmatpush3.bf16.xpose.msra.mxu0 %v4773_v24  ;;  %10337 = vmatprep.mubr.msk.bf16.mxu0 %vm12203_vm0, %v12202_v18  ;;  %v11355_v30 = vpop.eup %11354 }
0x1aa5   : > { %10347 = vmatprep.subr.bf16.mxu0 %v12202_v18  ;;  %v4617_v45 = vmul.f32 %v11355_v30, %v11347_v61 }
0x1aab   : > { %10338 = vmatmul.mubr.msk.bf16.vlgmr.msra.gmra.mrb[92].mxu0 %vm1574_vm1, %v4765_v46 }
0x1aac   : > { %10349 = vmatprep.mubr.msk.bf16.mxu0 %vm12203_vm0, %v12202_v18 }
0x1ac8   : > { %v4602_v63 = vpop.xlane.xlu0 %4601 }
0x1ac9   : > { %11356 = vrcp.f32 %v4602_v63 }
0x1acc   : > { %v4715_v57 = vpop.permute.xlu0 %4714 }
0x1acd   : > { %v4720_v13 = vsel %vm1574_vm1, %v4715_v57, 0 }
0x1ad3   : > { %v11357_v19 = vpop.eup %11356 }
0x1ad4   : > { %v4616_v37 = vmul.f32 %v11357_v19, %v11349_v22 }
0x1ad6   : > { %v4620_v56 = vpack.c.bf16 %v4617_v45, %v4616_v37 }
0x1ad8   : > { %10320 = vmatmul.mubr.msk.bf16.vlgmr.msra.gmra.mrb[92].mxu1 %vm1669_vm2, %v4620_v56 }
0x1ad9   : > { %10330 = vmatpush3.bf16.xpose.msra.mxu1 %v4720_v13  ;;  %10331 = vmatprep.mubr.msk.bf16.mxu1 %vm12203_vm0, %v12202_v18 }
0x1ada   : > { %10341 = vmatprep.subr.bf16.mxu1 %v12202_v18 }
0x1ae0   : > { %10332 = vmatmul.mubr.msk.bf16.vlgmr.msra.gmra.mrb[96].mxu1 %vm1574_vm1, %v4712_v54 }
0x1ae1   : > { %10343 = vmatprep.mubr.msk.bf16.mxu1 %vm12203_vm0, %v12202_v18 }
0x1b76   : > { %v13724_v51 = vpop.f32.mrb[88].mxu0 }
0x1b77   : > { %v10327_v41 = vpop.f32.mrb[89].mxu0 }
0x1b78   : > { %v13726_v42 = vpop.f32.mrb[90].mxu0 }
0x1b79   : > { %v10328_v58 = vpop.f32.mrb[91].mxu0 }
0x1b7e   : > { %v4809_v44 = vpop.f32.mrb[92].mxu0 }
0x1b7f   : > { %v10339_v23 = vpop.f32.mrb[93].mxu0  ;;  %v4822_v52 = vsel %vm1669_vm2, %v4809_v44, -inf }
0x1b80   : > { %4823 = vmax.xlane.f32.xlu0 %v4822_v52  ;;  %v4812_v0 = vpop.f32.mrb[94].mxu0 }
0x1b81   : > { %v10340_v3 = vpop.f32.mrb[95].mxu0  ;;  %v4825_v55 = vsel %vm1669_vm2, %v4812_v0, -inf }
0x1b82   : > { %4826 = vmax.xlane.f32.xlu1 %v4825_v55 }
0x1b93   : > { %5011 = vrot.lane.b32.xlu1 %v13598_v9, %s12205_s2 }
0x1bab   : > { %v13732_v1 = vpop.f32.mrb[92].mxu1 }
0x1bac   : > { %v10321_v59 = vpop.f32.mrb[93].mxu1 }
0x1bad   : > { %v13734_v53 = vpop.f32.mrb[94].mxu1 }
0x1bae   : > { %v10322_v15 = vpop.f32.mrb[95].mxu1 }
0x1bb3   : > { %v4756_v60 = vpop.f32.mrb[96].mxu1 }
0x1bb4   : > { %v10333_v61 = vpop.f32.mrb[97].mxu1  ;;  %v4816_v26 = vsel %vm1669_vm2, %v4756_v60, -inf }
0x1bb5   : > { %v4759_v62 = vpop.f32.mrb[98].mxu1 }
0x1bb6   : > { %v10334_v39 = vpop.f32.mrb[99].mxu1  ;;  %v4819_v5 = vsel %vm1669_vm2, %v4759_v62, -inf }
0x1bb7   : > { %4817 = vmax.xlane.f32.xlu1 %v4816_v26 }
0x1c0d   : > { %v4824_v22 = vpop.xlane.xlu0 %4823 }
0x1c0e   : > { %v4830_v2 = vsub.f32 %v4809_v44, %v4824_v22 }
0x1c0f   : > { %v4827_v27 = vpop.xlane.xlu1 %4826 }
0x1c10   : > { %v4836_v36 = vmul.f32 1.442695, %v4830_v2  ;;  %v4831_v11 = vsub.f32 %v4812_v0, %v4827_v27 }
0x1c12   : > { %11358 = vpow2.f32 %v4836_v36  ;;  %v4838_v4 = vmul.f32 1.442695, %v4831_v11 }
0x1c13   : > { %v5012_v43 = vpop.permute.xlu1 %5011 }
0x1c14   : > { %11360 = vpow2.f32 %v4838_v4  ;;  %v5017_v54 = vsel %vm1574_vm1, %v5012_v43, 0 }
0x1c1c   : > { %v11359_v40 = vpop.eup %11358 }
0x1c1d   : > { %v4846_v47 = vsel %vm1669_vm2, %v11359_v40, 0.0 }
0x1c1e   : > { %v11361_v35 = vpop.eup %11360  ;;  %4847 = vadd.xlane.f32.xlu0 %v4846_v47 }
0x1c1f   : > { %v4849_v16 = vsel %vm1669_vm2, %v11361_v35, 0.0 }
0x1c22   : > { %4850 = vadd.xlane.f32.xlu0 %v4849_v16 }
0x1c38   : > { %4911 = vrot.lane.b32.xlu0 %v13700_v33, %s12204_s13 }
0x1c44   : > { %v4818_v49 = vpop.xlane.xlu1 %4817 }
0x1c45   : > { %v4828_v50 = vsub.f32 %v4756_v60, %v4818_v49 }
0x1c47   : > { %v4832_v20 = vmul.f32 1.442695, %v4828_v50 }
0x1c49   : > { %11362 = vpow2.f32 %v4832_v20 }
0x1c53   : > { %v11363_v24 = vpop.eup %11362 }
0x1c54   : > { %v4840_v46 = vsel %vm1669_vm2, %v11363_v24, 0.0 }
0x1c55   : > { %4841 = vadd.xlane.f32.xlu1 %v4840_v46 }
0x1c57   : > { %4820 = vmax.xlane.f32.xlu0 %v4819_v5 }
0x1c6d   : > { %5009 = vrot.lane.b32.xlu0 %v13600_v29, %s12205_s2 }
0x1c71   : > { %4960 = vrot.lane.b32.xlu0 %v13591_v17, %s12205_s2 }
0x1cab   : > { %v4848_v63 = vpop.xlane.xlu0 %4847 }
0x1cac   : > { %11364 = vrcp.f32 %v4848_v63 }
0x1caf   : > { %v4851_v30 = vpop.xlane.xlu0 %4850 }
0x1cb0   : > { %11366 = vrcp.f32 %v4851_v30 }
0x1cb3   : > { %v4912_v19 = vpop.permute.xlu0 %4911 }
0x1cb4   : > { %10348 = vmatpush3.bf16.msra.mxu0 %v4912_v19 }
0x1cb5   : > { %10359 = vmatprep.subr.bf16.mxu0 %v12202_v18 }
0x1cb6   : > { %v11365_v45 = vpop.eup %11364 }
0x1cb7   : > { %v4858_v57 = vmul.f32 %v11365_v45, %v11359_v40 }
0x1cba   : > { %v11367_v37 = vpop.eup %11366 }
0x1cbb   : > { %v4859_v56 = vmul.f32 %v11367_v37, %v11361_v35 }
0x1cbd   : > { %v4861_v13 = vpack.c.bf16 %v4859_v56, %v4858_v57 }
0x1cbf   : > { %10350 = vmatmul.mubr.msk.bf16.vlgmr.msra.gmra.mrb[96].mxu0 %vm1669_vm2, %v4861_v13 }
0x1cc0   : > { %10360 = vmatpush3.bf16.xpose.msra.mxu0 %v5017_v54  ;;  %10361 = vmatprep.mubr.msk.bf16.mxu0 %vm12203_vm0, %v12202_v18 }
0x1cc1   : > { %10371 = vmatprep.subr.bf16.mxu0 %v12202_v18 }
0x1ce2   : > { %v4842_v3 = vpop.xlane.xlu1 %4841 }
0x1ce4   : > { %v4821_v41 = vpop.xlane.xlu0 %4820 }
0x1ce5   : > { %v4829_v58 = vsub.f32 %v4759_v62, %v4821_v41 }
0x1ce7   : > { %v4834_v44 = vmul.f32 1.442695, %v4829_v58 }
0x1ce8   : > { %v5010_v23 = vpop.permute.xlu0 %5009 }
0x1ce9   : > { %11368 = vpow2.f32 %v4834_v44  ;;  %10362 = vmatmul.mubr.msk.bf16.vlgmr.msra.gmra.mrb[100].mxu0 %vm1574_vm1, %v5010_v23 }
0x1cea   : > { %10373 = vmatprep.mubr.msk.bf16.mxu0 %vm12203_vm0, %v12202_v18  ;;  %11370 = vrcp.f32 %v4842_v3 }
0x1cec   : > { %v4961_v39 = vpop.permute.xlu0 %4960 }
0x1ced   : > { %v4966_v22 = vsel %vm1574_vm1, %v4961_v39, 0 }
0x1cf3   : > { %v11369_v52 = vpop.eup %11368 }
0x1cf4   : > { %v4843_v0 = vsel %vm1669_vm2, %v11369_v52, 0.0  ;;  %v11371_v15 = vpop.eup %11370 }
0x1cf5   : > { %4844 = vadd.xlane.f32.xlu1 %v4843_v0  ;;  %v4856_v61 = vmul.f32 %v11371_v15, %v11363_v24 }
0x1d06   : > { %4863 = vrot.lane.b32.xlu1 %v13702_v32, %s12204_s13 }
0x1d0a   : > { %4958 = vrot.lane.b32.xlu1 %v13593_v25, %s12205_s2 }
0x1d82   : > { %v4845_v55 = vpop.xlane.xlu1 %4844 }
0x1d83   : > { %11372 = vrcp.f32 %v4845_v55 }
0x1d86   : > { %v4864_v59 = vpop.permute.xlu1 %4863 }
0x1d87   : > { %10342 = vmatpush3.bf16.msra.mxu1 %v4864_v59 }
0x1d88   : > { %10353 = vmatprep.subr.bf16.mxu1 %v12202_v18 }
0x1d8a   : > { %v4959_v40 = vpop.permute.xlu1 %4958 }
0x1d8d   : > { %v11373_v60 = vpop.eup %11372 }
0x1d8e   : > { %v4857_v62 = vmul.f32 %v11373_v60, %v11369_v52 }
0x1d90   : > { %v4860_v26 = vpack.c.bf16 %v4857_v62, %v4856_v61 }
0x1d92   : > { %10344 = vmatmul.mubr.msk.bf16.vlgmr.msra.gmra.mrb[100].mxu1 %vm1669_vm2, %v4860_v26  ;;  %v13764_v2 = vpop.f32.mrb[96].mxu0 }
0x1d93   : > { %10354 = vmatpush3.bf16.xpose.msra.mxu1 %v4966_v22  ;;  %v10351_v27 = vpop.f32.mrb[97].mxu0  ;;  %10355 = vmatprep.mubr.msk.bf16.mxu1 %vm12203_vm0, %v12202_v18 }
0x1d94   : > { %v13768_v36 = vpop.f32.mrb[98].mxu0  ;;  %10365 = vmatprep.subr.bf16.mxu1 %v12202_v18 }
0x1d95   : > { %v10863_v11 = vpack.i.bf16 %v13768_v36, %v13764_v2  ;;  %v10352_v4 = vpop.f32.mrb[99].mxu0 }
0x1d9a   : > { %10356 = vmatmul.mubr.msk.bf16.vlgmr.msra.gmra.mrb[104].mxu1 %vm1574_vm1, %v4959_v40 }
0x1d9b   : > { %10367 = vmatprep.mubr.msk.bf16.mxu1 %vm12203_vm0, %v12202_v18 }
0x1dbc   : > { %v5053_v47 = vpop.f32.mrb[100].mxu0 }
0x1dbd   : > { %v10363_v35 = vpop.f32.mrb[101].mxu0  ;;  %v5066_v16 = vsel %vm1669_vm2, %v5053_v47, -inf }
0x1dbe   : > { %5067 = vmax.xlane.f32.xlu0 %v5066_v16  ;;  %v5056_v43 = vpop.f32.mrb[102].mxu0 }
0x1dbf   : > { %v10364_v49 = vpop.f32.mrb[103].mxu0  ;;  %v5069_v50 = vsel %vm1669_vm2, %v5056_v43, -inf }
0x1dc0   : > { %5070 = vmax.xlane.f32.xlu1 %v5069_v50 }
0x1dd1   : > { %5253 = vrot.lane.b32.xlu1 %v13598_v9, %s12206_s9 }
0x1e4b   : > { %v5068_v20 = vpop.xlane.xlu0 %5067 }
0x1e4c   : > { %v5074_v24 = vsub.f32 %v5053_v47, %v5068_v20 }
0x1e4d   : > { %v5071_v46 = vpop.xlane.xlu1 %5070 }
0x1e4e   : > { %v5080_v5 = vmul.f32 1.442695, %v5074_v24  ;;  %v5075_v63 = vsub.f32 %v5056_v43, %v5071_v46 }
0x1e50   : > { %11374 = vpow2.f32 %v5080_v5  ;;  %v5082_v30 = vmul.f32 1.442695, %v5075_v63 }
0x1e51   : > { %v5254_v62 = vpop.permute.xlu1 %5253 }
0x1e52   : > { %11376 = vpow2.f32 %v5082_v30 }
0x1e5a   : > { %v11375_v19 = vpop.eup %11374 }
0x1e5b   : > { %v5090_v45 = vsel %vm1669_vm2, %v11375_v19, 0.0 }
0x1e5c   : > { %v11377_v37 = vpop.eup %11376  ;;  %5091 = vadd.xlane.f32.xlu0 %v5090_v45 }
0x1e5d   : > { %v5093_v57 = vsel %vm1669_vm2, %v11377_v37, 0.0 }
0x1e60   : > { %5094 = vadd.xlane.f32.xlu0 %v5093_v57 }
0x1e65   : > { %v13782_v56 = vpop.f32.mrb[100].mxu1 }
0x1e66   : > { %v10345_v13 = vpop.f32.mrb[101].mxu1 }
0x1e67   : > { %v13784_v9 = vpop.f32.mrb[102].mxu1 }
0x1e68   : > { %v10858_v54 = vpack.i.bf16 %v13784_v9, %v13782_v56  ;;  %v10346_v41 = vpop.f32.mrb[103].mxu1 }
0x1e6d   : > { %v5002_v58 = vpop.f32.mrb[104].mxu1 }
0x1e6e   : > { %v10357_v44 = vpop.f32.mrb[105].mxu1  ;;  %v5060_v23 = vsel %vm1669_vm2, %v5002_v58, -inf }
0x1e6f   : > { %5061 = vmax.xlane.f32.xlu1 %v5060_v23  ;;  %v5005_v52 = vpop.f32.mrb[106].mxu1 }
0x1e70   : > { %v10358_v0 = vpop.f32.mrb[107].mxu1  ;;  %v5063_v3 = vsel %vm1669_vm2, %v5005_v52, -inf }
0x1e71   : > { %v9349_v0 = vld [vmem:[%s942_s28 + $0x1] ss:$0 sm:$0xff] }
0x1e76   : > { %5153 = vrot.lane.b32.xlu0 %v13700_v33, %s12205_s2 }
0x1e95   : > { %5064 = vmax.xlane.f32.xlu0 %v5063_v3  ;;  %v4111_v3 = vadd.f32 %v9349_v0, %v13694_v10  ;;  %v4119_v10 = vadd.f32 %v13692_v8, %v9349_v0 }
0x1eab   : > { %5251 = vrot.lane.b32.xlu0 %v13600_v29, %s12206_s9  ;;  %v5259_v29 = vsel %vm1574_vm1, %v5254_v62, 0 }
0x1eaf   : > { %5202 = vrot.lane.b32.xlu0 %v13591_v17, %s12206_s9 }
0x1ee9   : > { %v5092_v55 = vpop.xlane.xlu0 %5091 }
0x1eea   : > { %11378 = vrcp.f32 %v5092_v55 }
0x1eed   : > { %v5095_v59 = vpop.xlane.xlu0 %5094 }
0x1eee   : > { %11380 = vrcp.f32 %v5095_v59 }
0x1ef1   : > { %v5154_v15 = vpop.permute.xlu0 %5153 }
0x1ef2   : > { %10372 = vmatpush3.bf16.msra.mxu0 %v5154_v15 }
0x1ef3   : > { %10383 = vmatprep.subr.bf16.mxu0 %v12202_v18 }
0x1ef4   : > { %v11379_v60 = vpop.eup %11378 }
0x1ef5   : > { %v5102_v39 = vmul.f32 %v11379_v60, %v11375_v19  ;;  %v4122_v60 = vadd.f32 %v13696_v12, %v9349_v0 }
0x1ef8   : > { %v11381_v61 = vpop.eup %11380 }
0x1ef9   : > { %v5103_v26 = vmul.f32 %v11381_v61, %v11377_v37 }
0x1efb   : > { %v5105_v22 = vpack.c.bf16 %v5103_v26, %v5102_v39  ;;  %v11546_v26 = vld [vmem:[#allocation3] sm:$0xff] }
0x1efc   : > { %v5062_v27 = vpop.xlane.xlu1 %5061 }
0x1efd   : > { %v5072_v4 = vsub.f32 %v5002_v58, %v5062_v27  ;;  %10374 = vmatmul.mubr.msk.bf16.vlgmr.msra.gmra.mrb[104].mxu0 %vm1669_vm2, %v5105_v22  ;;  %v13832_v22 = vadd.f32 %v11546_v26, %v4111_v3  ;;  %v4114_v27 = vadd.f32 %v9349_v0, %v13698_v14 }
0x1efe   : > { %10384 = vmatpush3.bf16.xpose.msra.mxu0 %v5259_v29  ;;  %10385 = vmatprep.mubr.msk.bf16.mxu0 %vm12203_vm0, %v12202_v18  ;;  %v11547_v29 = vld [vmem:[#allocation3 + $0x18] sm:$0xff] }
0x1eff   : > { %v5076_v17 = vmul.f32 1.442695, %v5072_v4  ;;  %10395 = vmatprep.subr.bf16.mxu0 %v12202_v18  ;;  %v13835_v4 = vadd.f32 %v11547_v29, %v4122_v60 }
0x1f01   : > { %11382 = vpow2.f32 %v5076_v17  ;;  %v11548_v17 = vld [vmem:[#allocation3 + $0x8] sm:$0xff] }
0x1f02   : > { %v13839_v12 = vadd.f32 %v11548_v17, %v4114_v27 }
0x1f0b   : > { %v11383_v40 = vpop.eup %11382 }
0x1f0c   : > { %v5084_v47 = vsel %vm1669_vm2, %v11383_v40, 0.0 }
0x1f0d   : > { %5085 = vadd.xlane.f32.xlu1 %v5084_v47 }
0x1f22   : > { %v5065_v35 = vpop.xlane.xlu0 %5064 }
0x1f23   : > { %v5073_v16 = vsub.f32 %v5005_v52, %v5065_v35 }
0x1f25   : > { %v5078_v43 = vmul.f32 1.442695, %v5073_v16 }
0x1f26   : > { %v5252_v49 = vpop.permute.xlu0 %5251 }
0x1f27   : > { %11384 = vpow2.f32 %v5078_v43  ;;  %10386 = vmatmul.mubr.msk.bf16.vlgmr.msra.gmra.mrb[108].mxu0 %vm1574_vm1, %v5252_v49 }
0x1f28   : > { %10397 = vmatprep.mubr.msk.bf16.mxu0 %vm12203_vm0, %v12202_v18 }
0x1f2a   : > { %v5203_v37 = vpop.permute.xlu0 %5202 }
0x1f2b   : > { %v5208_v13 = vsel %vm1574_vm1, %v5203_v37, 0 }
0x1f31   : > { %v11385_v50 = vpop.eup %11384 }
0x1f32   : > { %v5087_v20 = vsel %vm1669_vm2, %v11385_v50, 0.0 }
0x1f33   : > { %5088 = vadd.xlane.f32.xlu1 %v5087_v20 }
0x1f44   : > { %5106 = vrot.lane.b32.xlu1 %v13702_v32, %s12205_s2 }
0x1f48   : > { %5200 = vrot.lane.b32.xlu1 %v13593_v25, %s12206_s9 }
0x1f9a   : > { %v5086_v24 = vpop.xlane.xlu1 %5085 }
0x1f9b   : > { %11386 = vrcp.f32 %v5086_v24 }
0x1fa5   : > { %v11387_v63 = vpop.eup %11386 }
0x1fa6   : > { %v5100_v19 = vmul.f32 %v11387_v63, %v11383_v40  ;;  %v11549_v40 = vld [vmem:[#allocation3 + $0x10] sm:$0xff] }
0x1fa7   : > { %v13843_v47 = vadd.f32 %v11549_v40, %v4119_v10 }
0x1fc0   : > { %v5089_v46 = vpop.xlane.xlu1 %5088 }
0x1fc1   : > { %11388 = vrcp.f32 %v5089_v46 }
0x1fc4   : > { %v5107_v5 = vpop.permute.xlu1 %5106 }
0x1fc5   : > { %10366 = vmatpush3.bf16.msra.mxu1 %v5107_v5 }
0x1fc6   : > { %10377 = vmatprep.subr.bf16.mxu1 %v12202_v18 }
0x1fc8   : > { %v5201_v52 = vpop.permute.xlu1 %5200 }
0x1fcb   : > { %v11389_v30 = vpop.eup %11388 }
0x1fcc   : > { %v5101_v45 = vmul.f32 %v11389_v30, %v11385_v50 }
0x1fce   : > { %v5104_v57 = vpack.c.bf16 %v5101_v45, %v5100_v19 }
0x1fd0   : > { %10368 = vmatmul.mubr.msk.bf16.vlgmr.msra.gmra.mrb[108].mxu1 %vm1669_vm2, %v5104_v57  ;;  %v13814_v25 = vpop.f32.mrb[104].mxu0 }
0x1fd1   : > { %10378 = vmatpush3.bf16.xpose.msra.mxu1 %v5208_v13  ;;  %v10375_v41 = vpop.f32.mrb[105].mxu0  ;;  %10379 = vmatprep.mubr.msk.bf16.mxu1 %vm12203_vm0, %v12202_v18 }
0x1fd2   : > { %v13818_v58 = vpop.f32.mrb[106].mxu0  ;;  %10389 = vmatprep.subr.bf16.mxu1 %v12202_v18 }
0x1fd3   : > { %v10873_v44 = vpack.i.bf16 %v13818_v58, %v13814_v25  ;;  %v10376_v23 = vpop.f32.mrb[107].mxu0 }
0x1fd8   : > { %10380 = vmatmul.mubr.msk.bf16.vlgmr.msra.gmra.mrb[112].mxu1 %vm1574_vm1, %v5201_v52 }
0x1fd9   : > { %10391 = vmatprep.mubr.msk.bf16.mxu1 %vm12203_vm0, %v12202_v18 }
0x1ffa   : > { %v5295_v55 = vpop.f32.mrb[108].mxu0 }
0x1ffb   : > { %v10387_v59 = vpop.f32.mrb[109].mxu0  ;;  %v5308_v15 = vsel %vm1669_vm2, %v5295_v55, -inf }
0x1ffc   : > { %5309 = vmax.xlane.f32.xlu0 %v5308_v15  ;;  %v5298_v61 = vpop.f32.mrb[110].mxu0 }
0x1ffd   : > { %v10388_v62 = vpop.f32.mrb[111].mxu0  ;;  %v5311_v39 = vsel %vm1669_vm2, %v5298_v61, -inf }
0x1ffe   : > { %5312 = vmax.xlane.f32.xlu1 %v5311_v39 }
0x2000   : > { %5613 = vadd.xlane.f32.xlu0 %v13832_v22 }
0x2002   : > { %5619 = vadd.xlane.f32.xlu1 %v13835_v4 }
0x2004   : > { %5615 = vadd.xlane.f32.xlu0 %v13839_v12 }
0x2008   : > { %5617 = vadd.xlane.f32.xlu0 %v13843_v47 }
0x2089   : > { %v5310_v14 = vpop.xlane.xlu0 %5309 }
0x208a   : > { %v5316_v35 = vsub.f32 %v5295_v55, %v5310_v14 }
0x208b   : > { %v5313_v16 = vpop.xlane.xlu1 %5312 }
0x208c   : > { %v5322_v43 = vmul.f32 1.442695, %v5316_v35  ;;  %v5317_v49 = vsub.f32 %v5298_v61, %v5313_v16 }
0x208d   : > { %v5614_v50 = vpop.xlane.xlu0 %5613 }
0x208e   : > { %11390 = vpow2.f32 %v5322_v43  ;;  %v5324_v8 = vmul.f32 1.442695, %v5317_v49  ;;  %v5621_v24 = vmul.f32 0.0078125, %v5614_v50 }
0x208f   : > { %v5620_v13 = vpop.xlane.xlu1 %5619 }
0x2090   : > { %11392 = vpow2.f32 %v5324_v8  ;;  %v13847_v30 = vsub.f32 %v13832_v22, %v5621_v24  ;;  %v5624_v52 = vmul.f32 0.0078125, %v5620_v13  ;;  %v11033_v13 = vld [vmem:[%s12953_s1 + $0xd8] ss:$12 sps:$4 sm:$0xff]  }
0x2091   : > { %v5616_v20 = vpop.xlane.xlu0 %5615 }
0x2092   : > { %v5622_v46 = vmul.f32 0.0078125, %v5616_v20  ;;  %v5629_v23 = vmul.f32 %v13847_v30, %v13847_v30  ;;  %v13862_v55 = vsub.f32 %v13835_v4, %v5624_v52  ;;  %v11030_v20 = vld [vmem:[%s12953_s1 + $0xc0] ss:$12 sps:$4 sm:$0xff]  }
0x2094   : > { %v13851_v37 = vsub.f32 %v13839_v12, %v5622_v46  ;;  %v5632_v26 = vmul.f32 %v13862_v55, %v13862_v55  ;;  %v11035_v46 = vld [vmem:[%s12953_s1 + $0xdc] ss:$12 sps:$4 sm:$0xff]  }
0x2095   : > { %v5618_v5 = vpop.xlane.xlu0 %5617 }
0x2096   : > { %v5623_v57 = vmul.f32 0.0078125, %v5618_v5  ;;  %v5630_v3 = vmul.f32 %v13851_v37, %v13851_v37 }
0x2098   : > { %v11391_v63 = vpop.eup %11390  ;;  %v13857_v0 = vsub.f32 %v13843_v47, %v5623_v57 }
0x2099   : > { %v5332_v19 = vsel %vm1669_vm2, %v11391_v63, 0.0 }
0x209a   : > { %v11393_v45 = vpop.eup %11392  ;;  %5333 = vadd.xlane.f32.xlu0 %v5332_v19  ;;  %v5631_v59 = vmul.f32 %v13857_v0, %v13857_v0 }
0x209b   : > { %v5335_v41 = vsel %vm1669_vm2, %v11393_v45, 0.0 }
0x209c   : > { %5336 = vadd.xlane.f32.xlu1 %v5335_v41 }
0x209e   : > { %5633 = vadd.xlane.f32.xlu0 %v5629_v23 }
0x20a0   : > { %5635 = vadd.xlane.f32.xlu1 %v5630_v3 }
0x20a3   : > { %v5146_v15 = vpop.f32.mrb[108].mxu1 }
0x20a4   : > { %v10369_v60 = vpop.f32.mrb[109].mxu1  ;;  %5637 = vadd.xlane.f32.xlu1 %v5631_v59  ;;  %v11036_v59 = vld [vmem:[%s12953_s1 + $0xf0] ss:$12 sps:$4 sm:$0xff]  }
0x20a5   : > { %v5149_v61 = vpop.f32.mrb[110].mxu1  ;;  %v11041_v60 = vld [vmem:[%s12953_s1 + $0x10c] ss:$12 sps:$4 sm:$0xff]  }
0x20a6   : > { %v10868_v62 = vpack.i.bf16 %v5149_v61, %v5146_v15  ;;  %v10370_v39 = vpop.f32.mrb[111].mxu1 }
0x20a8   : > { %5639 = vadd.xlane.f32.xlu1 %v5632_v26  ;;  %v11039_v26 = vld [vmem:[%s12953_s1 + $0x108] ss:$12 sps:$4 sm:$0xff]  }
0x20ab   : > { %v5244_v27 = vpop.f32.mrb[112].mxu1 }
0x20ac   : > { %v10381_v29 = vpop.f32.mrb[113].mxu1  ;;  %v5302_v10 = vsel %vm1669_vm2, %v5244_v27, -inf }
0x20ad   : > { %v5247_v17 = vpop.f32.mrb[114].mxu1  ;;  %5303 = vmax.xlane.f32.xlu1 %v5302_v10  ;;  %v11042_v10 = vld [vmem:[%s12953_s1 + $0x120] ss:$12 sps:$4 sm:$0xff]  }
0x20ae   : > { %v10382_v40 = vpop.f32.mrb[115].mxu1  ;;  %v5305_v14 = vsel %vm1669_vm2, %v5247_v17, -inf }
0x20b1   : > { %5306 = vmax.xlane.f32.xlu1 %v5305_v14 }
0x20b4   : > { %5395 = vrot.lane.b32.xlu0 %v13700_v33, %s12206_s9 }
0x20b8   : > { %5348 = vrot.lane.b32.xlu0 %v13702_v32, %s12206_s9  ;;  %v11032_v32 = vld [vmem:[%s12953_s1 + $0xc4] ss:$12 sps:$4 sm:$0xff]  }
0x20bc   : > { %10864 = vrot.lane.b32.xlu0 %v10863_v11, %s12206_s9 }
0x20c0   : > { %10869 = vrot.lane.b32.xlu0 %v10868_v62, %s12205_s2 }
0x20c4   : > { %10874 = vrot.lane.b32.xlu0 %v10873_v44, %s12205_s2 }
0x2127   : > { %v5334_v35 = vpop.xlane.xlu0 %5333 }
0x2128   : > { %11394 = vrcp.f32 %v5334_v35 }
0x2129   : > { %v5337_v16 = vpop.xlane.xlu1 %5336 }
0x212a   : > { %11396 = vrcp.f32 %v5337_v16 }
0x212b   : > { %v5634_v33 = vpop.xlane.xlu0 %5633 }
0x212c   : > { %v5641_v5 = vmul.f32 0.0078125, %v5634_v33  ;;  %v11045_v33 = vld [vmem:[%s12953_s1 + $0x138] ss:$12 sps:$4 sm:$0xff]  }
0x212d   : > { %v5636_v43 = vpop.xlane.xlu1 %5635 }
0x212e   : > { %v5642_v8 = vmul.f32 0.0078125, %v5636_v43  ;;  %v9407_v43 = vld [vmem:[%s12936_s6 + $0x4] sm:$0x7] }
0x212f   : > { %v5396_v49 = vpop.permute.xlu0 %5395 }
0x2130   : > { %10396 = vmatpush3.bf16.msra.mxu0 %v5396_v49  ;;  %v5646_v19 = vadd.f32 1e-05, %v5642_v8  ;;  %v11050_v49 = vld [vmem:[%s12953_s1 + $0x154] ss:$12 sps:$4 sm:$0xff]  }
0x2131   : > { %v5638_v2 = vpop.xlane.xlu1 %5637  ;;  %5836 = vmatprep.subr.bf16.mxu0 %v11032_v32 }
0x2132   : > { %v11395_v36 = vpop.eup %11394  ;;  %11398 = vrsqrt.f32 %v5646_v19  ;;  %v5643_v61 = vmul.f32 0.0078125, %v5638_v2 }
0x2133   : > { %v5349_v11 = vpop.permute.xlu0 %5348  ;;  %v5344_v25 = vmul.f32 %v11395_v36, %v11391_v63  ;;  %v11038_v63 = vld [vmem:[%s12953_s1 + $0xf4] ss:$12 sps:$4 sm:$0xff]  }
0x2134   : > { %v11397_v50 = vpop.eup %11396  ;;  %10390 = vmatpush3.bf16.msra.mxu1 %v5349_v11  ;;  %v5647_v29 = vadd.f32 1e-05, %v5643_v61  ;;  %v5660_v11 = vrot.slane %v9407_v43, %v13558_v28 }
0x2135   : > { %v5345_v58 = vmul.f32 %v11397_v50, %v11393_v45  ;;  %v5640_v44 = vpop.xlane.xlu1 %5639  ;;  %v5645_v45 = vadd.f32 1e-05, %v5641_v5  ;;  %v11051_v5 = vld [vmem:[%s12953_s1 + $0x168] ss:$12 sps:$4 sm:$0xff]  }
0x2136   : > { %v5644_v52 = vmul.f32 0.0078125, %v5640_v44  ;;  %v11053_v44 = vld [vmem:[%s12953_s1 + $0x16c] ss:$12 sps:$4 sm:$0xff]  }
0x2137   : > { %v5347_v24 = vpack.c.bf16 %v5345_v58, %v5344_v25  ;;  %v11048_v25 = vld [vmem:[%s12953_s1 + $0x150] ss:$12 sps:$4 sm:$0xff]  }
0x2138   : > { %v5648_v39 = vadd.f32 1e-05, %v5644_v52  ;;  %v9408_v58 = vld [vmem:[%s12944_s14 + $0x4] sm:$0x7] }
0x2139   : > { %10398 = vmatmul.mubr.msk.bf16.vlgmr.msra.gmra.mrb[112].mxu0 %vm1669_vm2, %v5347_v24  ;;  %v5668_v24 = vrot.slane %v9408_v58, %v13558_v28 }
0x213a   : > { %5837 = vmatpush1.bf16.msra.mxu0 %v11030_v20  ;;  %v5304_v57 = vpop.xlane.xlu1 %5303  ;;  %5868 = vmatprep.mubr.bf16.mxu0 %v12201_v6 }
0x213b   : > { %v5314_v41 = vsub.f32 %v5244_v27, %v5304_v57  ;;  %5838 = vmatprep.subr.bf16.mxu0 %v11035_v46  ;;  %v11044_v27 = vld [vmem:[%s12953_s1 + $0x124] ss:$12 sps:$4 sm:$0xff]  }
0x213c   : > { %v11399_v40 = vpop.eup %11398 }
0x213d   : > { %v5318_v23 = vmul.f32 1.442695, %v5314_v41  ;;  %v5654_v32 = vmul.f32 %v11399_v40, %v13851_v37 }
0x213e   : > { %5839 = vmatpush1.bf16.msra.mxu0 %v11033_v13  ;;  %v5307_v3 = vpop.xlane.xlu1 %5306 }
0x213f   : > { %11400 = vpow2.f32 %v5318_v23  ;;  %v5315_v15 = vsub.f32 %v5247_v17, %v5307_v3  ;;  %5840 = vmatprep.subr.bf16.mxu0 %v11038_v63  ;;  %v11047_v17 = vld [vmem:[%s12953_s1 + $0x13c] ss:$12 sps:$4 sm:$0xff]   ;;  %v5662_v8 = vmul.f32 %v5660_v11, %v5654_v32 }
0x2140   : > { %11402 = vrsqrt.f32 %v5645_v45 }
0x2141   : > { %v5320_v62 = vmul.f32 1.442695, %v5315_v15 }
0x2142   : > { %5841 = vmatpush1.bf16.msra.mxu0 %v11036_v59 }
0x2143   : > { %11404 = vpow2.f32 %v5320_v62  ;;  %5842 = vmatprep.subr.bf16.mxu0 %v11041_v60 }
0x2144   : > { %11406 = vrsqrt.f32 %v5648_v39 }
0x2145   : > { %11408 = vrsqrt.f32 %v5647_v29 }
0x2146   : > { %5843 = vmatpush1.bf16.msra.mxu0 %v11039_v26 }
0x2147   : > { %5844 = vmatprep.subr.bf16.mxu0 %v11044_v27 }
0x2149   : > { %v11401_v14 = vpop.eup %11400 }
0x214a   : > { %v11403_v35 = vpop.eup %11402  ;;  %5845 = vmatpush1.bf16.msra.mxu0 %v11042_v10  ;;  %v5326_v16 = vsel %vm1669_vm2, %v11401_v14, 0.0 }
0x214b   : > { %5327 = vadd.xlane.f32.xlu1 %v5326_v16  ;;  %5846 = vmatprep.subr.bf16.mxu0 %v11047_v17  ;;  %v5653_v36 = vmul.f32 %v11403_v35, %v13847_v30  ;;  %v5670_v30 = vadd.f32 %v5668_v24, %v5662_v8 }
0x214d   : > { %v11405_v2 = vpop.eup %11404  ;;  %v5661_v37 = vmul.f32 %v5660_v11, %v5653_v36 }
0x214e   : > { %5847 = vmatpush1.bf16.msra.mxu0 %v11045_v33  ;;  %v5329_v50 = vsel %vm1669_vm2, %v11405_v2, 0.0  ;;  %v11407_v20 = vpop.eup %11406 }
0x214f   : > { %5330 = vadd.xlane.f32.xlu1 %v5329_v50  ;;  %5848 = vmatprep.subr.bf16.mxu0 %v11050_v49  ;;  %v11409_v46 = vpop.eup %11408  ;;  %v5656_v19 = vmul.f32 %v11407_v20, %v13862_v55  ;;  %v5669_v57 = vadd.f32 %v5668_v24, %v5661_v37 }
0x2150   : > { %v5655_v13 = vmul.f32 %v11409_v46, %v13857_v0 }
0x2151   : > { %v13911_v41 = vpack.c.bf16 %v5670_v30, %v5669_v57  ;;  %v5664_v63 = vmul.f32 %v5660_v11, %v5656_v19 }
0x2152   : > { %5849 = vmatpush1.bf16.msra.mxu0 %v11048_v25  ;;  %v5663_v45 = vmul.f32 %v5660_v11, %v5655_v13 }
0x2153   : > { %5850 = vmatprep.subr.bf16.mxu0 %v11053_v44  ;;  %v5672_v23 = vadd.f32 %v5668_v24, %v5664_v63  ;;  %v10865_v44 = vpop.permute.xlu0 %10864 }
0x2154   : > { %v5671_v52 = vadd.f32 %v5668_v24, %v5663_v45  ;;  %v10867_v24 = vunpack.i.h.bf16 %v10865_v44  ;;  %v10866_v46 = vunpack.i.l.bf16 %v10865_v44 }
0x2156   : > { %5851 = vmatpush1.bf16.msra.mxu0 %v11051_v5  ;;  %v13916_v3 = vpack.c.bf16 %v5672_v23, %v5671_v52  ;;  %v5493_v57 = vsel %vm1574_vm1, %v13726_v42, %v10867_v24  ;;  %v5492_v13 = vsel %vm1574_vm1, %v13724_v51, %v10866_v46  ;;  %v11055_v51 = vld [vmem:[%s12955_s17 + $0x8] sm:$0xff]  }
0x2157   : > { %10441 = vmatprep.subr.bf16.mxu0 %v12202_v18  ;;  %v13949_v8 = vpop.permute.xlu0 %10869 }
0x2159   : > { %5869 = vmatmul.mubr.bf16.vlgmr.msra.gmra.mrb[116].mxu0 %v13911_v41 }
0x215a   : > { %5878 = vmatprep.mubr.bf16.mxu0 %v12201_v6 }
0x215b   : > { %v10875_v20 = vpop.permute.xlu0 %10874 }
0x215c   : > { %v10877_v5 = vunpack.i.h.bf16 %v10875_v20  ;;  %v10876_v30 = vunpack.i.l.bf16 %v10875_v20 }
0x215e   : > { %v5496_v23 = vsel %vm2588_vm3, %v5492_v13, %v10876_v30  ;;  %v5497_v52 = vsel %vm2588_vm3, %v5493_v57, %v10877_v5  ;;  %v10872_v30 = vunpack.i.h.bf16 %v13949_v8 }
0x2160   : > { %10859 = vrot.lane.b32.xlu1 %v10858_v54, %s12206_s9 }
0x2161   : > { %5879 = vmatmul.mubr.bf16.gmra.mrb[120].mxu0 %v13916_v3 }
0x2162   : > { %10443 = vmatprep.mubr.msk.bf16.mxu0 %vm12203_vm0, %v12202_v18 }
0x21d8   : > { %v5328_v0 = vpop.xlane.xlu1 %5327 }
0x21d9   : > { %11410 = vrcp.f32 %v5328_v0 }
0x21dc   : > { %v5331_v55 = vpop.xlane.xlu1 %5330 }
0x21dd   : > { %11412 = vrcp.f32 %v5331_v55 }
0x21e0   : > { %v13951_v37 = vpop.permute.xlu1 %10859 }
0x21e1   : > { %v10862_v20 = vunpack.i.h.bf16 %v13951_v37  ;;  %v10861_v24 = vunpack.i.l.bf16 %v13951_v37 }
0x21e3   : > { %v11411_v59 = vpop.eup %11410  ;;  %v5491_v46 = vsel %vm1574_vm1, %v13734_v53, %v10862_v20  ;;  %v5490_v5 = vsel %vm1574_vm1, %v13732_v1, %v10861_v24  ;;  %v11063_v1 = vld [vmem:[%s12953_s1 + $0xe0] ss:$12 sps:$4 sm:$0xff]  }
0x21e4   : > { %v5342_v60 = vmul.f32 %v11411_v59, %v11401_v14  ;;  %v11054_v59 = vld [vmem:[%s12955_s17] sm:$0xff]  }
0x21e5   : > { %10401 = vmatprep.subr.bf16.mxu1 %v11054_v59 }
0x21e7   : > { %v11413_v15 = vpop.eup %11412 }
0x21e8   : > { %v5343_v61 = vmul.f32 %v11413_v15, %v11405_v2  ;;  %v11056_v15 = vld [vmem:[%s12955_s17 + $0x10] sm:$0xff]  }
0x21ea   : > { %v5346_v62 = vpack.c.bf16 %v5343_v61, %v5342_v60  ;;  %v11057_v60 = vld [vmem:[%s12955_s17 + $0x18] sm:$0xff]   ;;  %v11058_v61 = vld [vmem:[%s12955_s17 + $0x20] sm:$0xff]  }
0x21ec   : > { %10392 = vmatmul.mubr.msk.bf16.vlgmr.msra.gmra.mrb[116].mxu1 %vm1669_vm2, %v5346_v62  ;;  %v11059_v62 = vld [vmem:[%s12955_s17 + $0x28] sm:$0xff]  }
0x21ed   : > { %10402 = vmatpush3.bf16.msra.mxu1 %v11054_v59  ;;  %v11065_v59 = vld [vmem:[%s12953_s1 + $0x110] ss:$12 sps:$4 sm:$0xff]  }
0x21ee   : > { %10403 = vmatprep.subr.bf16.mxu1 %v11055_v51 }
0x21f1   : > { %10404 = vmatpush3.bf16.msra.mxu1 %v11055_v51  ;;  %v11066_v51 = vld [vmem:[%s12953_s1 + $0x128] ss:$12 sps:$4 sm:$0xff]  }
0x21f2   : > { %10405 = vmatprep.subr.bf16.mxu1 %v11056_v15 }
0x21f5   : > { %10406 = vmatpush3.bf16.msra.mxu1 %v11056_v15  ;;  %v11067_v15 = vld [vmem:[%s12953_s1 + $0x140] ss:$12 sps:$4 sm:$0xff]  }
0x21f6   : > { %10407 = vmatprep.subr.bf16.mxu1 %v11057_v60 }
0x21f9   : > { %10408 = vmatpush3.bf16.msra.mxu1 %v11057_v60 }
0x21fa   : > { %10409 = vmatprep.subr.bf16.mxu1 %v11058_v61 }
0x21fd   : > { %10410 = vmatpush3.bf16.msra.mxu1 %v11058_v61 }
0x21fe   : > { %10411 = vmatprep.subr.bf16.mxu1 %v11059_v62 }
0x2201   : > { %10412 = vmatpush3.bf16.msra.mxu1 %v11059_v62 }
0x220c   : > { %v5435_v39 = vpop.f32.mrb[112].mxu0 }
0x220d   : > { %v10399_v26 = vpop.f32.mrb[113].mxu0 }
0x220e   : > { %v5438_v56 = vpop.f32.mrb[114].mxu0  ;;  %v11061_v26 = vld [vmem:[%s12955_s17 + $0x38] sm:$0xff]  }
0x220f   : > { %v10883_v9 = vpack.i.bf16 %v5438_v56, %v5435_v39  ;;  %v10400_v54 = vpop.f32.mrb[115].mxu0  ;;  %v11060_v39 = vld [vmem:[%s12955_s17 + $0x30] sm:$0xff]  }
0x2210   : > { %10413 = vmatprep.subr.bf16.mxu1 %v11060_v39  ;;  %v11062_v56 = vld [vmem:[%s12953_s1 + $0xc8] ss:$12 sps:$4 sm:$0xff]  }
0x2211   : > { %10884 = vrot.lane.b32.xlu1 %v10883_v9, %s12204_s13  ;;  %10414 = vmatpush3.bf16.msra.mxu1 %v11060_v39 }
0x2212   : > { %10415 = vmatprep.subr.bf16.mxu1 %v11061_v26 }
0x2215   : > { %10416 = vmatpush3.bf16.msra.mxu1 %v11061_v26 }
0x2216   : > { %10421 = vmatprep.subr.bf16.mxu1 %v11062_v56 }
0x222c   : > { %v5870_v27 = vpop.f32.mrb[116].mxu0 }
0x222d   : > { %v5872_v29 = vpop.f32.mrb[117].mxu0  ;;  %v5957_v17 = vmul.f32 0.17677669, %v5870_v27 }
0x222e   : > { %v5874_v10 = vpop.f32.mrb[118].mxu0 }
0x222f   : > { %v5958_v40 = vmul.f32 0.17677669, %v5874_v10  ;;  %v5876_v35 = vpop.f32.mrb[119].mxu0 }
0x2230   : > { %v13927_v16 = vpack.c.bf16 %v5876_v35, %v5872_v29 }
0x2231   : > { %v13929_v14 = vpack.c.bf16 %v5958_v40, %v5957_v17 }
0x2232   : > { %v5971_v33 = vsel %vm1574_vm1, %v13927_v16, 0 }
0x2233   : > { %10442 = vmatpush3.bf16.xpose.msra.mxu0 %v5971_v33 }
0x2234   : > { %v5880_v43 = vpop.f32.mrb[120].mxu0  ;;  %10447 = vmatprep.subr.bf16.mxu0 %v12202_v18 }
0x2235   : > { %v5882_v32 = vpop.f32.mrb[121].mxu0  ;;  %v5959_v2 = vmul.f32 0.17677669, %v5880_v43 }
0x2236   : > { %v5884_v49 = vpop.f32.mrb[122].mxu0 }
0x2237   : > { %v5960_v36 = vmul.f32 0.17677669, %v5884_v49  ;;  %v5886_v11 = vpop.f32.mrb[123].mxu0 }
0x2238   : > { %v13934_v50 = vpack.c.bf16 %v5886_v11, %v5882_v32 }
0x2239   : > { %v13936_v25 = vpack.c.bf16 %v5960_v36, %v5959_v2 }
0x223a   : > { %10444 = vmatmul.mubr.msk.bf16.vlgmr.msra.gmra.mrb[124].mxu0 %vm1574_vm1, %v13929_v14  ;;  %v6018_v58 = vsel %vm1574_vm1, %v13934_v50, 0 }
0x223b   : > { %10448 = vmatpush3.bf16.xpose.msra.mxu0 %v6018_v58  ;;  %10449 = vmatprep.mubr.msk.bf16.mxu0 %vm12203_vm0, %v12202_v18 }
0x223c   : > { %10453 = vmatprep.subr.bf16.mxu0 %v12202_v18 }
0x2242   : > { %10450 = vmatmul.mubr.msk.bf16.vlgmr.msra.gmra.mrb[128].mxu0 %vm1574_vm1, %v13936_v25 }
0x2243   : > { %10455 = vmatprep.mubr.msk.bf16.mxu0 %vm12203_vm0, %v12202_v18 }
0x2283   : > { %v10885_v19 = vpop.permute.xlu1 %10884 }
0x2284   : > { %v10887_v63 = vunpack.i.h.bf16 %v10885_v19  ;;  %v10886_v45 = vunpack.i.l.bf16 %v10885_v19  ;;  %v10871_v19 = vunpack.i.l.bf16 %v13949_v8  ;;  %v11064_v8 = vld [vmem:[%s12953_s1 + $0xf8] ss:$12 sps:$4 sm:$0xff]  }
0x2286   : > { %v13960_v0 = vsel %vm2593_vm4, %v5496_v23, %v10886_v45  ;;  %v13963_v55 = vsel %vm2593_vm4, %v5497_v52, %v10887_v63  ;;  %v5494_v45 = vsel %vm2588_vm3, %v5490_v5, %v10871_v19  ;;  %v5495_v23 = vsel %vm2588_vm3, %v5491_v46, %v10872_v30 }
0x2287   : > { %v5503_v42 = vpack.c.bf16 %v13963_v55, %v13960_v0  ;;  %v11068_v0 = vld [vmem:[%s12953_s1 + $0x158] ss:$12 sps:$4 sm:$0xff]   ;;  %v11069_v55 = vld [vmem:[%s12953_s1 + $0x170] ss:$12 sps:$4 sm:$0xff]  }
0x22bf   : > { %v5388_v9 = vpop.f32.mrb[116].mxu1 }
0x22c0   : > { %v10393_v54 = vpop.f32.mrb[117].mxu1 }
0x22c1   : > { %v5391_v27 = vpop.f32.mrb[118].mxu1 }
0x22c2   : > { %v10878_v29 = vpack.i.bf16 %v5391_v27, %v5388_v9  ;;  %v10394_v10 = vpop.f32.mrb[119].mxu1 }
0x22c4   : > { %10879 = vrot.lane.b32.xlu0 %v10878_v29, %s12204_s13 }
0x230d   : > { %v6007_v17 = vpop.f32.mrb[124].mxu0 }
0x230e   : > { %v10445_v40 = vpop.f32.mrb[125].mxu0  ;;  %v6061_v35 = vsel %vm1669_vm2, %v6007_v17, -inf }
0x230f   : > { %v6010_v33 = vpop.f32.mrb[126].mxu0  ;;  %6062 = vmax.xlane.f32.xlu0 %v6061_v35 }
0x2310   : > { %v10446_v43 = vpop.f32.mrb[127].mxu0  ;;  %v6064_v32 = vsel %vm1669_vm2, %v6010_v33, -inf }
0x2311   : > { %6065 = vmax.xlane.f32.xlu1 %v6064_v32 }
0x2315   : > { %v6054_v49 = vpop.f32.mrb[128].mxu0 }
0x2316   : > { %v10451_v2 = vpop.f32.mrb[129].mxu0  ;;  %v6067_v36 = vsel %vm1669_vm2, %v6054_v49, -inf }
0x2317   : > { %v13980_v11 = vpop.f32.mrb[130].mxu0  ;;  %6068 = vmax.xlane.f32.xlu0 %v6067_v36 }
0x2318   : > { %v10452_v58 = vpop.f32.mrb[131].mxu0  ;;  %v6070_v44 = vsel %vm1669_vm2, %v13980_v11, -inf }
0x231b   : > { %6071 = vmax.xlane.f32.xlu0 %v6070_v44 }
0x2336   : > { %v10880_v57 = vpop.permute.xlu0 %10879 }
0x2337   : > { %v10882_v13 = vunpack.i.h.bf16 %v10880_v57  ;;  %v10881_v63 = vunpack.i.l.bf16 %v10880_v57 }
0x2339   : > { %v5498_v37 = vsel %vm2593_vm4, %v5494_v45, %v10881_v63  ;;  %v5499_v53 = vsel %vm2593_vm4, %v5495_v23, %v10882_v13 }
0x233a   : > { %v5502_v52 = vpack.c.bf16 %v5499_v53, %v5498_v37 }
0x233c   : > { %10417 = vmatprep.mubr.bf16.mxu1 %v5502_v52 }
0x233d   : > { %10418 = vmatmul.mubr.bf16.vlgmr.msra.gmra.mrb[120].mxu1 %v5503_v42 }
0x233e   : > { %10422 = vmatpush3.bf16.msra.mxu1 %v11062_v56  ;;  %10437 = vmatprep.mubr.bf16.mxu1 %v13911_v41 }
0x233f   : > { %10423 = vmatprep.subr.bf16.mxu1 %v11063_v1 }
0x2342   : > { %10424 = vmatpush3.bf16.msra.mxu1 %v11063_v1 }
0x2343   : > { %10425 = vmatprep.subr.bf16.mxu1 %v11064_v8 }
0x2346   : > { %10426 = vmatpush3.bf16.msra.mxu1 %v11064_v8 }
0x2347   : > { %10427 = vmatprep.subr.bf16.mxu1 %v11065_v59 }
0x234a   : > { %10428 = vmatpush3.bf16.msra.mxu1 %v11065_v59 }
0x234b   : > { %10429 = vmatprep.subr.bf16.mxu1 %v11066_v51 }
0x234e   : > { %10430 = vmatpush3.bf16.msra.mxu1 %v11066_v51 }
0x234f   : > { %10431 = vmatprep.subr.bf16.mxu1 %v11067_v15 }
0x2352   : > { %10432 = vmatpush3.bf16.msra.mxu1 %v11067_v15 }
0x2353   : > { %10433 = vmatprep.subr.bf16.mxu1 %v11068_v0 }
0x2356   : > { %10434 = vmatpush3.bf16.msra.mxu1 %v11068_v0 }
0x2357   : > { %10435 = vmatprep.subr.bf16.mxu1 %v11069_v55 }
0x235a   : > { %10436 = vmatpush3.bf16.msra.mxu1 %v11069_v55 }
0x235b   : > { %10459 = vmatprep.subr.bf16.mxu1 %v12202_v18 }
0x235d   : > { %10438 = vmatmul.mubr.bf16.vlgmr.msra.gmra.mrb[124].mxu1 %v13916_v3 }
0x235e   : > { %10461 = vmatprep.mubr.msk.bf16.mxu1 %vm12203_vm0, %v12202_v18 }
0x239c   : > { %v6063_v41 = vpop.xlane.xlu0 %6062 }
0x239d   : > { %v6073_v42 = vsub.f32 %v6007_v17, %v6063_v41 }
0x239e   : > { %v6066_v60 = vpop.xlane.xlu1 %6065 }
0x239f   : > { %v6077_v61 = vmul.f32 1.442695, %v6073_v42  ;;  %v6074_v62 = vsub.f32 %v6010_v33, %v6066_v60 }
0x23a1   : > { %11414 = vpow2.f32 %v6077_v61  ;;  %v6079_v39 = vmul.f32 1.442695, %v6074_v62 }
0x23a3   : > { %11416 = vpow2.f32 %v6079_v39 }
0x23a4   : > { %v6069_v26 = vpop.xlane.xlu0 %6068 }
0x23a5   : > { %v6075_v56 = vsub.f32 %v6054_v49, %v6069_v26  ;;  %v14026_v49 = vld [vmem:[%s969_s4] ss:$0 sm:$0xff] }
0x23a7   : > { %v6081_v9 = vmul.f32 1.442695, %v6075_v56 }
0x23a8   : > { %v6072_v40 = vpop.xlane.xlu0 %6071 }
0x23a9   : > { %11418 = vpow2.f32 %v6081_v9  ;;  %v6076_v35 = vsub.f32 %v13980_v11, %v6072_v40 }
0x23ab   : > { %v11415_v54 = vpop.eup %11414  ;;  %v6083_v33 = vmul.f32 1.442695, %v6076_v35 }
0x23ac   : > { %v6085_v27 = vsel %vm1669_vm2, %v11415_v54, 0.0 }
0x23ad   : > { %v11417_v29 = vpop.eup %11416  ;;  %6086 = vadd.xlane.f32.xlu0 %v6085_v27  ;;  %11420 = vpow2.f32 %v6083_v33 }
0x23ae   : > { %v6088_v3 = vsel %vm1669_vm2, %v11417_v29, 0.0 }
0x23af   : > { %6089 = vadd.xlane.f32.xlu1 %v6088_v3 }
0x23b3   : > { %v11419_v10 = vpop.eup %11418 }
0x23b4   : > { %v6091_v17 = vsel %vm1669_vm2, %v11419_v10, 0.0 }
0x23b5   : > { %6092 = vadd.xlane.f32.xlu0 %v6091_v17 }
0x23b7   : > { %v11421_v43 = vpop.eup %11420 }
0x23b8   : > { %v6094_v32 = vsel %vm1669_vm2, %v11421_v43, 0.0 }
0x23c0   : > { %6252 = vrot.lane.b32.xlu1 %v13934_v50, %s12204_s13 }
0x23cb   : > { %6199 = vrot.lane.b32.xlu0 %v13927_v16, %s12204_s13 }
0x23e4   : > { %6095 = vadd.xlane.f32.xlu1 %v6094_v32 }
0x23f5   : > { %6196 = vrot.lane.b32.xlu1 %v13929_v14, %s12204_s13 }
0x23f9   : > { %6249 = vrot.lane.b32.xlu1 %v13936_v25, %s12204_s13 }
0x2410   : > { %v10419_v2 = vpop.f32.mrb[120].mxu1 }
0x2411   : > { %v14029_v36 = vadd.f32 %v10419_v2, %v14026_v49  ;;  %v14031_v11 = vpop.f32.mrb[121].mxu1 }
0x2412   : > { %v10420_v58 = vpop.f32.mrb[122].mxu1 }
0x2413   : > { %v14034_v44 = vadd.f32 %v10420_v58, %v14026_v49  ;;  %v5595_v20 = vpop.f32.mrb[123].mxu1 }
0x2414   : > { %v14037_v24 = vadd.f32 %v14026_v49, %v5595_v20 }
0x2430   : > { %v10439_v46 = vpop.f32.mrb[124].mxu1 }
0x2431   : > { %v5923_v5 = vpop.f32.mrb[125].mxu1 }
0x2432   : > { %v10440_v30 = vpop.f32.mrb[126].mxu1 }
0x2433   : > { %v14039_v19 = vpack.c.bf16 %v10440_v30, %v10439_v46  ;;  %v5926_v57 = vpop.f32.mrb[127].mxu1 }
0x2434   : > { %v14041_v13 = vpack.c.bf16 %v5926_v57, %v5923_v5 }
0x2435   : > { %10460 = vmatpush3.bf16.msra.mxu1 %v14039_v19 }
0x2436   : > { %10454 = vmatpush3.bf16.msra.mxu0 %v14041_v13  ;;  %10471 = vmatprep.subr.bf16.mxu1 %v12202_v18 }
0x2437   : > { %10465 = vmatprep.subr.bf16.mxu0 %v12202_v18 }
0x243a   : > { %v6087_v63 = vpop.xlane.xlu0 %6086 }
0x243b   : > { %11422 = vrcp.f32 %v6087_v63 }
0x243c   : > { %v6090_v45 = vpop.xlane.xlu1 %6089 }
0x243d   : > { %11424 = vrcp.f32 %v6090_v45 }
0x2440   : > { %v6253_v15 = vpop.permute.xlu1 %6252 }
0x2441   : > { %v6258_v39 = vsel %vm1574_vm1, %v6253_v15, 0 }
0x2442   : > { %v6093_v23 = vpop.xlane.xlu0 %6092 }
0x2443   : > { %11426 = vrcp.f32 %v6093_v23 }
0x2445   : > { %v11423_v37 = vpop.eup %11422 }
0x2446   : > { %v6101_v52 = vmul.f32 %v11423_v37, %v11415_v54  ;;  %v6200_v8 = vpop.permute.xlu0 %6199 }
0x2447   : > { %v11425_v53 = vpop.eup %11424  ;;  %v6205_v51 = vsel %vm1574_vm1, %v6200_v8, 0 }
0x2448   : > { %v6102_v1 = vmul.f32 %v11425_v53, %v11417_v29 }
0x244a   : > { %v6105_v59 = vpack.c.bf16 %v6102_v1, %v6101_v52 }
0x244c   : > { %10456 = vmatmul.mubr.msk.bf16.vlgmr.msra.gmra.mrb[132].mxu0 %vm1669_vm2, %v6105_v59 }
0x244d   : > { %10466 = vmatpush3.bf16.xpose.msra.mxu0 %v6205_v51  ;;  %10467 = vmatprep.mubr.msk.bf16.mxu0 %vm12203_vm0, %v12202_v18  ;;  %v11427_v41 = vpop.eup %11426 }
0x244e   : > { %10477 = vmatprep.subr.bf16.mxu0 %v12202_v18  ;;  %v6103_v60 = vmul.f32 %v11427_v41, %v11419_v10 }
0x2471   : > { %v6096_v0 = vpop.xlane.xlu1 %6095 }
0x2472   : > { %11428 = vrcp.f32 %v6096_v0 }
0x2475   : > { %v6197_v55 = vpop.permute.xlu1 %6196 }
0x2476   : > { %10468 = vmatmul.mubr.msk.bf16.vlgmr.msra.gmra.mrb[136].mxu0 %vm1574_vm1, %v6197_v55 }
0x2477   : > { %10479 = vmatprep.mubr.msk.bf16.mxu0 %vm12203_vm0, %v12202_v18 }
0x2479   : > { %v6250_v26 = vpop.permute.xlu1 %6249 }
0x247c   : > { %v11429_v42 = vpop.eup %11428 }
0x247d   : > { %v6104_v61 = vmul.f32 %v11429_v42, %v11421_v43 }
0x247f   : > { %v6106_v62 = vpack.c.bf16 %v6104_v61, %v6103_v60 }
0x2481   : > { %10462 = vmatmul.mubr.msk.bf16.vlgmr.msra.gmra.mrb[128].mxu1 %vm1669_vm2, %v6106_v62 }
0x2482   : > { %10472 = vmatpush3.bf16.xpose.msra.mxu1 %v6258_v39  ;;  %10473 = vmatprep.mubr.msk.bf16.mxu1 %vm12203_vm0, %v12202_v18 }
0x2483   : > { %10483 = vmatprep.subr.bf16.mxu1 %v12202_v18 }
0x2489   : > { %10474 = vmatmul.mubr.msk.bf16.vlgmr.msra.gmra.mrb[132].mxu1 %vm1574_vm1, %v6250_v26 }
0x248a   : > { %10485 = vmatprep.mubr.msk.bf16.mxu1 %vm12203_vm0, %v12202_v18 }
0x251f   : > { %v14063_v56 = vpop.f32.mrb[132].mxu0 }
0x2520   : > { %v10457_v9 = vpop.f32.mrb[133].mxu0 }
0x2521   : > { %v14065_v54 = vpop.f32.mrb[134].mxu0 }
0x2522   : > { %v10458_v27 = vpop.f32.mrb[135].mxu0 }
0x2549   : > { %v6241_v29 = vpop.f32.mrb[136].mxu0 }
0x254a   : > { %v10469_v3 = vpop.f32.mrb[137].mxu0  ;;  %v6301_v10 = vsel %vm1669_vm2, %v6241_v29, -inf }
0x254b   : > { %6302 = vmax.xlane.f32.xlu0 %v6301_v10  ;;  %v6244_v17 = vpop.f32.mrb[138].mxu0 }
0x254c   : > { %v10470_v40 = vpop.f32.mrb[139].mxu0  ;;  %v6304_v35 = vsel %vm1669_vm2, %v6244_v17, -inf }
0x254d   : > { %6305 = vmax.xlane.f32.xlu1 %v6304_v35 }
0x2554   : > { %v14069_v33 = vpop.f32.mrb[128].mxu1 }
0x2555   : > { %v10463_v43 = vpop.f32.mrb[129].mxu1 }
0x2556   : > { %v14071_v32 = vpop.f32.mrb[130].mxu1 }
0x2557   : > { %v10464_v2 = vpop.f32.mrb[131].mxu1 }
0x255c   : > { %v6294_v58 = vpop.f32.mrb[132].mxu1 }
0x255d   : > { %v10475_v20 = vpop.f32.mrb[133].mxu1  ;;  %v6307_v46 = vsel %vm1669_vm2, %v6294_v58, -inf }
0x255e   : > { %v6297_v5 = vpop.f32.mrb[134].mxu1  ;;  %6308 = vmax.xlane.f32.xlu0 %v6307_v46 }
0x255f   : > { %v10476_v30 = vpop.f32.mrb[135].mxu1  ;;  %v6310_v57 = vsel %vm1669_vm2, %v6297_v5, -inf }
0x2562   : > { %6311 = vmax.xlane.f32.xlu0 %v6310_v57 }
0x25d8   : > { %v6303_v63 = vpop.xlane.xlu0 %6302 }
0x25d9   : > { %v6313_v45 = vsub.f32 %v6241_v29, %v6303_v63 }
0x25da   : > { %v6306_v23 = vpop.xlane.xlu1 %6305 }
0x25db   : > { %v6317_v37 = vmul.f32 1.442695, %v6313_v45  ;;  %v6314_v53 = vsub.f32 %v6244_v17, %v6306_v23 }
0x25dd   : > { %11430 = vpow2.f32 %v6317_v37  ;;  %v6319_v52 = vmul.f32 1.442695, %v6314_v53 }
0x25df   : > { %11432 = vpow2.f32 %v6319_v52 }
0x25e7   : > { %v11431_v1 = vpop.eup %11430 }
0x25e8   : > { %v6325_v8 = vsel %vm1669_vm2, %v11431_v1, 0.0 }
0x25e9   : > { %v11433_v59 = vpop.eup %11432  ;;  %6326 = vadd.xlane.f32.xlu0 %v6325_v8 }
0x25ea   : > { %v6328_v51 = vsel %vm1669_vm2, %v11433_v59, 0.0 }
0x25eb   : > { %v6309_v15 = vpop.xlane.xlu0 %6308  ;;  %6329 = vadd.xlane.f32.xlu1 %v6328_v51 }
0x25ec   : > { %v6315_v0 = vsub.f32 %v6294_v58, %v6309_v15 }
0x25ee   : > { %v6321_v55 = vmul.f32 1.442695, %v6315_v0 }
0x25ef   : > { %v6312_v60 = vpop.xlane.xlu0 %6311 }
0x25f0   : > { %11434 = vpow2.f32 %v6321_v55  ;;  %v6316_v61 = vsub.f32 %v6297_v5, %v6312_v60 }
0x25f2   : > { %v6323_v62 = vmul.f32 1.442695, %v6316_v61 }
0x25f4   : > { %11436 = vpow2.f32 %v6323_v62 }
0x25fa   : > { %v11435_v41 = vpop.eup %11434 }
0x25fb   : > { %v6331_v42 = vsel %vm1669_vm2, %v11435_v41, 0.0 }
0x25fc   : > { %6332 = vadd.xlane.f32.xlu0 %v6331_v42  ;;  %6396 = vrot.lane.b32.xlu1 %v14039_v19, %s12204_s13 }
0x25fe   : > { %v11437_v39 = vpop.eup %11436 }
0x25ff   : > { %v6334_v26 = vsel %vm1669_vm2, %v11437_v39, 0.0 }
0x2600   : > { %6445 = vrot.lane.b32.xlu1 %v13927_v16, %s12205_s2 }
0x2612   : > { %6348 = vrot.lane.b32.xlu0 %v14041_v13, %s12204_s13 }
0x2616   : > { %6443 = vrot.lane.b32.xlu0 %v13929_v14, %s12205_s2 }
0x2624   : > { %6335 = vadd.xlane.f32.xlu1 %v6334_v26 }
0x2635   : > { %6496 = vrot.lane.b32.xlu1 %v13934_v50, %s12205_s2 }
0x2639   : > { %6494 = vrot.lane.b32.xlu1 %v13936_v25, %s12205_s2 }
0x2676   : > { %v6327_v29 = vpop.xlane.xlu0 %6326 }
0x2678   : > { %v6330_v9 = vpop.xlane.xlu1 %6329 }
0x2679   : > { %11438 = vrcp.f32 %v6330_v9 }
0x267a   : > { %11440 = vrcp.f32 %v6327_v29 }
0x267c   : > { %v6397_v27 = vpop.permute.xlu1 %6396 }
0x267d   : > { %10484 = vmatpush3.bf16.msra.mxu1 %v6397_v27 }
0x267e   : > { %10495 = vmatprep.subr.bf16.mxu1 %v12202_v18 }
0x2680   : > { %v6446_v58 = vpop.permute.xlu1 %6445 }
0x2681   : > { %v6451_v20 = vsel %vm1574_vm1, %v6446_v58, 0 }
0x2683   : > { %v11439_v3 = vpop.eup %11438 }
0x2684   : > { %v11441_v17 = vpop.eup %11440  ;;  %v6342_v40 = vmul.f32 %v11439_v3, %v11433_v59 }
0x2685   : > { %v6341_v35 = vmul.f32 %v11441_v17, %v11431_v1 }
0x2687   : > { %v6345_v2 = vpack.c.bf16 %v6342_v40, %v6341_v35 }
0x2689   : > { %v6333_v10 = vpop.xlane.xlu0 %6332 }
0x268a   : > { %11442 = vrcp.f32 %v6333_v10 }
0x268d   : > { %v6349_v43 = vpop.permute.xlu0 %6348 }
0x268e   : > { %10478 = vmatpush3.bf16.msra.mxu0 %v6349_v43 }
0x268f   : > { %10489 = vmatprep.subr.bf16.mxu0 %v12202_v18 }
0x2691   : > { %10480 = vmatmul.mubr.msk.bf16.vlgmr.msra.gmra.mrb[140].mxu0 %vm1669_vm2, %v6345_v2  ;;  %v6444_v46 = vpop.permute.xlu0 %6443 }
0x2692   : > { %10491 = vmatprep.mubr.msk.bf16.mxu0 %vm12203_vm0, %v12202_v18 }
0x2694   : > { %v11443_v30 = vpop.eup %11442 }
0x2695   : > { %v6343_v63 = vmul.f32 %v11443_v30, %v11435_v41 }
0x2697   : > { %10490 = vmatpush3.bf16.xpose.msra.mxu0 %v6451_v20 }
0x2698   : > { %10501 = vmatprep.subr.bf16.mxu0 %v12202_v18 }
0x269e   : > { %10492 = vmatmul.mubr.msk.bf16.vlgmr.msra.gmra.mrb[144].mxu0 %vm1574_vm1, %v6444_v46 }
0x269f   : > { %10503 = vmatprep.mubr.msk.bf16.mxu0 %vm12203_vm0, %v12202_v18 }
0x26b1   : > { %v6336_v5 = vpop.xlane.xlu1 %6335 }
0x26b2   : > { %11444 = vrcp.f32 %v6336_v5 }
0x26b5   : > { %v6497_v23 = vpop.permute.xlu1 %6496 }
0x26b6   : > { %v6502_v53 = vsel %vm1574_vm1, %v6497_v23, 0 }
0x26b9   : > { %v6495_v52 = vpop.permute.xlu1 %6494 }
0x26bc   : > { %v11445_v57 = vpop.eup %11444 }
0x26bd   : > { %v6344_v45 = vmul.f32 %v11445_v57, %v11437_v39 }
0x26bf   : > { %v6346_v37 = vpack.c.bf16 %v6344_v45, %v6343_v63 }
0x26c1   : > { %10486 = vmatmul.mubr.msk.bf16.vlgmr.msra.gmra.mrb[136].mxu1 %vm1669_vm2, %v6346_v37 }
0x26c2   : > { %10496 = vmatpush3.bf16.xpose.msra.mxu1 %v6502_v53  ;;  %10497 = vmatprep.mubr.msk.bf16.mxu1 %vm12203_vm0, %v12202_v18 }
0x26c3   : > { %10507 = vmatprep.subr.bf16.mxu1 %v12202_v18 }
0x26c9   : > { %10498 = vmatmul.mubr.msk.bf16.vlgmr.msra.gmra.mrb[140].mxu1 %vm1574_vm1, %v6495_v52 }
0x26ca   : > { %10509 = vmatprep.mubr.msk.bf16.mxu1 %vm12203_vm0, %v12202_v18 }
0x2764   : > { %v14109_v1 = vpop.f32.mrb[140].mxu0 }
0x2765   : > { %v10481_v8 = vpop.f32.mrb[141].mxu0 }
0x2766   : > { %v14111_v59 = vpop.f32.mrb[142].mxu0 }
0x2767   : > { %v10888_v51 = vpack.i.bf16 %v14111_v59, %v14109_v1  ;;  %v10482_v15 = vpop.f32.mrb[143].mxu0 }
0x2771   : > { %v6487_v0 = vpop.f32.mrb[144].mxu0 }
0x2772   : > { %v10493_v55 = vpop.f32.mrb[145].mxu0  ;;  %v6545_v41 = vsel %vm1669_vm2, %v6487_v0, -inf }
0x2773   : > { %6546 = vmax.xlane.f32.xlu0 %v6545_v41  ;;  %v6490_v42 = vpop.f32.mrb[146].mxu0 }
0x2774   : > { %v10494_v60 = vpop.f32.mrb[147].mxu0  ;;  %v6548_v61 = vsel %vm1669_vm2, %v6490_v42, -inf }
0x2775   : > { %6549 = vmax.xlane.f32.xlu1 %v6548_v61 }
0x2794   : > { %v14117_v62 = vpop.f32.mrb[136].mxu1 }
0x2795   : > { %v10487_v39 = vpop.f32.mrb[137].mxu1 }
0x2796   : > { %v14119_v26 = vpop.f32.mrb[138].mxu1 }
0x2797   : > { %v10893_v9 = vpack.i.bf16 %v14119_v26, %v14117_v62  ;;  %v10488_v27 = vpop.f32.mrb[139].mxu1 }
0x279c   : > { %v6538_v29 = vpop.f32.mrb[140].mxu1 }
0x279d   : > { %v10499_v3 = vpop.f32.mrb[141].mxu1  ;;  %v6551_v10 = vsel %vm1669_vm2, %v6538_v29, -inf }
0x279e   : > { %v6541_v17 = vpop.f32.mrb[142].mxu1  ;;  %6552 = vmax.xlane.f32.xlu0 %v6551_v10 }
0x279f   : > { %v10500_v40 = vpop.f32.mrb[143].mxu1  ;;  %v6554_v35 = vsel %vm1669_vm2, %v6541_v17, -inf }
0x27a2   : > { %6555 = vmax.xlane.f32.xlu0 %v6554_v35 }
0x2800   : > { %v6547_v43 = vpop.xlane.xlu0 %6546 }
0x2801   : > { %v6557_v2 = vsub.f32 %v6487_v0, %v6547_v43 }
0x2802   : > { %v6550_v58 = vpop.xlane.xlu1 %6549 }
0x2803   : > { %v6561_v20 = vmul.f32 1.442695, %v6557_v2  ;;  %v6558_v46 = vsub.f32 %v6490_v42, %v6550_v58 }
0x2805   : > { %11446 = vpow2.f32 %v6561_v20  ;;  %v6563_v5 = vmul.f32 1.442695, %v6558_v46 }
0x2807   : > { %11448 = vpow2.f32 %v6563_v5 }
0x280f   : > { %v11447_v30 = vpop.eup %11446 }
0x2810   : > { %v6569_v57 = vsel %vm1669_vm2, %v11447_v30, 0.0 }
0x2811   : > { %v11449_v63 = vpop.eup %11448  ;;  %6570 = vadd.xlane.f32.xlu0 %v6569_v57 }
0x2812   : > { %v6572_v45 = vsel %vm1669_vm2, %v11449_v63, 0.0 }
0x2813   : > { %6573 = vadd.xlane.f32.xlu1 %v6572_v45 }
0x2824   : > { %6638 = vrot.lane.b32.xlu1 %v14039_v19, %s12205_s2 }
0x2828   : > { %6687 = vrot.lane.b32.xlu1 %v13927_v16, %s12206_s9 }
0x282b   : > { %v6553_v23 = vpop.xlane.xlu0 %6552 }
0x282c   : > { %v6559_v37 = vsub.f32 %v6538_v29, %v6553_v23 }
0x282e   : > { %v6565_v53 = vmul.f32 1.442695, %v6559_v37 }
0x282f   : > { %v6556_v52 = vpop.xlane.xlu0 %6555 }
0x2830   : > { %11450 = vpow2.f32 %v6565_v53  ;;  %v6560_v8 = vsub.f32 %v6541_v17, %v6556_v52 }
0x2832   : > { %v6567_v0 = vmul.f32 1.442695, %v6560_v8 }
0x2834   : > { %11452 = vpow2.f32 %v6567_v0 }
0x283a   : > { %v11451_v15 = vpop.eup %11450 }
0x283b   : > { %v6575_v55 = vsel %vm1669_vm2, %v11451_v15, 0.0 }
0x283c   : > { %6576 = vadd.xlane.f32.xlu0 %v6575_v55 }
0x283e   : > { %v11453_v41 = vpop.eup %11452 }
0x283f   : > { %v6578_v42 = vsel %vm1669_vm2, %v11453_v41, 0.0 }
0x284c   : > { %6579 = vadd.xlane.f32.xlu1 %v6578_v42 }
0x2852   : > { %6591 = vrot.lane.b32.xlu0 %v14041_v13, %s12205_s2 }
0x2856   : > { %6685 = vrot.lane.b32.xlu0 %v13929_v14, %s12206_s9 }
0x285d   : > { %6738 = vrot.lane.b32.xlu1 %v13934_v50, %s12206_s9 }
0x2861   : > { %6736 = vrot.lane.b32.xlu1 %v13936_v25, %s12206_s9 }
0x289e   : > { %v6571_v61 = vpop.xlane.xlu0 %6570 }
0x28a0   : > { %v6574_v16 = vpop.xlane.xlu1 %6573 }
0x28a1   : > { %11454 = vrcp.f32 %v6574_v16 }
0x28a2   : > { %11456 = vrcp.f32 %v6571_v61 }
0x28a4   : > { %v6639_v60 = vpop.permute.xlu1 %6638 }
0x28a5   : > { %10508 = vmatpush3.bf16.msra.mxu1 %v6639_v60 }
0x28a6   : > { %10519 = vmatprep.subr.bf16.mxu1 %v12202_v18 }
0x28a8   : > { %v6688_v50 = vpop.permute.xlu1 %6687 }
0x28a9   : > { %v6693_v25 = vsel %vm1574_vm1, %v6688_v50, 0 }
0x28ab   : > { %v11455_v39 = vpop.eup %11454 }
0x28ac   : > { %v11457_v29 = vpop.eup %11456  ;;  %v6586_v3 = vmul.f32 %v11455_v39, %v11449_v63 }
0x28ad   : > { %v6585_v10 = vmul.f32 %v11457_v29, %v11447_v30 }
0x28af   : > { %v6589_v17 = vpack.c.bf16 %v6586_v3, %v6585_v10 }
0x28c9   : > { %v6577_v27 = vpop.xlane.xlu0 %6576 }
0x28ca   : > { %11458 = vrcp.f32 %v6577_v27 }
0x28cd   : > { %v6592_v14 = vpop.permute.xlu0 %6591 }
0x28ce   : > { %10502 = vmatpush3.bf16.msra.mxu0 %v6592_v14 }
0x28cf   : > { %10513 = vmatprep.subr.bf16.mxu0 %v12202_v18 }
0x28d1   : > { %10504 = vmatmul.mubr.msk.bf16.vlgmr.msra.gmra.mrb[148].mxu0 %vm1669_vm2, %v6589_v17  ;;  %v6686_v35 = vpop.permute.xlu0 %6685 }
0x28d2   : > { %10515 = vmatprep.mubr.msk.bf16.mxu0 %vm12203_vm0, %v12202_v18 }
0x28d4   : > { %v11459_v43 = vpop.eup %11458 }
0x28d5   : > { %v6587_v58 = vmul.f32 %v11459_v43, %v11451_v15 }
0x28d7   : > { %10514 = vmatpush3.bf16.xpose.msra.mxu0 %v6693_v25 }
0x28d8   : > { %10525 = vmatprep.subr.bf16.mxu0 %v12202_v18 }
0x28d9   : > { %v6580_v40 = vpop.xlane.xlu1 %6579 }
0x28da   : > { %11460 = vrcp.f32 %v6580_v40 }
0x28dd   : > { %v6739_v46 = vpop.permute.xlu1 %6738 }
0x28de   : > { %10516 = vmatmul.mubr.msk.bf16.vlgmr.msra.gmra.mrb[152].mxu0 %vm1574_vm1, %v6686_v35  ;;  %v6744_v30 = vsel %vm1574_vm1, %v6739_v46, 0 }
0x28df   : > { %10527 = vmatprep.mubr.msk.bf16.mxu0 %vm12203_vm0, %v12202_v18 }
0x28e1   : > { %v6737_v57 = vpop.permute.xlu1 %6736 }
0x28e4   : > { %v11461_v2 = vpop.eup %11460 }
0x28e5   : > { %v6588_v20 = vmul.f32 %v11461_v2, %v11453_v41 }
0x28e7   : > { %v6590_v5 = vpack.c.bf16 %v6588_v20, %v6587_v58 }
0x28e9   : > { %10510 = vmatmul.mubr.msk.bf16.vlgmr.msra.gmra.mrb[144].mxu1 %vm1669_vm2, %v6590_v5 }
0x28ea   : > { %10520 = vmatpush3.bf16.xpose.msra.mxu1 %v6744_v30  ;;  %10521 = vmatprep.mubr.msk.bf16.mxu1 %vm12203_vm0, %v12202_v18 }
0x28eb   : > { %10531 = vmatprep.subr.bf16.mxu1 %v12202_v18 }
0x28f1   : > { %10522 = vmatmul.mubr.msk.bf16.vlgmr.msra.gmra.mrb[148].mxu1 %vm1574_vm1, %v6737_v57 }
0x28f2   : > { %10533 = vmatprep.mubr.msk.bf16.mxu1 %vm12203_vm0, %v12202_v18 }
0x29a4   : > { %v6631_v63 = vpop.f32.mrb[148].mxu0 }
0x29a5   : > { %v10505_v45 = vpop.f32.mrb[149].mxu0 }
0x29a6   : > { %v6634_v23 = vpop.f32.mrb[150].mxu0 }
0x29a7   : > { %v10898_v37 = vpack.i.bf16 %v6634_v23, %v6631_v63  ;;  %v10506_v53 = vpop.f32.mrb[151].mxu0 }
0x29b1   : > { %v6729_v52 = vpop.f32.mrb[152].mxu0 }
0x29b2   : > { %v10517_v8 = vpop.f32.mrb[153].mxu0  ;;  %v6787_v15 = vsel %vm1669_vm2, %v6729_v52, -inf }
0x29b3   : > { %6788 = vmax.xlane.f32.xlu0 %v6787_v15  ;;  %v6732_v0 = vpop.f32.mrb[154].mxu0 }
0x29b4   : > { %v10518_v55 = vpop.f32.mrb[155].mxu0  ;;  %v6790_v41 = vsel %vm1669_vm2, %v6732_v0, -inf }
0x29b5   : > { %6791 = vmax.xlane.f32.xlu1 %v6790_v41 }
0x29bc   : > { %v6678_v42 = vpop.f32.mrb[144].mxu1 }
0x29bd   : > { %v10511_v16 = vpop.f32.mrb[145].mxu1 }
0x29be   : > { %v6681_v60 = vpop.f32.mrb[146].mxu1 }
0x29bf   : > { %v10903_v61 = vpack.i.bf16 %v6681_v60, %v6678_v42  ;;  %v10512_v18 = vpop.f32.mrb[147].mxu1 }
0x29c4   : > { %v6780_v39 = vpop.f32.mrb[148].mxu1 }
0x29c5   : > { %v10523_v27 = vpop.f32.mrb[149].mxu1  ;;  %v6793_v29 = vsel %vm1669_vm2, %v6780_v39, -inf }
0x29c6   : > { %v6783_v3 = vpop.f32.mrb[150].mxu1  ;;  %6794 = vmax.xlane.f32.xlu0 %v6793_v29 }
0x29c7   : > { %v10524_v10 = vpop.f32.mrb[151].mxu1  ;;  %v6796_v14 = vsel %vm1669_vm2, %v6783_v3, -inf }
0x29ca   : > { %6797 = vmax.xlane.f32.xlu0 %v6796_v14 }
0x2a40   : > { %v6789_v17 = vpop.xlane.xlu0 %6788 }
0x2a41   : > { %v6799_v50 = vsub.f32 %v6729_v52, %v6789_v17 }
0x2a42   : > { %v6792_v25 = vpop.xlane.xlu1 %6791 }
0x2a43   : > { %v6803_v40 = vmul.f32 1.442695, %v6799_v50  ;;  %v6800_v35 = vsub.f32 %v6732_v0, %v6792_v25  ;;  %v11070_v25 = vld [vmem:[%s12955_s17 + $0x40] sm:$0xff]  }
0x2a45   : > { %11462 = vpow2.f32 %v6803_v40  ;;  %v6805_v43 = vmul.f32 1.442695, %v6800_v35  ;;  %v11071_v40 = vld [vmem:[%s12955_s17 + $0x48] sm:$0xff]   ;;  %v11074_v35 = vld [vmem:[%s12955_s17 + $0x60] sm:$0xff]  }
0x2a47   : > { %11464 = vpow2.f32 %v6805_v43  ;;  %v11075_v43 = vld [vmem:[%s12955_s17 + $0x68] sm:$0xff]  }
0x2a4f   : > { %v11463_v2 = vpop.eup %11462 }
0x2a50   : > { %v6811_v58 = vsel %vm1669_vm2, %v11463_v2, 0.0 }
0x2a51   : > { %v11465_v20 = vpop.eup %11464  ;;  %6812 = vadd.xlane.f32.xlu0 %v6811_v58 }
0x2a52   : > { %v6814_v46 = vsel %vm1669_vm2, %v11465_v20, 0.0 }
0x2a53   : > { %v6795_v5 = vpop.xlane.xlu0 %6794  ;;  %6815 = vadd.xlane.f32.xlu1 %v6814_v46 }
0x2a54   : > { %v6801_v30 = vsub.f32 %v6780_v39, %v6795_v5 }
0x2a56   : > { %v6807_v57 = vmul.f32 1.442695, %v6801_v30 }
0x2a57   : > { %v6798_v63 = vpop.xlane.xlu0 %6797 }
0x2a58   : > { %11466 = vpow2.f32 %v6807_v57  ;;  %v6802_v45 = vsub.f32 %v6783_v3, %v6798_v63  ;;  %v11077_v57 = vld [vmem:[%s12955_s17 + $0x78] sm:$0xff]  }
0x2a5a   : > { %v6809_v23 = vmul.f32 1.442695, %v6802_v45 }
0x2a5c   : > { %11468 = vpow2.f32 %v6809_v23 }
0x2a62   : > { %v11467_v53 = vpop.eup %11466 }
0x2a63   : > { %v6817_v52 = vsel %vm1669_vm2, %v11467_v53, 0.0 }
0x2a64   : > { %6818 = vadd.xlane.f32.xlu0 %v6817_v52 }
0x2a66   : > { %v11469_v8 = vpop.eup %11468 }
0x2a67   : > { %v6820_v15 = vsel %vm1669_vm2, %v11469_v8, 0.0 }
0x2a68   : > { %6821 = vadd.xlane.f32.xlu1 %v6820_v15  ;;  %v14208_v15 = vadd.f32 %v14029_v36, %v13504_v38  ;;  %v14223_v38 = vadd.f32 %v14037_v24, %v13500_v34 }
0x2a79   : > { %6880 = vrot.lane.b32.xlu1 %v14039_v19, %s12206_s9  ;;  %v5593_v19 = vadd.f32 %v14026_v49, %v14031_v11 }
0x2a7a   : > { %6833 = vrot.lane.b32.xlu0 %v14041_v13, %s12206_s9 }
0x2a7b   : > { %v14184_v0 = vadd.f32 %v5593_v19, %v13493_v7 }
0x2a7d   : > { %10889 = vrot.lane.b32.xlu1 %v10888_v51, %s12206_s9 }
0x2a7e   : > { %10899 = vrot.lane.b32.xlu0 %v10898_v37, %s12205_s2 }
0x2a81   : > { %10894 = vrot.lane.b32.xlu1 %v10893_v9, %s12206_s9 }
0x2a85   : > { %10904 = vrot.lane.b32.xlu1 %v10903_v61, %s12205_s2 }
0x2a9d   : > { %7098 = vadd.xlane.f32.xlu0 %v14184_v0 }
0x2ade   : > { %v6813_v1 = vpop.xlane.xlu0 %6812 }
0x2ae0   : > { %v6816_v13 = vpop.xlane.xlu1 %6815 }
0x2ae1   : > { %11470 = vrcp.f32 %v6816_v13  ;;  %v14213_v13 = vadd.f32 %v14034_v44, %v13496_v48 }
0x2ae2   : > { %11472 = vrcp.f32 %v6813_v1 }
0x2aeb   : > { %v11471_v59 = vpop.eup %11470 }
0x2aec   : > { %v11473_v37 = vpop.eup %11472  ;;  %v6828_v55 = vmul.f32 %v11471_v59, %v11465_v20 }
0x2aed   : > { %v6827_v62 = vmul.f32 %v11473_v37, %v11463_v2  ;;  %v11076_v2 = vld [vmem:[%s12955_s17 + $0x70] sm:$0xff]  }
0x2aef   : > { %v6831_v49 = vpack.c.bf16 %v6828_v55, %v6827_v62 }
0x2af1   : > { %v6819_v51 = vpop.xlane.xlu0 %6818 }
0x2af2   : > { %11474 = vrcp.f32 %v6819_v51 }
0x2af5   : > { %v6834_v26 = vpop.permute.xlu0 %6833  ;;  %v6822_v9 = vpop.xlane.xlu1 %6821 }
0x2af6   : > { %11476 = vrcp.f32 %v6822_v9  ;;  %10526 = vmatpush3.bf16.msra.mxu0 %v6834_v26 }
0x2af7   : > { %10537 = vmatprep.subr.bf16.mxu0 %v11070_v25 }
0x2af9   : > { %10528 = vmatmul.mubr.msk.bf16.vlgmr.msra.gmra.mrb[156].mxu0 %vm1669_vm2, %v6831_v49  ;;  %v6881_v7 = vpop.permute.xlu1 %6880  ;;  %v10900_v11 = vpop.permute.xlu0 %10899 }
0x2afa   : > { %10532 = vmatpush3.bf16.msra.mxu1 %v6881_v7  ;;  %v10902_v61 = vunpack.i.h.bf16 %v10900_v11  ;;  %v10901_v18 = vunpack.i.l.bf16 %v10900_v11  ;;  %10538 = vmatpush3.bf16.msra.mxu0 %v11070_v25 }
0x2afb   : > { %10539 = vmatprep.subr.bf16.mxu0 %v11071_v40 }
0x2afc   : > { %v11475_v42 = vpop.eup %11474 }
0x2afd   : > { %v10890_v41 = vpop.permute.xlu1 %10889  ;;  %v6829_v3 = vmul.f32 %v11475_v42, %v11467_v53 }
0x2afe   : > { %v10892_v16 = vunpack.i.h.bf16 %v10890_v41  ;;  %v10891_v60 = vunpack.i.l.bf16 %v10890_v41  ;;  %10540 = vmatpush3.bf16.msra.mxu0 %v11071_v40 }
0x2b00   : > { %v11477_v39 = vpop.eup %11476  ;;  %v6976_v27 = vsel %vm1574_vm1, %v14065_v54, %v10892_v16  ;;  %v6975_v29 = vsel %vm1574_vm1, %v14063_v56, %v10891_v60  ;;  %v11072_v56 = vld [vmem:[%s12955_s17 + $0x50] sm:$0xff]   ;;  %v11073_v54 = vld [vmem:[%s12955_s17 + $0x58] sm:$0xff]  }
0x2b01   : > { %v6830_v10 = vmul.f32 %v11477_v39, %v11469_v8  ;;  %v6979_v14 = vsel %vm2588_vm3, %v6975_v29, %v10901_v18  ;;  %v6980_v17 = vsel %vm2588_vm3, %v6976_v27, %v10902_v61  ;;  %10541 = vmatprep.subr.bf16.mxu0 %v11072_v56  ;;  %v10895_v51 = vpop.permute.xlu1 %10894 }
0x2b02   : > { %10542 = vmatpush3.bf16.msra.mxu0 %v11072_v56  ;;  %v10897_v9 = vunpack.i.h.bf16 %v10895_v51  ;;  %v10896_v49 = vunpack.i.l.bf16 %v10895_v51  ;;  %v11104_v51 = vld [vmem:[%s12958_s22 + $0x80] ss:$12 sps:$4 sm:$0xff]  }
0x2b03   : > { %v6832_v50 = vpack.c.bf16 %v6830_v10, %v6829_v3  ;;  %10543 = vmatprep.subr.bf16.mxu0 %v11073_v54 }
0x2b04   : > { %v6978_v34 = vsel %vm1574_vm1, %v14071_v32, %v10897_v9  ;;  %v6977_v24 = vsel %vm1574_vm1, %v14069_v33, %v10896_v49 }
0x2b05   : > { %10534 = vmatmul.mubr.msk.bf16.vlgmr.msra.gmra.mrb[152].mxu1 %vm1669_vm2, %v6832_v50  ;;  %v10905_v26 = vpop.permute.xlu1 %10904 }
0x2b06   : > { %7369 = vmatprep.mubr.bf16.mxu1 %v12201_v6  ;;  %10544 = vmatpush3.bf16.msra.mxu0 %v11073_v54  ;;  %v10907_v7 = vunpack.i.h.bf16 %v10905_v26  ;;  %v10906_v11 = vunpack.i.l.bf16 %v10905_v26 }
0x2b07   : > { %10545 = vmatprep.subr.bf16.mxu0 %v11074_v35 }
0x2b08   : > { %v6981_v60 = vsel %vm2588_vm3, %v6977_v24, %v10906_v11  ;;  %v6982_v61 = vsel %vm2588_vm3, %v6978_v34, %v10907_v7 }
0x2b0a   : > { %10546 = vmatpush3.bf16.msra.mxu0 %v11074_v35  ;;  %v11080_v35 = vld [vmem:[%s12958_s22 + $0x4] ss:$12 sps:$4 sm:$0xff]  }
0x2b0b   : > { %10547 = vmatprep.subr.bf16.mxu0 %v11075_v43  ;;  %7337 = vmatprep.subr.bf16.mxu1 %v11080_v35 }
0x2b0e   : > { %10548 = vmatpush3.bf16.msra.mxu0 %v11075_v43  ;;  %v11078_v43 = vld [vmem:[%s12958_s22] ss:$12 sps:$4 sm:$0xff]  }
0x2b0f   : > { %10549 = vmatprep.subr.bf16.mxu0 %v11076_v2  ;;  %7338 = vmatpush1.bf16.msra.mxu1 %v11078_v43 }
0x2b12   : > { %10550 = vmatpush3.bf16.msra.mxu0 %v11076_v2  ;;  %v11083_v2 = vld [vmem:[%s12958_s22 + $0x1c] ss:$12 sps:$4 sm:$0xff]  }
0x2b13   : > { %10551 = vmatprep.subr.bf16.mxu0 %v11077_v57  ;;  %7339 = vmatprep.subr.bf16.mxu1 %v11083_v2 }
0x2b16   : > { %10552 = vmatpush3.bf16.msra.mxu0 %v11077_v57  ;;  %v11091_v57 = vld [vmem:[%s12958_s22 + $0x4c] ss:$12 sps:$4 sm:$0xff]  }
0x2b2a   : > { %v7099_v8 = vpop.xlane.xlu0 %7098 }
0x2b2b   : > { %v7106_v19 = vmul.f32 0.0078125, %v7099_v8  ;;  %v11099_v8 = vld [vmem:[%s12958_s22 + $0x7c] ss:$12 sps:$4 sm:$0xff]  }
0x2b2d   : > { %v14216_v1 = vsub.f32 %v14184_v0, %v7106_v19  ;;  %v11100_v19 = vld [vmem:[%s12958_s22 + $0x68] ss:$12 sps:$4 sm:$0xff]  }
0x2b2f   : > { %v7114_v59 = vmul.f32 %v14216_v1, %v14216_v1 }
0x2bcc   : > { %v6873_v58 = vpop.f32.mrb[156].mxu0 }
0x2bcd   : > { %v10529_v20 = vpop.f32.mrb[157].mxu0 }
0x2bce   : > { %v6876_v46 = vpop.f32.mrb[158].mxu0  ;;  %v11081_v20 = vld [vmem:[%s12958_s22 + $0x18] ss:$12 sps:$4 sm:$0xff]  }
0x2bcf   : > { %v10908_v5 = vpack.i.bf16 %v6876_v46, %v6873_v58  ;;  %v10530_v30 = vpop.f32.mrb[159].mxu0  ;;  %v11084_v58 = vld [vmem:[%s12958_s22 + $0x8] ss:$12 sps:$4 sm:$0xff]   ;;  %7340 = vmatpush1.bf16.msra.mxu1 %v11081_v20  ;;  %v11085_v46 = vld [vmem:[%s12958_s22 + $0x30] ss:$12 sps:$4 sm:$0xff]  }
0x2bd0   : > { %10557 = vmatprep.subr.bf16.mxu0 %v11084_v58  ;;  %v11088_v30 = vld [vmem:[%s12958_s22 + $0x20] ss:$12 sps:$4 sm:$0xff]  }
0x2bd1   : > { %10909 = vrot.lane.b32.xlu0 %v10908_v5, %s12204_s13  ;;  %v11087_v5 = vld [vmem:[%s12958_s22 + $0x34] ss:$12 sps:$4 sm:$0xff]  }
0x2bd2   : > { %7341 = vmatprep.subr.bf16.mxu1 %v11087_v5 }
0x2bd3   : > { %7342 = vmatpush1.bf16.msra.mxu1 %v11085_v46 }
0x2bd4   : > { %7343 = vmatprep.subr.bf16.mxu1 %v11091_v57 }
0x2bd8   : > { %v6920_v63 = vpop.f32.mrb[152].mxu1 }
0x2bd9   : > { %v10535_v45 = vpop.f32.mrb[153].mxu1 }
0x2bda   : > { %v6923_v23 = vpop.f32.mrb[154].mxu1  ;;  %v11089_v45 = vld [vmem:[%s12958_s22 + $0x48] ss:$12 sps:$4 sm:$0xff]  }
0x2bdb   : > { %v10913_v53 = vpack.i.bf16 %v6923_v23, %v6920_v63  ;;  %v10536_v52 = vpop.f32.mrb[155].mxu1  ;;  %v11092_v63 = vld [vmem:[%s12958_s22 + $0x38] ss:$12 sps:$4 sm:$0xff]   ;;  %7344 = vmatpush1.bf16.msra.mxu1 %v11089_v45 }
0x2bdc   : > { %v11095_v23 = vld [vmem:[%s12958_s22 + $0x64] ss:$12 sps:$4 sm:$0xff]   ;;  %v11093_v52 = vld [vmem:[%s12958_s22 + $0x60] ss:$12 sps:$4 sm:$0xff]  }
0x2bdd   : > { %10914 = vrot.lane.b32.xlu1 %v10913_v53, %s12204_s13  ;;  %v11096_v53 = vld [vmem:[%s12958_s22 + $0x50] ss:$12 sps:$4 sm:$0xff]   ;;  %7345 = vmatprep.subr.bf16.mxu1 %v11095_v23 }
0x2bdf   : > { %7346 = vmatpush1.bf16.msra.mxu1 %v11093_v52 }
0x2be0   : > { %7347 = vmatprep.subr.bf16.mxu1 %v11099_v8 }
0x2bf0   : > { %7102 = vadd.xlane.f32.xlu0 %v14208_v15 }
0x2bf4   : > { %7104 = vadd.xlane.f32.xlu0 %v14213_v13 }
0x2bf8   : > { %7118 = vadd.xlane.f32.xlu0 %v7114_v59  ;;  %v11097_v59 = vld [vmem:[%s12958_s22 + $0x78] ss:$12 sps:$4 sm:$0xff]  }
0x2bf9   : > { %7348 = vmatpush1.bf16.msra.mxu1 %v11097_v59  ;;  %v11111_v59 = vld [vmem:[%s12962_s20] sm:$0xff]  }
0x2c01   : > { %7100 = vadd.xlane.f32.xlu1 %v14223_v38 }
0x2c43   : > { %v10910_v36 = vpop.permute.xlu0 %10909 }
0x2c44   : > { %v10912_v37 = vunpack.i.h.bf16 %v10910_v36  ;;  %v10911_v48 = vunpack.i.l.bf16 %v10910_v36  ;;  %v11103_v36 = vld [vmem:[%s12958_s22 + $0x94] ss:$12 sps:$4 sm:$0xff]  }
0x2c45   : > { %7349 = vmatprep.subr.bf16.mxu1 %v11103_v36  ;;  %v11112_v36 = vld [vmem:[%s12962_s20 + $0x48] sm:$0xff]  }
0x2c46   : > { %v6983_v44 = vsel %vm2593_vm4, %v6979_v14, %v10911_v48  ;;  %v6984_v55 = vsel %vm2593_vm4, %v6980_v17, %v10912_v37  ;;  %v11101_v37 = vld [vmem:[%s12958_s22 + $0x90] ss:$12 sps:$4 sm:$0xff]   ;;  %v11107_v48 = vld [vmem:[%s12958_s22 + $0xac] ss:$12 sps:$4 sm:$0xff]  }
0x2c47   : > { %v6987_v62 = vpack.c.bf16 %v6984_v55, %v6983_v44  ;;  %7350 = vmatpush1.bf16.msra.mxu1 %v11101_v37  ;;  %v11108_v44 = vld [vmem:[%s12958_s22 + $0x98] ss:$12 sps:$4 sm:$0xff]   ;;  %v11105_v55 = vld [vmem:[%s12958_s22 + $0xa8] ss:$12 sps:$4 sm:$0xff]  }
0x2c48   : > { %7351 = vmatprep.subr.bf16.mxu1 %v11107_v48  ;;  %v11114_v37 = vld [vmem:[%s12962_s20 + $0x8] sm:$0xff]   ;;  %v11115_v48 = vld [vmem:[%s12962_s20 + $0x50] sm:$0xff]  }
0x2c49   : > { %10553 = vmatprep.mubr.bf16.mxu0 %v6987_v62  ;;  %v11109_v62 = vld [vmem:[%s12958_s22 + $0xb0] ss:$12 sps:$4 sm:$0xff]  }
0x2c4b   : > { %7352 = vmatpush1.bf16.msra.mxu1 %v11105_v55  ;;  %v11117_v55 = vld [vmem:[%s12962_s20 + $0x10] sm:$0xff]  }
0x2c4f   : > { %v10915_v41 = vpop.permute.xlu1 %10914 }
0x2c50   : > { %v10917_v42 = vunpack.i.h.bf16 %v10915_v41  ;;  %v10916_v16 = vunpack.i.l.bf16 %v10915_v41 }
0x2c52   : > { %v6985_v18 = vsel %vm2593_vm4, %v6981_v60, %v10916_v16  ;;  %v6986_v39 = vsel %vm2593_vm4, %v6982_v61, %v10917_v42  ;;  %v9498_v61 = vld [vmem:[%s969_s4 + $0x1] ss:$0 sm:$0xff] }
0x2c53   : > { %v6988_v27 = vpack.c.bf16 %v6986_v39, %v6985_v18 }
0x2c55   : > { %10554 = vmatmul.mubr.bf16.vlgmr.msra.gmra.mrb[160].mxu0 %v6988_v27 }
0x2c56   : > { %10558 = vmatpush3.bf16.msra.mxu0 %v11084_v58  ;;  %v7097_v58 = vld [vmem:[%s12944_s14] sm:$0x7] }
0x2c57   : > { %10559 = vmatprep.subr.bf16.mxu0 %v11088_v30 }
0x2c5a   : > { %10560 = vmatpush3.bf16.msra.mxu0 %v11088_v30 }
0x2c5b   : > { %10561 = vmatprep.subr.bf16.mxu0 %v11092_v63 }
0x2c5e   : > { %10562 = vmatpush3.bf16.msra.mxu0 %v11092_v63 }
0x2c5f   : > { %10563 = vmatprep.subr.bf16.mxu0 %v11096_v53 }
0x2c62   : > { %10564 = vmatpush3.bf16.msra.mxu0 %v11096_v53 }
0x2c63   : > { %10565 = vmatprep.subr.bf16.mxu0 %v11100_v19 }
0x2c66   : > { %10566 = vmatpush3.bf16.msra.mxu0 %v11100_v19 }
0x2c67   : > { %10567 = vmatprep.subr.bf16.mxu0 %v11104_v51 }
0x2c6a   : > { %10568 = vmatpush3.bf16.msra.mxu0 %v11104_v51  ;;  %v11113_v51 = vld [vmem:[%s12962_s20 + $0x80] sm:$0xff]  }
0x2c6b   : > { %10569 = vmatprep.subr.bf16.mxu0 %v11108_v44 }
0x2c6e   : > { %10570 = vmatpush3.bf16.msra.mxu0 %v11108_v44  ;;  %v11116_v44 = vld [vmem:[%s12962_s20 + $0x88] sm:$0xff]  }
0x2c6f   : > { %10571 = vmatprep.subr.bf16.mxu0 %v11109_v62 }
0x2c72   : > { %10572 = vmatpush3.bf16.msra.mxu0 %v11109_v62  ;;  %v11118_v62 = vld [vmem:[%s12962_s20 + $0x58] sm:$0xff]  }
0x2c73   : > { %10577 = vmatprep.subr.bf16.mxu0 %v11113_v51 }
0x2c7d   : > { %v7103_v29 = vpop.xlane.xlu0 %7102 }
0x2c7e   : > { %v7108_v3 = vmul.f32 0.0078125, %v7103_v29 }
0x2c80   : > { %v14237_v32 = vsub.f32 %v14208_v15, %v7108_v3 }
0x2c81   : > { %v7105_v10 = vpop.xlane.xlu0 %7104 }
0x2c82   : > { %v7116_v33 = vmul.f32 %v14237_v32, %v14237_v32  ;;  %v7109_v17 = vmul.f32 0.0078125, %v7105_v10 }
0x2c84   : > { %7122 = vadd.xlane.f32.xlu0 %v7116_v33  ;;  %v14245_v40 = vsub.f32 %v14213_v13, %v7109_v17  ;;  %v14278_v33 = vsub.s32 2, %v13031_v21  ;;  %v7096_v17 = vld [vmem:[%s12936_s6] sm:$0x7] }
0x2c85   : > { %v7119_v26 = vpop.xlane.xlu0 %7118 }
0x2c86   : > { %v7117_v54 = vmul.f32 %v14245_v40, %v14245_v40  ;;  %v7126_v9 = vmul.f32 0.0078125, %v7119_v26  ;;  %v7145_v21 = vrot.slane %v7096_v17, %v14278_v33  ;;  %v7153_v5 = vrot.slane %v7097_v58, %v14278_v33  ;;  %v11119_v26 = vld [vmem:[%s12962_s20 + $0x90] sm:$0xff]   ;;  %v14331_v17 = vld [vmem:[%s12958_s22 + $0xc8] ss:$12 sps:$4 sm:$0xff]  }
0x2c88   : > { %v7130_v7 = vadd.f32 1e-05, %v7126_v9  ;;  %v11120_v9 = vld [vmem:[%s12962_s20 + $0x18] sm:$0xff]  }
0x2c8a   : > { %11478 = vrsqrt.f32 %v7130_v7  ;;  %v11122_v7 = vld [vmem:[%s12962_s20 + $0x98] sm:$0xff]  }
0x2c8e   : > { %v7101_v14 = vpop.xlane.xlu1 %7100 }
0x2c8f   : > { %v7107_v50 = vmul.f32 0.0078125, %v7101_v14 }
0x2c91   : > { %v14242_v25 = vsub.f32 %v14223_v38, %v7107_v50 }
0x2c93   : > { %v7115_v56 = vmul.f32 %v14242_v25, %v14242_v25 }
0x2c94   : > { %v11479_v10 = vpop.eup %11478 }
0x2c95   : > { %7120 = vadd.xlane.f32.xlu1 %v7115_v56  ;;  %v7138_v35 = vmul.f32 %v11479_v10, %v14216_v1  ;;  %v11136_v10 = vld [vmem:[%s12958_s22 + $0xc4] ss:$12 sps:$4 sm:$0xff]  }
0x2c97   : > { %v7146_v57 = vmul.f32 %v7145_v21, %v7138_v35 }
0x2c99   : > { %7124 = vadd.xlane.f32.xlu1 %v7117_v54  ;;  %v7154_v23 = vadd.f32 %v7153_v5, %v7146_v57 }
0x2d11   : > { %v7123_v49 = vpop.xlane.xlu0 %7122 }
0x2d12   : > { %v7128_v11 = vmul.f32 0.0078125, %v7123_v49  ;;  %v11121_v49 = vld [vmem:[%s12962_s20 + $0x60] sm:$0xff]  }
0x2d14   : > { %v7132_v41 = vadd.f32 1e-05, %v7128_v11  ;;  %v11123_v11 = vld [vmem:[%s12962_s20 + $0x20] sm:$0xff]  }
0x2d16   : > { %11480 = vrsqrt.f32 %v7132_v41  ;;  %v11124_v41 = vld [vmem:[%s12962_s20 + $0x68] sm:$0xff]  }
0x2d20   : > { %v11481_v20 = vpop.eup %11480 }
0x2d21   : > { %v7140_v1 = vmul.f32 %v11481_v20, %v14237_v32 }
0x2d22   : > { %v7121_v34 = vpop.xlane.xlu1 %7120 }
0x2d23   : > { %v7127_v24 = vmul.f32 0.0078125, %v7121_v34  ;;  %v7148_v32 = vmul.f32 %v7145_v21, %v7140_v1  ;;  %v11125_v34 = vld [vmem:[%s12962_s20 + $0xa0] sm:$0xff]  }
0x2d25   : > { %v7131_v42 = vadd.f32 1e-05, %v7127_v24  ;;  %v7156_v52 = vadd.f32 %v7153_v5, %v7148_v32  ;;  %v11126_v24 = vld [vmem:[%s12962_s20 + $0x28] sm:$0xff]  }
0x2d26   : > { %v7125_v16 = vpop.xlane.xlu1 %7124 }
0x2d27   : > { %11482 = vrsqrt.f32 %v7131_v42  ;;  %v7129_v60 = vmul.f32 0.0078125, %v7125_v16  ;;  %v11127_v42 = vld [vmem:[%s12962_s20 + $0x70] sm:$0xff]   ;;  %v11128_v16 = vld [vmem:[%s12962_s20 + $0xa8] sm:$0xff]  }
0x2d28   : > { %v10555_v18 = vpop.f32.mrb[160].mxu0 }
0x2d29   : > { %v7133_v39 = vadd.f32 1e-05, %v7129_v60  ;;  %v7077_v27 = vpop.f32.mrb[161].mxu0  ;;  %v7086_v50 = vadd.f32 %v10555_v18, %v9498_v61  ;;  %v11129_v60 = vld [vmem:[%s12962_s20 + $0x30] sm:$0xff]  }
0x2d2a   : > { %v7078_v29 = vadd.f32 %v9498_v61, %v7077_v27  ;;  %v10556_v3 = vpop.f32.mrb[162].mxu0  ;;  %v11131_v18 = vld [vmem:[%s12962_s20 + $0xb0] sm:$0xff]   ;;  %v11133_v27 = vld [vmem:[%s12962_s20 + $0xb8] sm:$0xff]  }
0x2d2b   : > { %11484 = vrsqrt.f32 %v7133_v39  ;;  %v7080_v14 = vpop.f32.mrb[163].mxu0  ;;  %v7089_v43 = vadd.f32 %v10556_v3, %v9498_v61  ;;  %v14292_v46 = vadd.f32 %v7086_v50, %v13843_v47  ;;  %v11132_v39 = vld [vmem:[%s12962_s20 + $0x38] sm:$0xff]  }
0x2d2c   : > { %v14282_v56 = vadd.f32 %v7078_v29, %v13832_v22  ;;  %v7081_v54 = vadd.f32 %v9498_v61, %v7080_v14  ;;  %v11130_v61 = vld [vmem:[%s12962_s20 + $0x78] sm:$0xff]  }
0x2d2e   : > { %v14286_v2 = vadd.f32 %v7081_v54, %v13839_v12  ;;  %7856 = vadd.xlane.f32.xlu0 %v14282_v56  ;;  %v14299_v12 = vadd.f32 %v7089_v43, %v13835_v4 }
0x2d30   : > { %7858 = vadd.xlane.f32.xlu1 %v14286_v2 }
0x2d31   : > { %v11483_v22 = vpop.eup %11482 }
0x2d32   : > { %v7139_v30 = vmul.f32 %v11483_v22, %v14242_v25  ;;  %7860 = vadd.xlane.f32.xlu0 %v14292_v46 }
0x2d34   : > { %7862 = vadd.xlane.f32.xlu1 %v14299_v12  ;;  %v7147_v63 = vmul.f32 %v7145_v21, %v7139_v30 }
0x2d35   : > { %v11485_v47 = vpop.eup %11484 }
0x2d36   : > { %v7141_v45 = vmul.f32 %v11485_v47, %v14245_v40  ;;  %v7155_v53 = vadd.f32 %v7153_v5, %v7147_v63  ;;  %v11110_v40 = vld [vmem:[%s12962_s20 + $0x40] sm:$0xff]   ;;  %v7192_v47 = vld [vmem:[%s12960_s27] sm:$0x7] }
0x2d37   : > { %9927 = vmatprep.subr.bf16.mxu1 %v11110_v40 }
0x2d38   : > { %v7158_v25 = vpack.c.bf16 %v7155_v53, %v7154_v23  ;;  %v7149_v4 = vmul.f32 %v7145_v21, %v7141_v45  ;;  %v7197_v45 = vrot.slane %v7192_v47, %v13034_v31  ;;  %v7201_v23 = vrot.slane %v7192_v47, %v13558_v28 }
0x2d3a   : > { %7370 = vmatmul.mubr.bf16.vlgmr.msra.gmra.mrb[156].mxu1 %v7158_v25  ;;  %10573 = vmatprep.mubr.bf16.mxu0 %v7158_v25  ;;  %v7157_v8 = vadd.f32 %v7153_v5, %v7149_v4  ;;  %v7205_v4 = vrot.slane %v7192_v47, %v14278_v33 }
0x2d3b   : > { %7379 = vmatprep.mubr.bf16.mxu1 %v12201_v6  ;;  %9928 = vmatpush3.bf16.msra.mxu1 %v11111_v59 }
0x2d3c   : > { %v7159_v19 = vpack.c.bf16 %v7157_v8, %v7156_v52  ;;  %9929 = vmatprep.subr.bf16.mxu1 %v11112_v36 }
0x2d3e   : > { %10574 = vmatmul.mubr.bf16.vlgmr.msra.gmra.mrb[164].mxu0 %v7159_v19 }
0x2d3f   : > { %9930 = vmatpush3.bf16.msra.mxu1 %v11114_v37  ;;  %10578 = vmatpush3.bf16.msra.mxu0 %v11113_v51 }
0x2d40   : > { %9931 = vmatprep.subr.bf16.mxu1 %v11115_v48  ;;  %10579 = vmatprep.subr.bf16.mxu0 %v11116_v44 }
0x2d42   : > { %7380 = vmatmul.mubr.bf16.gmra.mrb[160].mxu1 %v7159_v19 }
0x2d43   : > { %9932 = vmatpush3.bf16.msra.mxu1 %v11117_v55  ;;  %10580 = vmatpush3.bf16.msra.mxu0 %v11116_v44 }
0x2d44   : > { %9933 = vmatprep.subr.bf16.mxu1 %v11118_v62  ;;  %10581 = vmatprep.subr.bf16.mxu0 %v11119_v26 }
0x2d47   : > { %9934 = vmatpush3.bf16.msra.mxu1 %v11120_v9  ;;  %10582 = vmatpush3.bf16.msra.mxu0 %v11119_v26 }
0x2d48   : > { %9935 = vmatprep.subr.bf16.mxu1 %v11121_v49  ;;  %10583 = vmatprep.subr.bf16.mxu0 %v11122_v7 }
0x2d4b   : > { %9936 = vmatpush3.bf16.msra.mxu1 %v11123_v11  ;;  %10584 = vmatpush3.bf16.msra.mxu0 %v11122_v7 }
0x2d4c   : > { %9937 = vmatprep.subr.bf16.mxu1 %v11124_v41  ;;  %10585 = vmatprep.subr.bf16.mxu0 %v11125_v34 }
0x2d4f   : > { %9938 = vmatpush3.bf16.msra.mxu1 %v11126_v24  ;;  %10586 = vmatpush3.bf16.msra.mxu0 %v11125_v34 }
0x2d50   : > { %9939 = vmatprep.subr.bf16.mxu1 %v11127_v42  ;;  %10587 = vmatprep.subr.bf16.mxu0 %v11128_v16 }
0x2d53   : > { %9940 = vmatpush3.bf16.msra.mxu1 %v11129_v60  ;;  %10588 = vmatpush3.bf16.msra.mxu0 %v11128_v16 }
0x2d54   : > { %9941 = vmatprep.subr.bf16.mxu1 %v11130_v61  ;;  %10589 = vmatprep.subr.bf16.mxu0 %v11131_v18 }
0x2d57   : > { %9942 = vmatpush3.bf16.msra.mxu1 %v11132_v39  ;;  %10590 = vmatpush3.bf16.msra.mxu0 %v11131_v18 }
0x2d58   : > { %10591 = vmatprep.subr.bf16.mxu0 %v11133_v27  ;;  %8097 = vmatprep.subr.bf16.mxu1 %v11136_v10 }
0x2d5b   : > { %10592 = vmatpush3.bf16.msra.mxu0 %v11133_v27 }
0x2d5c   : > { %10597 = vmatprep.subr.bf16.mxu0 %v14331_v17 }
0x2dbb   : > { %v7857_v29 = vpop.xlane.xlu0 %7856 }
0x2dbc   : > { %v7864_v3 = vmul.f32 0.0078125, %v7857_v29 }
0x2dbd   : > { %v7859_v14 = vpop.xlane.xlu1 %7858 }
0x2dbe   : > { %v14334_v50 = vsub.f32 %v14282_v56, %v7864_v3  ;;  %v7865_v54 = vmul.f32 0.0078125, %v7859_v14 }
0x2dbf   : > { %v7861_v35 = vpop.xlane.xlu0 %7860 }
0x2dc0   : > { %v14338_v43 = vsub.f32 %v14286_v2, %v7865_v54  ;;  %v7866_v58 = vmul.f32 0.0078125, %v7861_v35  ;;  %v7872_v21 = vmul.f32 %v14334_v50, %v14334_v50 }
0x2dc1   : > { %v7863_v20 = vpop.xlane.xlu1 %7862 }
0x2dc2   : > { %v14343_v22 = vsub.f32 %v14292_v46, %v7866_v58  ;;  %v7867_v5 = vmul.f32 0.0078125, %v7863_v20  ;;  %7876 = vadd.xlane.f32.xlu0 %v7872_v21  ;;  %v7873_v1 = vmul.f32 %v14338_v43, %v14338_v43 }
0x2dc4   : > { %v14348_v30 = vsub.f32 %v14299_v12, %v7867_v5  ;;  %7878 = vadd.xlane.f32.xlu1 %v7873_v1  ;;  %v7874_v57 = vmul.f32 %v14343_v22, %v14343_v22 }
0x2dc6   : > { %7880 = vadd.xlane.f32.xlu0 %v7874_v57  ;;  %v7875_v63 = vmul.f32 %v14348_v30, %v14348_v30 }
0x2dc8   : > { %7882 = vadd.xlane.f32.xlu1 %v7875_v63 }
0x2e0d   : > { %v7371_v53 = vpop.f32.mrb[156].mxu1 }
0x2e0e   : > { %v14357_v32 = vadd.f32 %v7371_v53, %v7197_v45  ;;  %v7373_v25 = vpop.f32.mrb[157].mxu1 }
0x2e0f   : > { %v14360_v52 = vadd.f32 %v7373_v25, %v7201_v23  ;;  %v7375_v8 = vpop.f32.mrb[158].mxu1 }
0x2e10   : > { %v7451_v19 = vmul.f32 0.044715, %v14357_v32  ;;  %v14363_v40 = vadd.f32 %v7375_v8, %v7197_v45  ;;  %v7377_v59 = vpop.f32.mrb[159].mxu1 }
0x2e11   : > { %v7452_v36 = vmul.f32 0.044715, %v14360_v52  ;;  %v14366_v51 = vadd.f32 %v7377_v59, %v7201_v23  ;;  %v10575_v37 = vpop.f32.mrb[164].mxu0 }
0x2e12   : > { %v7463_v48 = vmul.f32 %v7451_v19, %v14357_v32  ;;  %v7454_v44 = vmul.f32 0.044715, %v14363_v40  ;;  %v14370_v55 = vadd.f32 %v10575_v37, %v7205_v4  ;;  %v7424_v62 = vpop.f32.mrb[165].mxu0 }
0x2e13   : > { %v7464_v26 = vmul.f32 %v7452_v36, %v14360_v52  ;;  %v7455_v9 = vmul.f32 0.044715, %v14366_v51  ;;  %v14374_v49 = vadd.f32 %v7424_v62, %v7205_v4  ;;  %v10576_v7 = vpop.f32.mrb[166].mxu0 }
0x2e14   : > { %v7475_v11 = vmul.f32 %v7463_v48, %v14357_v32  ;;  %v7466_v41 = vmul.f32 %v7454_v44, %v14363_v40  ;;  %v7459_v34 = vmul.f32 0.044715, %v14370_v55  ;;  %v14379_v24 = vadd.f32 %v10576_v7, %v7205_v4  ;;  %v7427_v42 = vpop.f32.mrb[167].mxu0 }
0x2e15   : > { %v7467_v16 = vmul.f32 %v7455_v9, %v14366_v51  ;;  %v7453_v60 = vmul.f32 0.044715, %v14374_v49  ;;  %v14383_v61 = vadd.f32 %v7427_v42, %v7205_v4  ;;  %v7381_v18 = vpop.f32.mrb[160].mxu1  ;;  %v7476_v14 = vmul.f32 %v7464_v26, %v14360_v52 }
0x2e16   : > { %v7487_v39 = vadd.f32 %v7475_v11, %v14357_v32  ;;  %v7478_v27 = vmul.f32 %v7466_v41, %v14363_v40  ;;  %v7471_v29 = vmul.f32 %v7459_v34, %v14370_v55  ;;  %v7462_v3 = vmul.f32 0.044715, %v14379_v24  ;;  %v7383_v10 = vpop.f32.mrb[161].mxu1 }
0x2e17   : > { %v7465_v54 = vmul.f32 %v7453_v60, %v14374_v49  ;;  %v7456_v35 = vmul.f32 0.044715, %v14383_v61  ;;  %v14392_v58 = vadd.f32 %v7381_v18, %v7197_v45  ;;  %v7385_v21 = vpop.f32.mrb[162].mxu1  ;;  %v7479_v47 = vmul.f32 %v7467_v16, %v14366_v51 }
0x2e18   : > { %v7499_v20 = vmul.f32 0.7978846, %v7487_v39  ;;  %v7490_v5 = vadd.f32 %v7478_v27, %v14363_v40  ;;  %v7483_v1 = vmul.f32 %v7471_v29, %v14370_v55  ;;  %v7474_v57 = vmul.f32 %v7462_v3, %v14379_v24  ;;  %v7387_v63 = vpop.f32.mrb[163].mxu1 }
0x2e19   : > { %v7468_v53 = vmul.f32 %v7456_v35, %v14383_v61  ;;  %v7457_v25 = vmul.f32 0.044715, %v14392_v58  ;;  %v14400_v4 = vadd.f32 %v7383_v10, %v7201_v23  ;;  %v7477_v36 = vmul.f32 %v7465_v54, %v14374_v49 }
0x2e1a   : > { %11486 = vtanh.f32 %v7499_v20  ;;  %v7502_v8 = vmul.f32 0.7978846, %v7490_v5  ;;  %v7495_v19 = vadd.f32 %v7483_v1, %v14370_v55  ;;  %v7486_v59 = vmul.f32 %v7474_v57, %v14379_v24 }
0x2e1b   : > { %v7469_v37 = vmul.f32 %v7457_v25, %v14392_v58  ;;  %v7458_v48 = vmul.f32 0.044715, %v14400_v4  ;;  %v14407_v44 = vadd.f32 %v7385_v21, %v7197_v45  ;;  %v14410_v9 = vadd.f32 %v7387_v63, %v7201_v23 }
0x2e1c   : > { %11488 = vtanh.f32 %v7502_v8  ;;  %v7507_v62 = vmul.f32 0.7978846, %v7495_v19  ;;  %v7498_v26 = vadd.f32 %v7486_v59, %v14379_v24  ;;  %v7480_v7 = vmul.f32 %v7468_v53, %v14383_v61 }
0x2e1d   : > { %v7470_v11 = vmul.f32 %v7458_v48, %v14400_v4  ;;  %v7460_v41 = vmul.f32 0.044715, %v14407_v44  ;;  %v7488_v34 = vadd.f32 %v7476_v14, %v14360_v52  ;;  %v7461_v16 = vmul.f32 0.044715, %v14410_v9 }
0x2e1e   : > { %11490 = vtanh.f32 %v7507_v62  ;;  %v7510_v42 = vmul.f32 0.7978846, %v7498_v26  ;;  %v7491_v45 = vadd.f32 %v7479_v47, %v14366_v51  ;;  %v7481_v60 = vmul.f32 %v7469_v37, %v14392_v58 }
0x2e1f   : > { %v7472_v18 = vmul.f32 %v7460_v41, %v14407_v44  ;;  %v7500_v23 = vmul.f32 0.7978846, %v7488_v34  ;;  %v7482_v39 = vmul.f32 %v7470_v11, %v14400_v4  ;;  %v7473_v27 = vmul.f32 %v7461_v16, %v14410_v9 }
0x2e20   : > { %11492 = vtanh.f32 %v7510_v42  ;;  %v7503_v29 = vmul.f32 0.7978846, %v7491_v45  ;;  %v7489_v10 = vadd.f32 %v7477_v36, %v14374_v49  ;;  %v7492_v14 = vadd.f32 %v7480_v7, %v14383_v61 }
0x2e21   : > { %v7484_v3 = vmul.f32 %v7472_v18, %v14407_v44  ;;  %11494 = vtanh.f32 %v7500_v23  ;;  %v7485_v54 = vmul.f32 %v7473_v27, %v14410_v9  ;;  %v7494_v5 = vadd.f32 %v7482_v39, %v14400_v4 }
0x2e22   : > { %11496 = vtanh.f32 %v7503_v29  ;;  %v7501_v35 = vmul.f32 0.7978846, %v7489_v10  ;;  %v7504_v21 = vmul.f32 0.7978846, %v7492_v14  ;;  %v7493_v63 = vadd.f32 %v7481_v60, %v14392_v58 }
0x2e23   : > { %v7497_v1 = vadd.f32 %v7485_v54, %v14410_v9  ;;  %v7496_v47 = vadd.f32 %v7484_v3, %v14407_v44  ;;  %v7439_v25 = vmul.f32 0.5, %v14357_v32  ;;  %v7506_v8 = vmul.f32 0.7978846, %v7494_v5  ;;  %v11134_v5 = vld [vmem:[%s12958_s22 + $0xc0] ss:$12 sps:$4 sm:$0xff]  }
0x2e24   : > { %v11487_v20 = vpop.eup %11486  ;;  %11498 = vtanh.f32 %v7501_v35  ;;  %v7442_v59 = vmul.f32 0.5, %v14363_v40  ;;  %v7505_v37 = vmul.f32 0.7978846, %v7493_v63  ;;  %v7447_v34 = vmul.f32 0.5, %v14370_v55 }
0x2e25   : > { %v7523_v57 = vadd.f32 1.0, %v11487_v20  ;;  %11500 = vtanh.f32 %v7504_v21  ;;  %v7509_v19 = vmul.f32 0.7978846, %v7497_v1  ;;  %v7508_v48 = vmul.f32 0.7978846, %v7496_v47 }
0x2e26   : > { %v11489_v53 = vpop.eup %11488  ;;  %11502 = vtanh.f32 %v7506_v8  ;;  %v7450_v16 = vmul.f32 0.5, %v14379_v24  ;;  %v7440_v60 = vmul.f32 0.5, %v14360_v52  ;;  %v7443_v23 = vmul.f32 0.5, %v14366_v51 }
0x2e27   : > { %v7526_v36 = vadd.f32 1.0, %v11489_v53  ;;  %v7535_v26 = vmul.f32 %v7523_v57, %v7439_v25  ;;  %11504 = vtanh.f32 %v7509_v19  ;;  %v7441_v21 = vmul.f32 0.5, %v14374_v49  ;;  %v11139_v57 = vld [vmem:[%s12958_s22 + $0xdc] ss:$12 sps:$4 sm:$0xff]  }
0x2e28   : > { %v11491_v62 = vpop.eup %11490  ;;  %11506 = vtanh.f32 %v7505_v37  ;;  %v7444_v20 = vmul.f32 0.5, %v14383_v61  ;;  %v7446_v8 = vmul.f32 0.5, %v14400_v4  ;;  %v7449_v49 = vmul.f32 0.5, %v14410_v9  ;;  %v11143_v4 = vld [vmem:[%s12958_s22 + $0xf4] ss:$12 sps:$4 sm:$0xff]  }
0x2e29   : > { %v7538_v7 = vmul.f32 %v7526_v36, %v7442_v59  ;;  %v7531_v11 = vadd.f32 1.0, %v11491_v62  ;;  %11508 = vtanh.f32 %v7508_v48  ;;  %v7445_v36 = vmul.f32 0.5, %v14392_v58  ;;  %v11137_v48 = vld [vmem:[%s12958_s22 + $0xd8] ss:$12 sps:$4 sm:$0xff]   ;;  %v11144_v9 = vld [vmem:[%s12958_s22 + $0xe0] ss:$12 sps:$4 sm:$0xff]  }
0x2e2a   : > { %v11493_v41 = vpop.eup %11492 }
0x2e2b   : > { %v11495_v42 = vpop.eup %11494  ;;  %v7547_v32 = vpack.c.bf16 %v7538_v7, %v7535_v26  ;;  %v7534_v45 = vadd.f32 1.0, %v11493_v41  ;;  %v7543_v27 = vmul.f32 %v7531_v11, %v7447_v34  ;;  %v7448_v7 = vmul.f32 0.5, %v14407_v44 }
0x2e2c   : > { %v11497_v40 = vpop.eup %11496  ;;  %v7524_v18 = vadd.f32 1.0, %v11495_v42  ;;  %v11141_v42 = vld [vmem:[%s12958_s22 + $0xf0] ss:$12 sps:$4 sm:$0xff]  }
0x2e2d   : > { %v7527_v39 = vadd.f32 1.0, %v11497_v40  ;;  %v7546_v29 = vmul.f32 %v7534_v45, %v7450_v16  ;;  %v11148_v16 = vld [vmem:[%s12958_s22 + $0xf8] ss:$12 sps:$4 sm:$0xff]   ;;  %v11145_v45 = vld [vmem:[%s12958_s22 + $0x108] ss:$12 sps:$4 sm:$0xff]  }
0x2e2e   : > { %v11499_v3 = vpop.eup %11498  ;;  %v7536_v55 = vmul.f32 %v7524_v18, %v7440_v60  ;;  %v11151_v40 = vld [vmem:[%s12958_s22 + $0x124] ss:$12 sps:$4 sm:$0xff]   ;;  %v11149_v60 = vld [vmem:[%s12958_s22 + $0x120] ss:$12 sps:$4 sm:$0xff]   ;;  %v11155_v18 = vld [vmem:[%s12958_s22 + $0x13c] ss:$12 sps:$4 sm:$0xff]  }
0x2e2f   : > { %v7539_v10 = vmul.f32 %v7527_v39, %v7443_v23  ;;  %v7552_v14 = vpack.c.bf16 %v7546_v29, %v7543_v27  ;;  %v11501_v54 = vpop.eup %11500  ;;  %v7525_v35 = vadd.f32 1.0, %v11499_v3  ;;  %v11156_v23 = vld [vmem:[%s12958_s22 + $0x128] ss:$12 sps:$4 sm:$0xff]   ;;  %v11153_v39 = vld [vmem:[%s12958_s22 + $0x138] ss:$12 sps:$4 sm:$0xff]  }
0x2e30   : > { %v7528_v52 = vadd.f32 1.0, %v11501_v54  ;;  %v11503_v1 = vpop.eup %11502  ;;  %v11159_v27 = vld [vmem:[%s12958_s22 + $0x154] ss:$12 sps:$4 sm:$0xff]   ;;  %v11157_v3 = vld [vmem:[%s12958_s22 + $0x150] ss:$12 sps:$4 sm:$0xff]  }
0x2e31   : > { %v7548_v24 = vpack.c.bf16 %v7539_v10, %v7536_v55  ;;  %v11505_v51 = vpop.eup %11504  ;;  %v7537_v63 = vmul.f32 %v7525_v35, %v7441_v21  ;;  %v7530_v53 = vadd.f32 1.0, %v11503_v1  ;;  %v11160_v29 = vld [vmem:[%s12958_s22 + $0x140] ss:$12 sps:$4 sm:$0xff]   ;;  %v11164_v10 = vld [vmem:[%s12958_s22 + $0x158] ss:$12 sps:$4 sm:$0xff]  }
0x2e32   : > { %v7540_v47 = vmul.f32 %v7528_v52, %v7444_v20  ;;  %v11507_v25 = vpop.eup %11506  ;;  %v7533_v19 = vadd.f32 1.0, %v11505_v51  ;;  %v11163_v55 = vld [vmem:[%s12958_s22 + $0x16c] ss:$12 sps:$4 sm:$0xff]   ;;  %v11165_v54 = vld [vmem:[%s12958_s22 + $0x170] ss:$12 sps:$4 sm:$0xff]  }
0x2e33   : > { %7784 = vmatprep.mubr.bf16.mxu1 %v7548_v24  ;;  %v11509_v61 = vpop.eup %11508  ;;  %v7529_v37 = vadd.f32 1.0, %v11507_v25  ;;  %v7542_v62 = vmul.f32 %v7530_v53, %v7446_v8  ;;  %v9556_v25 = vld [vmem:[%s12936_s6 + $0x4] sm:$0x7]  ;;  %s14842_s6 = sld [smem:[#allocation36_spill]] }
0x2e34   : > { %7785 = vmatmul.mubr.bf16.vlgmr.msra.gmra.mrb[164].mxu1 %v7547_v32  ;;  %v7549_v59 = vpack.c.bf16 %v7540_v47, %v7537_v63  ;;  %v7545_v26 = vmul.f32 %v7533_v19, %v7449_v49  ;;  %v7532_v11 = vadd.f32 1.0, %v11509_v61  ;;  %v11147_v32 = vld [vmem:[%s12958_s22 + $0x10c] ss:$12 sps:$4 sm:$0xff]   ;;  %v7903_v8 = vrot.slane %v9556_v25, %v14278_v33 }
0x2e35   : > { %8098 = vmatpush1.bf16.msra.mxu1 %v11134_v5  ;;  %v7541_v34 = vmul.f32 %v7529_v37, %v7445_v36  ;;  %v9557_v19 = vld [vmem:[%s12944_s14 + $0x4] sm:$0x7] }
0x2e36   : > { %8099 = vmatprep.subr.bf16.mxu1 %v11139_v57  ;;  %10593 = vmatprep.mubr.bf16.mxu0 %v7549_v59  ;;  %v7551_v41 = vpack.c.bf16 %v7545_v26, %v7542_v62  ;;  %v7544_v58 = vmul.f32 %v7532_v11, %v7448_v7 }
0x2e37   : > { %10594 = vmatmul.mubr.bf16.vlgmr.msra.gmra.mrb[168].mxu0 %v7552_v14  ;;  %v11161_v14 = vld [vmem:[%s12958_s22 + $0x168] ss:$12 sps:$4 sm:$0xff]  }
0x2e38   : > { %10598 = vmatpush3.bf16.msra.mxu0 %v14331_v17  ;;  %7792 = vmatprep.mubr.bf16.mxu1 %v7551_v41  ;;  %v7550_v44 = vpack.c.bf16 %v7544_v58, %v7541_v34  ;;  %v11152_v17 = vld [vmem:[%s12958_s22 + $0x110] ss:$12 sps:$4 sm:$0xff]  }
0x2e39   : > { %8100 = vmatpush1.bf16.msra.mxu1 %v11137_v48  ;;  %10599 = vmatprep.subr.bf16.mxu0 %v11144_v9  ;;  %v7911_v48 = vrot.slane %v9557_v19, %v14278_v33  ;;  %p9689_p6 = scmp.ne.s32.totalorder %s14842_s6, 1 }
0x2e3a   : > { %8101 = vmatprep.subr.bf16.mxu1 %v11143_v4 }
0x2e3c   : > { %7793 = vmatmul.mubr.bf16.gmra.mrb[168].mxu1 %v7550_v44  ;;  %10600 = vmatpush3.bf16.msra.mxu0 %v11144_v9  ;;  %v11167_v44 = vld [vmem:[%s12962_s20 + $0xc0] sm:$0xff]  }
0x2e3d   : > { %8102 = vmatpush1.bf16.msra.mxu1 %v11141_v42  ;;  %10601 = vmatprep.subr.bf16.mxu0 %v11148_v16 }
0x2e3e   : > { %8103 = vmatprep.subr.bf16.mxu1 %v11147_v32  ;;  %8129 = vmatprep.mubr.bf16.mxu1 %v12201_v6  ;;  %v11168_v32 = vld [vmem:[%s12962_s20 + $0x108] sm:$0xff]  }
0x2e40   : > { %10602 = vmatpush3.bf16.msra.mxu0 %v11148_v16  ;;  %v11169_v16 = vld [vmem:[%s12962_s20 + $0x140] sm:$0xff]  }
0x2e41   : > { %8104 = vmatpush1.bf16.msra.mxu1 %v11145_v45  ;;  %10603 = vmatprep.subr.bf16.mxu0 %v11152_v17  ;;  %v11170_v45 = vld [vmem:[%s12962_s20 + $0xc8] sm:$0xff]  }
0x2e42   : > { %8105 = vmatprep.subr.bf16.mxu1 %v11151_v40  ;;  %v11171_v40 = vld [vmem:[%s12962_s20 + $0x110] sm:$0xff]  }
0x2e44   : > { %10604 = vmatpush3.bf16.msra.mxu0 %v11152_v17  ;;  %v11173_v17 = vld [vmem:[%s12962_s20 + $0xd0] sm:$0xff]  }
0x2e45   : > { %8106 = vmatpush1.bf16.msra.mxu1 %v11149_v60  ;;  %10605 = vmatprep.subr.bf16.mxu0 %v11156_v23  ;;  %v11174_v60 = vld [vmem:[%s12962_s20 + $0x118] sm:$0xff]  }
0x2e46   : > { %8107 = vmatprep.subr.bf16.mxu1 %v11155_v18  ;;  %v11175_v18 = vld [vmem:[%s12962_s20 + $0x150] sm:$0xff]  }
0x2e48   : > { %10606 = vmatpush3.bf16.msra.mxu0 %v11156_v23  ;;  %v11176_v23 = vld [vmem:[%s12962_s20 + $0xd8] sm:$0xff]  }
0x2e49   : > { %8108 = vmatpush1.bf16.msra.mxu1 %v11153_v39  ;;  %10607 = vmatprep.subr.bf16.mxu0 %v11160_v29  ;;  %v11177_v39 = vld [vmem:[%s12962_s20 + $0x120] sm:$0xff]  }
0x2e4a   : > { %8109 = vmatprep.subr.bf16.mxu1 %v11159_v27  ;;  %v11178_v27 = vld [vmem:[%s12962_s20 + $0x158] sm:$0xff]  }
0x2e4c   : > { %10608 = vmatpush3.bf16.msra.mxu0 %v11160_v29  ;;  %v11179_v29 = vld [vmem:[%s12962_s20 + $0xe0] sm:$0xff]  }
0x2e4d   : > { %8110 = vmatpush1.bf16.msra.mxu1 %v11157_v3  ;;  %10609 = vmatprep.subr.bf16.mxu0 %v11164_v10  ;;  %v11180_v3 = vld [vmem:[%s12962_s20 + $0x128] sm:$0xff]  }
0x2e4e   : > { %8111 = vmatprep.subr.bf16.mxu1 %v11163_v55  ;;  %v11181_v55 = vld [vmem:[%s12962_s20 + $0x160] sm:$0xff]  }
0x2e4f   : > { %v7877_v35 = vpop.xlane.xlu0 %7876 }
0x2e50   : > { %v7884_v24 = vmul.f32 0.0078125, %v7877_v35  ;;  %10610 = vmatpush3.bf16.msra.mxu0 %v11164_v10  ;;  %v11182_v10 = vld [vmem:[%s12962_s20 + $0xe8] sm:$0xff]   ;;  %v11185_v35 = vld [vmem:[%s12962_s20 + $0xf0] sm:$0xff]  }
0x2e51   : > { %v7879_v21 = vpop.xlane.xlu1 %7878  ;;  %8112 = vmatpush1.bf16.msra.mxu1 %v11161_v14  ;;  %10611 = vmatprep.subr.bf16.mxu0 %v11165_v54  ;;  %v11183_v14 = vld [vmem:[%s12962_s20 + $0x130] sm:$0xff]  }
0x2e52   : > { %v7888_v20 = vadd.f32 1e-05, %v7884_v24  ;;  %v7885_v52 = vmul.f32 0.0078125, %v7879_v21  ;;  %v11186_v24 = vld [vmem:[%s12962_s20 + $0x138] sm:$0xff]   ;;  %v11187_v21 = vld [vmem:[%s12962_s20 + $0x170] sm:$0xff]  }
0x2e53   : > { %v7881_v5 = vpop.xlane.xlu0 %7880 }
0x2e54   : > { %11510 = vrsqrt.f32 %v7888_v20  ;;  %v7889_v1 = vadd.f32 1e-05, %v7885_v52  ;;  %v7886_v57 = vmul.f32 0.0078125, %v7881_v5  ;;  %10612 = vmatpush3.bf16.msra.mxu0 %v11165_v54  ;;  %v11184_v54 = vld [vmem:[%s12962_s20 + $0x168] sm:$0xff]   ;;  %v11188_v20 = vld [vmem:[%s12962_s20 + $0xf8] sm:$0xff]  }
0x2e55   : > { %v7883_v51 = vpop.xlane.xlu1 %7882  ;;  %10617 = vmatprep.subr.bf16.mxu0 %v11169_v16  ;;  %v11189_v52 = vld [vmem:[%s12962_s20 + $0x178] sm:$0xff]  }
0x2e56   : > { %11512 = vrsqrt.f32 %v7889_v1  ;;  %v7890_v63 = vadd.f32 1e-05, %v7886_v57  ;;  %v7887_v47 = vmul.f32 0.0078125, %v7883_v51  ;;  %v9531_v57 = vld [vmem:[%s1005_s23] ss:$0 sm:$0xff] }
0x2e58   : > { %11514 = vrsqrt.f32 %v7890_v63  ;;  %v7891_v53 = vadd.f32 1e-05, %v7887_v47 }
0x2e5a   : > { %11516 = vrsqrt.f32 %v7891_v53 }
0x2e5e   : > { %v11511_v49 = vpop.eup %11510 }
0x2e5f   : > { %v7896_v61 = vmul.f32 %v11511_v49, %v14334_v50 }
0x2e60   : > { %v11513_v59 = vpop.eup %11512 }
0x2e61   : > { %v7904_v36 = vmul.f32 %v7903_v8, %v7896_v61  ;;  %v7897_v37 = vmul.f32 %v11513_v59, %v14338_v43 }
0x2e62   : > { %v11515_v62 = vpop.eup %11514 }
0x2e63   : > { %v7905_v26 = vmul.f32 %v7903_v8, %v7897_v37  ;;  %v7898_v7 = vmul.f32 %v11515_v62, %v14343_v22  ;;  %v7912_v9 = vadd.f32 %v7911_v48, %v7904_v36 }
0x2e64   : > { %v11517_v11 = vpop.eup %11516 }
0x2e65   : > { %v7899_v4 = vmul.f32 %v11517_v11, %v14348_v30  ;;  %v7913_v41 = vadd.f32 %v7911_v48, %v7905_v26  ;;  %v7906_v34 = vmul.f32 %v7903_v8, %v7898_v7  ;;  %v11166_v30 = vld [vmem:[%s12962_s20 + $0x100] sm:$0xff]  }
0x2e66   : > { %9975 = vmatprep.subr.bf16.mxu1 %v11166_v30 }
0x2e67   : > { %v7916_v50 = vpack.c.bf16 %v7913_v41, %v7912_v9  ;;  %v7907_v58 = vmul.f32 %v7903_v8, %v7899_v4  ;;  %v7914_v43 = vadd.f32 %v7911_v48, %v7906_v34 }
0x2e69   : > { %8130 = vmatmul.mubr.bf16.vlgmr.msra.gmra.mrb[172].mxu1 %v7916_v50  ;;  %10613 = vmatprep.mubr.bf16.mxu0 %v7916_v50  ;;  %v7915_v42 = vadd.f32 %v7911_v48, %v7907_v58 }
0x2e6a   : > { %8139 = vmatprep.mubr.bf16.mxu1 %v12201_v6  ;;  %9976 = vmatpush3.bf16.msra.mxu1 %v11167_v44  ;;  %v11172_v6 = vld [vmem:[%s12962_s20 + $0x148] sm:$0xff]  }
0x2e6b   : > { %v7917_v22 = vpack.c.bf16 %v7915_v42, %v7914_v43  ;;  %9977 = vmatprep.subr.bf16.mxu1 %v11168_v32 }
0x2e6d   : > { %10614 = vmatmul.mubr.bf16.vlgmr.msra.gmra.mrb[172].mxu0 %v7917_v22 }
0x2e6e   : > { %9978 = vmatpush3.bf16.msra.mxu1 %v11170_v45  ;;  %10618 = vmatpush3.bf16.msra.mxu0 %v11169_v16 }
0x2e6f   : > { %9979 = vmatprep.subr.bf16.mxu1 %v11171_v40  ;;  %10619 = vmatprep.subr.bf16.mxu0 %v11172_v6 }
0x2e71   : > { %8140 = vmatmul.mubr.bf16.gmra.mrb[176].mxu1 %v7917_v22 }
0x2e72   : > { %9980 = vmatpush3.bf16.msra.mxu1 %v11173_v17  ;;  %10620 = vmatpush3.bf16.msra.mxu0 %v11172_v6 }
0x2e73   : > { %9981 = vmatprep.subr.bf16.mxu1 %v11174_v60  ;;  %10621 = vmatprep.subr.bf16.mxu0 %v11175_v18 }
0x2e76   : > { %9982 = vmatpush3.bf16.msra.mxu1 %v11176_v23  ;;  %10622 = vmatpush3.bf16.msra.mxu0 %v11175_v18 }
0x2e77   : > { %9983 = vmatprep.subr.bf16.mxu1 %v11177_v39  ;;  %10623 = vmatprep.subr.bf16.mxu0 %v11178_v27 }
0x2e7a   : > { %9984 = vmatpush3.bf16.msra.mxu1 %v11179_v29  ;;  %10624 = vmatpush3.bf16.msra.mxu0 %v11178_v27 }
0x2e7b   : > { %9985 = vmatprep.subr.bf16.mxu1 %v11180_v3  ;;  %10625 = vmatprep.subr.bf16.mxu0 %v11181_v55 }
0x2e7e   : > { %9986 = vmatpush3.bf16.msra.mxu1 %v11182_v10  ;;  %10626 = vmatpush3.bf16.msra.mxu0 %v11181_v55 }
0x2e7f   : > { %9987 = vmatprep.subr.bf16.mxu1 %v11183_v14  ;;  %10627 = vmatprep.subr.bf16.mxu0 %v11184_v54 }
0x2e82   : > { %9988 = vmatpush3.bf16.msra.mxu1 %v11185_v35  ;;  %10628 = vmatpush3.bf16.msra.mxu0 %v11184_v54 }
0x2e83   : > { %9989 = vmatprep.subr.bf16.mxu1 %v11186_v24  ;;  %10629 = vmatprep.subr.bf16.mxu0 %v11187_v21 }
0x2e86   : > { %9990 = vmatpush3.bf16.msra.mxu1 %v11188_v20  ;;  %10630 = vmatpush3.bf16.msra.mxu0 %v11187_v21 }
0x2e87   : > { %10631 = vmatprep.subr.bf16.mxu0 %v11189_v52 }
0x2e8a   : > { %10632 = vmatpush3.bf16.msra.mxu0 %v11189_v52 }
0x2f07   : > { %v9943_v5 = vpop.f32.mrb[164].mxu1 }
0x2f08   : > { %v9944_v1 = vpop.f32.mrb[165].mxu1 }
0x2f09   : > { %v9945_v51 = vadd.f32 %v9944_v1, %v9943_v5  ;;  %v9946_v63 = vpop.f32.mrb[166].mxu1 }
0x2f0a   : > { %v9947_v47 = vpop.f32.mrb[167].mxu1  ;;  %v10595_v25 = vpop.f32.mrb[168].mxu0 }
0x2f0b   : > { %v9948_v53 = vadd.f32 %v9947_v47, %v9946_v63  ;;  %v7787_v8 = vadd.f32 %v9945_v51, %v9531_v57  ;;  %v7835_v49 = vpop.f32.mrb[169].mxu0 }
0x2f0c   : > { %v10596_v61 = vpop.f32.mrb[170].mxu0 }
0x2f0d   : > { %v7836_v19 = vadd.f32 %v7835_v49, %v7787_v8  ;;  %v7790_v59 = vadd.f32 %v9948_v53, %v9531_v57  ;;  %v7838_v36 = vpop.f32.mrb[171].mxu0 }
0x2f0f   : > { %v14502_v37 = vadd.f32 %v7836_v19, %v14184_v0  ;;  %v7839_v48 = vadd.f32 %v7838_v36, %v7790_v59  ;;  %v9949_v62 = vpop.f32.mrb[168].mxu1 }
0x2f10   : > { %v9950_v26 = vpop.f32.mrb[169].mxu1 }
0x2f11   : > { %8616 = vst [vmem:[#allocation2] sm:$0xff] %v14502_v37  ;;  %v14506_v7 = vadd.f32 %v7839_v48, %v14223_v38  ;;  %v9951_v11 = vadd.f32 %v9950_v26, %v9949_v62  ;;  %v9952_v4 = vpop.f32.mrb[170].mxu1  ;;  %v9590_v38 = vld [vmem:[%s12960_s27 + $0x3] sm:$0x7]  ;;  %8630 = vadd.xlane.f32.xlu0 (!%p9689_p6), %v14502_v37 }
0x2f12   : > { %v9953_v9 = vpop.f32.mrb[171].mxu1  ;;  %v7957_v22 = vrot.slane %v9590_v38, %v13034_v31  ;;  %v7961_v30 = vrot.slane %v9590_v38, %v13558_v28 }
0x2f13   : > { %8617 = vst [vmem:[#allocation2 + $0x8] sm:$0xff] %v14506_v7  ;;  %v7795_v41 = vadd.f32 %v9951_v11, %v9531_v57  ;;  %v9954_v34 = vadd.f32 %v9953_v9, %v9952_v4 }
0x2f15   : > { %v7844_v50 = vadd.f32 %v10595_v25, %v7795_v41  ;;  %v7798_v58 = vadd.f32 %v9954_v34, %v9531_v57  ;;  %8632 = vadd.xlane.f32.xlu0 (!%p9689_p6), %v14506_v7 }
0x2f17   : > { %v14510_v0 = vadd.f32 %v7844_v50, %v14208_v15  ;;  %v7847_v43 = vadd.f32 %v10596_v61, %v7798_v58  ;;  %v7965_v15 = vrot.slane %v9590_v38, %v14278_v33 }
0x2f19   : > { %8618 = vst [vmem:[#allocation2 + $0x10] sm:$0xff] %v14510_v0  ;;  %v14514_v42 = vadd.f32 %v7847_v43, %v14213_v13  ;;  %8634 = vadd.xlane.f32.xlu1 (!%p9689_p6), %v14510_v0 }
0x2f1b   : > { %8619 = vst [vmem:[#allocation2 + $0x18] sm:$0xff] %v14514_v42 }
0x2f1d   : > { %8636 = vadd.xlane.f32.xlu1 (!%p9689_p6), %v14514_v42 }
0x2f3c   : > { %v8131_v44 = vpop.f32.mrb[172].mxu1 }
0x2f3d   : > { %v14520_v32 = vadd.f32 %v8131_v44, %v7957_v22  ;;  %v8133_v16 = vpop.f32.mrb[173].mxu1 }
0x2f3e   : > { %v14523_v45 = vadd.f32 %v8133_v16, %v7961_v30  ;;  %v8135_v40 = vpop.f32.mrb[174].mxu1 }
0x2f3f   : > { %v8211_v6 = vmul.f32 0.044715, %v14520_v32  ;;  %v14526_v13 = vadd.f32 %v8135_v40, %v7957_v22  ;;  %v8137_v17 = vpop.f32.mrb[175].mxu1 }
0x2f40   : > { %v8212_v60 = vmul.f32 0.044715, %v14523_v45  ;;  %v14529_v18 = vadd.f32 %v8137_v17, %v7961_v30  ;;  %v10615_v31 = vpop.f32.mrb[172].mxu0 }
0x2f41   : > { %v8223_v28 = vmul.f32 %v8211_v6, %v14520_v32  ;;  %v8214_v23 = vmul.f32 0.044715, %v14526_v13  ;;  %v14533_v39 = vadd.f32 %v10615_v31, %v7965_v15  ;;  %v8184_v33 = vpop.f32.mrb[173].mxu0 }
0x2f42   : > { %v8224_v27 = vmul.f32 %v8212_v60, %v14523_v45  ;;  %v8215_v29 = vmul.f32 0.044715, %v14529_v18  ;;  %v14537_v3 = vadd.f32 %v8184_v33, %v7965_v15  ;;  %v10616_v55 = vpop.f32.mrb[174].mxu0 }
0x2f43   : > { %v8235_v10 = vmul.f32 %v8223_v28, %v14520_v32  ;;  %v8226_v14 = vmul.f32 %v8214_v23, %v14526_v13  ;;  %v8219_v54 = vmul.f32 0.044715, %v14533_v39  ;;  %v14542_v35 = vadd.f32 %v10616_v55, %v7965_v15  ;;  %v8187_v24 = vpop.f32.mrb[175].mxu0 }
0x2f44   : > { %v8227_v21 = vmul.f32 %v8215_v29, %v14529_v18  ;;  %v8213_v20 = vmul.f32 0.044715, %v14537_v3  ;;  %v14546_v52 = vadd.f32 %v8187_v24, %v7965_v15  ;;  %v8141_v5 = vpop.f32.mrb[176].mxu1  ;;  %v8236_v53 = vmul.f32 %v8224_v27, %v14523_v45 }
0x2f45   : > { %v8247_v1 = vadd.f32 %v8235_v10, %v14520_v32  ;;  %v8238_v57 = vmul.f32 %v8226_v14, %v14526_v13  ;;  %v8231_v51 = vmul.f32 %v8219_v54, %v14533_v39  ;;  %v8222_v63 = vmul.f32 0.044715, %v14542_v35  ;;  %v8143_v47 = vpop.f32.mrb[177].mxu1 }
0x2f46   : > { %v8225_v25 = vmul.f32 %v8213_v20, %v14537_v3  ;;  %v8216_v8 = vmul.f32 0.044715, %v14546_v52  ;;  %v14555_v49 = vadd.f32 %v8141_v5, %v7957_v22  ;;  %v8145_v19 = vpop.f32.mrb[178].mxu1  ;;  %v8239_v26 = vmul.f32 %v8227_v21, %v14529_v18 }
0x2f47   : > { %v8259_v61 = vmul.f32 0.7978846, %v8247_v1  ;;  %v8250_v59 = vadd.f32 %v8238_v57, %v14526_v13  ;;  %v8243_v36 = vmul.f32 %v8231_v51, %v14533_v39  ;;  %v8234_v48 = vmul.f32 %v8222_v63, %v14542_v35  ;;  %v8147_v62 = vpop.f32.mrb[179].mxu1 }
0x2f48   : > { %v8228_v11 = vmul.f32 %v8216_v8, %v14546_v52  ;;  %v8217_v4 = vmul.f32 0.044715, %v14555_v49  ;;  %v14563_v9 = vadd.f32 %v8143_v47, %v7961_v30  ;;  %v8237_v58 = vmul.f32 %v8225_v25, %v14537_v3 }
0x2f49   : > { %11518 = vtanh.f32 %v8259_v61  ;;  %v8262_v41 = vmul.f32 0.7978846, %v8250_v59  ;;  %v8255_v34 = vadd.f32 %v8243_v36, %v14533_v39  ;;  %v8246_v50 = vmul.f32 %v8234_v48, %v14542_v35 }
0x2f4a   : > { %v8229_v43 = vmul.f32 %v8217_v4, %v14555_v49  ;;  %v8218_v38 = vmul.f32 0.044715, %v14563_v9  ;;  %v14570_v44 = vadd.f32 %v8145_v19, %v7957_v22  ;;  %v14573_v40 = vadd.f32 %v8147_v62, %v7961_v30 }
0x2f4b   : > { %11520 = vtanh.f32 %v8262_v41  ;;  %v8267_v16 = vmul.f32 0.7978846, %v8255_v34  ;;  %v8258_v15 = vadd.f32 %v8246_v50, %v14542_v35  ;;  %v8240_v6 = vmul.f32 %v8228_v11, %v14546_v52 }
0x2f4c   : > { %v8230_v17 = vmul.f32 %v8218_v38, %v14563_v9  ;;  %v8220_v60 = vmul.f32 0.044715, %v14570_v44  ;;  %v8248_v31 = vadd.f32 %v8236_v53, %v14523_v45  ;;  %v8221_v23 = vmul.f32 0.044715, %v14573_v40 }
0x2f4d   : > { %11522 = vtanh.f32 %v8267_v16  ;;  %v8270_v28 = vmul.f32 0.7978846, %v8258_v15  ;;  %v8251_v22 = vadd.f32 %v8239_v26, %v14529_v18  ;;  %v8241_v33 = vmul.f32 %v8229_v43, %v14555_v49 }
0x2f4e   : > { %v8232_v27 = vmul.f32 %v8220_v60, %v14570_v44  ;;  %v8260_v30 = vmul.f32 0.7978846, %v8248_v31  ;;  %v8242_v29 = vmul.f32 %v8230_v17, %v14563_v9  ;;  %v8233_v55 = vmul.f32 %v8221_v23, %v14573_v40 }
0x2f4f   : > { %11524 = vtanh.f32 %v8270_v28  ;;  %v8263_v10 = vmul.f32 0.7978846, %v8251_v22  ;;  %v8249_v54 = vadd.f32 %v8237_v58, %v14537_v3  ;;  %v8252_v24 = vadd.f32 %v8240_v6, %v14546_v52 }
0x2f50   : > { %v8244_v14 = vmul.f32 %v8232_v27, %v14570_v44  ;;  %11526 = vtanh.f32 %v8260_v30  ;;  %v8245_v21 = vmul.f32 %v8233_v55, %v14573_v40  ;;  %v8254_v57 = vadd.f32 %v8242_v29, %v14563_v9 }
0x2f51   : > { %11528 = vtanh.f32 %v8263_v10  ;;  %v8261_v20 = vmul.f32 0.7978846, %v8249_v54  ;;  %v8264_v5 = vmul.f32 0.7978846, %v8252_v24  ;;  %v8253_v47 = vadd.f32 %v8241_v33, %v14555_v49 }
0x2f52   : > { %v8257_v51 = vadd.f32 %v8245_v21, %v14573_v40  ;;  %v8256_v53 = vadd.f32 %v8244_v14, %v14570_v44  ;;  %v8199_v8 = vmul.f32 0.5, %v14520_v32  ;;  %v8266_v19 = vmul.f32 0.7978846, %v8254_v57 }
0x2f53   : > { %v11519_v1 = vpop.eup %11518  ;;  %11530 = vtanh.f32 %v8261_v20  ;;  %v8202_v59 = vmul.f32 0.5, %v14526_v13  ;;  %v8265_v48 = vmul.f32 0.7978846, %v8253_v47  ;;  %v8207_v50 = vmul.f32 0.5, %v14533_v39 }
0x2f54   : > { %v8283_v63 = vadd.f32 1.0, %v11519_v1  ;;  %11532 = vtanh.f32 %v8264_v5  ;;  %v8269_v61 = vmul.f32 0.7978846, %v8257_v51  ;;  %v8268_v62 = vmul.f32 0.7978846, %v8256_v53 }
0x2f55   : > { %v11521_v25 = vpop.eup %11520  ;;  %11534 = vtanh.f32 %v8266_v19  ;;  %v8210_v43 = vmul.f32 0.5, %v14542_v35  ;;  %v8200_v16 = vmul.f32 0.5, %v14523_v45  ;;  %v8203_v6 = vmul.f32 0.5, %v14529_v18 }
0x2f56   : > { %v8286_v36 = vadd.f32 1.0, %v11521_v25  ;;  %v8295_v11 = vmul.f32 %v8283_v63, %v8199_v8  ;;  %11536 = vtanh.f32 %v8269_v61  ;;  %v8201_v35 = vmul.f32 0.5, %v14537_v3 }
0x2f57   : > { %v11523_v26 = vpop.eup %11522  ;;  %11538 = vtanh.f32 %v8265_v48  ;;  %v8204_v29 = vmul.f32 0.5, %v14546_v52  ;;  %v8206_v21 = vmul.f32 0.5, %v14563_v9  ;;  %v8209_v20 = vmul.f32 0.5, %v14573_v40 }
0x2f58   : > { %v8298_v4 = vmul.f32 %v8286_v36, %v8202_v59  ;;  %v8291_v41 = vadd.f32 1.0, %v11523_v26  ;;  %11540 = vtanh.f32 %v8268_v62  ;;  %v8205_v3 = vmul.f32 0.5, %v14555_v49  ;;  %v9664_v59 = vld [vmem:[%s1005_s23 + $0x1] ss:$0 sm:$0xff] }
0x2f59   : > { %v11525_v34 = vpop.eup %11524  ;;  %v8208_v47 = vmul.f32 0.5, %v14570_v44 }
0x2f5a   : > { %v11527_v58 = vpop.eup %11526  ;;  %v8307_v32 = vpack.c.bf16 %v8298_v4, %v8295_v11  ;;  %v8294_v38 = vadd.f32 1.0, %v11525_v34  ;;  %v8303_v60 = vmul.f32 %v8291_v41, %v8207_v50 }
0x2f5b   : > { %v11529_v13 = vpop.eup %11528  ;;  %v8284_v15 = vadd.f32 1.0, %v11527_v58 }
0x2f5c   : > { %v8287_v17 = vadd.f32 1.0, %v11529_v13  ;;  %v8306_v31 = vmul.f32 %v8294_v38, %v8210_v43 }
0x2f5d   : > { %v11531_v28 = vpop.eup %11530  ;;  %v8296_v23 = vmul.f32 %v8284_v15, %v8200_v16 }
0x2f5e   : > { %v8299_v22 = vmul.f32 %v8287_v17, %v8203_v6  ;;  %v8312_v39 = vpack.c.bf16 %v8306_v31, %v8303_v60  ;;  %v11533_v33 = vpop.eup %11532  ;;  %v8285_v27 = vadd.f32 1.0, %v11531_v28 }
0x2f5f   : > { %v8288_v55 = vadd.f32 1.0, %v11533_v33  ;;  %v11535_v10 = vpop.eup %11534 }
0x2f60   : > { %v8308_v30 = vpack.c.bf16 %v8299_v22, %v8296_v23  ;;  %v11537_v45 = vpop.eup %11536  ;;  %v8297_v14 = vmul.f32 %v8285_v27, %v8201_v35  ;;  %v8290_v54 = vadd.f32 1.0, %v11535_v10 }
0x2f61   : > { %v8300_v18 = vmul.f32 %v8288_v55, %v8204_v29  ;;  %v11539_v24 = vpop.eup %11538  ;;  %v8293_v5 = vadd.f32 1.0, %v11537_v45 }
0x2f62   : > { %8546 = vmatprep.mubr.bf16.mxu1 %v8308_v30  ;;  %v11541_v1 = vpop.eup %11540  ;;  %v8289_v52 = vadd.f32 1.0, %v11539_v24  ;;  %v8302_v51 = vmul.f32 %v8290_v54, %v8206_v21 }
0x2f63   : > { %8547 = vmatmul.mubr.bf16.vlgmr.msra.gmra.mrb[180].mxu1 %v8307_v32  ;;  %v8309_v57 = vpack.c.bf16 %v8300_v18, %v8297_v14  ;;  %v8305_v63 = vmul.f32 %v8293_v5, %v8209_v20  ;;  %v8292_v53 = vadd.f32 1.0, %v11541_v1 }
0x2f64   : > { %v8301_v8 = vmul.f32 %v8289_v52, %v8205_v3 }
0x2f65   : > { %10633 = vmatprep.mubr.bf16.mxu0 %v8309_v57  ;;  %v8311_v25 = vpack.c.bf16 %v8305_v63, %v8302_v51  ;;  %v8304_v19 = vmul.f32 %v8292_v53, %v8208_v47 }
0x2f66   : > { %10634 = vmatmul.mubr.bf16.vlgmr.msra.gmra.mrb[176].mxu0 %v8312_v39 }
0x2f67   : > { %8554 = vmatprep.mubr.bf16.mxu1 %v8311_v25  ;;  %v8310_v9 = vpack.c.bf16 %v8304_v19, %v8301_v8 }
0x2f6b   : > { %8555 = vmatmul.mubr.bf16.gmra.mrb[184].mxu1 %v8310_v9 }
0x3036   : > { %v9991_v40 = vpop.f32.mrb[180].mxu1 }
0x3037   : > { %v9992_v61 = vpop.f32.mrb[181].mxu1 }
0x3038   : > { %v9993_v49 = vadd.f32 %v9992_v61, %v9991_v40  ;;  %v9994_v36 = vpop.f32.mrb[182].mxu1 }
0x3039   : > { %v9995_v48 = vpop.f32.mrb[183].mxu1  ;;  %v10635_v26 = vpop.f32.mrb[176].mxu0 }
0x303a   : > { %v9996_v62 = vadd.f32 %v9995_v48, %v9994_v36  ;;  %v8549_v11 = vadd.f32 %v9993_v49, %v9664_v59  ;;  %v8597_v44 = vpop.f32.mrb[177].mxu0 }
0x303b   : > { %v10636_v41 = vpop.f32.mrb[178].mxu0 }
0x303c   : > { %v8598_v4 = vadd.f32 %v8597_v44, %v8549_v11  ;;  %v8552_v34 = vadd.f32 %v9996_v62, %v9664_v59  ;;  %v8600_v50 = vpop.f32.mrb[179].mxu0 }
0x303e   : > { %v8612_v58 = vadd.f32 %v8598_v4, %v14282_v56  ;;  %v8601_v32 = vadd.f32 %v8600_v50, %v8552_v34  ;;  %v9997_v43 = vpop.f32.mrb[184].mxu1 }
0x303f   : > { %v9998_v38 = vpop.f32.mrb[185].mxu1 }
0x3040   : > { %8620 = vst [vmem:[#allocation3] sm:$0xff] %v8612_v58  ;;  %v8613_v13 = vadd.f32 %v8601_v32, %v14286_v2  ;;  %v9999_v16 = vadd.f32 %v9998_v38, %v9997_v43  ;;  %v10000_v15 = vpop.f32.mrb[186].mxu1  ;;  %8702 = vadd.xlane.f32.xlu0 (!%p9689_p6), %v8612_v58  ;;  %v8631_v2 = vpop.xlane.xlu0 (!%p9689_p6), %8630  ;;  %v9690_v38 = vld [vmem:[#allocation22] ss:$0 sm:$0xff] (!%p9689_p6) }
0x3041   : > { %v10001_v6 = vpop.f32.mrb[187].mxu1  ;;  %v8638_v39 = vmul.f32 (!%p9689_p6), 0.0078125, %v8631_v2 }
0x3042   : > { %8621 = vst [vmem:[#allocation3 + $0x8] sm:$0xff] %v8613_v13  ;;  %v8557_v17 = vadd.f32 %v9999_v16, %v9664_v59  ;;  %v10002_v60 = vadd.f32 %v10001_v6, %v10000_v15  ;;  %8704 = vadd.xlane.f32.xlu1 (!%p9689_p6), %v8613_v13 }
0x3043   : > { %v14617_v33 = vsub.f32 (!%p9689_p6), %v14502_v37, %v8638_v39 }
0x3044   : > { %v8606_v31 = vadd.f32 %v10635_v26, %v8557_v17  ;;  %v8560_v28 = vadd.f32 %v10002_v60, %v9664_v59  ;;  %8627 = sbr.rel (%p9689_p6) target bundleno = 12674 (0x3182), region = 164  ;;  %v8633_v30 = vpop.xlane.xlu0 (!%p9689_p6), %8632  ;;  %v9691_v17 = vld [vmem:[#allocation23] ss:$0 sm:$0xff] (!%p9689_p6) }
0x3045   : > { %v8639_v29 = vmul.f32 (!%p9689_p6), 0.0078125, %v8633_v30  ;;  %v8646_v55 = vmul.f32 (!%p9689_p6), %v14617_v33, %v14617_v33 }
0x3046   : > { %v8614_v23 = vadd.f32 %v8606_v31, %v14292_v46  ;;  %v8609_v22 = vadd.f32 %v10636_v41, %v8560_v28  ;;  %v8635_v46 = vpop.xlane.xlu1 (!%p9689_p6), %8634 }
0x3047   : > { %v14625_v45 = vsub.f32 (!%p9689_p6), %v14506_v7, %v8639_v29 }
0x3048   : > { %8622 = vst [vmem:[#allocation3 + $0x10] sm:$0xff] %v8614_v23  ;;  %v8615_v56 = vadd.f32 %v8609_v22, %v14299_v12  ;;  %8706 = vadd.xlane.f32.xlu0 (!%p9689_p6), %v8614_v23  ;;  %v8640_v12 = vmul.f32 (!%p9689_p6), 0.0078125, %v8635_v46 }
0x3049   : > { %v8647_v24 = vmul.f32 (!%p9689_p6), %v14625_v45, %v14625_v45 }
0x304a   : > { %8623 = vst [vmem:[#allocation3 + $0x18] sm:$0xff] %v8615_v56  ;;  %8708 = vadd.xlane.f32.xlu1 (!%p9689_p6), %v8615_v56  ;;  %v14620_v27 = vsub.f32 (!%p9689_p6), %v14510_v0, %v8640_v12  ;;  %v8637_v35 = vpop.xlane.xlu1 (!%p9689_p6), %8636 }
0x304b   : > { %v8641_v10 = vmul.f32 0.0078125, %v8637_v35 }
0x304c   : > { %8650 = vadd.xlane.f32.xlu0 %v8646_v55  ;;  %v8648_v37 = vmul.f32 %v14620_v27, %v14620_v27  ;;  %v9692_v55 = vld [vmem:[#allocation22 + $0x1] ss:$0 sm:$0xff] }
0x304d   : > { %v14628_v14 = vsub.f32 %v14514_v42, %v8641_v10 }
0x304e   : > { %8652 = vadd.xlane.f32.xlu1 %v8647_v24 }
0x304f   : > { %v8649_v42 = vmul.f32 %v14628_v14, %v14628_v14 }
0x3050   : > { %8654 = vadd.xlane.f32.xlu0 %v8648_v37 }
0x3052   : > { %8656 = vadd.xlane.f32.xlu1 %v8649_v42 }
0x30cd   : > { %v8703_v18 = vpop.xlane.xlu0 %8702 }
0x30ce   : > { %v8710_v54 = vmul.f32 0.0078125, %v8703_v18 }
0x30cf   : > { %v8705_v0 = vpop.xlane.xlu1 %8704 }
0x30d0   : > { %v8711_v21 = vmul.f32 0.0078125, %v8705_v0  ;;  %v14634_v20 = vsub.f32 %v8612_v58, %v8710_v54  ;;  %v9693_v0 = vld [vmem:[#allocation23 + $0x1] ss:$0 sm:$0xff] }
0x30d2   : > { %v14636_v7 = vsub.f32 %v8613_v13, %v8711_v21  ;;  %v8718_v3 = vmul.f32 %v14634_v20, %v14634_v20 }
0x30d4   : > { %8722 = vadd.xlane.f32.xlu0 %v8718_v3  ;;  %v8719_v47 = vmul.f32 %v14636_v7, %v14636_v7 }
0x30d5   : > { %v8707_v5 = vpop.xlane.xlu0 %8706 }
0x30d6   : > { %v8712_v57 = vmul.f32 0.0078125, %v8707_v5  ;;  %8724 = vadd.xlane.f32.xlu1 %v8719_v47 }
0x30d7   : > { %v8709_v1 = vpop.xlane.xlu1 %8708 }
0x30d8   : > { %v8713_v52 = vmul.f32 0.0078125, %v8709_v1  ;;  %v14642_v51 = vsub.f32 %v8614_v23, %v8712_v57 }
0x30d9   : > { %v8651_v8 = vpop.xlane.xlu0 %8650 }
0x30da   : > { %v14644_v63 = vsub.f32 %v8615_v56, %v8713_v52  ;;  %v8720_v53 = vmul.f32 %v14642_v51, %v14642_v51  ;;  %v8658_v19 = vmul.f32 0.0078125, %v8651_v8 }
0x30db   : > { %v8653_v40 = vpop.xlane.xlu1 %8652 }
0x30dc   : > { %8726 = vadd.xlane.f32.xlu0 %v8720_v53  ;;  %v8721_v25 = vmul.f32 %v14644_v63, %v14644_v63  ;;  %v8662_v9 = vadd.f32 1e-05, %v8658_v19  ;;  %v8659_v59 = vmul.f32 0.0078125, %v8653_v40 }
0x30dd   : > { %v8655_v61 = vpop.xlane.xlu0 %8654 }
0x30de   : > { %8728 = vadd.xlane.f32.xlu1 %v8721_v25  ;;  %11550 = vrsqrt.f32 %v8662_v9  ;;  %v8660_v49 = vmul.f32 0.0078125, %v8655_v61  ;;  %v8663_v36 = vadd.f32 1e-05, %v8659_v59 }
0x30df   : > { %v8657_v62 = vpop.xlane.xlu1 %8656 }
0x30e0   : > { %v8664_v48 = vadd.f32 1e-05, %v8660_v49  ;;  %11552 = vrsqrt.f32 %v8663_v36  ;;  %v8661_v11 = vmul.f32 0.0078125, %v8657_v62 }
0x30e2   : > { %11554 = vrsqrt.f32 %v8664_v48  ;;  %v8665_v4 = vadd.f32 1e-05, %v8661_v11 }
0x30e4   : > { %11556 = vrsqrt.f32 %v8665_v4 }
0x30e8   : > { %v11551_v43 = vpop.eup %11550 }
0x30e9   : > { %v8670_v15 = vmul.f32 %v11551_v43, %v14617_v33 }
0x30ea   : > { %v11553_v28 = vpop.eup %11552 }
0x30eb   : > { %v8680_v31 = vmul.f32 %v9690_v38, %v8670_v15  ;;  %v8671_v2 = vmul.f32 %v11553_v28, %v14625_v45 }
0x30ec   : > { %v11555_v22 = vpop.eup %11554 }
0x30ed   : > { %v8690_v56 = vadd.f32 %v9691_v17, %v8680_v31  ;;  %v8672_v46 = vmul.f32 %v11555_v22, %v14620_v27  ;;  %v8681_v39 = vmul.f32 %v9690_v38, %v8671_v2 }
0x30ee   : > { %v11557_v12 = vpop.eup %11556 }
0x30ef   : > { %8694 = vst [vmem:[#allocation25] sm:$0xff] %v8690_v56  ;;  %v8682_v30 = vmul.f32 %v9690_v38, %v8672_v46  ;;  %v8691_v35 = vadd.f32 %v9691_v17, %v8681_v39  ;;  %v8673_v29 = vmul.f32 %v11557_v12, %v14628_v14 }
0x30f1   : > { %v8692_v10 = vadd.f32 %v9691_v17, %v8682_v30  ;;  %8695 = vst [vmem:[#allocation25 + $0x8] sm:$0xff] %v8691_v35  ;;  %v8683_v18 = vmul.f32 %v9690_v38, %v8673_v29 }
0x30f3   : > { %8696 = vst [vmem:[#allocation25 + $0x10] sm:$0xff] %v8692_v10  ;;  %v8693_v24 = vadd.f32 %v9691_v17, %v8683_v18 }
0x30f5   : > { %8697 = vst [vmem:[#allocation25 + $0x18] sm:$0xff] %v8693_v24 }
0x3161   : > { %v8723_v26 = vpop.xlane.xlu0 %8722 }
0x3162   : > { %v8730_v44 = vmul.f32 0.0078125, %v8723_v26 }
0x3163   : > { %v8725_v34 = vpop.xlane.xlu1 %8724 }
0x3164   : > { %v8734_v41 = vadd.f32 1e-05, %v8730_v44  ;;  %v8731_v58 = vmul.f32 0.0078125, %v8725_v34 }
0x3166   : > { %11558 = vrsqrt.f32 %v8734_v41  ;;  %v8735_v13 = vadd.f32 1e-05, %v8731_v58 }
0x3168   : > { %11560 = vrsqrt.f32 %v8735_v13 }
0x3169   : > { %v8727_v50 = vpop.xlane.xlu0 %8726 }
0x316a   : > { %v8732_v32 = vmul.f32 0.0078125, %v8727_v50 }
0x316b   : > { %v8729_v6 = vpop.xlane.xlu1 %8728 }
0x316c   : > { %v8736_v16 = vadd.f32 1e-05, %v8732_v32  ;;  %v8733_v60 = vmul.f32 0.0078125, %v8729_v6 }
0x316e   : > { %11562 = vrsqrt.f32 %v8736_v16  ;;  %v8737_v23 = vadd.f32 1e-05, %v8733_v60 }
0x3170   : > { %11564 = vrsqrt.f32 %v8737_v23  ;;  %v11559_v33 = vpop.eup %11558 }
0x3171   : > { %v8742_v37 = vmul.f32 %v11559_v33, %v14634_v20 }
0x3172   : > { %v11561_v54 = vpop.eup %11560 }
0x3173   : > { %v8752_v45 = vmul.f32 %v9692_v55, %v8742_v37  ;;  %v8743_v21 = vmul.f32 %v11561_v54, %v14636_v7 }
0x3175   : > { %v8762_v42 = vadd.f32 %v9693_v0, %v8752_v45  ;;  %v8753_v1 = vmul.f32 %v9692_v55, %v8743_v21 }
0x3177   : > { %8766 = vst [vmem:[#allocation26] sm:$0xff] %v8762_v42  ;;  %v8763_v3 = vadd.f32 %v9693_v0, %v8753_v1 }
0x3178   : > { %v11563_v27 = vpop.eup %11562 }
0x3179   : > { %v8744_v5 = vmul.f32 %v11563_v27, %v14642_v51  ;;  %8767 = vst [vmem:[#allocation26 + $0x8] sm:$0xff] %v8763_v3 }
0x317a   : > { %v11565_v14 = vpop.eup %11564 }
0x317b   : > { %v8754_v57 = vmul.f32 %v9692_v55, %v8744_v5  ;;  %v8745_v20 = vmul.f32 %v11565_v14, %v14644_v63 }
0x317d   : > { %v8764_v52 = vadd.f32 %v9693_v0, %v8754_v57  ;;  %v8755_v47 = vmul.f32 %v9692_v55, %v8745_v20 }
0x317f   : > { %8768 = vst [vmem:[#allocation26 + $0x10] sm:$0xff] %v8764_v52  ;;  %v8765_v53 = vadd.f32 %v9693_v0, %v8755_v47 }
0x3181   : > { %8769 = vst [vmem:[#allocation26 + $0x18] sm:$0xff] %v8765_v53 }
0x3182 PF: > { %s14843_s18 = sld [smem:[#allocation37_spill]]  ;;  %s12207_s10 = smov [#allocation25]  }
0x3183   : > { %s8780_s30 = sshll.u32 %s12207_s10, 4  ;;  %s8781_s30 = int_to_ptr.vmem [resolvable:$true] %s8780_s30 }
0x3184   : > { %s12042_s11 = scalar_lea.vmem %s8781_s30, 512  ;;  %p12049_p3 = scmp.lt.s32.totalorder %s8781_s30, %s8781_s30 }
0x3185   : > { %p12043_p10 = scmp.ne.s32.totalorder %s8781_s30, %s12042_s11  ;;  %p12050_p2 = scmp.lt.s32.totalorder %s12042_s11, %s12042_s11 }
0x3187   : > { %p12051_p8 = por %p12050_p2, %p12049_p3 }
0x3188   : > { %p10718_p9 = scmp.eq.s32.totalorder %s14843_s18, 1 }
0x318a   : > { %p12044_p11 = pnand %p12043_p10, %p10718_p9 }
0x318c   : > { %p12045_p12 = pneg %p12044_p11 }
0x318e   : > { %p12052_p0 = pnand %p12051_p8, %p12045_p12 }
0x3190   : > { %12055 = shalt.err (!%p12052_p0)
}
0x3191   : > { %s14844_s3 = sld [smem:[#allocation57_spill]] }
0x3197   : > { %s12056_s26 = scalar_lea.hbm %s14844_s3, 512 }
0x3198   : > { %p12057_p13 = scmp.ne.s32.totalorder %s14844_s3, %s12056_s26  ;;  %p12062_p4 = scmp.lt.u32.totalorder %s12056_s26, %s14844_s3 }
0x319a   : > { %p12058_p7 = pnand %p12057_p13, %p10718_p9 }
0x319c   : > { %p12059_p1 = pneg %p12058_p7 }
0x319e   : > { %p12064_p5 = pnand %p12062_p4, %p12059_p1 }
0x31a0   : > { %12067 = shalt.err (!%p12064_p5)
}
0x31a1   : > { %s12208_s22 = smov 128   ;;  %s12209_s27 = smov 8  }
0x31a2   : > { %10690 = dma.vmem_to_hbm [thread:$0]  (%p10718_p9), %s8781_s30, 512, %s14844_s3, [#allocation6], %s12208_s22, %s12208_s22, %s12209_s27  }
0x31a3   : > { %s12210_s12 = smov [#allocation26]  }
0x31a4   : > { %s8797_s13 = sshll.u32 %s12210_s12, 4  ;;  %s8798_s13 = int_to_ptr.vmem [resolvable:$true] %s8797_s13 }
0x31a5   : > { %s12068_s2 = scalar_lea.vmem %s8798_s13, 512  ;;  %p12075_p12 = scmp.lt.s32.totalorder %s8798_s13, %s8798_s13 }
0x31a6   : > { %p12069_p6 = scmp.ne.s32.totalorder %s8798_s13, %s12068_s2  ;;  %p12076_p3 = scmp.lt.s32.totalorder %s12068_s2, %s12068_s2 }
0x31a8   : > { %p12070_p10 = pnand %p12069_p6, %p10718_p9  ;;  %p12077_p2 = por %p12076_p3, %p12075_p12 }
0x31aa   : > { %p12071_p11 = pneg %p12070_p10 }
0x31ac   : > { %p12078_p8 = pnand %p12077_p2, %p12071_p11 }
0x31ae   : > { %12081 = shalt.err (!%p12078_p8)
}
0x31af   : > { %s14845_s10 = sld [smem:[#allocation58_spill]] }
0x31b5   : > { %s12082_s11 = scalar_lea.hbm %s14845_s10, 512 }
0x31b6   : > { %p12083_p0 = scmp.ne.s32.totalorder %s14845_s10, %s12082_s11  ;;  %p12088_p1 = scmp.lt.u32.totalorder %s12082_s11, %s14845_s10 }
0x31b8   : > { %p12084_p13 = pnand %p12083_p0, %p10718_p9 }
0x31ba   : > { %p12085_p7 = pneg %p12084_p13 }
0x31bc   : > { %p12090_p4 = pnand %p12088_p1, %p12085_p7 }
0x31be   : > { %12093 = shalt.err (!%p12090_p4)
}
0x31bf   : > { %10692 = dma.vmem_to_hbm [thread:$0]  (%p10718_p9), %s8798_s13, 512, %s14845_s10, [#allocation27], %s12208_s22, %s12208_s22, %s12209_s27  }
0x31c0   : > { %12139 = dma.done.wait (%p10718_p9), [#allocation6], 512  }
0x31c1   : > { %12141 = vsyncadd (%p10718_p9), [#allocation6], 4294966784 }
0x31c2   : > { %12143 = dma.done.wait (%p10718_p9), [#allocation27], 512  }
0x31c3   : > { %12145 = vsyncadd (%p10718_p9), [#allocation27], 4294966784 }
0x31c4 PF: > { %s34_s19 = sadd.s32 1, %s12168_s19   ;;  %s14846_s27 = sld [smem:[#allocation35_spill]] }
0x31c5   : > { %p31_p5 = scmp.ge.s32.totalorder %s34_s19, 4   ;;  %s14847_s17 = sld [smem:[#allocation40_spill]] }
0x31c6   : > { %s14848_s4 = sld [smem:[#allocation38_spill]]  ;;  %s14849_s28 = smov %s12156_s29 }
0x31c7   : > { %s14851_s30 = smov %s12164_s0  ;;  %33 = sbr.rel (!%p31_p5) target bundleno = 25 (0x19), region = 307 }
0x31cb   : > { %s14850_s29 = smov %s14847_s17 }
0x31cc   : > { %s14852_s0 = smov %s14848_s4 }
0x31ce   :  { %8817 = vsyncpa [#allocation5], 1 }
0x31cf   :  { %8819 = vsyncpa [#allocation5 + $0x1], 1 }
0x31d0   :  { %8820 = vsyncpa [#allocation8], 1 }
0x31d1   :  { %8821 = vsyncpa [#allocation24], 1 }
0x31d2   :  { %8822 = vsyncpa [#allocation6], 1 }
0x31d3   :  { %8824 = vsyncpa [#allocation6 + $0x1], 1 }
0x31d4   :  { %8825 = vsyncpa [#allocation27], 1 }

</bundles_post_ra>
